<compile_context>
chip_gen: v7x
topology: tpu7x:2x2x1
jax: 0.10.0
libtpu: 0.0.40
codegen_flags: <defaults>
</compile_context>

<pallas_src>
import math

import numpy as np

import jax
import jax.numpy as jnp
from jax.experimental import pallas as pl
from jax.experimental.pallas import tpu as pltpu


# Network dimensions (true / lane-padded).
IN_FEATURES = 1 * 24 * 24        # 576, flattened NCHW input
IN_PAD = 640
P1 = 6 * 10 * 10                 # 600, conv1 -> relu -> pool output (c, h, w)
P1_PAD = 640
P2 = 16 * 3 * 3                  # 144, conv2 -> relu -> pool output (c, h, w)
P2_PAD = 256
H1, H1_PAD = 120, 128
H2, H2_PAD = 84, 128
OUT_ROWS = 8                     # fc3 output rows (row 0 real, rows 1..7 zero-pad)


def _round_up(x, m):
    return (x + m - 1) // m * m


# ----------------------------------------------------------------------------
# Fused forward kernel: runs once per batch tile; weights are grid-invariant.
# ----------------------------------------------------------------------------
def _fused_cnn_kernel(x_ref, w1_ref, b1_ref, w2_ref, b2_ref,
                      wf1_ref, bf1_ref, wf2_ref, bf2_ref, wf3_ref, bf3_ref,
                      out_ref):
    f32 = jnp.float32
    bf16 = jnp.bfloat16

    # conv1 + bias + ReLU + 2x2 maxpool, folded into max over 4 strided-conv matmuls.
    x = x_ref[...]                                                    # (bt, 640) bf16
    z = jnp.dot(x, w1_ref[0], preferred_element_type=f32)             # (bt, 640) f32
    for d in range(1, 4):
        z = jnp.maximum(z, jnp.dot(x, w1_ref[d], preferred_element_type=f32))
    h = jnp.maximum(z + b1_ref[...], 0.0)

    # conv2 + bias + ReLU + 2x2 maxpool, same folding.
    hb = h.astype(bf16)
    z = jnp.dot(hb, w2_ref[0], preferred_element_type=f32)            # (bt, 256) f32
    for d in range(1, 4):
        z = jnp.maximum(z, jnp.dot(hb, w2_ref[d], preferred_element_type=f32))
    h = jnp.maximum(z + b2_ref[...], 0.0)

    # MLP head: fc1 -> relu -> fc2 -> relu (bf16 operands, f32 accumulation).
    h = jnp.maximum(
        jnp.dot(h.astype(bf16), wf1_ref[...], preferred_element_type=f32)
        + bf1_ref[...], 0.0)                                          # (bt, 128)
    h = jnp.maximum(
        jnp.dot(h.astype(bf16), wf2_ref[...], preferred_element_type=f32)
        + bf2_ref[...], 0.0)                                          # (bt, 128)

    # fc3: emit a lane-dense (8, bt) block; row 0 carries the logits.
    ht = jnp.transpose(h).astype(bf16)                                # (128, bt), XLU
    logits = jnp.dot(wf3_ref[...], ht, preferred_element_type=f32)    # (8, bt)
    out_ref[...] = logits + bf3_ref[0]


def cnn_forward(x_nchw, params):
    """Forward pass matching CNN.forward (eval mode). x_nchw: (B, 1, 24, 24)."""
    B = x_nchw.shape[0]
    # torch.flatten-compatible (c, y, x) flattening; bf16 + lane padding on host.
    x_flat = x_nchw.reshape(B, IN_FEATURES).astype(jnp.bfloat16)

    # Batch tile: multiple of 128, up to 512; >= 2 grid steps once B > 128 so
    # v7x's two TensorCores both get work.
    bt = min(512, max(128, _round_up(pl.cdiv(B, 2), 128)))
    b_pad = _round_up(B, bt)
    x_flat = jnp.pad(x_flat, ((0, b_pad - B), (0, IN_PAD - IN_FEATURES)))

    out = pl.pallas_call(
        _fused_cnn_kernel,
        grid=(b_pad // bt,),
        in_specs=[
            pl.BlockSpec((bt, IN_PAD), lambda b: (b, 0)),
            # Grid-invariant weights: fetched into VMEM once, reused every step.
            pl.BlockSpec((4, IN_PAD, P1_PAD), lambda b: (0, 0, 0)),
            pl.BlockSpec((1, P1_PAD), lambda b: (0, 0)),
            pl.BlockSpec((4, P1_PAD, P2_PAD), lambda b: (0, 0, 0)),
            pl.BlockSpec((1, P2_PAD), lambda b: (0, 0)),
            pl.BlockSpec((P2_PAD, H1_PAD), lambda b: (0, 0)),
            pl.BlockSpec((1, H1_PAD), lambda b: (0, 0)),
            pl.BlockSpec((H1_PAD, H2_PAD), lambda b: (0, 0)),
            pl.BlockSpec((1, H2_PAD), lambda b: (0, 0)),
            pl.BlockSpec((OUT_ROWS, H2_PAD), lambda b: (0, 0)),
            pl.BlockSpec(memory_space=pltpu.MemorySpace.SMEM),   # fc3 bias scalar
        ],
        out_specs=pl.BlockSpec((OUT_ROWS, bt), lambda b: (0, b)),
        out_shape=jax.ShapeDtypeStruct((OUT_ROWS, b_pad), jnp.float32),
        compiler_params=pltpu.CompilerParams(
            dimension_semantics=("parallel",),       # megacore sharding on v7x
            vmem_limit_bytes=48 * 1024 * 1024),
    )(x_flat,
      params["w_pool1"], params["b_pool1"],
      params["w_pool2"], params["b_pool2"],
      params["w_fc1"], params["b_fc1"],
      params["w_fc2"], params["b_fc2"],
      params["w_fc3"], params["b_fc3"])

    return out[0, :B].reshape(B, 1)                  # logits live in row 0


# ----------------------------------------------------------------------------
# Host-side parameter construction (runs once).
# ----------------------------------------------------------------------------
def init_raw_params(key):
    """PyTorch-style uniform(-1/sqrt(fan_in), 1/sqrt(fan_in)) init (f32)."""
    def u(k, shape, fan_in):
        bound = 1.0 / math.sqrt(fan_in)
        return jax.random.uniform(k, shape, jnp.float32, -bound, bound)

    ks = jax.random.split(key, 10)
    return {
        "conv1_w": u(ks[0], (6, 1, 5, 5), 25),   "conv1_b": u(ks[1], (6,), 25),
        "conv2_w": u(ks[2], (16, 6, 5, 5), 150), "conv2_b": u(ks[3], (16,), 150),
        "fc1_w":   u(ks[4], (120, 144), 144),    "fc1_b":   u(ks[5], (120,), 144),
        "fc2_w":   u(ks[6], (84, 120), 120),     "fc2_b":   u(ks[7], (84,), 120),
        "fc3_w":   u(ks[8], (1, 84), 84),        "fc3_b":   u(ks[9], (1,), 84),
    }


def _conv_pool_matrix(w, h_in, w_in, h_out, w_out, dy, dx, rows_pad, cols_pad):
    """Zero-padded dense matrix M such that, for x flattened in (c, y, x) order,
    (x_flat @ M)[:, co*h_out*w_out + py*w_out + px]
      == conv2d_valid(x, w)[co, 2*py + dy, 2*px + dx]."""
    w = np.asarray(w, np.float32)
    c_out, c_in, kh, kw = w.shape
    co, py, px, ci, i, j = np.indices((c_out, h_out, w_out, c_in, kh, kw))
    rows = ci * (h_in * w_in) + (2 * py + dy + i) * w_in + (2 * px + dx + j)
    cols = co * (h_out * w_out) + py * w_out + px
    m = np.zeros((rows_pad, cols_pad), np.float32)
    m[rows.ravel(), cols.ravel()] = w[co, ci, i, j].ravel()
    return m


def prepare_params(raw):
    """Fold conv+pool into stride-2 'conv-as-matmul' matrices; pad every dim to
    a lane-dense size with zeros (padded biases = 0, padded K-rows = 0)."""
    w1 = np.asarray(raw["conv1_w"])
    w2 = np.asarray(raw["conv2_w"])
    offs = [(0, 0), (0, 1), (1, 0), (1, 1)]
    w_pool1 = np.stack([_conv_pool_matrix(w1, 24, 24, 10, 10, dy, dx, IN_PAD, P1_PAD)
                        for dy, dx in offs])
    w_pool2 = np.stack([_conv_pool_matrix(w2, 10, 10, 3, 3, dy, dx, P1_PAD, P2_PAD)
                        for dy, dx in offs])

    b_pool1 = np.zeros((1, P1_PAD), np.float32)
    b_pool1[0, :P1] = np.repeat(np.asarray(raw["conv1_b"], np.float32), 100)
    b_pool2 = np.zeros((1, P2_PAD), np.float32)
    b_pool2[0, :P2] = np.repeat(np.asarray(raw["conv2_b"], np.float32), 9)

    w_fc1 = np.zeros((P2_PAD, H1_PAD), np.float32)
    w_fc1[:P2, :H1] = np.asarray(raw["fc1_w"], np.float32).T
    b_fc1 = np.zeros((1, H1_PAD), np.float32)
    b_fc1[0, :H1] = np.asarray(raw["fc1_b"], np.float32)

    w_fc2 = np.zeros((H1_PAD, H2_PAD), np.float32)
    w_fc2[:H1, :H2] = np.asarray(raw["fc2_w"], np.float32).T
    b_fc2 = np.zeros((1, H2_PAD), np.float32)
    b_fc2[0, :H2] = np.asarray(raw["fc2_b"], np.float32)

    w_fc3 = np.zeros((OUT_ROWS, H2_PAD), np.float32)
    w_fc3[0, :H2] = np.asarray(raw["fc3_w"], np.float32)[0]
    b_fc3 = np.asarray(raw["fc3_b"], np.float32).reshape(1)

    return {
        "w_pool1": jnp.asarray(w_pool1, jnp.bfloat16),
        "b_pool1": jnp.asarray(b_pool1, jnp.float32),
        "w_pool2": jnp.asarray(w_pool2, jnp.bfloat16),
        "b_pool2": jnp.asarray(b_pool2, jnp.float32),
        "w_fc1": jnp.asarray(w_fc1, jnp.bfloat16),
        "b_fc1": jnp.asarray(b_fc1, jnp.float32),
        "w_fc2": jnp.asarray(w_fc2, jnp.bfloat16),
        "b_fc2": jnp.asarray(b_fc2, jnp.float32),
        "w_fc3": jnp.asarray(w_fc3, jnp.bfloat16),
        "b_fc3": jnp.asarray(b_fc3, jnp.float32),
    }


# ----------------------------------------------------------------------------
# Pure-JAX reference (rounds matmul operands to bf16 exactly like the kernel).
# ----------------------------------------------------------------------------
def cnn_reference(x_nchw, raw):
    hi = jax.lax.Precision.HIGHEST
    rb = lambda a: a.astype(jnp.bfloat16).astype(jnp.float32)
    dn = ("NCHW", "OIHW", "NCHW")

    z = jax.lax.conv_general_dilated(rb(x_nchw), rb(raw["conv1_w"]), (1, 1),
                                     "VALID", dimension_numbers=dn, precision=hi)
    z = jnp.maximum(z + raw["conv1_b"][None, :, None, None], 0.0)
    z = jax.lax.reduce_window(z, -jnp.inf, jax.lax.max, (1, 1, 2, 2), (1, 1, 2, 2), "VALID")
    z = jax.lax.conv_general_dilated(rb(z), rb(raw["conv2_w"]), (1, 1),
                                     "VALID", dimension_numbers=dn, precision=hi)
    z = jnp.maximum(z + raw["conv2_b"][None, :, None, None], 0.0)
    z = jax.lax.reduce_window(z, -jnp.inf, jax.lax.max, (1, 1, 2, 2), (1, 1, 2, 2), "VALID")
    z = z.reshape(z.shape[0], -1)                      # torch.flatten(x, 1) (NCHW order)
    z = jnp.maximum(jnp.dot(rb(z), rb(raw["fc1_w"]).T, precision=hi) + raw["fc1_b"], 0.0)
    z = jnp.maximum(jnp.dot(rb(z), rb(raw["fc2_w"]).T, precision=hi) + raw["fc2_b"], 0.0)
    return jnp.dot(rb(z), rb(raw["fc3_w"]).T, precision=hi) + raw["fc3_b"]


if __name__ == "__main__":
    key = jax.random.PRNGKey(0)
    k_params, k_x = jax.random.split(key)

    raw = init_raw_params(k_params)
    params = prepare_params(raw)

    # Input consistent with fc1 = Linear(16*3*3, ...): spatial 24x24, 1 channel.
    x = jax.random.normal(k_x, (2, 1, 24, 24), dtype=jnp.float32)

    out = jax.jit(cnn_forward)(x, params)
    out = jax.block_until_ready(out)
    assert out.shape == (2, 1), out.shape

    ref = cnn_reference(x, raw)
    err = float(jnp.max(jnp.abs(out - ref)))
    assert err < 2e-2, f"max abs error vs reference: {err}"

    print("KERNEL_OK")
</pallas_src>

<mosaic_0001>
module attributes {stable_mosaic.version = 11 : i64} {
  func.func @_fused_cnn_kernel(%arg0: i32, %arg1: memref<128x640xbf16, #tpu.memory_space<vmem>>, %arg2: memref<4x640x640xbf16, #tpu.memory_space<vmem>>, %arg3: memref<1x640xf32, #tpu.memory_space<vmem>>, %arg4: memref<4x640x256xbf16, #tpu.memory_space<vmem>>, %arg5: memref<1x256xf32, #tpu.memory_space<vmem>>, %arg6: memref<256x128xbf16, #tpu.memory_space<vmem>>, %arg7: memref<1x128xf32, #tpu.memory_space<vmem>>, %arg8: memref<128x128xbf16, #tpu.memory_space<vmem>>, %arg9: memref<1x128xf32, #tpu.memory_space<vmem>>, %arg10: memref<8x128xbf16, #tpu.memory_space<vmem>>, %arg11: memref<1xf32, #tpu.memory_space<smem>>, %arg12: memref<8x128xf32, #tpu.memory_space<vmem>>) attributes {dimension_semantics = [#tpu.dimension_semantics<parallel>], iteration_bounds = array<i64: 1>, scalar_prefetch = 0 : i64, scratch_operands = 0 : i64, tpu.core_type = #tpu.core_type<tc>, window_params = [{transform_indices = @transform_0, window_bounds = array<i64: 128, 640>}, {pipeline_mode = #tpu.pipeline_mode<synchronous>, transform_indices = @transform_1, window_bounds = array<i64: 4, 640, 640>}, {pipeline_mode = #tpu.pipeline_mode<synchronous>, transform_indices = @transform_2, window_bounds = array<i64: 1, 640>}, {pipeline_mode = #tpu.pipeline_mode<synchronous>, transform_indices = @transform_3, window_bounds = array<i64: 4, 640, 256>}, {pipeline_mode = #tpu.pipeline_mode<synchronous>, transform_indices = @transform_4, window_bounds = array<i64: 1, 256>}, {pipeline_mode = #tpu.pipeline_mode<synchronous>, transform_indices = @transform_5, window_bounds = array<i64: 256, 128>}, {pipeline_mode = #tpu.pipeline_mode<synchronous>, transform_indices = @transform_6, window_bounds = array<i64: 1, 128>}, {pipeline_mode = #tpu.pipeline_mode<synchronous>, transform_indices = @transform_7, window_bounds = array<i64: 128, 128>}, {pipeline_mode = #tpu.pipeline_mode<synchronous>, transform_indices = @transform_8, window_bounds = array<i64: 1, 128>}, {pipeline_mode = #tpu.pipeline_mode<synchronous>, transform_indices = @transform_9, window_bounds = array<i64: 8, 128>}, {transform_indices = @transform_10, window_bounds = array<i64: 1>}, {transform_indices = @transform_11, window_bounds = array<i64: 8, 128>}]} {
    %c0 = arith.constant 0 : index
    %c0_0 = arith.constant 0 : index
    %0 = vector.load %arg1[%c0, %c0_0] : memref<128x640xbf16, #tpu.memory_space<vmem>>, vector<128x640xbf16>
    %c0_1 = arith.constant 0 : index
    %c0_2 = arith.constant 0 : index
    %c0_3 = arith.constant 0 : index
    %1 = vector.load %arg2[%c0_1, %c0_2, %c0_3] : memref<4x640x640xbf16, #tpu.memory_space<vmem>>, vector<1x640x640xbf16>
    %2 = vector.shape_cast %1 : vector<1x640x640xbf16> to vector<640x640xbf16>
    %cst = arith.constant dense<0.000000e+00> : vector<128x640xf32>
    %3 = tpu.matmul %0, %2, %cst {dimension_numbers = #tpu.dot_dimension_numbers<[1], [0], [0], [1], [0, 0, 1, 1], [], []>} : vector<128x640xbf16>, vector<640x640xbf16>, vector<128x640xf32> -> vector<128x640xf32>
    %c1 = arith.constant 1 : index
    %c0_4 = arith.constant 0 : index
    %c0_5 = arith.constant 0 : index
    %4 = vector.load %arg2[%c1, %c0_4, %c0_5] : memref<4x640x640xbf16, #tpu.memory_space<vmem>>, vector<1x640x640xbf16>
    %5 = vector.shape_cast %4 : vector<1x640x640xbf16> to vector<640x640xbf16>
    %cst_6 = arith.constant dense<0.000000e+00> : vector<128x640xf32>
    %6 = tpu.matmul %0, %5, %cst_6 {dimension_numbers = #tpu.dot_dimension_numbers<[1], [0], [0], [1], [0, 0, 1, 1], [], []>} : vector<128x640xbf16>, vector<640x640xbf16>, vector<128x640xf32> -> vector<128x640xf32>
    %7 = arith.maximumf %3, %6 : vector<128x640xf32>
    %c2 = arith.constant 2 : index
    %c0_7 = arith.constant 0 : index
    %c0_8 = arith.constant 0 : index
    %8 = vector.load %arg2[%c2, %c0_7, %c0_8] : memref<4x640x640xbf16, #tpu.memory_space<vmem>>, vector<1x640x640xbf16>
    %9 = vector.shape_cast %8 : vector<1x640x640xbf16> to vector<640x640xbf16>
    %cst_9 = arith.constant dense<0.000000e+00> : vector<128x640xf32>
    %10 = tpu.matmul %0, %9, %cst_9 {dimension_numbers = #tpu.dot_dimension_numbers<[1], [0], [0], [1], [0, 0, 1, 1], [], []>} : vector<128x640xbf16>, vector<640x640xbf16>, vector<128x640xf32> -> vector<128x640xf32>
    %11 = arith.maximumf %7, %10 : vector<128x640xf32>
    %c3 = arith.constant 3 : index
    %c0_10 = arith.constant 0 : index
    %c0_11 = arith.constant 0 : index
    %12 = vector.load %arg2[%c3, %c0_10, %c0_11] : memref<4x640x640xbf16, #tpu.memory_space<vmem>>, vector<1x640x640xbf16>
    %13 = vector.shape_cast %12 : vector<1x640x640xbf16> to vector<640x640xbf16>
    %cst_12 = arith.constant dense<0.000000e+00> : vector<128x640xf32>
    %14 = tpu.matmul %0, %13, %cst_12 {dimension_numbers = #tpu.dot_dimension_numbers<[1], [0], [0], [1], [0, 0, 1, 1], [], []>} : vector<128x640xbf16>, vector<640x640xbf16>, vector<128x640xf32> -> vector<128x640xf32>
    %15 = arith.maximumf %11, %14 : vector<128x640xf32>
    %c0_13 = arith.constant 0 : index
    %c0_14 = arith.constant 0 : index
    %16 = vector.load %arg3[%c0_13, %c0_14] : memref<1x640xf32, #tpu.memory_space<vmem>>, vector<1x640xf32>
    %17 = vector.broadcast %16 : vector<1x640xf32> to vector<128x640xf32>
    %18 = arith.addf %15, %17 : vector<128x640xf32>
    %cst_15 = arith.constant 0.000000e+00 : f32
    %19 = vector.broadcast %cst_15 : f32 to vector<128x640xf32>
    %20 = arith.maximumf %18, %19 : vector<128x640xf32>
    %21 = arith.truncf %20 : vector<128x640xf32> to vector<128x640xbf16>
    %c0_16 = arith.constant 0 : index
    %c0_17 = arith.constant 0 : index
    %c0_18 = arith.constant 0 : index
    %22 = vector.load %arg4[%c0_16, %c0_17, %c0_18] : memref<4x640x256xbf16, #tpu.memory_space<vmem>>, vector<1x640x256xbf16>
    %23 = vector.shape_cast %22 : vector<1x640x256xbf16> to vector<640x256xbf16>
    %cst_19 = arith.constant dense<0.000000e+00> : vector<128x256xf32>
    %24 = tpu.matmul %21, %23, %cst_19 {dimension_numbers = #tpu.dot_dimension_numbers<[1], [0], [0], [1], [0, 0, 1, 1], [], []>} : vector<128x640xbf16>, vector<640x256xbf16>, vector<128x256xf32> -> vector<128x256xf32>
    %c1_20 = arith.constant 1 : index
    %c0_21 = arith.constant 0 : index
    %c0_22 = arith.constant 0 : index
    %25 = vector.load %arg4[%c1_20, %c0_21, %c0_22] : memref<4x640x256xbf16, #tpu.memory_space<vmem>>, vector<1x640x256xbf16>
    %26 = vector.shape_cast %25 : vector<1x640x256xbf16> to vector<640x256xbf16>
    %cst_23 = arith.constant dense<0.000000e+00> : vector<128x256xf32>
    %27 = tpu.matmul %21, %26, %cst_23 {dimension_numbers = #tpu.dot_dimension_numbers<[1], [0], [0], [1], [0, 0, 1, 1], [], []>} : vector<128x640xbf16>, vector<640x256xbf16>, vector<128x256xf32> -> vector<128x256xf32>
    %28 = arith.maximumf %24, %27 : vector<128x256xf32>
    %c2_24 = arith.constant 2 : index
    %c0_25 = arith.constant 0 : index
    %c0_26 = arith.constant 0 : index
    %29 = vector.load %arg4[%c2_24, %c0_25, %c0_26] : memref<4x640x256xbf16, #tpu.memory_space<vmem>>, vector<1x640x256xbf16>
    %30 = vector.shape_cast %29 : vector<1x640x256xbf16> to vector<640x256xbf16>
    %cst_27 = arith.constant dense<0.000000e+00> : vector<128x256xf32>
    %31 = tpu.matmul %21, %30, %cst_27 {dimension_numbers = #tpu.dot_dimension_numbers<[1], [0], [0], [1], [0, 0, 1, 1], [], []>} : vector<128x640xbf16>, vector<640x256xbf16>, vector<128x256xf32> -> vector<128x256xf32>
    %32 = arith.maximumf %28, %31 : vector<128x256xf32>
    %c3_28 = arith.constant 3 : index
    %c0_29 = arith.constant 0 : index
    %c0_30 = arith.constant 0 : index
    %33 = vector.load %arg4[%c3_28, %c0_29, %c0_30] : memref<4x640x256xbf16, #tpu.memory_space<vmem>>, vector<1x640x256xbf16>
    %34 = vector.shape_cast %33 : vector<1x640x256xbf16> to vector<640x256xbf16>
    %cst_31 = arith.constant dense<0.000000e+00> : vector<128x256xf32>
    %35 = tpu.matmul %21, %34, %cst_31 {dimension_numbers = #tpu.dot_dimension_numbers<[1], [0], [0], [1], [0, 0, 1, 1], [], []>} : vector<128x640xbf16>, vector<640x256xbf16>, vector<128x256xf32> -> vector<128x256xf32>
    %36 = arith.maximumf %32, %35 : vector<128x256xf32>
    %c0_32 = arith.constant 0 : index
    %c0_33 = arith.constant 0 : index
    %37 = vector.load %arg5[%c0_32, %c0_33] : memref<1x256xf32, #tpu.memory_space<vmem>>, vector<1x256xf32>
    %38 = vector.broadcast %37 : vector<1x256xf32> to vector<128x256xf32>
    %39 = arith.addf %36, %38 : vector<128x256xf32>
    %cst_34 = arith.constant 0.000000e+00 : f32
    %40 = vector.broadcast %cst_34 : f32 to vector<128x256xf32>
    %41 = arith.maximumf %39, %40 : vector<128x256xf32>
    %42 = arith.truncf %41 : vector<128x256xf32> to vector<128x256xbf16>
    %c0_35 = arith.constant 0 : index
    %c0_36 = arith.constant 0 : index
    %43 = vector.load %arg6[%c0_35, %c0_36] : memref<256x128xbf16, #tpu.memory_space<vmem>>, vector<256x128xbf16>
    %cst_37 = arith.constant dense<0.000000e+00> : vector<128x128xf32>
    %44 = tpu.matmul %42, %43, %cst_37 {dimension_numbers = #tpu.dot_dimension_numbers<[1], [0], [0], [1], [0, 0, 1, 1], [], []>} : vector<128x256xbf16>, vector<256x128xbf16>, vector<128x128xf32> -> vector<128x128xf32>
    %c0_38 = arith.constant 0 : index
    %c0_39 = arith.constant 0 : index
    %45 = vector.load %arg7[%c0_38, %c0_39] : memref<1x128xf32, #tpu.memory_space<vmem>>, vector<1x128xf32>
    %46 = vector.broadcast %45 : vector<1x128xf32> to vector<128x128xf32>
    %47 = arith.addf %44, %46 : vector<128x128xf32>
    %cst_40 = arith.constant 0.000000e+00 : f32
    %48 = vector.broadcast %cst_40 : f32 to vector<128x128xf32>
    %49 = arith.maximumf %47, %48 : vector<128x128xf32>
    %50 = arith.truncf %49 : vector<128x128xf32> to vector<128x128xbf16>
    %c0_41 = arith.constant 0 : index
    %c0_42 = arith.constant 0 : index
    %51 = vector.load %arg8[%c0_41, %c0_42] : memref<128x128xbf16, #tpu.memory_space<vmem>>, vector<128x128xbf16>
    %cst_43 = arith.constant dense<0.000000e+00> : vector<128x128xf32>
    %52 = tpu.matmul %50, %51, %cst_43 {dimension_numbers = #tpu.dot_dimension_numbers<[1], [0], [0], [1], [0, 0, 1, 1], [], []>} : vector<128x128xbf16>, vector<128x128xbf16>, vector<128x128xf32> -> vector<128x128xf32>
    %c0_44 = arith.constant 0 : index
    %c0_45 = arith.constant 0 : index
    %53 = vector.load %arg9[%c0_44, %c0_45] : memref<1x128xf32, #tpu.memory_space<vmem>>, vector<1x128xf32>
    %54 = vector.broadcast %53 : vector<1x128xf32> to vector<128x128xf32>
    %55 = arith.addf %52, %54 : vector<128x128xf32>
    %cst_46 = arith.constant 0.000000e+00 : f32
    %56 = vector.broadcast %cst_46 : f32 to vector<128x128xf32>
    %57 = arith.maximumf %55, %56 : vector<128x128xf32>
    %58 = tpu.transpose %57, [1, 0] : vector<128x128xf32> -> vector<128x128xf32>
    %59 = arith.truncf %58 : vector<128x128xf32> to vector<128x128xbf16>
    %c0_47 = arith.constant 0 : index
    %c0_48 = arith.constant 0 : index
    %60 = vector.load %arg10[%c0_47, %c0_48] : memref<8x128xbf16, #tpu.memory_space<vmem>>, vector<8x128xbf16>
    %cst_49 = arith.constant dense<0.000000e+00> : vector<8x128xf32>
    %61 = tpu.matmul %60, %59, %cst_49 {dimension_numbers = #tpu.dot_dimension_numbers<[1], [0], [0], [1], [0, 0, 1, 1], [], []>} : vector<8x128xbf16>, vector<128x128xbf16>, vector<8x128xf32> -> vector<8x128xf32>
    %c0_50 = arith.constant 0 : index
    %62 = memref.load %arg11[%c0_50] : memref<1xf32, #tpu.memory_space<smem>>
    %63 = vector.broadcast %62 : f32 to vector<8x128xf32>
    %64 = arith.addf %61, %63 : vector<8x128xf32>
    %c0_51 = arith.constant 0 : index
    %c0_52 = arith.constant 0 : index
    %65 = vector.load %arg12[%c0_51, %c0_52] : memref<8x128xf32, #tpu.memory_space<vmem>>, vector<8x128xf32>
    tpu.vector_store %arg12[%c0_51, %c0_52], %64 {strides = array<i32>} : memref<8x128xf32, #tpu.memory_space<vmem>>, vector<8x128xf32>,
    return
  }
  func.func @transform_0(%arg0: i32) -> (i32, i32) {
    %c0_i32 = arith.constant 0 : i32
    %c0_i32_0 = arith.constant 0 : i32
    return %arg0, %c0_i32 : i32, i32
  }
  func.func @transform_1(%arg0: i32) -> (i32, i32, i32) {
    %c0_i32 = arith.constant 0 : i32
    %c0_i32_0 = arith.constant 0 : i32
    %c0_i32_1 = arith.constant 0 : i32
    %c0_i32_2 = arith.constant 0 : i32
    return %c0_i32, %c0_i32_0, %c0_i32_1 : i32, i32, i32
  }
  func.func @transform_2(%arg0: i32) -> (i32, i32) {
    %c0_i32 = arith.constant 0 : i32
    %c0_i32_0 = arith.constant 0 : i32
    %c0_i32_1 = arith.constant 0 : i32
    return %c0_i32, %c0_i32_0 : i32, i32
  }
  func.func @transform_3(%arg0: i32) -> (i32, i32, i32) {
    %c0_i32 = arith.constant 0 : i32
    %c0_i32_0 = arith.constant 0 : i32
    %c0_i32_1 = arith.constant 0 : i32
    %c0_i32_2 = arith.constant 0 : i32
    return %c0_i32, %c0_i32_0, %c0_i32_1 : i32, i32, i32
  }
  func.func @transform_4(%arg0: i32) -> (i32, i32) {
    %c0_i32 = arith.constant 0 : i32
    %c0_i32_0 = arith.constant 0 : i32
    %c0_i32_1 = arith.constant 0 : i32
    return %c0_i32, %c0_i32_0 : i32, i32
  }
  func.func @transform_5(%arg0: i32) -> (i32, i32) {
    %c0_i32 = arith.constant 0 : i32
    %c0_i32_0 = arith.constant 0 : i32
    %c0_i32_1 = arith.constant 0 : i32
    return %c0_i32, %c0_i32_0 : i32, i32
  }
  func.func @transform_6(%arg0: i32) -> (i32, i32) {
    %c0_i32 = arith.constant 0 : i32
    %c0_i32_0 = arith.constant 0 : i32
    %c0_i32_1 = arith.constant 0 : i32
    return %c0_i32, %c0_i32_0 : i32, i32
  }
  func.func @transform_7(%arg0: i32) -> (i32, i32) {
    %c0_i32 = arith.constant 0 : i32
    %c0_i32_0 = arith.constant 0 : i32
    %c0_i32_1 = arith.constant 0 : i32
    return %c0_i32, %c0_i32_0 : i32, i32
  }
  func.func @transform_8(%arg0: i32) -> (i32, i32) {
    %c0_i32 = arith.constant 0 : i32
    %c0_i32_0 = arith.constant 0 : i32
    %c0_i32_1 = arith.constant 0 : i32
    return %c0_i32, %c0_i32_0 : i32, i32
  }
  func.func @transform_9(%arg0: i32) -> (i32, i32) {
    %c0_i32 = arith.constant 0 : i32
    %c0_i32_0 = arith.constant 0 : i32
    %c0_i32_1 = arith.constant 0 : i32
    return %c0_i32, %c0_i32_0 : i32, i32
  }
  func.func @transform_10(%arg0: i32) -> i32 {
    %c0_i32 = arith.constant 0 : i32
    %c0_i32_0 = arith.constant 0 : i32
    return %c0_i32 : i32
  }
  func.func @transform_11(%arg0: i32) -> (i32, i32) {
    %c0_i32 = arith.constant 0 : i32
    %c0_i32_0 = arith.constant 0 : i32
    return %c0_i32, %arg0 : i32, i32
  }
}

</mosaic_0001>

<bundles_post_ra>
// kernel: cnn_forward.1
= control target key start
LH: loop header
LB: loop body
LE: loop exit
PB: predicated region body
PF: predicated region fallthrough
CT: control target
= control target key end

     0   :  { %17 = vsyncpa [#allocation4], 0  ;;  %s22322_s0 = inlined_call_operand.vmem [shape: bf16[128,640], index: 0, kind: input, shape index: {}]   ;;  %s22323_s1 = inlined_call_operand.hbm [shape: bf16[4,640,640], index: 1, kind: input, shape index: {}]   ;;  %s22324_s2 = inlined_call_operand.hbm [shape: f32[1,640], index: 2, kind: input, shape index: {}]   ;;  %s22325_s3 = inlined_call_operand.hbm [shape: bf16[4,640,256], index: 3, kind: input, shape index: {}]   ;;  %s22326_s4 = inlined_call_operand.hbm [shape: f32[1,256], index: 4, kind: input, shape index: {}]   ;;  %s22327_s5 = inlined_call_operand.hbm [shape: bf16[256,128], index: 5, kind: input, shape index: {}]   ;;  %s22328_s6 = inlined_call_operand.hbm [shape: f32[1,128], index: 6, kind: input, shape index: {}]   ;;  %s22329_s7 = inlined_call_operand.hbm [shape: bf16[128,128], index: 7, kind: input, shape index: {}]   ;;  %s22330_s8 = inlined_call_operand.hbm [shape: f32[1,128], index: 8, kind: input, shape index: {}]   ;;  %s22331_s9 = inlined_call_operand.hbm [shape: bf16[8,128], index: 9, kind: input, shape index: {}]   ;;  %s22332_s10 = inlined_call_operand.<no memory space> [shape: f32[1], index: 10, kind: input, shape index: {}]   ;;  %s22333_s11 = inlined_call_operand.vmem [shape: f32[8,128], index: 11, kind: output, shape index: {}]  }
   0x1   :  { %18 = vsyncpa [#allocation6], 0 }
   0x2   :  { %19 = vsyncpa [#allocation9], 0 }
   0x3   :  { %20 = vsyncpa [#allocation12], 0 }
   0x4   :  { %21 = vsyncpa [#allocation15], 0  ;;  %s18779_s17 = smov [#allocation5]   ;;  %s18780_s19 = smov [#allocation8]  }
   0x5   :  { %s42_s18 = sshll.u32 %s18779_s17, 4  ;;  %s64_s20 = sshll.u32 %s18780_s19, 4  ;;  %s43_s18 = int_to_ptr.vmem [resolvable:$true] %s42_s18  ;;  %s65_s20 = int_to_ptr.vmem [resolvable:$true] %s64_s20 }
   0x6   :  { %s18571_s23 = scalar_lea.hbm %s22324_s2, 80 }
   0x7   :  { %p18572_p0 = scmp.ne.s32.totalorder %s22324_s2, %s18571_s23  ;;  %p18575_p1 = scmp.lt.u32.totalorder %s18571_s23, %s22324_s2 }
   0x9   :  { %p18577_p2 = pnand %p18575_p1, %p18572_p0 }
   0xb   :  { %18580 = shalt.err (!%p18577_p2)
}
   0xc   :  { %s18581_s28 = scalar_lea.vmem %s43_s18, 80  ;;  %s18585_s29 = scalar_lea.vmem %s43_s18, 96 }
   0xd   :  { %p18582_p3 = scmp.ne.s32.totalorder %s43_s18, %s18581_s28  ;;  %p18586_p4 = scmp.lt.s32.totalorder %s43_s18, %s43_s18 }
   0xe   :  { %p18587_p5 = scmp.lt.s32.totalorder %s18585_s29, %s18581_s28 }
  0x10   :  { %p18588_p6 = por %p18587_p5, %p18586_p4 }
  0x12   :  { %p18589_p7 = pnand %p18588_p6, %p18582_p3 }
  0x14   :  { %18592 = shalt.err (!%p18589_p7)
}
  0x15   :  { %45 = dma.hbm_to_vmem [thread:$0]  %s22324_s2, 80, %s43_s18, [#allocation6]  }
  0x16   :  { %s18593_s15 = scalar_lea.hbm %s22326_s4, 32 }
  0x17   :  { %p18594_p8 = scmp.ne.s32.totalorder %s22326_s4, %s18593_s15  ;;  %p18597_p9 = scmp.lt.u32.totalorder %s18593_s15, %s22326_s4 }
  0x19   :  { %p18599_p10 = pnand %p18597_p9, %p18594_p8 }
  0x1b   :  { %18602 = shalt.err (!%p18599_p10)
}
  0x1c   :  { %s18603_s22 = scalar_lea.vmem %s65_s20, 32  ;;  %p18608_p12 = scmp.lt.s32.totalorder %s65_s20, %s65_s20 }
  0x1d   :  { %p18604_p11 = scmp.ne.s32.totalorder %s65_s20, %s18603_s22  ;;  %p18609_p13 = scmp.lt.s32.totalorder %s18603_s22, %s18603_s22 }
  0x1f   :  { %p18610_p0 = por %p18609_p13, %p18608_p12 }
  0x21   :  { %p18611_p1 = pnand %p18610_p0, %p18604_p11 }
  0x23   :  { %18614 = shalt.err (!%p18611_p1)
}
  0x24   :  { %67 = dma.hbm_to_vmem [thread:$0]  %s22326_s4, 32, %s65_s20, [#allocation9]  }
  0x25   :  { %s18781_s23 = smov [#allocation11]   ;;  %s18782_s25 = smov [#allocation14]  }
  0x26   :  { %s86_s24 = sshll.u32 %s18781_s23, 4  ;;  %s108_s26 = sshll.u32 %s18782_s25, 4  ;;  %s87_s24 = int_to_ptr.vmem [resolvable:$true] %s86_s24  ;;  %s109_s26 = int_to_ptr.vmem [resolvable:$true] %s108_s26 }
  0x27   :  { %s18615_s29 = scalar_lea.hbm %s22328_s6, 16 }
  0x28   :  { %p18616_p2 = scmp.ne.s32.totalorder %s22328_s6, %s18615_s29  ;;  %p18619_p3 = scmp.lt.u32.totalorder %s18615_s29, %s22328_s6 }
  0x2a   :  { %p18621_p4 = pnand %p18619_p3, %p18616_p2 }
  0x2c   :  { %18624 = shalt.err (!%p18621_p4)
}
  0x2d   :  { %s18625_s4 = scalar_lea.vmem %s87_s24, 16  ;;  %s18629_s20 = scalar_lea.vmem %s87_s24, 32 }
  0x2e   :  { %p18626_p5 = scmp.ne.s32.totalorder %s87_s24, %s18625_s4  ;;  %p18630_p6 = scmp.lt.s32.totalorder %s87_s24, %s87_s24 }
  0x2f   :  { %p18631_p7 = scmp.lt.s32.totalorder %s18629_s20, %s18625_s4 }
  0x31   :  { %p18632_p8 = por %p18631_p7, %p18630_p6 }
  0x33   :  { %p18633_p9 = pnand %p18632_p8, %p18626_p5 }
  0x35   :  { %18636 = shalt.err (!%p18633_p9)
}
  0x36   :  { %89 = dma.hbm_to_vmem [thread:$0]  %s22328_s6, 16, %s87_s24, [#allocation12]  }
  0x37   :  { %s18637_s21 = scalar_lea.hbm %s22330_s8, 16 }
  0x38   :  { %p18638_p10 = scmp.ne.s32.totalorder %s22330_s8, %s18637_s21  ;;  %p18641_p11 = scmp.lt.u32.totalorder %s18637_s21, %s22330_s8 }
  0x3a   :  { %p18643_p12 = pnand %p18641_p11, %p18638_p10 }
  0x3c   :  { %18646 = shalt.err (!%p18643_p12)
}
  0x3d   :  { %s18647_s25 = scalar_lea.vmem %s109_s26, 16  ;;  %s18651_s27 = scalar_lea.vmem %s109_s26, 32 }
  0x3e   :  { %p18648_p13 = scmp.ne.s32.totalorder %s109_s26, %s18647_s25  ;;  %p18652_p0 = scmp.lt.s32.totalorder %s109_s26, %s109_s26 }
  0x3f   :  { %p18653_p1 = scmp.lt.s32.totalorder %s18651_s27, %s18647_s25 }
  0x41   :  { %p18654_p2 = por %p18653_p1, %p18652_p0 }
  0x43   :  { %p18655_p3 = pnand %p18654_p2, %p18648_p13 }
  0x45   :  { %18658 = shalt.err (!%p18655_p3)
}
  0x46   :  { %111 = dma.hbm_to_vmem [thread:$0]  %s22330_s8, 16, %s109_s26, [#allocation15]  }
  0x47   :  { %s18783_s28 = smov [#allocation3]   ;;  %s18659_s13 = scalar_lea.hbm %s22323_s1, 102400 }
  0x48   :  { %s29_s29 = sshll.u32 %s18783_s28, 4  ;;  %p18660_p4 = scmp.ne.s32.totalorder %s22323_s1, %s18659_s13  ;;  %s30_s29 = int_to_ptr.vmem [resolvable:$true] %s29_s29 }
  0x49   :  { %p18663_p5 = scmp.lt.u32.totalorder %s18659_s13, %s22323_s1 }
  0x4b   :  { %p18665_p6 = pnand %p18663_p5, %p18660_p4 }
  0x4d   :  { %18668 = shalt.err (!%p18665_p6)
}
  0x4e   :  { %s18669_s16 = scalar_lea.vmem %s30_s29, 102400  ;;  %p18674_p8 = scmp.lt.s32.totalorder %s30_s29, %s30_s29 }
  0x4f   :  { %p18670_p7 = scmp.ne.s32.totalorder %s30_s29, %s18669_s16  ;;  %p18675_p9 = scmp.lt.s32.totalorder %s18669_s16, %s18669_s16 }
  0x51   :  { %p18676_p10 = por %p18675_p9, %p18674_p8 }
  0x53   :  { %p18677_p11 = pnand %p18676_p10, %p18670_p7 }
  0x55   :  { %18680 = shalt.err (!%p18677_p11)
}
  0x56   :  { %s18784_s8 = smov 320   ;;  %s18785_s26 = smov 20  }
  0x57   :  { %35 = dma.hbm_to_vmem [thread:$0]  %s22323_s1, 102400, %s30_s29, [#allocation4], %s18784_s8, %s18784_s8, %s18785_s26  }
  0x58   :  { %s18786_s21 = smov [#allocation7]   ;;  %s18681_s23 = scalar_lea.hbm %s22325_s3, 40960 }
  0x59   :  { %s51_s22 = sshll.u32 %s18786_s21, 4  ;;  %p18682_p12 = scmp.ne.s32.totalorder %s22325_s3, %s18681_s23  ;;  %s52_s22 = int_to_ptr.vmem [resolvable:$true] %s51_s22 }
  0x5a   :  { %p18685_p13 = scmp.lt.u32.totalorder %s18681_s23, %s22325_s3 }
  0x5c   :  { %p18687_p0 = pnand %p18685_p13, %p18682_p12 }
  0x5e   :  { %18690 = shalt.err (!%p18687_p0)
}
  0x5f   :  { %s18691_s28 = scalar_lea.vmem %s52_s22, 40960  ;;  %p18696_p2 = scmp.lt.s32.totalorder %s52_s22, %s52_s22 }
  0x60   :  { %p18692_p1 = scmp.ne.s32.totalorder %s52_s22, %s18691_s28  ;;  %p18697_p3 = scmp.lt.s32.totalorder %s18691_s28, %s18691_s28 }
  0x62   :  { %p18698_p4 = por %p18697_p3, %p18696_p2 }
  0x64   :  { %p18699_p5 = pnand %p18698_p4, %p18692_p1 }
  0x66   :  { %18702 = shalt.err (!%p18699_p5)
}
  0x67   :  { %s18787_s1 = smov 128   ;;  %s18788_s29 = smov 8  }
  0x68   :  { %57 = dma.hbm_to_vmem [thread:$0]  %s22325_s3, 40960, %s52_s22, [#allocation6], %s18787_s1, %s18787_s1, %s18788_s29  }
  0x69   :  { %s18789_s13 = smov [#allocation10]   ;;  %s18703_s15 = scalar_lea.hbm %s22327_s5, 2048 }
  0x6a   :  { %s73_s14 = sshll.u32 %s18789_s13, 4  ;;  %p18704_p6 = scmp.ne.s32.totalorder %s22327_s5, %s18703_s15  ;;  %s74_s14 = int_to_ptr.vmem [resolvable:$true] %s73_s14 }
  0x6b   :  { %p18707_p7 = scmp.lt.u32.totalorder %s18703_s15, %s22327_s5 }
  0x6d   :  { %p18709_p8 = pnand %p18707_p7, %p18704_p6 }
  0x6f   :  { %18712 = shalt.err (!%p18709_p8)
}
  0x70   :  { %s18713_s19 = scalar_lea.vmem %s74_s14, 2048  ;;  %p18718_p10 = scmp.lt.s32.totalorder %s74_s14, %s74_s14 }
  0x71   :  { %p18714_p9 = scmp.ne.s32.totalorder %s74_s14, %s18713_s19  ;;  %p18719_p11 = scmp.lt.s32.totalorder %s18713_s19, %s18713_s19 }
  0x73   :  { %p18720_p12 = por %p18719_p11, %p18718_p10 }
  0x75   :  { %p18721_p13 = pnand %p18720_p12, %p18714_p9 }
  0x77   :  { %18724 = shalt.err (!%p18721_p13)
}
  0x78   :  { %s18790_s3 = smov 64   ;;  %s18791_s21 = smov 4  }
  0x79   :  { %79 = dma.hbm_to_vmem [thread:$0]  %s22327_s5, 2048, %s74_s14, [#allocation9], %s18790_s3, %s18790_s3, %s18791_s21  }
  0x7a   :  { %s18792_s18 = smov [#allocation13]   ;;  %s18793_s25 = smov [#allocation16]  }
  0x7b   :  { %s95_s23 = sshll.u32 %s18792_s18, 4  ;;  %s118_s27 = sshll.u32 %s18793_s25, 4  ;;  %s96_s23 = int_to_ptr.vmem [resolvable:$true] %s95_s23  ;;  %s119_s27 = int_to_ptr.vmem [resolvable:$true] %s118_s27 }
  0x7c   :  { %s18725_s28 = scalar_lea.hbm %s22329_s7, 1024 }
  0x7d   :  { %p18726_p0 = scmp.ne.s32.totalorder %s22329_s7, %s18725_s28  ;;  %p18729_p1 = scmp.lt.u32.totalorder %s18725_s28, %s22329_s7 }
  0x7f   :  { %p18731_p2 = pnand %p18729_p1, %p18726_p0 }
  0x81   :  { %18734 = shalt.err (!%p18731_p2)
}
  0x82   :  { %s18735_s5 = scalar_lea.vmem %s96_s23, 1024  ;;  %p18740_p4 = scmp.lt.s32.totalorder %s96_s23, %s96_s23 }
  0x83   :  { %p18736_p3 = scmp.ne.s32.totalorder %s96_s23, %s18735_s5  ;;  %p18741_p5 = scmp.lt.s32.totalorder %s18735_s5, %s18735_s5 }
  0x85   :  { %p18742_p6 = por %p18741_p5, %p18740_p4 }
  0x87   :  { %p18743_p7 = pnand %p18742_p6, %p18736_p3 }
  0x89   :  { %18746 = shalt.err (!%p18743_p7)
}
  0x8a   :  { %101 = dma.hbm_to_vmem [thread:$0]  %s22329_s7, 1024, %s96_s23, [#allocation12], %s18790_s3, %s18790_s3, %s18791_s21  }
  0x8b   :  { %s18747_s15 = scalar_lea.hbm %s22331_s9, 64 }
  0x8c   :  { %p18748_p8 = scmp.ne.s32.totalorder %s22331_s9, %s18747_s15  ;;  %p18751_p9 = scmp.lt.u32.totalorder %s18747_s15, %s22331_s9 }
  0x8e   :  { %p18753_p10 = pnand %p18751_p9, %p18748_p8 }
  0x90   :  { %18756 = shalt.err (!%p18753_p10)
}
  0x91   :  { %s18757_s19 = scalar_lea.vmem %s119_s27, 64  ;;  %p18762_p12 = scmp.lt.s32.totalorder %s119_s27, %s119_s27 }
  0x92   :  { %p18758_p11 = scmp.ne.s32.totalorder %s119_s27, %s18757_s19  ;;  %p18763_p13 = scmp.lt.s32.totalorder %s18757_s19, %s18757_s19 }
  0x94   :  { %p18764_p0 = por %p18763_p13, %p18762_p12 }
  0x96   :  { %p18765_p1 = pnand %p18764_p0, %p18758_p11 }
  0x98   :  { %18768 = shalt.err (!%p18765_p1)
}
  0x99   :  { %121 = dma.hbm_to_vmem [thread:$0]  %s22331_s9, 64, %s119_s27, [#allocation15]  }
  0x9a   :  { %18769 = dma.done.wait [#allocation4], 102400  }
  0x9b   :  { %18770 = vsyncadd [#allocation4], 4294864896 }
  0x9c   :  { %18771 = dma.done.wait [#allocation6], 41040  }
  0x9d   :  { %18772 = vsyncadd [#allocation6], 4294926256 }
  0x9e   :  { %18773 = dma.done.wait [#allocation9], 2080  }
  0x9f   :  { %18774 = vsyncadd [#allocation9], 4294965216 }
  0xa0   :  { %18775 = dma.done.wait [#allocation12], 1040  }
  0xa1   :  { %18776 = vsyncadd [#allocation12], 4294966256 }
  0xa2   :  { %18777 = dma.done.wait [#allocation15], 80  }
  0xa3   :  { %18778 = vsyncadd [#allocation15], 4294967216  ;;  %v16691_v0 = vld [vmem:[#allocation3 + $0x4] ss:$20 sps:$4 sm:$0xff]   ;;  %v16693_v1 = vld [vmem:[#allocation3 + $0xc] ss:$20 sps:$4 sm:$0xff]  }
  0xa4   :  { %1688 = vmatprep.subr.bf16.mxu0 %v16691_v0  ;;  %v16695_v2 = vld [vmem:[#allocation3] ss:$20 sps:$4 sm:$0xff]   ;;  %v16696_v3 = vld [vmem:[#allocation3 + $0x8] ss:$20 sps:$4 sm:$0xff]   ;;  %2027 = vmatprep.subr.bf16.mxu1 %v16693_v1  ;;  %v16702_v7 = vld [vmem:[#allocation3 + $0x30] ss:$20 sps:$4 sm:$0xff]  }
  0xa5   :  { %v16697_v4 = vld [vmem:[#allocation3 + $0x2c] ss:$20 sps:$4 sm:$0xff]   ;;  %1689 = vmatpush1.bf16.msra.mxu0 %v16695_v2  ;;  %2028 = vmatpush1.bf16.msra.mxu1 %v16696_v3  ;;  %v16699_v5 = vld [vmem:[#allocation3 + $0x34] ss:$20 sps:$4 sm:$0xff]   ;;  %v16705_v9 = vld [vmem:[#allocation3 + $0x5c] ss:$20 sps:$4 sm:$0xff]  }
  0xa6   :  { %v16701_v6 = vld [vmem:[#allocation3 + $0x28] ss:$20 sps:$4 sm:$0xff]   ;;  %1690 = vmatprep.subr.bf16.mxu0 %v16697_v4  ;;  %2029 = vmatprep.subr.bf16.mxu1 %v16699_v5  ;;  %v16707_v10 = vld [vmem:[#allocation3 + $0x50] ss:$20 sps:$4 sm:$0xff]   ;;  %v16708_v11 = vld [vmem:[#allocation3 + $0x58] ss:$20 sps:$4 sm:$0xff]  }
  0xa7   :  { %v16703_v8 = vld [vmem:[#allocation3 + $0x54] ss:$20 sps:$4 sm:$0xff]   ;;  %v16709_v12 = vld [vmem:[#allocation3 + $0x7c] ss:$20 sps:$4 sm:$0xff]   ;;  %v16711_v13 = vld [vmem:[#allocation3 + $0x84] ss:$20 sps:$4 sm:$0xff]  }
  0xa8   :  { %v16713_v14 = vld [vmem:[#allocation3 + $0x78] ss:$20 sps:$4 sm:$0xff]   ;;  %v16714_v15 = vld [vmem:[#allocation3 + $0x80] ss:$20 sps:$4 sm:$0xff]   ;;  %v16720_v19 = vld [vmem:[#allocation3 + $0xa8] ss:$20 sps:$4 sm:$0xff]  }
  0xa9   :  { %1691 = vmatpush1.bf16.msra.mxu0 %v16701_v6  ;;  %2030 = vmatpush1.bf16.msra.mxu1 %v16702_v7  ;;  %v16715_v16 = vld [vmem:[#allocation3 + $0xa4] ss:$20 sps:$4 sm:$0xff]   ;;  %v16717_v17 = vld [vmem:[#allocation3 + $0xac] ss:$20 sps:$4 sm:$0xff]   ;;  %v16723_v21 = vld [vmem:[#allocation3 + $0xd4] ss:$20 sps:$4 sm:$0xff]  }
  0xaa   :  { %1692 = vmatprep.subr.bf16.mxu0 %v16703_v8  ;;  %2031 = vmatprep.subr.bf16.mxu1 %v16705_v9  ;;  %v16719_v18 = vld [vmem:[#allocation3 + $0xa0] ss:$20 sps:$4 sm:$0xff]   ;;  %v16725_v22 = vld [vmem:[#allocation3 + $0xc8] ss:$20 sps:$4 sm:$0xff]   ;;  %v16726_v23 = vld [vmem:[#allocation3 + $0xd0] ss:$20 sps:$4 sm:$0xff]  }
  0xab   :  { %v16721_v20 = vld [vmem:[#allocation3 + $0xcc] ss:$20 sps:$4 sm:$0xff]   ;;  %v16727_v24 = vld [vmem:[#allocation3 + $0xf4] ss:$20 sps:$4 sm:$0xff]   ;;  %v16729_v25 = vld [vmem:[#allocation3 + $0xfc] ss:$20 sps:$4 sm:$0xff]  }
  0xac   :  { %v16731_v26 = vld [vmem:[#allocation3 + $0xf0] ss:$20 sps:$4 sm:$0xff]   ;;  %v16732_v27 = vld [vmem:[#allocation3 + $0xf8] ss:$20 sps:$4 sm:$0xff]   ;;  %v16738_v31 = vld [vmem:[#allocation3 + $0x120] ss:$20 sps:$4 sm:$0xff]  }
  0xad   :  { %1693 = vmatpush1.bf16.msra.mxu0 %v16707_v10  ;;  %2032 = vmatpush1.bf16.msra.mxu1 %v16708_v11  ;;  %v16733_v28 = vld [vmem:[#allocation3 + $0x11c] ss:$20 sps:$4 sm:$0xff]   ;;  %v16735_v29 = vld [vmem:[#allocation3 + $0x124] ss:$20 sps:$4 sm:$0xff]   ;;  %v16741_v33 = vld [vmem:[#allocation3 + $0x14c] ss:$20 sps:$4 sm:$0xff]  }
  0xae   :  { %1694 = vmatprep.subr.bf16.mxu0 %v16709_v12  ;;  %2033 = vmatprep.subr.bf16.mxu1 %v16711_v13  ;;  %v16737_v30 = vld [vmem:[#allocation3 + $0x118] ss:$20 sps:$4 sm:$0xff]   ;;  %v16743_v34 = vld [vmem:[#allocation3 + $0x140] ss:$20 sps:$4 sm:$0xff]   ;;  %v16744_v35 = vld [vmem:[#allocation3 + $0x148] ss:$20 sps:$4 sm:$0xff]  }
  0xaf   :  { %v16739_v32 = vld [vmem:[#allocation3 + $0x144] ss:$20 sps:$4 sm:$0xff]   ;;  %v16745_v36 = vld [vmem:[#allocation3 + $0x16c] ss:$20 sps:$4 sm:$0xff]   ;;  %v16747_v37 = vld [vmem:[#allocation3 + $0x174] ss:$20 sps:$4 sm:$0xff]  }
  0xb0   :  { %v16749_v38 = vld [vmem:[#allocation3 + $0x168] ss:$20 sps:$4 sm:$0xff]   ;;  %v16750_v39 = vld [vmem:[#allocation3 + $0x170] ss:$20 sps:$4 sm:$0xff]   ;;  %v16756_v43 = vld [vmem:[#allocation3 + $0x198] ss:$20 sps:$4 sm:$0xff]  }
  0xb1   :  { %1695 = vmatpush1.bf16.msra.mxu0 %v16713_v14  ;;  %2034 = vmatpush1.bf16.msra.mxu1 %v16714_v15  ;;  %v16751_v40 = vld [vmem:[#allocation3 + $0x194] ss:$20 sps:$4 sm:$0xff]   ;;  %v16753_v41 = vld [vmem:[#allocation3 + $0x19c] ss:$20 sps:$4 sm:$0xff]   ;;  %v16759_v45 = vld [vmem:[#allocation3 + $0x1c4] ss:$20 sps:$4 sm:$0xff]  }
  0xb2   :  { %1696 = vmatprep.subr.bf16.mxu0 %v16715_v16  ;;  %2035 = vmatprep.subr.bf16.mxu1 %v16717_v17  ;;  %v16755_v42 = vld [vmem:[#allocation3 + $0x190] ss:$20 sps:$4 sm:$0xff]   ;;  %v16761_v46 = vld [vmem:[#allocation3 + $0x1b8] ss:$20 sps:$4 sm:$0xff]   ;;  %v16762_v47 = vld [vmem:[#allocation3 + $0x1c0] ss:$20 sps:$4 sm:$0xff]  }
  0xb3   :  { %v16757_v44 = vld [vmem:[#allocation3 + $0x1bc] ss:$20 sps:$4 sm:$0xff]   ;;  %v16787_v48 = vld [vmem:[%s22322_s0 + $0x4] ss:$20 sps:$4 sm:$0xff]   ;;  %v16765_v50 = vld [vmem:[#allocation3 + $0x1ec] ss:$20 sps:$4 sm:$0xff]  }
  0xb4   :  { %v16763_v49 = vld [vmem:[#allocation3 + $0x1e4] ss:$20 sps:$4 sm:$0xff]   ;;  %1720 = vmatprep.mubr.bf16.mxu0 %v16787_v48  ;;  %2059 = vmatprep.mubr.bf16.mxu1 %v16787_v48  ;;  %v16767_v51 = vld [vmem:[#allocation3 + $0x1e0] ss:$20 sps:$4 sm:$0xff]   ;;  %v16768_v52 = vld [vmem:[#allocation3 + $0x1e8] ss:$20 sps:$4 sm:$0xff]  }
  0xb5   :  { %1697 = vmatpush1.bf16.msra.mxu0 %v16719_v18  ;;  %2036 = vmatpush1.bf16.msra.mxu1 %v16720_v19  ;;  %v16769_v53 = vld [vmem:[#allocation3 + $0x20c] ss:$20 sps:$4 sm:$0xff]   ;;  %v16771_v54 = vld [vmem:[#allocation3 + $0x214] ss:$20 sps:$4 sm:$0xff]   ;;  %v16774_v56 = vld [vmem:[#allocation3 + $0x210] ss:$20 sps:$4 sm:$0xff]  }
  0xb6   :  { %1698 = vmatprep.subr.bf16.mxu0 %v16721_v20  ;;  %2037 = vmatprep.subr.bf16.mxu1 %v16723_v21  ;;  %v16773_v55 = vld [vmem:[#allocation3 + $0x208] ss:$20 sps:$4 sm:$0xff]   ;;  %v16779_v59 = vld [vmem:[#allocation3 + $0x230] ss:$20 sps:$4 sm:$0xff]   ;;  %v16780_v60 = vld [vmem:[#allocation3 + $0x238] ss:$20 sps:$4 sm:$0xff]  }
  0xb7   :  { %v16775_v57 = vld [vmem:[#allocation3 + $0x234] ss:$20 sps:$4 sm:$0xff]   ;;  %v16777_v58 = vld [vmem:[#allocation3 + $0x23c] ss:$20 sps:$4 sm:$0xff]   ;;  %v16783_v62 = vld [vmem:[#allocation3 + $0x264] ss:$20 sps:$4 sm:$0xff]  }
  0xb8   :  { %v16781_v61 = vld [vmem:[#allocation3 + $0x25c] ss:$20 sps:$4 sm:$0xff]   ;;  %v16785_v63 = vld [vmem:[#allocation3 + $0x258] ss:$20 sps:$4 sm:$0xff]   ;;  %v16786_v0 = vld [vmem:[#allocation3 + $0x260] ss:$20 sps:$4 sm:$0xff]  }
  0xb9   :  { %1699 = vmatpush1.bf16.msra.mxu0 %v16725_v22  ;;  %2038 = vmatpush1.bf16.msra.mxu1 %v16726_v23  ;;  %v16792_v1 = vld [vmem:[#allocation3 + $0x284] ss:$20 sps:$4 sm:$0xff]   ;;  %v16795_v2 = vld [vmem:[#allocation3 + $0x28c] ss:$20 sps:$4 sm:$0xff]   ;;  %v16793_v5 = vld [vmem:[#allocation3 + $0x288] ss:$20 sps:$4 sm:$0xff]  }
  0xba   :  { %1700 = vmatprep.subr.bf16.mxu0 %v16727_v24  ;;  %2039 = vmatprep.subr.bf16.mxu1 %v16729_v25  ;;  %v16789_v3 = vld [vmem:[%s22322_s0] ss:$20 sps:$4 sm:$0xff]   ;;  %v16796_v9 = vld [vmem:[#allocation3 + $0x2a8] ss:$20 sps:$4 sm:$0xff]   ;;  %v16799_v10 = vld [vmem:[#allocation3 + $0x2b0] ss:$20 sps:$4 sm:$0xff]  }
  0xbb   :  { %v16790_v4 = vld [vmem:[#allocation3 + $0x280] ss:$20 sps:$4 sm:$0xff]   ;;  %v16810_v12 = vld [vmem:[#allocation3 + $0x2dc] ss:$20 sps:$4 sm:$0xff]   ;;  %v16808_v15 = vld [vmem:[#allocation3 + $0x2d8] ss:$20 sps:$4 sm:$0xff]  }
  0xbc   :  { %v16798_v6 = vld [vmem:[#allocation3 + $0x2ac] ss:$20 sps:$4 sm:$0xff]   ;;  %v16801_v7 = vld [vmem:[#allocation3 + $0x2b4] ss:$20 sps:$4 sm:$0xff]   ;;  %v16805_v14 = vld [vmem:[#allocation3 + $0x2d0] ss:$20 sps:$4 sm:$0xff]  }
  0xbd   :  { %1701 = vmatpush1.bf16.msra.mxu0 %v16731_v26  ;;  %2040 = vmatpush1.bf16.msra.mxu1 %v16732_v27  ;;  %v16802_v8 = vld [vmem:[%s22322_s0 + $0x2c] ss:$20 sps:$4 sm:$0xff]   ;;  %v16807_v11 = vld [vmem:[#allocation3 + $0x2d4] ss:$20 sps:$4 sm:$0xff]   ;;  %v16813_v16 = vld [vmem:[#allocation3 + $0x2fc] ss:$20 sps:$4 sm:$0xff]  }
  0xbe   :  { %1702 = vmatprep.subr.bf16.mxu0 %v16733_v28  ;;  %2041 = vmatprep.subr.bf16.mxu1 %v16735_v29  ;;  %v16804_v13 = vld [vmem:[%s22322_s0 + $0x28] ss:$20 sps:$4 sm:$0xff]   ;;  %v16816_v17 = vld [vmem:[#allocation3 + $0x304] ss:$20 sps:$4 sm:$0xff]   ;;  %v16814_v20 = vld [vmem:[#allocation3 + $0x300] ss:$20 sps:$4 sm:$0xff]  }
  0xbf   :  { %v16817_v18 = vld [vmem:[%s22322_s0 + $0x54] ss:$20 sps:$4 sm:$0xff]   ;;  %v16811_v19 = vld [vmem:[#allocation3 + $0x2f8] ss:$20 sps:$4 sm:$0xff]   ;;  %v16819_v23 = vld [vmem:[%s22322_s0 + $0x50] ss:$20 sps:$4 sm:$0xff]  }
  0xc0   :  { %v16822_v21 = vld [vmem:[#allocation3 + $0x324] ss:$20 sps:$4 sm:$0xff]   ;;  %v16825_v22 = vld [vmem:[#allocation3 + $0x32c] ss:$20 sps:$4 sm:$0xff]   ;;  %v16823_v25 = vld [vmem:[#allocation3 + $0x328] ss:$20 sps:$4 sm:$0xff]  }
  0xc1   :  { %1703 = vmatpush1.bf16.msra.mxu0 %v16737_v30  ;;  %2042 = vmatpush1.bf16.msra.mxu1 %v16738_v31  ;;  %v16820_v24 = vld [vmem:[#allocation3 + $0x320] ss:$20 sps:$4 sm:$0xff]   ;;  %v16832_v28 = vld [vmem:[%s22322_s0 + $0x7c] ss:$20 sps:$4 sm:$0xff]   ;;  %vm18796_vm0 = vmmov 0  }
  0xc2   :  { %1704 = vmatprep.subr.bf16.mxu0 %v16739_v32  ;;  %2043 = vmatprep.subr.bf16.mxu1 %v16741_v33  ;;  %v16828_v26 = vld [vmem:[#allocation3 + $0x34c] ss:$20 sps:$4 sm:$0xff]   ;;  %v16831_v27 = vld [vmem:[#allocation3 + $0x354] ss:$20 sps:$4 sm:$0xff]   ;;  %v16829_v30 = vld [vmem:[#allocation3 + $0x350] ss:$20 sps:$4 sm:$0xff]  }
  0xc3   :  { %v16826_v29 = vld [vmem:[#allocation3 + $0x348] ss:$20 sps:$4 sm:$0xff]   ;;  %v16834_v33 = vld [vmem:[%s22322_s0 + $0x78] ss:$20 sps:$4 sm:$0xff]  }
  0xc4   :  { %v16837_v31 = vld [vmem:[#allocation3 + $0x374] ss:$20 sps:$4 sm:$0xff]   ;;  %v16840_v32 = vld [vmem:[#allocation3 + $0x37c] ss:$20 sps:$4 sm:$0xff]   ;;  %v16862_v48 = vld [vmem:[%s22322_s0 + $0xcc] ss:$20 sps:$4 sm:$0xff]  }
  0xc5   :  { %1705 = vmatpush1.bf16.msra.mxu0 %v16743_v34  ;;  %2044 = vmatpush1.bf16.msra.mxu1 %v16744_v35  ;;  %v16835_v34 = vld [vmem:[#allocation3 + $0x370] ss:$20 sps:$4 sm:$0xff]   ;;  %v16838_v35 = vld [vmem:[#allocation3 + $0x378] ss:$20 sps:$4 sm:$0xff]  }
  0xc6   :  { %1706 = vmatprep.subr.bf16.mxu0 %v16745_v36  ;;  %2045 = vmatprep.subr.bf16.mxu1 %v16747_v37  ;;  %v16843_v36 = vld [vmem:[#allocation3 + $0x39c] ss:$20 sps:$4 sm:$0xff]   ;;  %v16846_v37 = vld [vmem:[#allocation3 + $0x3a4] ss:$20 sps:$4 sm:$0xff]  }
  0xc9   :  { %1707 = vmatpush1.bf16.msra.mxu0 %v16749_v38  ;;  %2046 = vmatpush1.bf16.msra.mxu1 %v16750_v39  ;;  %v16847_v38 = vld [vmem:[%s22322_s0 + $0xa4] ss:$20 sps:$4 sm:$0xff]  }
  0xca   :  { %1708 = vmatprep.subr.bf16.mxu0 %v16751_v40  ;;  %2047 = vmatprep.subr.bf16.mxu1 %v16753_v41  ;;  %v16841_v39 = vld [vmem:[#allocation3 + $0x398] ss:$20 sps:$4 sm:$0xff]   ;;  %v16844_v40 = vld [vmem:[#allocation3 + $0x3a0] ss:$20 sps:$4 sm:$0xff]  }
  0xcb   :  { %v16852_v41 = vld [vmem:[#allocation3 + $0x3c4] ss:$20 sps:$4 sm:$0xff]  }
  0xcd   :  { %1709 = vmatpush1.bf16.msra.mxu0 %v16755_v42  ;;  %2048 = vmatpush1.bf16.msra.mxu1 %v16756_v43  ;;  %v16855_v42 = vld [vmem:[#allocation3 + $0x3cc] ss:$20 sps:$4 sm:$0xff]  }
  0xce   :  { %1710 = vmatprep.subr.bf16.mxu0 %v16757_v44  ;;  %2049 = vmatprep.subr.bf16.mxu1 %v16759_v45  ;;  %v16849_v43 = vld [vmem:[%s22322_s0 + $0xa0] ss:$20 sps:$4 sm:$0xff]   ;;  %v16853_v45 = vld [vmem:[#allocation3 + $0x3c8] ss:$20 sps:$4 sm:$0xff]  }
  0xcf   :  { %v16850_v44 = vld [vmem:[#allocation3 + $0x3c0] ss:$20 sps:$4 sm:$0xff]  }
  0xd1   :  { %1711 = vmatpush1.bf16.msra.mxu0 %v16761_v46  ;;  %2050 = vmatpush1.bf16.msra.mxu1 %v16762_v47  ;;  %v16858_v46 = vld [vmem:[#allocation3 + $0x3ec] ss:$20 sps:$4 sm:$0xff]   ;;  %v16861_v47 = vld [vmem:[#allocation3 + $0x3f4] ss:$20 sps:$4 sm:$0xff]  }
  0xd2   :  { %1712 = vmatprep.subr.bf16.mxu0 %v16763_v49  ;;  %2051 = vmatprep.subr.bf16.mxu1 %v16765_v50  ;;  %v16856_v49 = vld [vmem:[#allocation3 + $0x3e8] ss:$20 sps:$4 sm:$0xff]   ;;  %v16859_v50 = vld [vmem:[#allocation3 + $0x3f0] ss:$20 sps:$4 sm:$0xff]  }
  0xd5   :  { %1713 = vmatpush1.bf16.msra.mxu0 %v16767_v51  ;;  %2052 = vmatpush1.bf16.msra.mxu1 %v16768_v52  ;;  %v16867_v51 = vld [vmem:[#allocation3 + $0x414] ss:$20 sps:$4 sm:$0xff]   ;;  %v16870_v52 = vld [vmem:[#allocation3 + $0x41c] ss:$20 sps:$4 sm:$0xff]  }
  0xd6   :  { %1714 = vmatprep.subr.bf16.mxu0 %v16769_v53  ;;  %2053 = vmatprep.subr.bf16.mxu1 %v16771_v54  ;;  %v16864_v53 = vld [vmem:[%s22322_s0 + $0xc8] ss:$20 sps:$4 sm:$0xff]   ;;  %v16865_v54 = vld [vmem:[#allocation3 + $0x410] ss:$20 sps:$4 sm:$0xff]  }
  0xd9   :  { %1715 = vmatpush1.bf16.msra.mxu0 %v16773_v55  ;;  %2054 = vmatpush1.bf16.msra.mxu1 %v16774_v56  ;;  %v16868_v55 = vld [vmem:[#allocation3 + $0x418] ss:$20 sps:$4 sm:$0xff]   ;;  %v16873_v56 = vld [vmem:[#allocation3 + $0x43c] ss:$20 sps:$4 sm:$0xff]  }
  0xda   :  { %1716 = vmatprep.subr.bf16.mxu0 %v16775_v57  ;;  %2055 = vmatprep.subr.bf16.mxu1 %v16777_v58  ;;  %v16876_v57 = vld [vmem:[#allocation3 + $0x444] ss:$20 sps:$4 sm:$0xff]   ;;  %v16877_v58 = vld [vmem:[%s22322_s0 + $0xf4] ss:$20 sps:$4 sm:$0xff]  }
  0xdd   :  { %1717 = vmatpush1.bf16.msra.mxu0 %v16779_v59  ;;  %2056 = vmatpush1.bf16.msra.mxu1 %v16780_v60  ;;  %v16871_v59 = vld [vmem:[#allocation3 + $0x438] ss:$20 sps:$4 sm:$0xff]   ;;  %v16874_v60 = vld [vmem:[#allocation3 + $0x440] ss:$20 sps:$4 sm:$0xff]  }
  0xde   :  { %1718 = vmatprep.subr.bf16.mxu0 %v16781_v61  ;;  %2057 = vmatprep.subr.bf16.mxu1 %v16783_v62  ;;  %v16882_v61 = vld [vmem:[#allocation3 + $0x464] ss:$20 sps:$4 sm:$0xff]   ;;  %v16885_v62 = vld [vmem:[#allocation3 + $0x46c] ss:$20 sps:$4 sm:$0xff]  }
  0xe1   :  { %1719 = vmatpush1.bf16.msra.mxu0 %v16785_v63  ;;  %2058 = vmatpush1.bf16.msra.mxu1 %v16786_v0  ;;  %v16879_v63 = vld [vmem:[%s22322_s0 + $0xf0] ss:$20 sps:$4 sm:$0xff]   ;;  %v16880_v0 = vld [vmem:[#allocation3 + $0x460] ss:$20 sps:$4 sm:$0xff]  }
  0xe2   :  { %1801 = vmatprep.subr.bf16.mxu0 %v16792_v1  ;;  %2140 = vmatprep.subr.bf16.mxu1 %v16795_v2  ;;  %v16883_v1 = vld [vmem:[#allocation3 + $0x468] ss:$20 sps:$4 sm:$0xff]   ;;  %v16888_v2 = vld [vmem:[#allocation3 + $0x48c] ss:$20 sps:$4 sm:$0xff]  }
  0xe4   :  { %1721 = vmatmul.mubr.bf16.vlgmr.msra.gmra.mrb[0].mxu0 %v16789_v3  ;;  %2060 = vmatmul.mubr.bf16.vlgmr.msra.gmra.mrb[0].mxu1 %v16789_v3  ;;  %v16891_v3 = vld [vmem:[#allocation3 + $0x494] ss:$20 sps:$4 sm:$0xff]  }
  0xe5   :  { %1802 = vmatpush1.bf16.msra.mxu0 %v16790_v4  ;;  %2141 = vmatpush1.bf16.msra.mxu1 %v16793_v5  ;;  %v16892_v4 = vld [vmem:[%s22322_s0 + $0x11c] ss:$20 sps:$4 sm:$0xff]  }
  0xe6   :  { %1803 = vmatprep.subr.bf16.mxu0 %v16798_v6  ;;  %2142 = vmatprep.subr.bf16.mxu1 %v16801_v7  ;;  %v16886_v5 = vld [vmem:[#allocation3 + $0x488] ss:$20 sps:$4 sm:$0xff]   ;;  %v16889_v6 = vld [vmem:[#allocation3 + $0x490] ss:$20 sps:$4 sm:$0xff]  }
  0xe7   :  { %1730 = vmatprep.mubr.bf16.mxu0 %v16802_v8  ;;  %2069 = vmatprep.mubr.bf16.mxu1 %v16802_v8  ;;  %v16897_v7 = vld [vmem:[#allocation3 + $0x4b4] ss:$20 sps:$4 sm:$0xff]   ;;  %v16900_v8 = vld [vmem:[#allocation3 + $0x4bc] ss:$20 sps:$4 sm:$0xff]  }
  0xe9   :  { %1804 = vmatpush1.bf16.msra.mxu0 %v16796_v9  ;;  %2143 = vmatpush1.bf16.msra.mxu1 %v16799_v10  ;;  %v16894_v9 = vld [vmem:[%s22322_s0 + $0x118] ss:$20 sps:$4 sm:$0xff]   ;;  %v16895_v10 = vld [vmem:[#allocation3 + $0x4b0] ss:$20 sps:$4 sm:$0xff]  }
  0xea   :  { %1805 = vmatprep.subr.bf16.mxu0 %v16807_v11  ;;  %2144 = vmatprep.subr.bf16.mxu1 %v16810_v12  ;;  %v16898_v11 = vld [vmem:[#allocation3 + $0x4b8] ss:$20 sps:$4 sm:$0xff]   ;;  %v16903_v12 = vld [vmem:[#allocation3 + $0x4dc] ss:$20 sps:$4 sm:$0xff]  }
  0xec   :  { %1731 = vmatmul.mubr.bf16.gmra.mrb[4].mxu0 %v16804_v13  ;;  %2070 = vmatmul.mubr.bf16.gmra.mrb[4].mxu1 %v16804_v13  ;;  %v16906_v13 = vld [vmem:[#allocation3 + $0x4e4] ss:$20 sps:$4 sm:$0xff]  }
  0xed   :  { %1806 = vmatpush1.bf16.msra.mxu0 %v16805_v14  ;;  %2145 = vmatpush1.bf16.msra.mxu1 %v16808_v15  ;;  %v19016_v14 = vld [vmem:[%s22322_s0 + $0xc] ss:$20 sps:$4 sm:$0xff]  }
  0xee   :  { %1807 = vmatprep.subr.bf16.mxu0 %v16813_v16  ;;  %2146 = vmatprep.subr.bf16.mxu1 %v16816_v17  ;;  %v16901_v15 = vld [vmem:[#allocation3 + $0x4d8] ss:$20 sps:$4 sm:$0xff]   ;;  %v16904_v16 = vld [vmem:[#allocation3 + $0x4e0] ss:$20 sps:$4 sm:$0xff]  }
  0xef   :  { %1740 = vmatprep.mubr.bf16.mxu0 %v16817_v18  ;;  %2079 = vmatprep.mubr.bf16.mxu1 %v16817_v18  ;;  %v16912_v17 = vld [vmem:[#allocation3 + $0x504] ss:$20 sps:$4 sm:$0xff]   ;;  %v16915_v18 = vld [vmem:[#allocation3 + $0x50c] ss:$20 sps:$4 sm:$0xff]  }
  0xf1   :  { %1808 = vmatpush1.bf16.msra.mxu0 %v16811_v19  ;;  %2147 = vmatpush1.bf16.msra.mxu1 %v16814_v20  ;;  %v19023_v19 = vld [vmem:[%s22322_s0 + $0x8] ss:$20 sps:$4 sm:$0xff]   ;;  %v16910_v20 = vld [vmem:[#allocation3 + $0x500] ss:$20 sps:$4 sm:$0xff]  }
  0xf2   :  { %1809 = vmatprep.subr.bf16.mxu0 %v16822_v21  ;;  %2148 = vmatprep.subr.bf16.mxu1 %v16825_v22  ;;  %v16913_v21 = vld [vmem:[#allocation3 + $0x508] ss:$20 sps:$4 sm:$0xff]  }
  0xf3   :  { %v19028_v22 = vld [vmem:[%s22322_s0 + $0x34] ss:$20 sps:$4 sm:$0xff]  }
  0xf4   :  { %1741 = vmatmul.mubr.bf16.gmra.mrb[8].mxu0 %v16819_v23  ;;  %2080 = vmatmul.mubr.bf16.gmra.mrb[8].mxu1 %v16819_v23  ;;  %v16921_v23 = vld [vmem:[#allocation3 + $0x52c] ss:$20 sps:$4 sm:$0xff]  }
  0xf5   :  { %1810 = vmatpush1.bf16.msra.mxu0 %v16820_v24  ;;  %2149 = vmatpush1.bf16.msra.mxu1 %v16823_v25  ;;  %v16919_v24 = vld [vmem:[#allocation3 + $0x528] ss:$20 sps:$4 sm:$0xff]  }
  0xf6   :  { %1811 = vmatprep.subr.bf16.mxu0 %v16828_v26  ;;  %2150 = vmatprep.subr.bf16.mxu1 %v16831_v27  ;;  %v16924_v25 = vld [vmem:[#allocation3 + $0x534] ss:$20 sps:$4 sm:$0xff]   ;;  %v16922_v26 = vld [vmem:[#allocation3 + $0x530] ss:$20 sps:$4 sm:$0xff]  }
  0xf7   :  { %1750 = vmatprep.mubr.bf16.mxu0 %v16832_v28  ;;  %2089 = vmatprep.mubr.bf16.mxu1 %v16832_v28  ;;  %v16930_v27 = vld [vmem:[#allocation3 + $0x554] ss:$20 sps:$4 sm:$0xff]   ;;  %v19037_v28 = vld [vmem:[%s22322_s0 + $0x30] ss:$20 sps:$4 sm:$0xff]  }
  0xf9   :  { %1812 = vmatpush1.bf16.msra.mxu0 %v16826_v29  ;;  %2151 = vmatpush1.bf16.msra.mxu1 %v16829_v30  ;;  %v16933_v29 = vld [vmem:[#allocation3 + $0x55c] ss:$20 sps:$4 sm:$0xff]  }
  0xfa   :  { %1813 = vmatprep.subr.bf16.mxu0 %v16837_v31  ;;  %2152 = vmatprep.subr.bf16.mxu1 %v16840_v32  ;;  %v19042_v30 = vld [vmem:[%s22322_s0 + $0x5c] ss:$20 sps:$4 sm:$0xff]   ;;  %v16931_v32 = vld [vmem:[#allocation3 + $0x558] ss:$20 sps:$4 sm:$0xff]  }
  0xfb   :  { %v16928_v31 = vld [vmem:[#allocation3 + $0x550] ss:$20 sps:$4 sm:$0xff]  }
  0xfc   :  { %1751 = vmatmul.mubr.bf16.gmra.mrb[12].mxu0 %v16834_v33  ;;  %2090 = vmatmul.mubr.bf16.gmra.mrb[12].mxu1 %v16834_v33  ;;  %v16939_v33 = vld [vmem:[#allocation3 + $0x57c] ss:$20 sps:$4 sm:$0xff]  }
  0xfd   :  { %1814 = vmatpush1.bf16.msra.mxu0 %v16835_v34  ;;  %2153 = vmatpush1.bf16.msra.mxu1 %v16838_v35  ;;  %v16942_v34 = vld [vmem:[#allocation3 + $0x584] ss:$20 sps:$4 sm:$0xff]  }
  0xfe   :  { %1815 = vmatprep.subr.bf16.mxu0 %v16843_v36  ;;  %2154 = vmatprep.subr.bf16.mxu1 %v16846_v37  ;;  %v16937_v35 = vld [vmem:[#allocation3 + $0x578] ss:$20 sps:$4 sm:$0xff]   ;;  %v16940_v36 = vld [vmem:[#allocation3 + $0x580] ss:$20 sps:$4 sm:$0xff]  }
  0xff   :  { %1760 = vmatprep.mubr.bf16.mxu0 %v16847_v38  ;;  %2099 = vmatprep.mubr.bf16.mxu1 %v16847_v38  ;;  %v19051_v37 = vld [vmem:[%s22322_s0 + $0x58] ss:$20 sps:$4 sm:$0xff]  }
 0x100   :  { %v16948_v38 = vld [vmem:[#allocation3 + $0x5a4] ss:$20 sps:$4 sm:$0xff]  }
 0x101   :  { %1816 = vmatpush1.bf16.msra.mxu0 %v16841_v39  ;;  %2155 = vmatpush1.bf16.msra.mxu1 %v16844_v40  ;;  %v19056_v39 = vld [vmem:[%s22322_s0 + $0x84] ss:$20 sps:$4 sm:$0xff]   ;;  %v16951_v40 = vld [vmem:[#allocation3 + $0x5ac] ss:$20 sps:$4 sm:$0xff]  }
 0x102   :  { %1817 = vmatprep.subr.bf16.mxu0 %v16852_v41  ;;  %2156 = vmatprep.subr.bf16.mxu1 %v16855_v42  ;;  %v16946_v41 = vld [vmem:[#allocation3 + $0x5a0] ss:$20 sps:$4 sm:$0xff]   ;;  %v16949_v42 = vld [vmem:[#allocation3 + $0x5a8] ss:$20 sps:$4 sm:$0xff]  }
 0x104   :  { %1761 = vmatmul.mubr.bf16.gmra.mrb[16].mxu0 %v16849_v43  ;;  %2100 = vmatmul.mubr.bf16.gmra.mrb[16].mxu1 %v16849_v43  ;;  %v16957_v43 = vld [vmem:[#allocation3 + $0x5cc] ss:$20 sps:$4 sm:$0xff]  }
 0x105   :  { %1818 = vmatpush1.bf16.msra.mxu0 %v16850_v44  ;;  %2157 = vmatpush1.bf16.msra.mxu1 %v16853_v45  ;;  %v16960_v44 = vld [vmem:[#allocation3 + $0x5d4] ss:$20 sps:$4 sm:$0xff]  }
 0x106   :  { %1819 = vmatprep.subr.bf16.mxu0 %v16858_v46  ;;  %2158 = vmatprep.subr.bf16.mxu1 %v16861_v47  ;;  %v16955_v45 = vld [vmem:[#allocation3 + $0x5c8] ss:$20 sps:$4 sm:$0xff]   ;;  %v16958_v46 = vld [vmem:[#allocation3 + $0x5d0] ss:$20 sps:$4 sm:$0xff]   ;;  %v19065_v47 = vld [vmem:[%s22322_s0 + $0x80] ss:$20 sps:$4 sm:$0xff]  }
 0x107   :  { %1770 = vmatprep.mubr.bf16.mxu0 %v16862_v48  ;;  %2109 = vmatprep.mubr.bf16.mxu1 %v16862_v48  ;;  %v16966_v48 = vld [vmem:[#allocation3 + $0x5f4] ss:$20 sps:$4 sm:$0xff]  }
 0x109   :  { %1820 = vmatpush1.bf16.msra.mxu0 %v16856_v49  ;;  %2159 = vmatpush1.bf16.msra.mxu1 %v16859_v50  ;;  %v19070_v49 = vld [vmem:[%s22322_s0 + $0xac] ss:$20 sps:$4 sm:$0xff]   ;;  %v16969_v50 = vld [vmem:[#allocation3 + $0x5fc] ss:$20 sps:$4 sm:$0xff]  }
 0x10a   :  { %1821 = vmatprep.subr.bf16.mxu0 %v16867_v51  ;;  %2160 = vmatprep.subr.bf16.mxu1 %v16870_v52  ;;  %v16964_v51 = vld [vmem:[#allocation3 + $0x5f0] ss:$20 sps:$4 sm:$0xff]   ;;  %v16967_v52 = vld [vmem:[#allocation3 + $0x5f8] ss:$20 sps:$4 sm:$0xff]  }
 0x10c   :  { %1771 = vmatmul.mubr.bf16.gmra.mrb[20].mxu0 %v16864_v53  ;;  %2110 = vmatmul.mubr.bf16.gmra.mrb[20].mxu1 %v16864_v53  ;;  %v16975_v53 = vld [vmem:[#allocation3 + $0x61c] ss:$20 sps:$4 sm:$0xff]  }
 0x10d   :  { %1822 = vmatpush1.bf16.msra.mxu0 %v16865_v54  ;;  %2161 = vmatpush1.bf16.msra.mxu1 %v16868_v55  ;;  %v16978_v54 = vld [vmem:[#allocation3 + $0x624] ss:$20 sps:$4 sm:$0xff]  }
 0x10e   :  { %1823 = vmatprep.subr.bf16.mxu0 %v16873_v56  ;;  %2162 = vmatprep.subr.bf16.mxu1 %v16876_v57  ;;  %v16973_v55 = vld [vmem:[#allocation3 + $0x618] ss:$20 sps:$4 sm:$0xff]   ;;  %v16976_v56 = vld [vmem:[#allocation3 + $0x620] ss:$20 sps:$4 sm:$0xff]   ;;  %v16980_v57 = vld [vmem:[#allocation3 + $0x150] ss:$20 sps:$4 sm:$0xff]  }
 0x10f   :  { %1780 = vmatprep.mubr.bf16.mxu0 %v16877_v58  ;;  %2119 = vmatprep.mubr.bf16.mxu1 %v16877_v58  ;;  %v16982_v58 = vld [vmem:[#allocation3 + $0x3d0] ss:$20 sps:$4 sm:$0xff]  }
 0x111   :  { %1824 = vmatpush1.bf16.msra.mxu0 %v16871_v59  ;;  %2163 = vmatpush1.bf16.msra.mxu1 %v16874_v60  ;;  %v19079_v59 = vld [vmem:[%s22322_s0 + $0xa8] ss:$20 sps:$4 sm:$0xff]  }
 0x112   :  { %1825 = vmatprep.subr.bf16.mxu0 %v16882_v61  ;;  %2164 = vmatprep.subr.bf16.mxu1 %v16885_v62  ;;  %v19084_v60 = vld [vmem:[%s22322_s0 + $0xd4] ss:$20 sps:$4 sm:$0xff]   ;;  %v19093_v61 = vld [vmem:[%s22322_s0 + $0xd0] ss:$20 sps:$4 sm:$0xff]  }
 0x113   :  { %v19098_v62 = vld [vmem:[%s22322_s0 + $0xfc] ss:$20 sps:$4 sm:$0xff]  }
 0x114   :  { %1781 = vmatmul.mubr.bf16.gmra.mrb[24].mxu0 %v16879_v63  ;;  %2120 = vmatmul.mubr.bf16.gmra.mrb[24].mxu1 %v16879_v63  ;;  %v19107_v63 = vld [vmem:[%s22322_s0 + $0xf8] ss:$20 sps:$4 sm:$0xff]  }
 0x115   :  { %1826 = vmatpush1.bf16.msra.mxu0 %v16880_v0  ;;  %2165 = vmatpush1.bf16.msra.mxu1 %v16883_v1  ;;  %v19112_v0 = vld [vmem:[%s22322_s0 + $0x124] ss:$20 sps:$4 sm:$0xff]   ;;  %v19121_v1 = vld [vmem:[%s22322_s0 + $0x120] ss:$20 sps:$4 sm:$0xff]  }
 0x116   :  { %1827 = vmatprep.subr.bf16.mxu0 %v16888_v2  ;;  %2166 = vmatprep.subr.bf16.mxu1 %v16891_v3  ;;  %v22339_v2 = vmov 0   ;;  %v19130_v3 = vld [vmem:[%s22322_s0 + $0x10] ss:$20 sps:$4 sm:$0xff]  }
 0x117   :  { %1790 = vmatprep.mubr.bf16.mxu0 %v16892_v4  ;;  %2129 = vmatprep.mubr.bf16.mxu1 %v16892_v4  ;;  %v16981_v4 = vld [vmem:[#allocation3 + $0x10] ss:$20 sps:$4 sm:$0xff]  }
 0x119   :  { %1828 = vmatpush1.bf16.msra.mxu0 %v16886_v5  ;;  %2167 = vmatpush1.bf16.msra.mxu1 %v16889_v6  ;;  %v16983_v5 = vld [vmem:[#allocation3 + $0x290] ss:$20 sps:$4 sm:$0xff]   ;;  %v16985_v6 = vld [vmem:[#allocation3 + $0x178] ss:$20 sps:$4 sm:$0xff]  }
 0x11a   :  { %1829 = vmatprep.subr.bf16.mxu0 %v16897_v7  ;;  %2168 = vmatprep.subr.bf16.mxu1 %v16900_v8  ;;  %v16987_v7 = vld [vmem:[#allocation3 + $0x3f8] ss:$20 sps:$4 sm:$0xff]  }
 0x11b   :  { %v16986_v8 = vld [vmem:[#allocation3 + $0x38] ss:$20 sps:$4 sm:$0xff]  }
 0x11c   :  { %1791 = vmatmul.mubr.bf16.gmra.mrb[28].mxu0 %v16894_v9  ;;  %2130 = vmatmul.mubr.bf16.gmra.mrb[28].mxu1 %v16894_v9  ;;  %v16988_v9 = vld [vmem:[#allocation3 + $0x2b8] ss:$20 sps:$4 sm:$0xff]  }
 0x11d   :  { %1830 = vmatpush1.bf16.msra.mxu0 %v16895_v10  ;;  %2169 = vmatpush1.bf16.msra.mxu1 %v16898_v11  ;;  %v16990_v10 = vld [vmem:[#allocation3 + $0x1a0] ss:$20 sps:$4 sm:$0xff]  }
 0x11e   :  { %1831 = vmatprep.subr.bf16.mxu0 %v16903_v12  ;;  %2170 = vmatprep.subr.bf16.mxu1 %v16906_v13  ;;  %v16992_v11 = vld [vmem:[#allocation3 + $0x420] ss:$20 sps:$4 sm:$0xff]   ;;  %v19139_v12 = vld [vmem:[%s22322_s0 + $0x38] ss:$20 sps:$4 sm:$0xff]  }
 0x11f   :  { %1833 = vmatprep.mubr.bf16.mxu0 %v19016_v14  ;;  %2172 = vmatprep.mubr.bf16.mxu1 %v19016_v14  ;;  %v16991_v13 = vld [vmem:[#allocation3 + $0x60] ss:$20 sps:$4 sm:$0xff]  }
 0x121   :  { %1832 = vmatpush1.bf16.msra.mxu0 %v16901_v15  ;;  %2171 = vmatpush1.bf16.msra.mxu1 %v16904_v16  ;;  %v16993_v15 = vld [vmem:[#allocation3 + $0x2e0] ss:$20 sps:$4 sm:$0xff]   ;;  %v16995_v16 = vld [vmem:[#allocation3 + $0x1c8] ss:$20 sps:$4 sm:$0xff]  }
 0x122   :  { %1914 = vmatprep.subr.bf16.mxu0 %v16912_v17  ;;  %2253 = vmatprep.subr.bf16.mxu1 %v16915_v18  ;;  %v16997_v17 = vld [vmem:[#allocation3 + $0x448] ss:$20 sps:$4 sm:$0xff]  }
 0x123   :  { %v16996_v18 = vld [vmem:[#allocation3 + $0x88] ss:$20 sps:$4 sm:$0xff]  }
 0x124   :  { %1834 = vmatmul.mubr.bf16.vlgmr.msra.gmra.mrb[0].mxu0 %v19023_v19  ;;  %2173 = vmatmul.mubr.bf16.vlgmr.msra.gmra.mrb[0].mxu1 %v19023_v19 }
 0x125   :  { %1915 = vmatpush1.bf16.msra.mxu0 %v16910_v20  ;;  %2254 = vmatpush1.bf16.msra.mxu1 %v16913_v21  ;;  %v16998_v20 = vld [vmem:[#allocation3 + $0x308] ss:$20 sps:$4 sm:$0xff]   ;;  %v17000_v21 = vld [vmem:[#allocation3 + $0x1f0] ss:$20 sps:$4 sm:$0xff]  }
 0x126   :  { %1843 = vmatprep.mubr.bf16.mxu0 %v19028_v22  ;;  %2182 = vmatprep.mubr.bf16.mxu1 %v19028_v22 }
 0x127   :  { %1916 = vmatprep.subr.bf16.mxu0 %v16921_v23  ;;  %2255 = vmatprep.subr.bf16.mxu1 %v16924_v25  ;;  %v17002_v23 = vld [vmem:[#allocation3 + $0x470] ss:$20 sps:$4 sm:$0xff]  }
 0x128   :  { %v17001_v25 = vld [vmem:[#allocation3 + $0xb0] ss:$20 sps:$4 sm:$0xff]  }
 0x129   :  { %1917 = vmatpush1.bf16.msra.mxu0 %v16919_v24  ;;  %2256 = vmatpush1.bf16.msra.mxu1 %v16922_v26  ;;  %v19148_v24 = vld [vmem:[%s22322_s0 + $0x60] ss:$20 sps:$4 sm:$0xff]   ;;  %v17003_v26 = vld [vmem:[#allocation3 + $0x330] ss:$20 sps:$4 sm:$0xff]  }
 0x12a   :  { %1918 = vmatprep.subr.bf16.mxu0 %v16930_v27  ;;  %2257 = vmatprep.subr.bf16.mxu1 %v16933_v29  ;;  %v17005_v27 = vld [vmem:[#allocation3 + $0x218] ss:$20 sps:$4 sm:$0xff]  }
 0x12b   :  { %v17007_v29 = vld [vmem:[#allocation3 + $0x498] ss:$20 sps:$4 sm:$0xff]  }
 0x12c   :  { %1844 = vmatmul.mubr.bf16.gmra.mrb[4].mxu0 %v19037_v28  ;;  %2183 = vmatmul.mubr.bf16.gmra.mrb[4].mxu1 %v19037_v28 }
 0x12d   :  { %1853 = vmatprep.mubr.bf16.mxu0 %v19042_v30  ;;  %2192 = vmatprep.mubr.bf16.mxu1 %v19042_v30 }
 0x12e   :  { %1919 = vmatpush1.bf16.msra.mxu0 %v16928_v31  ;;  %2258 = vmatpush1.bf16.msra.mxu1 %v16931_v32  ;;  %v17006_v31 = vld [vmem:[#allocation3 + $0xd8] ss:$20 sps:$4 sm:$0xff]  }
 0x12f   :  { %1920 = vmatprep.subr.bf16.mxu0 %v16939_v33  ;;  %2259 = vmatprep.subr.bf16.mxu1 %v16942_v34  ;;  %v17008_v32 = vld [vmem:[#allocation3 + $0x358] ss:$20 sps:$4 sm:$0xff]   ;;  %v19157_v33 = vld [vmem:[%s22322_s0 + $0x88] ss:$20 sps:$4 sm:$0xff]   ;;  %v17010_v34 = vld [vmem:[#allocation3 + $0x240] ss:$20 sps:$4 sm:$0xff]  }
 0x132   :  { %1921 = vmatpush1.bf16.msra.mxu0 %v16937_v35  ;;  %2260 = vmatpush1.bf16.msra.mxu1 %v16940_v36  ;;  %v17012_v35 = vld [vmem:[#allocation3 + $0x4c0] ss:$20 sps:$4 sm:$0xff]  }
 0x133   :  { %1922 = vmatprep.subr.bf16.mxu0 %v16948_v38  ;;  %2261 = vmatprep.subr.bf16.mxu1 %v16951_v40  ;;  %v17011_v36 = vld [vmem:[#allocation3 + $0x100] ss:$20 sps:$4 sm:$0xff]   ;;  %v17015_v40 = vld [vmem:[#allocation3 + $0x268] ss:$20 sps:$4 sm:$0xff]  }
 0x134   :  { %1854 = vmatmul.mubr.bf16.gmra.mrb[8].mxu0 %v19051_v37  ;;  %2193 = vmatmul.mubr.bf16.gmra.mrb[8].mxu1 %v19051_v37  ;;  %v17013_v38 = vld [vmem:[#allocation3 + $0x380] ss:$20 sps:$4 sm:$0xff]  }
 0x135   :  { %1863 = vmatprep.mubr.bf16.mxu0 %v19056_v39  ;;  %2202 = vmatprep.mubr.bf16.mxu1 %v19056_v39 }
 0x136   :  { %1923 = vmatpush1.bf16.msra.mxu0 %v16946_v41  ;;  %2262 = vmatpush1.bf16.msra.mxu1 %v16949_v42  ;;  %v17017_v41 = vld [vmem:[#allocation3 + $0x4e8] ss:$20 sps:$4 sm:$0xff]  }
 0x137   :  { %1924 = vmatprep.subr.bf16.mxu0 %v16957_v43  ;;  %2263 = vmatprep.subr.bf16.mxu1 %v16960_v44  ;;  %v17016_v42 = vld [vmem:[#allocation3 + $0x128] ss:$20 sps:$4 sm:$0xff]   ;;  %v19166_v44 = vld [vmem:[%s22322_s0 + $0xb0] ss:$20 sps:$4 sm:$0xff]  }
 0x138   :  { %v17018_v43 = vld [vmem:[#allocation3 + $0x3a8] ss:$20 sps:$4 sm:$0xff]  }
 0x13a   :  { %1925 = vmatpush1.bf16.msra.mxu0 %v16955_v45  ;;  %2264 = vmatpush1.bf16.msra.mxu1 %v16958_v46  ;;  %v17019_v45 = vld [vmem:[#allocation3 + $0x510] ss:$20 sps:$4 sm:$0xff]  }
 0x13b   :  { %1926 = vmatprep.subr.bf16.mxu0 %v16966_v48  ;;  %2265 = vmatprep.subr.bf16.mxu1 %v16969_v50  ;;  %v17022_v46 = vld [vmem:[#allocation3 + $0x644] ss:$20 sps:$4 sm:$0xff]   ;;  %v19184_v50 = vld [vmem:[%s22322_s0 + $0x100] ss:$20 sps:$4 sm:$0xff]  }
 0x13c   :  { %1864 = vmatmul.mubr.bf16.gmra.mrb[12].mxu0 %v19065_v47  ;;  %2203 = vmatmul.mubr.bf16.gmra.mrb[12].mxu1 %v19065_v47  ;;  %v19175_v48 = vld [vmem:[%s22322_s0 + $0xd8] ss:$20 sps:$4 sm:$0xff]  }
 0x13d   :  { %1873 = vmatprep.mubr.bf16.mxu0 %v19070_v49  ;;  %2212 = vmatprep.mubr.bf16.mxu1 %v19070_v49 }
 0x13e   :  { %1927 = vmatpush1.bf16.msra.mxu0 %v16964_v51  ;;  %2266 = vmatpush1.bf16.msra.mxu1 %v16967_v52  ;;  %v19193_v51 = vld [vmem:[%s22322_s0 + $0x128] ss:$20 sps:$4 sm:$0xff]   ;;  %v19200_v52 = vld [vmem:[%s22322_s0 + $0x4] ss:$20 sps:$4 sm:$0xff]  }
 0x13f   :  { %1928 = vmatprep.subr.bf16.mxu0 %v16975_v53  ;;  %2267 = vmatprep.subr.bf16.mxu1 %v16978_v54  ;;  %v17020_v53 = vld [vmem:[#allocation3 + $0x640] ss:$20 sps:$4 sm:$0xff]  }
 0x140   :  { %v17025_v54 = vld [vmem:[#allocation3 + $0x66c] ss:$20 sps:$4 sm:$0xff]  }
 0x142   :  { %1929 = vmatpush1.bf16.msra.mxu0 %v16973_v55  ;;  %2268 = vmatpush1.bf16.msra.mxu1 %v16976_v56  ;;  %v17026_v55 = vld [vmem:[#allocation3 + $0x538] ss:$20 sps:$4 sm:$0xff]   ;;  %v19207_v56 = vld [vmem:[%s22322_s0] ss:$20 sps:$4 sm:$0xff]  }
 0x143   :  { %15060 = vmatprep.subr.bf16.mxu0 %v16980_v57  ;;  %15124 = vmatprep.subr.bf16.mxu1 %v16982_v58  ;;  %v17023_v57 = vld [vmem:[#allocation3 + $0x668] ss:$20 sps:$4 sm:$0xff]  }
 0x144   :  { %1874 = vmatmul.mubr.bf16.gmra.mrb[16].mxu0 %v19079_v59  ;;  %2213 = vmatmul.mubr.bf16.gmra.mrb[16].mxu1 %v19079_v59  ;;  %v17029_v58 = vld [vmem:[#allocation3 + $0x694] ss:$20 sps:$4 sm:$0xff]  }
 0x145   :  { %1883 = vmatprep.mubr.bf16.mxu0 %v19084_v60  ;;  %2222 = vmatprep.mubr.bf16.mxu1 %v19084_v60 }
 0x14c   :  { %1884 = vmatmul.mubr.bf16.gmra.mrb[20].mxu0 %v19093_v61  ;;  %2223 = vmatmul.mubr.bf16.gmra.mrb[20].mxu1 %v19093_v61 }
 0x14d   :  { %1893 = vmatprep.mubr.bf16.mxu0 %v19098_v62  ;;  %2232 = vmatprep.mubr.bf16.mxu1 %v19098_v62 }
 0x154   :  { %1894 = vmatmul.mubr.bf16.gmra.mrb[24].mxu0 %v19107_v63  ;;  %2233 = vmatmul.mubr.bf16.gmra.mrb[24].mxu1 %v19107_v63 }
 0x155   :  { %1903 = vmatprep.mubr.bf16.mxu0 %v19112_v0  ;;  %2242 = vmatprep.mubr.bf16.mxu1 %v19112_v0 }
 0x15c   :  { %1904 = vmatmul.mubr.bf16.gmra.mrb[28].mxu0 %v19121_v1  ;;  %2243 = vmatmul.mubr.bf16.gmra.mrb[28].mxu1 %v19121_v1 }
 0x15d   :  { %1946 = vmatprep.mubr.bf16.mxu0 %v22339_v2  ;;  %2285 = vmatprep.mubr.bf16.mxu1 %v22339_v2 }
 0x164   :  { %1947 = vmatmul.mubr.bf16.vlgmr.msra.gmra.mrb[0].mxu0 %v19130_v3  ;;  %2286 = vmatmul.mubr.bf16.vlgmr.msra.gmra.mrb[0].mxu1 %v19130_v3 }
 0x165   :  { %15061 = vmatpush3.bf16.msra.mxu0 %v16981_v4  ;;  %15125 = vmatpush3.bf16.msra.mxu1 %v16983_v5  ;;  %v17033_v4 = vld [vmem:[#allocation3 + $0x560] ss:$20 sps:$4 sm:$0xff]   ;;  %v17027_v5 = vld [vmem:[#allocation3 + $0x690] ss:$20 sps:$4 sm:$0xff]  }
 0x166   :  { %1956 = vmatprep.mubr.bf16.mxu0 %v22339_v2  ;;  %2295 = vmatprep.mubr.bf16.mxu1 %v22339_v2 }
 0x167   :  { %15062 = vmatprep.subr.bf16.mxu0 %v16985_v6  ;;  %15126 = vmatprep.subr.bf16.mxu1 %v16987_v7  ;;  %v17040_v6 = vld [vmem:[#allocation3 + $0x588] ss:$20 sps:$4 sm:$0xff]  }
 0x168   :  { %v19221_v7 = vld [vmem:[%s22322_s0 + $0x28] ss:$20 sps:$4 sm:$0xff]  }
 0x169   :  { %15063 = vmatpush3.bf16.msra.mxu0 %v16986_v8  ;;  %15127 = vmatpush3.bf16.msra.mxu1 %v16988_v9  ;;  %v17030_v8 = vld [vmem:[#allocation3 + $0x6b8] ss:$20 sps:$4 sm:$0xff]  }
 0x16a   :  { %15064 = vmatprep.subr.bf16.mxu0 %v16990_v10  ;;  %15128 = vmatprep.subr.bf16.mxu1 %v16992_v11  ;;  %v17036_v9 = vld [vmem:[#allocation3 + $0x6e4] ss:$20 sps:$4 sm:$0xff]   ;;  %v17034_v10 = vld [vmem:[#allocation3 + $0x6e0] ss:$20 sps:$4 sm:$0xff]  }
 0x16b   :  { %v17039_v11 = vld [vmem:[#allocation3 + $0x70c] ss:$20 sps:$4 sm:$0xff]  }
 0x16c   :  { %1957 = vmatmul.mubr.bf16.gmra.mrb[4].mxu0 %v19139_v12  ;;  %2296 = vmatmul.mubr.bf16.gmra.mrb[4].mxu1 %v19139_v12 }
 0x16d   :  { %1966 = vmatprep.mubr.bf16.mxu0 %v22339_v2  ;;  %2305 = vmatprep.mubr.bf16.mxu1 %v22339_v2 }
 0x16e   :  { %15065 = vmatpush3.bf16.msra.mxu0 %v16991_v13  ;;  %15129 = vmatpush3.bf16.msra.mxu1 %v16993_v15  ;;  %v17037_v13 = vld [vmem:[#allocation3 + $0x708] ss:$20 sps:$4 sm:$0xff]   ;;  %v17054_v15 = vld [vmem:[#allocation3 + $0x5d8] ss:$20 sps:$4 sm:$0xff]  }
 0x16f   :  { %15066 = vmatprep.subr.bf16.mxu0 %v16995_v16  ;;  %15130 = vmatprep.subr.bf16.mxu1 %v16997_v17  ;;  %v19235_v16 = vld [vmem:[%s22322_s0 + $0x50] ss:$20 sps:$4 sm:$0xff]   ;;  %v17043_v17 = vld [vmem:[#allocation3 + $0x734] ss:$20 sps:$4 sm:$0xff]  }
 0x172   :  { %15067 = vmatpush3.bf16.msra.mxu0 %v16996_v18  ;;  %15131 = vmatpush3.bf16.msra.mxu1 %v16998_v20  ;;  %v17041_v18 = vld [vmem:[#allocation3 + $0x730] ss:$20 sps:$4 sm:$0xff]  }
 0x173   :  { %15068 = vmatprep.subr.bf16.mxu0 %v17000_v21  ;;  %15132 = vmatprep.subr.bf16.mxu1 %v17002_v23  ;;  %v17046_v20 = vld [vmem:[#allocation3 + $0x75c] ss:$20 sps:$4 sm:$0xff]   ;;  %v17061_v21 = vld [vmem:[#allocation3 + $0x600] ss:$20 sps:$4 sm:$0xff]   ;;  %v19249_v23 = vld [vmem:[%s22322_s0 + $0x78] ss:$20 sps:$4 sm:$0xff]  }
 0x174   :  { %1967 = vmatmul.mubr.bf16.gmra.mrb[8].mxu0 %v19148_v24  ;;  %2306 = vmatmul.mubr.bf16.gmra.mrb[8].mxu1 %v19148_v24 }
 0x175   :  { %1976 = vmatprep.mubr.bf16.mxu0 %v22339_v2  ;;  %2315 = vmatprep.mubr.bf16.mxu1 %v22339_v2 }
 0x176   :  { %15069 = vmatpush3.bf16.msra.mxu0 %v17001_v25  ;;  %15133 = vmatpush3.bf16.msra.mxu1 %v17003_v26  ;;  %v17050_v25 = vld [vmem:[#allocation3 + $0x784] ss:$20 sps:$4 sm:$0xff]   ;;  %v17048_v26 = vld [vmem:[#allocation3 + $0x780] ss:$20 sps:$4 sm:$0xff]  }
 0x177   :  { %15070 = vmatprep.subr.bf16.mxu0 %v17005_v27  ;;  %15134 = vmatprep.subr.bf16.mxu1 %v17007_v29  ;;  %v17053_v27 = vld [vmem:[#allocation3 + $0x7ac] ss:$20 sps:$4 sm:$0xff]   ;;  %v17068_v29 = vld [vmem:[#allocation3 + $0x628] ss:$20 sps:$4 sm:$0xff]  }
 0x17a   :  { %15071 = vmatpush3.bf16.msra.mxu0 %v17006_v31  ;;  %15135 = vmatpush3.bf16.msra.mxu1 %v17008_v32  ;;  %v17077_v31 = vld [vmem:[#allocation3 + $0x64c] ss:$20 sps:$4 sm:$0xff]  }
 0x17b   :  { %15072 = vmatprep.subr.bf16.mxu0 %v17010_v34  ;;  %15136 = vmatprep.subr.bf16.mxu1 %v17012_v35  ;;  %v19263_v32 = vld [vmem:[%s22322_s0 + $0xa0] ss:$20 sps:$4 sm:$0xff]   ;;  %v17055_v35 = vld [vmem:[#allocation3 + $0x7d0] ss:$20 sps:$4 sm:$0xff]  }
 0x17c   :  { %1977 = vmatmul.mubr.bf16.gmra.mrb[12].mxu0 %v19157_v33  ;;  %2316 = vmatmul.mubr.bf16.gmra.mrb[12].mxu1 %v19157_v33  ;;  %v17057_v34 = vld [vmem:[#allocation3 + $0x7d4] ss:$20 sps:$4 sm:$0xff]  }
 0x17d   :  { %1986 = vmatprep.mubr.bf16.mxu0 %v22339_v2  ;;  %2325 = vmatprep.mubr.bf16.mxu1 %v22339_v2 }
 0x17e   :  { %15073 = vmatpush3.bf16.msra.mxu0 %v17011_v36  ;;  %15137 = vmatpush3.bf16.msra.mxu1 %v17013_v38  ;;  %v17060_v36 = vld [vmem:[#allocation3 + $0x7fc] ss:$20 sps:$4 sm:$0xff]  }
 0x17f   :  { %15074 = vmatprep.subr.bf16.mxu0 %v17015_v40  ;;  %15138 = vmatprep.subr.bf16.mxu1 %v17017_v41  ;;  %v19277_v38 = vld [vmem:[%s22322_s0 + $0xc8] ss:$20 sps:$4 sm:$0xff]   ;;  %v17064_v40 = vld [vmem:[#allocation3 + $0x824] ss:$20 sps:$4 sm:$0xff]   ;;  %v17062_v41 = vld [vmem:[#allocation3 + $0x820] ss:$20 sps:$4 sm:$0xff]  }
 0x182   :  { %15075 = vmatpush3.bf16.msra.mxu0 %v17016_v42  ;;  %15139 = vmatpush3.bf16.msra.mxu1 %v17018_v43  ;;  %v17067_v42 = vld [vmem:[#allocation3 + $0x84c] ss:$20 sps:$4 sm:$0xff]   ;;  %v17065_v43 = vld [vmem:[#allocation3 + $0x848] ss:$20 sps:$4 sm:$0xff]  }
 0x183   :  { %15725 = vmatprep.subr.bf16.mxu0 %v17019_v45  ;;  %3938 = vmatprep.subr.bf16.mxu1 %v17022_v46  ;;  %v17069_v46 = vld [vmem:[#allocation3 + $0x870] ss:$20 sps:$4 sm:$0xff]  }
 0x184   :  { %1987 = vmatmul.mubr.bf16.gmra.mrb[16].mxu0 %v19166_v44  ;;  %2326 = vmatmul.mubr.bf16.gmra.mrb[16].mxu1 %v19166_v44 }
 0x185   :  { %1996 = vmatprep.mubr.bf16.mxu0 %v22339_v2  ;;  %2335 = vmatprep.mubr.bf16.mxu1 %v22339_v2 }
 0x18c   :  { %1997 = vmatmul.mubr.bf16.gmra.mrb[20].mxu0 %v19175_v48  ;;  %2336 = vmatmul.mubr.bf16.gmra.mrb[20].mxu1 %v19175_v48 }
 0x18d   :  { %2006 = vmatprep.mubr.bf16.mxu0 %v22339_v2  ;;  %2345 = vmatprep.mubr.bf16.mxu1 %v22339_v2 }
 0x194   :  { %2007 = vmatmul.mubr.bf16.gmra.mrb[24].mxu0 %v19184_v50  ;;  %2346 = vmatmul.mubr.bf16.gmra.mrb[24].mxu1 %v19184_v50 }
 0x195   :  { %2016 = vmatprep.mubr.bf16.mxu0 %v22339_v2  ;;  %2355 = vmatprep.mubr.bf16.mxu1 %v22339_v2 }
 0x19c   :  { %2017 = vmatmul.mubr.bf16.gmra.mrb[28].mxu0 %v19193_v51  ;;  %2356 = vmatmul.mubr.bf16.gmra.mrb[28].mxu1 %v19193_v51 }
 0x19d   :  { %2398 = vmatprep.mubr.bf16.mxu0 %v19200_v52  ;;  %2495 = vmatprep.mubr.bf16.mxu1 %v19016_v14  ;;  %v19214_v14 = vld [vmem:[%s22322_s0 + $0x2c] ss:$20 sps:$4 sm:$0xff]  }
 0x1a4   :  { %2399 = vmatmul.mubr.bf16.vlgmr.msra.gmra.mrb[32].mxu0 %v19207_v56  ;;  %2496 = vmatmul.mubr.bf16.vlgmr.msra.gmra.mrb[32].mxu1 %v19023_v19  ;;  %v17032_v19 = vld [vmem:[#allocation3 + $0x6bc] ss:$20 sps:$4 sm:$0xff]  }
 0x1a5   :  { %15726 = vmatpush3.bf16.msra.mxu0 %v17019_v45  ;;  %3939 = vmatpush1.bf16.msra.mxu1 %v17020_v53  ;;  %v17071_v45 = vld [vmem:[#allocation3 + $0x874] ss:$20 sps:$4 sm:$0xff]   ;;  %v17074_v53 = vld [vmem:[#allocation3 + $0x89c] ss:$20 sps:$4 sm:$0xff]  }
 0x1a6   :  { %3940 = vmatprep.subr.bf16.mxu1 %v17025_v54  ;;  %2406 = vmatprep.mubr.bf16.mxu0 %v19214_v14  ;;  %v17072_v54 = vld [vmem:[#allocation3 + $0x898] ss:$20 sps:$4 sm:$0xff]  }
 0x1a7   :  { %2503 = vmatprep.mubr.bf16.mxu1 %v19028_v22  ;;  %15727 = vmatprep.subr.bf16.mxu0 %v17026_v55  ;;  %v19228_v22 = vld [vmem:[%s22322_s0 + $0x54] ss:$20 sps:$4 sm:$0xff]  }
 0x1a9   :  { %3941 = vmatpush1.bf16.msra.mxu1 %v17023_v57  ;;  %15728 = vmatpush3.bf16.msra.mxu0 %v17026_v55  ;;  %v17075_v55 = vld [vmem:[#allocation3 + $0x648] ss:$20 sps:$4 sm:$0xff]   ;;  %v17078_v57 = vld [vmem:[#allocation3 + $0x8c0] ss:$20 sps:$4 sm:$0xff]  }
 0x1aa   :  { %3942 = vmatprep.subr.bf16.mxu1 %v17029_v58  ;;  %15729 = vmatprep.subr.bf16.mxu0 %v17033_v4  ;;  %v17083_v58 = vld [vmem:[#allocation3 + $0x674] ss:$20 sps:$4 sm:$0xff]  }
 0x1ac   :  { %2407 = vmatmul.mubr.bf16.gmra.mrb[36].mxu0 %v19221_v7  ;;  %2504 = vmatmul.mubr.bf16.gmra.mrb[36].mxu1 %v19037_v28  ;;  %v17047_v28 = vld [vmem:[#allocation3 + $0x5b0] ss:$20 sps:$4 sm:$0xff]  }
 0x1ad   :  { %3943 = vmatpush1.bf16.msra.mxu1 %v17027_v5  ;;  %2414 = vmatprep.mubr.bf16.mxu0 %v19228_v22  ;;  %v17081_v5 = vld [vmem:[#allocation3 + $0x670] ss:$20 sps:$4 sm:$0xff]  }
 0x1ae   :  { %3944 = vmatprep.subr.bf16.mxu1 %v17032_v19  ;;  %2511 = vmatprep.mubr.bf16.mxu1 %v19042_v30  ;;  %v19242_v30 = vld [vmem:[%s22322_s0 + $0x7c] ss:$20 sps:$4 sm:$0xff]  }
 0x1af   :  { %15730 = vmatpush3.bf16.msra.mxu0 %v17033_v4  ;;  %v17086_v4 = vld [vmem:[#allocation3 + $0x8ec] ss:$20 sps:$4 sm:$0xff]   ;;  %v17084_v19 = vld [vmem:[#allocation3 + $0x8e8] ss:$20 sps:$4 sm:$0xff]  }
 0x1b0   :  { %15731 = vmatprep.subr.bf16.mxu0 %v17040_v6 }
 0x1b1   :  { %3945 = vmatpush1.bf16.msra.mxu1 %v17030_v8  ;;  %v17090_v8 = vld [vmem:[#allocation3 + $0x910] ss:$20 sps:$4 sm:$0xff]  }
 0x1b2   :  { %3946 = vmatprep.subr.bf16.mxu1 %v17036_v9  ;;  %v17095_v9 = vld [vmem:[#allocation3 + $0x6c4] ss:$20 sps:$4 sm:$0xff]  }
 0x1b3   :  { %15732 = vmatpush3.bf16.msra.mxu0 %v17040_v6  ;;  %v17092_v6 = vld [vmem:[#allocation3 + $0x914] ss:$20 sps:$4 sm:$0xff]  }
 0x1b4   :  { %2415 = vmatmul.mubr.bf16.gmra.mrb[40].mxu0 %v19235_v16  ;;  %2512 = vmatmul.mubr.bf16.gmra.mrb[40].mxu1 %v19051_v37  ;;  %v17044_v37 = vld [vmem:[#allocation3 + $0x758] ss:$20 sps:$4 sm:$0xff]  }
 0x1b5   :  { %3947 = vmatpush1.bf16.msra.mxu1 %v17034_v10  ;;  %2422 = vmatprep.mubr.bf16.mxu0 %v19242_v30  ;;  %v17098_v10 = vld [vmem:[#allocation3 + $0x93c] ss:$20 sps:$4 sm:$0xff]  }
 0x1b6   :  { %3948 = vmatprep.subr.bf16.mxu1 %v17039_v11  ;;  %2519 = vmatprep.mubr.bf16.mxu1 %v19056_v39  ;;  %v19256_v39 = vld [vmem:[%s22322_s0 + $0xa4] ss:$20 sps:$4 sm:$0xff]   ;;  %v17101_v11 = vld [vmem:[#allocation3 + $0x6ec] ss:$20 sps:$4 sm:$0xff]  }
 0x1b7   :  { %15733 = vmatprep.subr.bf16.mxu0 %v17047_v28 }
 0x1b8   :  { %15734 = vmatpush3.bf16.msra.mxu0 %v17047_v28  ;;  %v17104_v28 = vld [vmem:[#allocation3 + $0x964] ss:$20 sps:$4 sm:$0xff]  }
 0x1b9   :  { %3949 = vmatpush1.bf16.msra.mxu1 %v17037_v13  ;;  %15735 = vmatprep.subr.bf16.mxu0 %v17054_v15  ;;  %v17107_v13 = vld [vmem:[#allocation3 + $0x714] ss:$20 sps:$4 sm:$0xff]  }
 0x1ba   :  { %3950 = vmatprep.subr.bf16.mxu1 %v17043_v17  ;;  %v17113_v17 = vld [vmem:[#allocation3 + $0x73c] ss:$20 sps:$4 sm:$0xff]  }
 0x1bc   :  { %2423 = vmatmul.mubr.bf16.gmra.mrb[44].mxu0 %v19249_v23  ;;  %2520 = vmatmul.mubr.bf16.gmra.mrb[44].mxu1 %v19065_v47  ;;  %v17051_v47 = vld [vmem:[#allocation3 + $0x7a8] ss:$20 sps:$4 sm:$0xff]  }
 0x1bd   :  { %3951 = vmatpush1.bf16.msra.mxu1 %v17041_v18  ;;  %2430 = vmatprep.mubr.bf16.mxu0 %v19256_v39  ;;  %v17116_v18 = vld [vmem:[#allocation3 + $0x9b4] ss:$20 sps:$4 sm:$0xff]  }
 0x1be   :  { %3952 = vmatprep.subr.bf16.mxu1 %v17046_v20  ;;  %2527 = vmatprep.mubr.bf16.mxu1 %v19070_v49  ;;  %v19270_v49 = vld [vmem:[%s22322_s0 + $0xcc] ss:$20 sps:$4 sm:$0xff]   ;;  %v17119_v20 = vld [vmem:[#allocation3 + $0x764] ss:$20 sps:$4 sm:$0xff]  }
 0x1bf   :  { %15736 = vmatpush3.bf16.msra.mxu0 %v17054_v15  ;;  %v17110_v15 = vld [vmem:[#allocation3 + $0x98c] ss:$20 sps:$4 sm:$0xff]  }
 0x1c0   :  { %15737 = vmatprep.subr.bf16.mxu0 %v17061_v21 }
 0x1c1   :  { %3953 = vmatpush1.bf16.msra.mxu1 %v17044_v37  ;;  %v17122_v37 = vld [vmem:[#allocation3 + $0x9dc] ss:$20 sps:$4 sm:$0xff]  }
 0x1c2   :  { %3954 = vmatprep.subr.bf16.mxu1 %v17050_v25  ;;  %v17128_v25 = vld [vmem:[#allocation3 + $0xa04] ss:$20 sps:$4 sm:$0xff]  }
 0x1c3   :  { %15738 = vmatpush3.bf16.msra.mxu0 %v17061_v21  ;;  %v17125_v21 = vld [vmem:[#allocation3 + $0x78c] ss:$20 sps:$4 sm:$0xff]  }
 0x1c4   :  { %2431 = vmatmul.mubr.bf16.gmra.mrb[48].mxu0 %v19263_v32  ;;  %2528 = vmatmul.mubr.bf16.gmra.mrb[48].mxu1 %v19079_v59  ;;  %v17058_v59 = vld [vmem:[#allocation3 + $0x7f8] ss:$20 sps:$4 sm:$0xff]  }
 0x1c5   :  { %3955 = vmatpush1.bf16.msra.mxu1 %v17048_v26  ;;  %2438 = vmatprep.mubr.bf16.mxu0 %v19270_v49  ;;  %v17131_v26 = vld [vmem:[#allocation3 + $0x7b4] ss:$20 sps:$4 sm:$0xff]  }
 0x1c6   :  { %3956 = vmatprep.subr.bf16.mxu1 %v17053_v27  ;;  %2535 = vmatprep.mubr.bf16.mxu1 %v19084_v60  ;;  %v19284_v60 = vld [vmem:[%s22322_s0 + $0xf4] ss:$20 sps:$4 sm:$0xff]   ;;  %v17134_v27 = vld [vmem:[#allocation3 + $0xa2c] ss:$20 sps:$4 sm:$0xff]  }
 0x1c7   :  { %15739 = vmatprep.subr.bf16.mxu0 %v17068_v29 }
 0x1c8   :  { %15740 = vmatpush3.bf16.msra.mxu0 %v17068_v29  ;;  %v17137_v29 = vld [vmem:[#allocation3 + $0x7dc] ss:$20 sps:$4 sm:$0xff]  }
 0x1c9   :  { %3957 = vmatpush1.bf16.msra.mxu1 %v17051_v47  ;;  %4277 = vmatprep.subr.bf16.mxu0 %v17077_v31  ;;  %v17140_v47 = vld [vmem:[#allocation3 + $0xa54] ss:$20 sps:$4 sm:$0xff]   ;;  %v17143_v31 = vld [vmem:[#allocation3 + $0x804] ss:$20 sps:$4 sm:$0xff]  }
 0x1ca   :  { %3958 = vmatprep.subr.bf16.mxu1 %v17057_v34  ;;  %v17146_v34 = vld [vmem:[#allocation3 + $0xa7c] ss:$20 sps:$4 sm:$0xff]  }
 0x1cc   :  { %2439 = vmatmul.mubr.bf16.gmra.mrb[52].mxu0 %v19277_v38  ;;  %2536 = vmatmul.mubr.bf16.gmra.mrb[52].mxu1 %v19093_v61  ;;  %v19291_v61 = vld [vmem:[%s22322_s0 + $0xf0] ss:$20 sps:$4 sm:$0xff]  }
 0x1cd   :  { %3959 = vmatpush1.bf16.msra.mxu1 %v17055_v35  ;;  %2446 = vmatprep.mubr.bf16.mxu0 %v19284_v60  ;;  %v17141_v35 = vld [vmem:[#allocation3 + $0x800] ss:$20 sps:$4 sm:$0xff]  }
 0x1ce   :  { %3960 = vmatprep.subr.bf16.mxu1 %v17060_v36  ;;  %2543 = vmatprep.mubr.bf16.mxu1 %v19098_v62  ;;  %v19298_v62 = vld [vmem:[%s22322_s0 + $0x11c] ss:$20 sps:$4 sm:$0xff]   ;;  %v17144_v36 = vld [vmem:[#allocation3 + $0xa78] ss:$20 sps:$4 sm:$0xff]  }
 0x1d1   :  { %3961 = vmatpush1.bf16.msra.mxu1 %v17058_v59  ;;  %v17152_v59 = vld [vmem:[#allocation3 + $0xaa4] ss:$20 sps:$4 sm:$0xff]  }
 0x1d2   :  { %3962 = vmatprep.subr.bf16.mxu1 %v17064_v40  ;;  %v17150_v40 = vld [vmem:[#allocation3 + $0xaa0] ss:$20 sps:$4 sm:$0xff]  }
 0x1d4   :  { %2447 = vmatmul.mubr.bf16.gmra.mrb[56].mxu0 %v19291_v61  ;;  %2544 = vmatmul.mubr.bf16.gmra.mrb[56].mxu1 %v19107_v63  ;;  %v19305_v63 = vld [vmem:[%s22322_s0 + $0x118] ss:$20 sps:$4 sm:$0xff]  }
 0x1d5   :  { %3963 = vmatpush1.bf16.msra.mxu1 %v17062_v41  ;;  %2454 = vmatprep.mubr.bf16.mxu0 %v19298_v62  ;;  %v17155_v41 = vld [vmem:[#allocation3 + $0x854] ss:$20 sps:$4 sm:$0xff]  }
 0x1d6   :  { %3964 = vmatprep.subr.bf16.mxu1 %v17067_v42  ;;  %2551 = vmatprep.mubr.bf16.mxu1 %v19112_v0  ;;  %v17080_v0 = vld [vmem:[#allocation3 + $0x8c4] ss:$20 sps:$4 sm:$0xff]   ;;  %v17158_v42 = vld [vmem:[#allocation3 + $0xacc] ss:$20 sps:$4 sm:$0xff]  }
 0x1d9   :  { %3965 = vmatpush1.bf16.msra.mxu1 %v17065_v43  ;;  %v17153_v43 = vld [vmem:[#allocation3 + $0x850] ss:$20 sps:$4 sm:$0xff]  }
 0x1da   :  { %3966 = vmatprep.subr.bf16.mxu1 %v17071_v45  ;;  %v17156_v45 = vld [vmem:[#allocation3 + $0xac8] ss:$20 sps:$4 sm:$0xff]  }
 0x1dc   :  { %2455 = vmatmul.mubr.bf16.gmra.mrb[60].mxu0 %v19305_v63  ;;  %2552 = vmatmul.mubr.bf16.gmra.mrb[60].mxu1 %v19121_v1  ;;  %v17089_v1 = vld [vmem:[#allocation3 + $0x69c] ss:$20 sps:$4 sm:$0xff]  }
 0x1dd   :  { %3967 = vmatpush1.bf16.msra.mxu1 %v17069_v46  ;;  %15741 = vmatprep.mubr.bf16.mxu0 %v19130_v3  ;;  %v17087_v3 = vld [vmem:[#allocation3 + $0x698] ss:$20 sps:$4 sm:$0xff]   ;;  %v17164_v46 = vld [vmem:[#allocation3 + $0xaf4] ss:$20 sps:$4 sm:$0xff]  }
 0x1de   :  { %3968 = vmatprep.subr.bf16.mxu1 %v17074_v53  ;;  %3970 = vmatprep.mubr.bf16.mxu1 %v19200_v52  ;;  %v17162_v53 = vld [vmem:[#allocation3 + $0xaf0] ss:$20 sps:$4 sm:$0xff]  }
 0x1e1   :  { %3969 = vmatpush1.bf16.msra.mxu1 %v17072_v54  ;;  %v17167_v54 = vld [vmem:[#allocation3 + $0x8a4] ss:$20 sps:$4 sm:$0xff]  }
 0x1e2   :  { %4051 = vmatprep.subr.bf16.mxu1 %v17080_v0  ;;  %v17170_v0 = vld [vmem:[#allocation3 + $0xb1c] ss:$20 sps:$4 sm:$0xff]  }
 0x1e4   :  { %15742 = vmatmul.mubr.bf16.vlgmr.msra.gmra.mrb[64].mxu0 %v19139_v12  ;;  %3971 = vmatmul.mubr.bf16.vlgmr.msra.gmra.mrb[64].mxu1 %v19207_v56  ;;  %v17093_v12 = vld [vmem:[#allocation3 + $0x6c0] ss:$20 sps:$4 sm:$0xff]   ;;  %v17096_v56 = vld [vmem:[#allocation3 + $0x938] ss:$20 sps:$4 sm:$0xff]  }
 0x1e5   :  { %4278 = vmatpush1.bf16.msra.mxu0 %v17075_v55  ;;  %4052 = vmatpush1.bf16.msra.mxu1 %v17078_v57  ;;  %v17165_v55 = vld [vmem:[#allocation3 + $0x8a0] ss:$20 sps:$4 sm:$0xff]   ;;  %v17168_v57 = vld [vmem:[#allocation3 + $0xb18] ss:$20 sps:$4 sm:$0xff]  }
 0x1e6   :  { %4279 = vmatprep.subr.bf16.mxu0 %v17083_v58  ;;  %4053 = vmatprep.subr.bf16.mxu1 %v17086_v4  ;;  %v17176_v58 = vld [vmem:[#allocation3 + $0xb44] ss:$20 sps:$4 sm:$0xff]   ;;  %v17171_v4 = vld [vmem:[#allocation3 + $0x8c8] ss:$20 sps:$4 sm:$0xff]  }
 0x1e7   :  { %15745 = vmatprep.mubr.bf16.mxu0 %v19148_v24  ;;  %3980 = vmatprep.mubr.bf16.mxu1 %v19214_v14  ;;  %v17099_v24 = vld [vmem:[#allocation3 + $0x6e8] ss:$20 sps:$4 sm:$0xff]   ;;  %v17102_v14 = vld [vmem:[#allocation3 + $0x960] ss:$20 sps:$4 sm:$0xff]  }
 0x1e9   :  { %4280 = vmatpush1.bf16.msra.mxu0 %v17081_v5  ;;  %4054 = vmatpush1.bf16.msra.mxu1 %v17084_v19  ;;  %v17174_v5 = vld [vmem:[#allocation3 + $0xb40] ss:$20 sps:$4 sm:$0xff]  }
 0x1ea   :  { %4281 = vmatprep.subr.bf16.mxu0 %v17089_v1  ;;  %4055 = vmatprep.subr.bf16.mxu1 %v17092_v6  ;;  %v17179_v19 = vld [vmem:[#allocation3 + $0x8f4] ss:$20 sps:$4 sm:$0xff]   ;;  %v17185_v1 = vld [vmem:[#allocation3 + $0xb6c] ss:$20 sps:$4 sm:$0xff]  }
 0x1eb   :  { %v18388_v6 = vld [vmem:[%s22322_s0] ss:$20 sps:$4 sm:$0xff]  }
 0x1ec   :  { %15746 = vmatmul.mubr.bf16.gmra.mrb[68].mxu0 %v19157_v33  ;;  %3981 = vmatmul.mubr.bf16.gmra.mrb[68].mxu1 %v19221_v7  ;;  %v17105_v33 = vld [vmem:[#allocation3 + $0x710] ss:$20 sps:$4 sm:$0xff]   ;;  %v17108_v7 = vld [vmem:[#allocation3 + $0x988] ss:$20 sps:$4 sm:$0xff]  }
 0x1ed   :  { %4282 = vmatpush1.bf16.msra.mxu0 %v17087_v3  ;;  %4056 = vmatpush1.bf16.msra.mxu1 %v17090_v8  ;;  %v19346_v3 = vld [vmem:[%s22322_s0 + $0x8] ss:$20 sps:$4 sm:$0xff]  }
 0x1ee   :  { %4283 = vmatprep.subr.bf16.mxu0 %v17095_v9  ;;  %4057 = vmatprep.subr.bf16.mxu1 %v17098_v10  ;;  %v17182_v8 = vld [vmem:[#allocation3 + $0x91c] ss:$20 sps:$4 sm:$0xff]   ;;  %v17194_v10 = vld [vmem:[#allocation3 + $0xb94] ss:$20 sps:$4 sm:$0xff]  }
 0x1ef   :  { %15749 = vmatprep.mubr.bf16.mxu0 %v19166_v44  ;;  %3990 = vmatprep.mubr.bf16.mxu1 %v19228_v22  ;;  %v17111_v44 = vld [vmem:[#allocation3 + $0x738] ss:$20 sps:$4 sm:$0xff]   ;;  %v17114_v22 = vld [vmem:[#allocation3 + $0x9b0] ss:$20 sps:$4 sm:$0xff]   ;;  %v17183_v9 = vld [vmem:[#allocation3 + $0xb68] ss:$20 sps:$4 sm:$0xff]  }
 0x1f1   :  { %4284 = vmatpush1.bf16.msra.mxu0 %v17093_v12  ;;  %4058 = vmatpush1.bf16.msra.mxu1 %v17096_v56  ;;  %v18390_v12 = vld [vmem:[%s22322_s0 + $0x2c] ss:$20 sps:$4 sm:$0xff]   ;;  %v19355_v56 = vld [vmem:[%s22322_s0 + $0x34] ss:$20 sps:$4 sm:$0xff]  }
 0x1f2   :  { %4285 = vmatprep.subr.bf16.mxu0 %v17101_v11  ;;  %4059 = vmatprep.subr.bf16.mxu1 %v17104_v28  ;;  %v17180_v11 = vld [vmem:[#allocation3 + $0x918] ss:$20 sps:$4 sm:$0xff]  }
 0x1f3   :  { %v17188_v28 = vld [vmem:[#allocation3 + $0x944] ss:$20 sps:$4 sm:$0xff]  }
 0x1f4   :  { %15750 = vmatmul.mubr.bf16.gmra.mrb[72].mxu0 %v19175_v48  ;;  %3991 = vmatmul.mubr.bf16.gmra.mrb[72].mxu1 %v19235_v16  ;;  %v17117_v48 = vld [vmem:[#allocation3 + $0x760] ss:$20 sps:$4 sm:$0xff]   ;;  %v17120_v16 = vld [vmem:[#allocation3 + $0x9d8] ss:$20 sps:$4 sm:$0xff]  }
 0x1f5   :  { %4286 = vmatpush1.bf16.msra.mxu0 %v17099_v24  ;;  %4060 = vmatpush1.bf16.msra.mxu1 %v17102_v14  ;;  %v17192_v24 = vld [vmem:[#allocation3 + $0xb90] ss:$20 sps:$4 sm:$0xff]   ;;  %v17186_v14 = vld [vmem:[#allocation3 + $0x940] ss:$20 sps:$4 sm:$0xff]  }
 0x1f6   :  { %4287 = vmatprep.subr.bf16.mxu0 %v17107_v13  ;;  %4061 = vmatprep.subr.bf16.mxu1 %v17110_v15  ;;  %v18392_v13 = vld [vmem:[%s22322_s0 + $0x28] ss:$20 sps:$4 sm:$0xff]   ;;  %v19364_v15 = vld [vmem:[%s22322_s0 + $0x30] ss:$20 sps:$4 sm:$0xff]  }
 0x1f7   :  { %15753 = vmatprep.mubr.bf16.mxu0 %v19184_v50  ;;  %4000 = vmatprep.mubr.bf16.mxu1 %v19242_v30  ;;  %v17123_v50 = vld [vmem:[#allocation3 + $0x788] ss:$20 sps:$4 sm:$0xff]   ;;  %v17126_v30 = vld [vmem:[#allocation3 + $0xa00] ss:$20 sps:$4 sm:$0xff]  }
 0x1f9   :  { %4288 = vmatpush1.bf16.msra.mxu0 %v17105_v33  ;;  %4062 = vmatpush1.bf16.msra.mxu1 %v17108_v7  ;;  %v17191_v33 = vld [vmem:[#allocation3 + $0x96c] ss:$20 sps:$4 sm:$0xff]   ;;  %v17203_v7 = vld [vmem:[#allocation3 + $0xbbc] ss:$20 sps:$4 sm:$0xff]  }
 0x1fa   :  { %4289 = vmatprep.subr.bf16.mxu0 %v17113_v17  ;;  %4063 = vmatprep.subr.bf16.mxu1 %v17116_v18  ;;  %v18394_v17 = vld [vmem:[%s22322_s0 + $0x54] ss:$20 sps:$4 sm:$0xff]   ;;  %v19373_v18 = vld [vmem:[%s22322_s0 + $0x5c] ss:$20 sps:$4 sm:$0xff]  }
 0x1fc   :  { %15754 = vmatmul.mubr.bf16.gmra.mrb[76].mxu0 %v19193_v51  ;;  %4001 = vmatmul.mubr.bf16.gmra.mrb[76].mxu1 %v19249_v23  ;;  %v17129_v51 = vld [vmem:[#allocation3 + $0x7b0] ss:$20 sps:$4 sm:$0xff]   ;;  %v17132_v23 = vld [vmem:[#allocation3 + $0xa28] ss:$20 sps:$4 sm:$0xff]  }
 0x1fd   :  { %4290 = vmatpush1.bf16.msra.mxu0 %v17111_v44  ;;  %4064 = vmatpush1.bf16.msra.mxu1 %v17114_v22  ;;  %v17189_v44 = vld [vmem:[#allocation3 + $0x968] ss:$20 sps:$4 sm:$0xff]   ;;  %v17201_v22 = vld [vmem:[#allocation3 + $0xbb8] ss:$20 sps:$4 sm:$0xff]  }
 0x1fe   :  { %4291 = vmatprep.subr.bf16.mxu0 %v17119_v20  ;;  %4065 = vmatprep.subr.bf16.mxu1 %v17122_v37  ;;  %v17197_v20 = vld [vmem:[#allocation3 + $0x994] ss:$20 sps:$4 sm:$0xff]   ;;  %v17212_v37 = vld [vmem:[#allocation3 + $0xbe4] ss:$20 sps:$4 sm:$0xff]  }
 0x1ff   :  { %4010 = vmatprep.mubr.bf16.mxu1 %v19256_v39  ;;  %4309 = vmatprep.mubr.bf16.mxu0 %v19200_v52  ;;  %v17135_v39 = vld [vmem:[#allocation3 + $0x7d8] ss:$20 sps:$4 sm:$0xff]   ;;  %v17138_v52 = vld [vmem:[#allocation3 + $0xa50] ss:$20 sps:$4 sm:$0xff]  }
 0x201   :  { %4292 = vmatpush1.bf16.msra.mxu0 %v17117_v48  ;;  %4066 = vmatpush1.bf16.msra.mxu1 %v17120_v16  ;;  %v17195_v48 = vld [vmem:[#allocation3 + $0x990] ss:$20 sps:$4 sm:$0xff]  }
 0x202   :  { %4293 = vmatprep.subr.bf16.mxu0 %v17125_v21  ;;  %4067 = vmatprep.subr.bf16.mxu1 %v17128_v25  ;;  %v18396_v16 = vld [vmem:[%s22322_s0 + $0x50] ss:$20 sps:$4 sm:$0xff]   ;;  %v19382_v21 = vld [vmem:[%s22322_s0 + $0x58] ss:$20 sps:$4 sm:$0xff]  }
 0x203   :  { %v17200_v25 = vld [vmem:[#allocation3 + $0x9bc] ss:$20 sps:$4 sm:$0xff]  }
 0x204   :  { %4011 = vmatmul.mubr.bf16.gmra.mrb[80].mxu1 %v19263_v32  ;;  %v17149_v32 = vld [vmem:[#allocation3 + $0x82c] ss:$20 sps:$4 sm:$0xff]  }
 0x205   :  { %4294 = vmatpush1.bf16.msra.mxu0 %v17123_v50  ;;  %4068 = vmatpush1.bf16.msra.mxu1 %v17126_v30  ;;  %v17210_v50 = vld [vmem:[#allocation3 + $0xbe0] ss:$20 sps:$4 sm:$0xff]  }
 0x206   :  { %4295 = vmatprep.subr.bf16.mxu0 %v17131_v26  ;;  %4069 = vmatprep.subr.bf16.mxu1 %v17134_v27  ;;  %v17221_v30 = vld [vmem:[#allocation3 + $0xc0c] ss:$20 sps:$4 sm:$0xff]   ;;  %v18398_v26 = vld [vmem:[%s22322_s0 + $0x7c] ss:$20 sps:$4 sm:$0xff]   ;;  %v19391_v27 = vld [vmem:[%s22322_s0 + $0x84] ss:$20 sps:$4 sm:$0xff]  }
 0x207   :  { %4020 = vmatprep.mubr.bf16.mxu1 %v19270_v49  ;;  %v17147_v49 = vld [vmem:[#allocation3 + $0x828] ss:$20 sps:$4 sm:$0xff]  }
 0x209   :  { %4296 = vmatpush1.bf16.msra.mxu0 %v17129_v51  ;;  %4070 = vmatpush1.bf16.msra.mxu1 %v17132_v23 }
 0x20a   :  { %4297 = vmatprep.subr.bf16.mxu0 %v17137_v29  ;;  %4071 = vmatprep.subr.bf16.mxu1 %v17140_v47  ;;  %v17198_v29 = vld [vmem:[#allocation3 + $0x9b8] ss:$20 sps:$4 sm:$0xff]  }
 0x20c   :  { %4021 = vmatmul.mubr.bf16.gmra.mrb[84].mxu1 %v19277_v38  ;;  %v17161_v38 = vld [vmem:[#allocation3 + $0x87c] ss:$20 sps:$4 sm:$0xff]  }
 0x20d   :  { %4298 = vmatpush1.bf16.msra.mxu0 %v17135_v39  ;;  %4072 = vmatpush1.bf16.msra.mxu1 %v17138_v52  ;;  %v17206_v52 = vld [vmem:[#allocation3 + $0x9e4] ss:$20 sps:$4 sm:$0xff]  }
 0x20e   :  { %4299 = vmatprep.subr.bf16.mxu0 %v17143_v31  ;;  %4073 = vmatprep.subr.bf16.mxu1 %v17146_v34 }
 0x20f   :  { %4030 = vmatprep.mubr.bf16.mxu1 %v19284_v60  ;;  %v17159_v60 = vld [vmem:[#allocation3 + $0x878] ss:$20 sps:$4 sm:$0xff]  }
 0x211   :  { %4300 = vmatpush1.bf16.msra.mxu0 %v17141_v35  ;;  %4074 = vmatpush1.bf16.msra.mxu1 %v17144_v36  ;;  %v17219_v35 = vld [vmem:[#allocation3 + $0xc08] ss:$20 sps:$4 sm:$0xff]  }
 0x212   :  { %4301 = vmatprep.subr.bf16.mxu0 %v17149_v32  ;;  %4075 = vmatprep.subr.bf16.mxu1 %v17152_v59  ;;  %v17204_v59 = vld [vmem:[#allocation3 + $0x9e0] ss:$20 sps:$4 sm:$0xff]  }
 0x214   :  { %4031 = vmatmul.mubr.bf16.gmra.mrb[88].mxu1 %v19291_v61  ;;  %v17173_v61 = vld [vmem:[#allocation3 + $0x8cc] ss:$20 sps:$4 sm:$0xff]  }
 0x215   :  { %4302 = vmatpush1.bf16.msra.mxu0 %v17147_v49  ;;  %4076 = vmatpush1.bf16.msra.mxu1 %v17150_v40  ;;  %v18400_v49 = vld [vmem:[%s22322_s0 + $0x78] ss:$20 sps:$4 sm:$0xff]   ;;  %v19416_v40 = vld [vmem:[%s22322_s0 + $0x80] ss:$20 sps:$4 sm:$0xff]  }
 0x216   :  { %4303 = vmatprep.subr.bf16.mxu0 %v17155_v41  ;;  %4077 = vmatprep.subr.bf16.mxu1 %v17158_v42  ;;  %v17209_v41 = vld [vmem:[#allocation3 + $0xa0c] ss:$20 sps:$4 sm:$0xff]   ;;  %v17230_v42 = vld [vmem:[#allocation3 + $0xc34] ss:$20 sps:$4 sm:$0xff]  }
 0x217   :  { %4040 = vmatprep.mubr.bf16.mxu1 %v19298_v62  ;;  %v19337_v62 = vld [vmem:[%s22322_s0 + $0xc] ss:$20 sps:$4 sm:$0xff]  }
 0x219   :  { %4304 = vmatpush1.bf16.msra.mxu0 %v17153_v43  ;;  %4078 = vmatpush1.bf16.msra.mxu1 %v17156_v45  ;;  %v18402_v43 = vld [vmem:[%s22322_s0 + $0xa4] ss:$20 sps:$4 sm:$0xff]   ;;  %v19425_v45 = vld [vmem:[%s22322_s0 + $0xac] ss:$20 sps:$4 sm:$0xff]  }
 0x21a   :  { %4305 = vmatprep.subr.bf16.mxu0 %v17161_v38  ;;  %4079 = vmatprep.subr.bf16.mxu1 %v17164_v46 }
 0x21c   :  { %4041 = vmatmul.mubr.bf16.gmra.mrb[92].mxu1 %v19305_v63  ;;  %v17177_v63 = vld [vmem:[#allocation3 + $0x8f0] ss:$20 sps:$4 sm:$0xff]  }
 0x21d   :  { %4306 = vmatpush1.bf16.msra.mxu0 %v17159_v60  ;;  %4080 = vmatpush1.bf16.msra.mxu1 %v17162_v53  ;;  %v17207_v60 = vld [vmem:[#allocation3 + $0xa08] ss:$20 sps:$4 sm:$0xff]   ;;  %v17228_v53 = vld [vmem:[#allocation3 + $0xc30] ss:$20 sps:$4 sm:$0xff]  }
 0x21e   :  { %4307 = vmatprep.subr.bf16.mxu0 %v17167_v54  ;;  %4081 = vmatprep.subr.bf16.mxu1 %v17170_v0 }
 0x21f   :  { %4083 = vmatprep.mubr.bf16.mxu1 %v19337_v62 }
 0x221   :  { %4308 = vmatpush1.bf16.msra.mxu0 %v17165_v55  ;;  %4082 = vmatpush1.bf16.msra.mxu1 %v17168_v57  ;;  %v17215_v55 = vld [vmem:[#allocation3 + $0xa34] ss:$20 sps:$4 sm:$0xff]  }
 0x222   :  { %4390 = vmatprep.subr.bf16.mxu0 %v17173_v61  ;;  %4164 = vmatprep.subr.bf16.mxu1 %v17176_v58  ;;  %v17239_v58 = vld [vmem:[#allocation3 + $0xc5c] ss:$20 sps:$4 sm:$0xff]  }
 0x224   :  { %4310 = vmatmul.mubr.bf16.vlgmr.msra.gmra.mrb[80].mxu0 %v18388_v6  ;;  %4084 = vmatmul.mubr.bf16.vlgmr.msra.gmra.mrb[64].mxu1 %v19346_v3  ;;  %v17218_v6 = vld [vmem:[#allocation3 + $0xa5c] ss:$20 sps:$4 sm:$0xff]  }
 0x225   :  { %4391 = vmatpush1.bf16.msra.mxu0 %v17171_v4  ;;  %4165 = vmatpush1.bf16.msra.mxu1 %v17174_v5 }
 0x226   :  { %4392 = vmatprep.subr.bf16.mxu0 %v17179_v19  ;;  %4319 = vmatprep.mubr.bf16.mxu0 %v18390_v12  ;;  %v17213_v19 = vld [vmem:[#allocation3 + $0xa30] ss:$20 sps:$4 sm:$0xff]   ;;  %v19459_v12 = vld [vmem:[%s22322_s0 + $0xd4] ss:$20 sps:$4 sm:$0xff]  }
 0x227   :  { %4093 = vmatprep.mubr.bf16.mxu1 %v19355_v56  ;;  %4166 = vmatprep.subr.bf16.mxu1 %v17185_v1  ;;  %v18404_v1 = vld [vmem:[%s22322_s0 + $0xa0] ss:$20 sps:$4 sm:$0xff]  }
 0x229   :  { %4393 = vmatpush1.bf16.msra.mxu0 %v17177_v63  ;;  %4167 = vmatpush1.bf16.msra.mxu1 %v17183_v9  ;;  %v19450_v63 = vld [vmem:[%s22322_s0 + $0xa8] ss:$20 sps:$4 sm:$0xff]   ;;  %v17246_v9 = vld [vmem:[#allocation3 + $0x790] ss:$20 sps:$4 sm:$0xff]  }
 0x22a   :  { %4394 = vmatprep.subr.bf16.mxu0 %v17182_v8  ;;  %4168 = vmatprep.subr.bf16.mxu1 %v17194_v10  ;;  %v17237_v8 = vld [vmem:[#allocation3 + $0xc58] ss:$20 sps:$4 sm:$0xff]  }
 0x22b   :  { %v18406_v10 = vld [vmem:[%s22322_s0 + $0xcc] ss:$20 sps:$4 sm:$0xff]  }
 0x22c   :  { %4320 = vmatmul.mubr.bf16.gmra.mrb[84].mxu0 %v18392_v13  ;;  %4094 = vmatmul.mubr.bf16.gmra.mrb[68].mxu1 %v19364_v15 }
 0x22d   :  { %4395 = vmatpush1.bf16.msra.mxu0 %v17180_v11  ;;  %4329 = vmatprep.mubr.bf16.mxu0 %v18394_v17 }
 0x22e   :  { %4396 = vmatprep.subr.bf16.mxu0 %v17188_v28  ;;  %4103 = vmatprep.mubr.bf16.mxu1 %v19373_v18 }
 0x22f   :  { %4169 = vmatpush1.bf16.msra.mxu1 %v17192_v24  ;;  %v17216_v24 = vld [vmem:[#allocation3 + $0xa58] ss:$20 sps:$4 sm:$0xff]  }
 0x230   :  { %4170 = vmatprep.subr.bf16.mxu1 %v17203_v7 }
 0x231   :  { %4397 = vmatpush1.bf16.msra.mxu0 %v17186_v14 }
 0x232   :  { %4398 = vmatprep.subr.bf16.mxu0 %v17191_v33  ;;  %v17224_v33 = vld [vmem:[#allocation3 + $0xa84] ss:$20 sps:$4 sm:$0xff]  }
 0x233   :  { %4171 = vmatpush1.bf16.msra.mxu1 %v17201_v22 }
 0x234   :  { %4330 = vmatmul.mubr.bf16.gmra.mrb[88].mxu0 %v18396_v16  ;;  %4104 = vmatmul.mubr.bf16.gmra.mrb[72].mxu1 %v19382_v21  ;;  %v17227_v16 = vld [vmem:[#allocation3 + $0xaac] ss:$20 sps:$4 sm:$0xff]  }
 0x235   :  { %4399 = vmatpush1.bf16.msra.mxu0 %v17189_v44  ;;  %4339 = vmatprep.mubr.bf16.mxu0 %v18398_v26 }
 0x236   :  { %4400 = vmatprep.subr.bf16.mxu0 %v17197_v20  ;;  %4113 = vmatprep.mubr.bf16.mxu1 %v19391_v27  ;;  %v18408_v20 = vld [vmem:[%s22322_s0 + $0xc8] ss:$20 sps:$4 sm:$0xff]  }
 0x237   :  { %v19394_v51 = vpop.f32.mrb[0].mxu0  ;;  %v19396_v23 = vpop.f32.mrb[0].mxu1  ;;  %4172 = vmatprep.subr.bf16.mxu1 %v17212_v37  ;;  %v19484_v37 = vld [vmem:[%s22322_s0 + $0xd0] ss:$20 sps:$4 sm:$0xff]  }
 0x238   :  { %22556 = vst [vmem:[#allocation22_spill] sm:$0xff] %v19394_v51  ;;  %22557 = vst [vmem:[#allocation23_spill] sm:$0xff] %v19396_v23  ;;  %v19398_v47 = vpop.f32.mrb[1].mxu0  ;;  %v19400_v39 = vpop.f32.mrb[1].mxu1  ;;  %4173 = vmatpush1.bf16.msra.mxu1 %v17210_v50  ;;  %v19493_v50 = vld [vmem:[%s22322_s0 + $0xfc] ss:$20 sps:$4 sm:$0xff]  }
 0x239   :  { %22558 = vst [vmem:[#allocation24_spill] sm:$0xff] %v19398_v47  ;;  %22559 = vst [vmem:[#allocation25_spill] sm:$0xff] %v19400_v39  ;;  %4401 = vmatpush1.bf16.msra.mxu0 %v17195_v48  ;;  %v19402_v31 = vpop.f32.mrb[2].mxu0  ;;  %v19404_v34 = vpop.f32.mrb[2].mxu1  ;;  %4174 = vmatprep.subr.bf16.mxu1 %v17221_v30  ;;  %v17222_v48 = vld [vmem:[#allocation3 + $0xa80] ss:$20 sps:$4 sm:$0xff]  }
 0x23a   :  { %22560 = vst [vmem:[#allocation26_spill] sm:$0xff] %v19402_v31  ;;  %22561 = vst [vmem:[#allocation27_spill] sm:$0xff] %v19404_v34  ;;  %v19406_v36 = vpop.f32.mrb[3].mxu0  ;;  %v19408_v32 = vpop.f32.mrb[3].mxu1  ;;  %4402 = vmatprep.subr.bf16.mxu0 %v17200_v25  ;;  %v18410_v25 = vld [vmem:[%s22322_s0 + $0xf4] ss:$20 sps:$4 sm:$0xff]  }
 0x23b   :  { %22562 = vst [vmem:[#allocation28_spill] sm:$0xff] %v19406_v36  ;;  %22563 = vst [vmem:[#allocation29_spill] sm:$0xff] %v19408_v32  ;;  %v17273_v23 = vld [vmem:[#allocation3 + $0xc38] ss:$20 sps:$4 sm:$0xff]  }
 0x23c   :  { %4340 = vmatmul.mubr.bf16.gmra.mrb[92].mxu0 %v18400_v49  ;;  %4114 = vmatmul.mubr.bf16.gmra.mrb[76].mxu1 %v19416_v40  ;;  %v17551_v47 = vld [vmem:[#allocation3 + $0xdf8] ss:$20 sps:$4 sm:$0xff]  }
 0x23d   :  { %4403 = vmatpush1.bf16.msra.mxu0 %v17198_v29  ;;  %4349 = vmatprep.mubr.bf16.mxu0 %v18402_v43  ;;  %v17225_v29 = vld [vmem:[#allocation3 + $0xaa8] ss:$20 sps:$4 sm:$0xff]   ;;  %v17554_v31 = vld [vmem:[#allocation3 + $0xf38] ss:$20 sps:$4 sm:$0xff]  }
 0x23e   :  { %4404 = vmatprep.subr.bf16.mxu0 %v17206_v52  ;;  %4123 = vmatprep.mubr.bf16.mxu1 %v19425_v45 }
 0x23f   :  { %v19428_v38 = vpop.f32.mrb[4].mxu0  ;;  %v19430_v46 = vpop.f32.mrb[4].mxu1  ;;  %4175 = vmatpush1.bf16.msra.mxu1 %v17219_v35 }
 0x240   :  { %22564 = vst [vmem:[#allocation30_spill] sm:$0xff] %v19428_v38  ;;  %22565 = vst [vmem:[#allocation31_spill] sm:$0xff] %v19430_v46  ;;  %v19432_v54 = vpop.f32.mrb[5].mxu0  ;;  %v19434_v0 = vpop.f32.mrb[5].mxu1  ;;  %4176 = vmatprep.subr.bf16.mxu1 %v17230_v42 }
 0x241   :  { %22566 = vst [vmem:[#allocation32_spill] sm:$0xff] %v19432_v54  ;;  %22567 = vst [vmem:[#allocation33_spill] sm:$0xff] %v19434_v0  ;;  %4405 = vmatpush1.bf16.msra.mxu0 %v17204_v59  ;;  %v19436_v57 = vpop.f32.mrb[6].mxu0  ;;  %v19438_v61 = vpop.f32.mrb[6].mxu1  ;;  %v17233_v59 = vld [vmem:[#allocation3 + $0xad4] ss:$20 sps:$4 sm:$0xff]  }
 0x242   :  { %22568 = vst [vmem:[#allocation34_spill] sm:$0xff] %v19436_v57  ;;  %22569 = vst [vmem:[#allocation35_spill] sm:$0xff] %v19438_v61  ;;  %v19440_v4 = vpop.f32.mrb[7].mxu0  ;;  %v19442_v5 = vpop.f32.mrb[7].mxu1  ;;  %4406 = vmatprep.subr.bf16.mxu0 %v17209_v41  ;;  %v17267_v61 = vld [vmem:[#allocation3 + $0x6f0] ss:$20 sps:$4 sm:$0xff]  }
 0x243   :  { %22570 = vst [vmem:[#allocation36_spill] sm:$0xff] %v19440_v4  ;;  %22571 = vst [vmem:[#allocation37_spill] sm:$0xff] %v19442_v5  ;;  %4177 = vmatpush1.bf16.msra.mxu1 %v17228_v53  ;;  %v19518_v53 = vld [vmem:[%s22322_s0 + $0xf8] ss:$20 sps:$4 sm:$0xff]  }
 0x244   :  { %4350 = vmatmul.mubr.bf16.gmra.mrb[96].mxu0 %v18404_v1  ;;  %4124 = vmatmul.mubr.bf16.gmra.mrb[80].mxu1 %v19450_v63  ;;  %v19527_v1 = vld [vmem:[%s22322_s0 + $0x124] ss:$20 sps:$4 sm:$0xff]  }
 0x245   :  { %4407 = vmatpush1.bf16.msra.mxu0 %v17207_v60  ;;  %4359 = vmatprep.mubr.bf16.mxu0 %v18406_v10  ;;  %v18412_v60 = vld [vmem:[%s22322_s0 + $0xf0] ss:$20 sps:$4 sm:$0xff]  }
 0x246   :  { %4408 = vmatprep.subr.bf16.mxu0 %v17215_v55  ;;  %4133 = vmatprep.mubr.bf16.mxu1 %v19459_v12  ;;  %v17231_v55 = vld [vmem:[#allocation3 + $0xad0] ss:$20 sps:$4 sm:$0xff]  }
 0x247   :  { %v19462_v11 = vpop.f32.mrb[8].mxu0  ;;  %v19464_v28 = vpop.f32.mrb[8].mxu1  ;;  %4178 = vmatprep.subr.bf16.mxu1 %v17239_v58  ;;  %v17236_v58 = vld [vmem:[#allocation3 + $0xafc] ss:$20 sps:$4 sm:$0xff]  }
 0x248   :  { %22572 = vst [vmem:[#allocation38_spill] sm:$0xff] %v19462_v11  ;;  %22573 = vst [vmem:[#allocation39_spill] sm:$0xff] %v19464_v28  ;;  %v19466_v14 = vpop.f32.mrb[9].mxu0  ;;  %v19468_v13 = vpop.f32.mrb[9].mxu1  ;;  %4179 = vmatpush1.bf16.msra.mxu1 %v17237_v8 }
 0x249   :  { %22574 = vst [vmem:[#allocation40_spill] sm:$0xff] %v19466_v14  ;;  %22575 = vst [vmem:[#allocation41_spill] sm:$0xff] %v19468_v13  ;;  %4409 = vmatpush1.bf16.msra.mxu0 %v17213_v19  ;;  %v19470_v7 = vpop.f32.mrb[10].mxu0  ;;  %v19472_v17 = vpop.f32.mrb[10].mxu1  ;;  %15204 = vmatprep.subr.bf16.mxu1 %v17246_v9  ;;  %v18414_v19 = vld [vmem:[%s22322_s0 + $0x11c] ss:$20 sps:$4 sm:$0xff]  }
 0x24a   :  { %22576 = vst [vmem:[#allocation42_spill] sm:$0xff] %v19470_v7  ;;  %22577 = vst [vmem:[#allocation43_spill] sm:$0xff] %v19472_v17  ;;  %v19474_v44 = vpop.f32.mrb[11].mxu0  ;;  %v19476_v22 = vpop.f32.mrb[11].mxu1  ;;  %4410 = vmatprep.subr.bf16.mxu0 %v17218_v6  ;;  %v17234_v9 = vld [vmem:[#allocation3 + $0xaf8] ss:$20 sps:$4 sm:$0xff]  }
 0x24b   :  { %22578 = vst [vmem:[#allocation44_spill] sm:$0xff] %v19474_v44  ;;  %22579 = vst [vmem:[#allocation45_spill] sm:$0xff] %v19476_v22  ;;  %v17253_v17 = vld [vmem:[#allocation3 + $0xb98] ss:$20 sps:$4 sm:$0xff]  }
 0x24c   :  { %4360 = vmatmul.mubr.bf16.gmra.mrb[100].mxu0 %v18408_v20  ;;  %4134 = vmatmul.mubr.bf16.gmra.mrb[84].mxu1 %v19484_v37  ;;  %v17483_v44 = vld [vmem:[#allocation3 + $0x110c] ss:$20 sps:$4 sm:$0xff]  }
 0x24d   :  { %4411 = vmatpush1.bf16.msra.mxu0 %v17216_v24  ;;  %4369 = vmatprep.mubr.bf16.mxu0 %v18410_v25 }
 0x24e   :  { %4412 = vmatprep.subr.bf16.mxu0 %v17224_v33  ;;  %4143 = vmatprep.mubr.bf16.mxu1 %v19493_v50  ;;  %v17242_v33 = vld [vmem:[#allocation3 + $0xb24] ss:$20 sps:$4 sm:$0xff]  }
 0x24f   :  { %v19496_v30 = vpop.f32.mrb[12].mxu0  ;;  %v19498_v26 = vpop.f32.mrb[12].mxu1 }
 0x250   :  { %22580 = vst [vmem:[#allocation46_spill] sm:$0xff] %v19496_v30  ;;  %22581 = vst [vmem:[#allocation47_spill] sm:$0xff] %v19498_v26  ;;  %v19500_v52 = vpop.f32.mrb[13].mxu0  ;;  %v19502_v35 = vpop.f32.mrb[13].mxu1  ;;  %v20141_v30 = vld [vmem:[%s22322_s0 + $0x80] ss:$20 sps:$4 sm:$0xff]  }
 0x251   :  { %22582 = vst [vmem:[#allocation48_spill] sm:$0xff] %v19500_v52  ;;  %22583 = vst [vmem:[#allocation49_spill] sm:$0xff] %v19502_v35  ;;  %4413 = vmatpush1.bf16.msra.mxu0 %v17222_v48  ;;  %v19504_v49 = vpop.f32.mrb[14].mxu0  ;;  %v19506_v41 = vpop.f32.mrb[14].mxu1  ;;  %v17531_v52 = vld [vmem:[#allocation3 + $0x124c] ss:$20 sps:$4 sm:$0xff]  }
 0x252   :  { %22584 = vst [vmem:[#allocation50_spill] sm:$0xff] %v19504_v49  ;;  %22585 = vst [vmem:[#allocation51_spill] sm:$0xff] %v19506_v41  ;;  %v19508_v42 = vpop.f32.mrb[15].mxu0  ;;  %v19510_v43 = vpop.f32.mrb[15].mxu1  ;;  %4414 = vmatprep.subr.bf16.mxu0 %v17227_v16  ;;  %v17522_v49 = vld [vmem:[#allocation3 + $0x1204] ss:$20 sps:$4 sm:$0xff]  }
 0x253   :  { %22586 = vst [vmem:[#allocation52_spill] sm:$0xff] %v19508_v42  ;;  %22587 = vst [vmem:[#allocation53_spill] sm:$0xff] %v19510_v43  ;;  %v17495_v42 = vld [vmem:[#allocation3 + $0x115c] ss:$20 sps:$4 sm:$0xff]  }
 0x254   :  { %4370 = vmatmul.mubr.bf16.gmra.mrb[104].mxu0 %v18412_v60  ;;  %4144 = vmatmul.mubr.bf16.gmra.mrb[88].mxu1 %v19518_v53  ;;  %v17240_v60 = vld [vmem:[#allocation3 + $0xb20] ss:$20 sps:$4 sm:$0xff]  }
 0x255   :  { %4415 = vmatpush1.bf16.msra.mxu0 %v17225_v29  ;;  %4379 = vmatprep.mubr.bf16.mxu0 %v18414_v19  ;;  %v18416_v29 = vld [vmem:[%s22322_s0 + $0x118] ss:$20 sps:$4 sm:$0xff]  }
 0x256   :  { %4416 = vmatprep.subr.bf16.mxu0 %v17233_v59  ;;  %4153 = vmatprep.mubr.bf16.mxu1 %v19527_v1  ;;  %v19552_v59 = vld [vmem:[%s22322_s0 + $0x120] ss:$20 sps:$4 sm:$0xff]  }
 0x257   :  { %v19530_v6 = vpop.f32.mrb[16].mxu0  ;;  %v19532_v8 = vpop.f32.mrb[16].mxu1 }
 0x258   :  { %22588 = vst [vmem:[#allocation54_spill] sm:$0xff] %v19530_v6  ;;  %22589 = vst [vmem:[#allocation55_spill] sm:$0xff] %v19532_v8  ;;  %v19534_v10 = vpop.f32.mrb[17].mxu0  ;;  %v19536_v24 = vpop.f32.mrb[17].mxu1  ;;  %v17519_v6 = vld [vmem:[#allocation3 + $0x11fc] ss:$20 sps:$4 sm:$0xff]  }
 0x259   :  { %22590 = vst [vmem:[#allocation56_spill] sm:$0xff] %v19534_v10  ;;  %22591 = vst [vmem:[#allocation57_spill] sm:$0xff] %v19536_v24  ;;  %4417 = vmatpush1.bf16.msra.mxu0 %v17231_v55  ;;  %v19538_v20 = vpop.f32.mrb[18].mxu0  ;;  %v19540_v48 = vpop.f32.mrb[18].mxu1  ;;  %v17245_v55 = vld [vmem:[#allocation3 + $0xb4c] ss:$20 sps:$4 sm:$0xff]  }
 0x25a   :  { %22592 = vst [vmem:[#allocation58_spill] sm:$0xff] %v19538_v20  ;;  %22593 = vst [vmem:[#allocation59_spill] sm:$0xff] %v19540_v48  ;;  %v19542_v16 = vpop.f32.mrb[19].mxu0  ;;  %v19544_v25 = vpop.f32.mrb[19].mxu1  ;;  %4418 = vmatprep.subr.bf16.mxu0 %v17236_v58  ;;  %v17507_v10 = vld [vmem:[#allocation3 + $0x11ac] ss:$20 sps:$4 sm:$0xff]  }
 0x25b   :  { %22594 = vst [vmem:[#allocation60_spill] sm:$0xff] %v19542_v16  ;;  %22595 = vst [vmem:[#allocation61_spill] sm:$0xff] %v19544_v25  ;;  %v17247_v25 = vld [vmem:[#allocation3 + $0x650] ss:$20 sps:$4 sm:$0xff]   ;;  %v20054_v20 = vld [vmem:[%s22322_s0 + $0x34] ss:$20 sps:$4 sm:$0xff]  }
 0x25c   :  { %4380 = vmatmul.mubr.bf16.gmra.mrb[108].mxu0 %v18416_v29  ;;  %4154 = vmatmul.mubr.bf16.gmra.mrb[92].mxu1 %v19552_v59  ;;  %v17243_v29 = vld [vmem:[#allocation3 + $0xb48] ss:$20 sps:$4 sm:$0xff]  }
 0x25d   :  { %4419 = vmatpush1.bf16.msra.mxu0 %v17234_v9  ;;  %4422 = vmatprep.mubr.bf16.mxu0 %v19337_v62 }
 0x25e   :  { %4420 = vmatprep.subr.bf16.mxu0 %v17242_v33  ;;  %4196 = vmatprep.mubr.bf16.mxu1 %v22339_v2  ;;  %v17250_v33 = vld [vmem:[#allocation3 + $0xb74] ss:$20 sps:$4 sm:$0xff]   ;;  %v17251_v2 = vld [vmem:[#allocation3 + $0x7b8] ss:$20 sps:$4 sm:$0xff]  }
 0x25f   :  { %v19557_v58 = vpop.f32.mrb[20].mxu0  ;;  %v19559_v19 = vpop.f32.mrb[20].mxu1 }
 0x260   :  { %22596 = vst [vmem:[#allocation62_spill] sm:$0xff] %v19557_v58  ;;  %22597 = vst [vmem:[#allocation63_spill] sm:$0xff] %v19559_v19  ;;  %v19561_v48 = vpop.f32.mrb[21].mxu0  ;;  %v19563_v24 = vpop.f32.mrb[21].mxu1  ;;  %v19577_v19 = vld [vmem:[%s22322_s0 + $0x10] ss:$20 sps:$4 sm:$0xff]  }
 0x261   :  { %22598 = vst [vmem:[#allocation64_spill] sm:$0xff] %v19561_v48  ;;  %22599 = vst [vmem:[#allocation65_spill] sm:$0xff] %v19563_v24  ;;  %4421 = vmatpush1.bf16.msra.mxu0 %v17240_v60  ;;  %v19565_v8 = vpop.f32.mrb[22].mxu0  ;;  %v19567_v43 = vpop.f32.mrb[22].mxu1  ;;  %v17248_v60 = vld [vmem:[#allocation3 + $0xb70] ss:$20 sps:$4 sm:$0xff]  }
 0x262   :  { %22600 = vst [vmem:[#allocation66_spill] sm:$0xff] %v19565_v8  ;;  %22601 = vst [vmem:[#allocation67_spill] sm:$0xff] %v19567_v43  ;;  %v19569_v9 = vpop.f32.mrb[23].mxu0  ;;  %v19571_v62 = vpop.f32.mrb[23].mxu1  ;;  %4503 = vmatprep.subr.bf16.mxu0 %v17245_v55  ;;  %v17252_v43 = vld [vmem:[#allocation3 + $0x678] ss:$20 sps:$4 sm:$0xff]  }
 0x263   :  { %22602 = vst [vmem:[#allocation68_spill] sm:$0xff] %v19569_v9  ;;  %22603 = vst [vmem:[#allocation69_spill] sm:$0xff] %v19571_v62  ;;  %v22604_v24 = vmov 0   ;;  %v17255_v55 = vld [vmem:[#allocation3 + $0xb9c] ss:$20 sps:$4 sm:$0xff]  }
 0x264   :  { %4423 = vmatmul.mubr.bf16.vlgmr.msra.gmra.mrb[80].mxu0 %v19346_v3  ;;  %4197 = vmatmul.mubr.bf16.vlgmr.msra.gmra.mrb[64].mxu1 %v19577_v19  ;;  %v17256_v62 = vld [vmem:[#allocation3 + $0x7e0] ss:$20 sps:$4 sm:$0xff]   ;;  %v17514_v58 = vld [vmem:[#allocation3 + $0x11d8] ss:$20 sps:$4 sm:$0xff]  }
 0x265   :  { %4504 = vmatpush1.bf16.msra.mxu0 %v17243_v29  ;;  %15205 = vmatpush3.bf16.msra.mxu1 %v17247_v25 }
 0x266   :  { %4432 = vmatprep.mubr.bf16.mxu0 %v19355_v56  ;;  %4206 = vmatprep.mubr.bf16.mxu1 %v22604_v24 }
 0x267   :  { %v19582_v41 = vpop.f32.mrb[24].mxu0  ;;  %v19584_v3 = vpop.f32.mrb[24].mxu1  ;;  %4505 = vmatprep.subr.bf16.mxu0 %v17250_v33  ;;  %15206 = vmatprep.subr.bf16.mxu1 %v17251_v2  ;;  %v17260_v33 = vld [vmem:[#allocation3 + $0xbc4] ss:$20 sps:$4 sm:$0xff]   ;;  %v17261_v2 = vld [vmem:[#allocation3 + $0x808] ss:$20 sps:$4 sm:$0xff]  }
 0x268   :  { %22605 = vst [vmem:[#allocation70_spill] sm:$0xff] %v19582_v41  ;;  %22606 = vst [vmem:[#allocation71_spill] sm:$0xff] %v19584_v3  ;;  %v19586_v35 = vpop.f32.mrb[25].mxu0  ;;  %v19588_v26 = vpop.f32.mrb[25].mxu1  ;;  %v17257_v3 = vld [vmem:[#allocation3 + $0x6a0] ss:$20 sps:$4 sm:$0xff]  }
 0x269   :  { %22607 = vst [vmem:[#allocation72_spill] sm:$0xff] %v19586_v35  ;;  %22608 = vst [vmem:[#allocation73_spill] sm:$0xff] %v19588_v26  ;;  %v19590_v29 = vpop.f32.mrb[26].mxu0  ;;  %v19592_v25 = vpop.f32.mrb[26].mxu1  ;;  %4506 = vmatpush1.bf16.msra.mxu0 %v17248_v60  ;;  %15207 = vmatpush3.bf16.msra.mxu1 %v17252_v43  ;;  %v19602_v26 = vld [vmem:[%s22322_s0 + $0x38] ss:$20 sps:$4 sm:$0xff]  }
 0x26a   :  { %22609 = vst [vmem:[#allocation74_spill] sm:$0xff] %v19590_v29  ;;  %22610 = vst [vmem:[#allocation75_spill] sm:$0xff] %v19592_v25  ;;  %v19594_v56 = vpop.f32.mrb[27].mxu0  ;;  %v19596_v22 = vpop.f32.mrb[27].mxu1  ;;  %4507 = vmatprep.subr.bf16.mxu0 %v17255_v55  ;;  %15208 = vmatprep.subr.bf16.mxu1 %v17256_v62  ;;  %v17258_v43 = vld [vmem:[#allocation3 + $0xbc0] ss:$20 sps:$4 sm:$0xff]  }
 0x26b   :  { %22611 = vst [vmem:[#allocation76_spill] sm:$0xff] %v19594_v56  ;;  %22612 = vst [vmem:[#allocation77_spill] sm:$0xff] %v19596_v22  ;;  %v17262_v60 = vld [vmem:[#allocation3 + $0x6c8] ss:$20 sps:$4 sm:$0xff]   ;;  %v17265_v62 = vld [vmem:[#allocation3 + $0xbec] ss:$20 sps:$4 sm:$0xff]  }
 0x26c   :  { %4433 = vmatmul.mubr.bf16.gmra.mrb[84].mxu0 %v19364_v15  ;;  %4207 = vmatmul.mubr.bf16.gmra.mrb[68].mxu1 %v19602_v26  ;;  %v17266_v55 = vld [vmem:[#allocation3 + $0x830] ss:$20 sps:$4 sm:$0xff]   ;;  %v17286_v56 = vld [vmem:[#allocation3 + $0xa38] ss:$20 sps:$4 sm:$0xff]  }
 0x26d   :  { %4442 = vmatprep.mubr.bf16.mxu0 %v19373_v18  ;;  %4216 = vmatprep.mubr.bf16.mxu1 %v22604_v24  ;;  %v17288_v29 = vld [vmem:[#allocation3 + $0xb78] ss:$20 sps:$4 sm:$0xff]  }
 0x26e   :  { %4508 = vmatpush1.bf16.msra.mxu0 %v17253_v17  ;;  %15209 = vmatpush3.bf16.msra.mxu1 %v17257_v3  ;;  %v17263_v3 = vld [vmem:[#allocation3 + $0xbe8] ss:$20 sps:$4 sm:$0xff]  }
 0x26f   :  { %v19607_v22 = vpop.f32.mrb[28].mxu0  ;;  %v19609_v15 = vpop.f32.mrb[28].mxu1  ;;  %4509 = vmatprep.subr.bf16.mxu0 %v17260_v33  ;;  %15210 = vmatprep.subr.bf16.mxu1 %v17261_v2  ;;  %v17270_v33 = vld [vmem:[#allocation3 + $0xc14] ss:$20 sps:$4 sm:$0xff]   ;;  %v17271_v2 = vld [vmem:[#allocation3 + $0x858] ss:$20 sps:$4 sm:$0xff]  }
 0x270   :  { %22613 = vst [vmem:[#allocation78_spill] sm:$0xff] %v19607_v22  ;;  %22614 = vst [vmem:[#allocation79_spill] sm:$0xff] %v19609_v15  ;;  %v19611_v25 = vpop.f32.mrb[29].mxu0  ;;  %v19613_v13 = vpop.f32.mrb[29].mxu1 }
 0x271   :  { %22615 = vst [vmem:[#allocation80_spill] sm:$0xff] %v19611_v25  ;;  %22616 = vst [vmem:[#allocation81_spill] sm:$0xff] %v19613_v13  ;;  %v19615_v28 = vpop.f32.mrb[30].mxu0  ;;  %v19617_v18 = vpop.f32.mrb[30].mxu1  ;;  %v19627_v13 = vld [vmem:[%s22322_s0 + $0x60] ss:$20 sps:$4 sm:$0xff]  }
 0x272   :  { %22617 = vst [vmem:[#allocation82_spill] sm:$0xff] %v19615_v28  ;;  %22618 = vst [vmem:[#allocation83_spill] sm:$0xff] %v19617_v18  ;;  %v19619_v5 = vpop.f32.mrb[31].mxu0  ;;  %v19621_v17 = vpop.f32.mrb[31].mxu1  ;;  %4510 = vmatpush1.bf16.msra.mxu0 %v17258_v43  ;;  %15211 = vmatpush3.bf16.msra.mxu1 %v17262_v60  ;;  %v17268_v43 = vld [vmem:[#allocation3 + $0xc10] ss:$20 sps:$4 sm:$0xff]  }
 0x273   :  { %22619 = vst [vmem:[#allocation84_spill] sm:$0xff] %v19619_v5  ;;  %22620 = vst [vmem:[#allocation85_spill] sm:$0xff] %v19621_v17  ;;  %4511 = vmatprep.subr.bf16.mxu0 %v17265_v62  ;;  %15212 = vmatprep.subr.bf16.mxu1 %v17266_v55  ;;  %v17272_v60 = vld [vmem:[#allocation3 + $0x718] ss:$20 sps:$4 sm:$0xff]   ;;  %v17275_v62 = vld [vmem:[#allocation3 + $0xc3c] ss:$20 sps:$4 sm:$0xff]  }
 0x274   :  { %4443 = vmatmul.mubr.bf16.gmra.mrb[88].mxu0 %v19382_v21  ;;  %4217 = vmatmul.mubr.bf16.gmra.mrb[72].mxu1 %v19627_v13  ;;  %v17276_v55 = vld [vmem:[#allocation3 + $0x880] ss:$20 sps:$4 sm:$0xff]  }
 0x275   :  { %4452 = vmatprep.mubr.bf16.mxu0 %v19391_v27  ;;  %4226 = vmatprep.mubr.bf16.mxu1 %v22604_v24  ;;  %v17277_v5 = vld [vmem:[#allocation3 + $0x740] ss:$20 sps:$4 sm:$0xff]  }
 0x276   :  { %4512 = vmatpush1.bf16.msra.mxu0 %v17263_v3  ;;  %15213 = vmatpush3.bf16.msra.mxu1 %v17267_v61  ;;  %v17280_v61 = vld [vmem:[#allocation3 + $0xc64] ss:$20 sps:$4 sm:$0xff]   ;;  %v17281_v3 = vld [vmem:[#allocation3 + $0x8a8] ss:$20 sps:$4 sm:$0xff]  }
 0x277   :  { %v15076_v17 = vpop.f32.mrb[32].mxu0  ;;  %v15140_v18 = vpop.f32.mrb[32].mxu1  ;;  %4513 = vmatprep.subr.bf16.mxu0 %v17270_v33  ;;  %15214 = vmatprep.subr.bf16.mxu1 %v17271_v2 }
 0x278   :  { %v15077_v21 = vpop.f32.mrb[33].mxu0  ;;  %v15141_v15 = vpop.f32.mrb[33].mxu1 }
 0x279   :  { %v15079_v0 = vpop.f32.mrb[34].mxu0  ;;  %v15143_v46 = vpop.f32.mrb[34].mxu1  ;;  %v15078_v32 = vadd.f32 %v15077_v21, %v15076_v17  ;;  %v15142_v34 = vadd.f32 %v15141_v15, %v15140_v18  ;;  %v19638_v15 = vld [vmem:[%s22322_s0 + $0x88] ss:$20 sps:$4 sm:$0xff]   ;;  %v17278_v18 = vld [vmem:[#allocation3 + $0xc60] ss:$20 sps:$4 sm:$0xff]  }
 0x27a   :  { %v15080_v39 = vpop.f32.mrb[35].mxu0  ;;  %v15144_v27 = vpop.f32.mrb[35].mxu1  ;;  %4514 = vmatpush1.bf16.msra.mxu0 %v17268_v43  ;;  %15215 = vmatpush3.bf16.msra.mxu1 %v17272_v60  ;;  %v17282_v17 = vld [vmem:[#allocation3 + $0x768] ss:$20 sps:$4 sm:$0xff]  }
 0x27b   :  { %4515 = vmatprep.subr.bf16.mxu0 %v17275_v62  ;;  %15216 = vmatprep.subr.bf16.mxu1 %v17276_v55  ;;  %v19632_v28 = vadd.f32 %v15142_v34, %v15078_v32  ;;  %v15081_v33 = vadd.f32 %v15080_v39, %v15079_v0  ;;  %v15145_v2 = vadd.f32 %v15144_v27, %v15143_v46  ;;  %v17283_v39 = vld [vmem:[#allocation3 + $0xa10] ss:$20 sps:$4 sm:$0xff]  }
 0x27c   :  { %4453 = vmatmul.mubr.bf16.gmra.mrb[92].mxu0 %v19416_v40  ;;  %4227 = vmatmul.mubr.bf16.gmra.mrb[76].mxu1 %v19638_v15  ;;  %v19645_v34 = vld [vmem:[#allocation3 + $0xb50] ss:$20 sps:$4 sm:$0xff]  }
 0x27d   :  { %4462 = vmatprep.mubr.bf16.mxu0 %v19425_v45  ;;  %4236 = vmatprep.mubr.bf16.mxu1 %v22604_v24  ;;  %v19643_v43 = vadd.f32 %v15145_v2, %v15081_v33 }
 0x27e   :  { %4516 = vmatpush1.bf16.msra.mxu0 %v17273_v23  ;;  %15217 = vmatpush3.bf16.msra.mxu1 %v17277_v5 }
 0x27f   :  { %v15082_v32 = vpop.f32.mrb[36].mxu0  ;;  %v15146_v40 = vpop.f32.mrb[36].mxu1  ;;  %4517 = vmatprep.subr.bf16.mxu0 %v17280_v61  ;;  %15218 = vmatprep.subr.bf16.mxu1 %v17281_v3  ;;  %v19654_v61 = vld [vmem:[%s22322_s0 + $0xb0] ss:$20 sps:$4 sm:$0xff]  }
 0x280   :  { %v15083_v46 = vpop.f32.mrb[37].mxu0  ;;  %v15147_v0 = vpop.f32.mrb[37].mxu1 }
 0x281   :  { %v15084_v60 = vadd.f32 %v15083_v46, %v15082_v32  ;;  %v15148_v62 = vadd.f32 %v15147_v0, %v15146_v40  ;;  %v15085_v45 = vpop.f32.mrb[38].mxu0  ;;  %v15149_v55 = vpop.f32.mrb[38].mxu1 }
 0x282   :  { %v15086_v21 = vpop.f32.mrb[39].mxu0  ;;  %v15150_v27 = vpop.f32.mrb[39].mxu1  ;;  %4518 = vmatpush1.bf16.msra.mxu0 %v17278_v18  ;;  %15219 = vmatpush3.bf16.msra.mxu1 %v17282_v17 }
 0x283   :  { %v15087_v33 = vadd.f32 %v15086_v21, %v15085_v45  ;;  %v15151_v23 = vadd.f32 %v15150_v27, %v15149_v55  ;;  %15268 = vmatprep.subr.bf16.mxu0 %v17283_v39  ;;  %15757 = vmatprep.subr.bf16.mxu1 %v19645_v34  ;;  %v19648_v5 = vadd.f32 %v15148_v62, %v15084_v60 }
 0x284   :  { %4463 = vmatmul.mubr.bf16.gmra.mrb[96].mxu0 %v19450_v63  ;;  %4237 = vmatmul.mubr.bf16.gmra.mrb[80].mxu1 %v19654_v61 }
 0x285   :  { %4472 = vmatprep.mubr.bf16.mxu0 %v19459_v12  ;;  %4246 = vmatprep.mubr.bf16.mxu1 %v22604_v24  ;;  %v19659_v3 = vadd.f32 %v15151_v23, %v15087_v33  ;;  %v19667_v12 = vld [vmem:[%s22322_s0 + $0xd8] ss:$20 sps:$4 sm:$0xff]  }
 0x287   :  { %v15088_v2 = vpop.f32.mrb[40].mxu0  ;;  %v15152_v18 = vpop.f32.mrb[40].mxu1 }
 0x288   :  { %v15089_v17 = vpop.f32.mrb[41].mxu0  ;;  %v15153_v39 = vpop.f32.mrb[41].mxu1 }
 0x289   :  { %v15091_v32 = vpop.f32.mrb[42].mxu0  ;;  %v15155_v40 = vpop.f32.mrb[42].mxu1  ;;  %v15090_v63 = vadd.f32 %v15089_v17, %v15088_v2  ;;  %v15154_v46 = vadd.f32 %v15153_v39, %v15152_v18 }
 0x28a   :  { %v15092_v0 = vpop.f32.mrb[43].mxu0  ;;  %v15156_v60 = vpop.f32.mrb[43].mxu1 }
 0x28b   :  { %v19661_v62 = vadd.f32 %v15154_v46, %v15090_v63  ;;  %v15093_v45 = vadd.f32 %v15092_v0, %v15091_v32  ;;  %v15157_v55 = vadd.f32 %v15156_v60, %v15155_v40 }
 0x28c   :  { %4473 = vmatmul.mubr.bf16.gmra.mrb[100].mxu0 %v19484_v37  ;;  %4247 = vmatmul.mubr.bf16.gmra.mrb[84].mxu1 %v19667_v12 }
 0x28d   :  { %4482 = vmatprep.mubr.bf16.mxu0 %v19493_v50  ;;  %4256 = vmatprep.mubr.bf16.mxu1 %v22604_v24  ;;  %v19672_v21 = vadd.f32 %v15157_v55, %v15093_v45  ;;  %v19680_v50 = vld [vmem:[%s22322_s0 + $0x100] ss:$20 sps:$4 sm:$0xff]  }
 0x28f   :  { %v15094_v27 = vpop.f32.mrb[44].mxu0  ;;  %v15158_v33 = vpop.f32.mrb[44].mxu1 }
 0x290   :  { %v15095_v23 = vpop.f32.mrb[45].mxu0  ;;  %v15159_v2 = vpop.f32.mrb[45].mxu1 }
 0x291   :  { %v15096_v18 = vadd.f32 %v15095_v23, %v15094_v27  ;;  %v15160_v17 = vadd.f32 %v15159_v2, %v15158_v33  ;;  %v15097_v37 = vpop.f32.mrb[46].mxu0  ;;  %v15161_v39 = vpop.f32.mrb[46].mxu1 }
 0x292   :  { %v15098_v32 = vpop.f32.mrb[47].mxu0  ;;  %v15162_v40 = vpop.f32.mrb[47].mxu1 }
 0x293   :  { %v15099_v63 = vadd.f32 %v15098_v32, %v15097_v37  ;;  %v15163_v46 = vadd.f32 %v15162_v40, %v15161_v39  ;;  %v19674_v0 = vadd.f32 %v15160_v17, %v15096_v18 }
 0x294   :  { %4483 = vmatmul.mubr.bf16.gmra.mrb[104].mxu0 %v19518_v53  ;;  %4257 = vmatmul.mubr.bf16.gmra.mrb[88].mxu1 %v19680_v50 }
 0x295   :  { %4492 = vmatprep.mubr.bf16.mxu0 %v19527_v1  ;;  %4266 = vmatprep.mubr.bf16.mxu1 %v22604_v24  ;;  %v19685_v60 = vadd.f32 %v15163_v46, %v15099_v63  ;;  %v19693_v1 = vld [vmem:[%s22322_s0 + $0x128] ss:$20 sps:$4 sm:$0xff]   ;;  %v19700_v63 = vld [vmem:[%s22322_s0 + $0x4] ss:$20 sps:$4 sm:$0xff]  }
 0x297   :  { %v15100_v45 = vpop.f32.mrb[48].mxu0  ;;  %v15164_v55 = vpop.f32.mrb[48].mxu1 }
 0x298   :  { %v15101_v27 = vpop.f32.mrb[49].mxu0  ;;  %v15165_v33 = vpop.f32.mrb[49].mxu1 }
 0x299   :  { %v15103_v23 = vpop.f32.mrb[50].mxu0  ;;  %v15167_v2 = vpop.f32.mrb[50].mxu1  ;;  %v15102_v53 = vadd.f32 %v15101_v27, %v15100_v45  ;;  %v15166_v18 = vadd.f32 %v15165_v33, %v15164_v55  ;;  %v17284_v55 = vld [vmem:[#allocation3 + $0x8d0] ss:$20 sps:$4 sm:$0xff]  }
 0x29a   :  { %v15104_v17 = vpop.f32.mrb[51].mxu0  ;;  %v15168_v37 = vpop.f32.mrb[51].mxu1 }
 0x29b   :  { %v19687_v39 = vadd.f32 %v15166_v18, %v15102_v53  ;;  %v15105_v32 = vadd.f32 %v15104_v17, %v15103_v23  ;;  %v15169_v40 = vadd.f32 %v15168_v37, %v15167_v2 }
 0x29c   :  { %4493 = vmatmul.mubr.bf16.gmra.mrb[108].mxu0 %v19552_v59  ;;  %4267 = vmatmul.mubr.bf16.gmra.mrb[92].mxu1 %v19693_v1 }
 0x29d   :  { %4535 = vmatprep.mubr.bf16.mxu0 %v22604_v24  ;;  %4648 = vmatprep.mubr.bf16.mxu1 %v19700_v63  ;;  %v19703_v46 = vadd.f32 %v15169_v40, %v15105_v32  ;;  %v18427_v32 = vld [vmem:[%s22322_s0] ss:$20 sps:$4 sm:$0xff]   ;;  %v17287_v40 = vld [vmem:[#allocation3 + $0x8f8] ss:$20 sps:$4 sm:$0xff]  }
 0x29f   :  { %v15106_v45 = vpop.f32.mrb[52].mxu0  ;;  %v15170_v59 = vpop.f32.mrb[52].mxu1 }
 0x2a0   :  { %v15107_v27 = vpop.f32.mrb[53].mxu0  ;;  %v15171_v33 = vpop.f32.mrb[53].mxu1 }
 0x2a1   :  { %v15108_v23 = vadd.f32 %v15107_v27, %v15106_v45  ;;  %v15172_v2 = vadd.f32 %v15171_v33, %v15170_v59  ;;  %v15109_v53 = vpop.f32.mrb[54].mxu0  ;;  %v15173_v18 = vpop.f32.mrb[54].mxu1  ;;  %v18428_v59 = vld [vmem:[%s22322_s0 + $0x2c] ss:$20 sps:$4 sm:$0xff]  }
 0x2a2   :  { %v15110_v17 = vpop.f32.mrb[55].mxu0  ;;  %v15174_v37 = vpop.f32.mrb[55].mxu1  ;;  %v17289_v27 = vld [vmem:[#allocation3 + $0xa60] ss:$20 sps:$4 sm:$0xff]  }
 0x2a3   :  { %v15111_v25 = vadd.f32 %v15110_v17, %v15109_v53  ;;  %v15175_v22 = vadd.f32 %v15174_v37, %v15173_v18  ;;  %v19705_v35 = vadd.f32 %v15172_v2, %v15108_v23  ;;  %v17290_v37 = vld [vmem:[#allocation3 + $0x920] ss:$20 sps:$4 sm:$0xff]  }
 0x2a4   :  { %4536 = vmatmul.mubr.bf16.vlgmr.msra.gmra.mrb[80].mxu0 %v19577_v19  ;;  %4649 = vmatmul.mubr.bf16.vlgmr.msra.gmra.mrb[96].mxu1 %v18427_v32  ;;  %v17291_v19 = vld [vmem:[#allocation3 + $0xba0] ss:$20 sps:$4 sm:$0xff]   ;;  %v17292_v32 = vld [vmem:[#allocation3 + $0xa88] ss:$20 sps:$4 sm:$0xff]  }
 0x2a5   :  { %15269 = vmatpush3.bf16.msra.mxu0 %v17284_v55  ;;  %15758 = vmatpush3.bf16.msra.mxu1 %v19645_v34  ;;  %v19712_v45 = vadd.f32 %v15175_v22, %v15111_v25 }
 0x2a6   :  { %4545 = vmatprep.mubr.bf16.mxu0 %v22604_v24  ;;  %4656 = vmatprep.mubr.bf16.mxu1 %v18428_v59  ;;  %v17294_v59 = vld [vmem:[#allocation3 + $0xbc8] ss:$20 sps:$4 sm:$0xff]  }
 0x2a7   :  { %v15112_v33 = vpop.f32.mrb[56].mxu0  ;;  %v15176_v23 = vpop.f32.mrb[56].mxu1  ;;  %15270 = vmatprep.subr.bf16.mxu0 %v17286_v56  ;;  %15759 = vmatprep.subr.bf16.mxu1 %v17288_v29 }
 0x2a8   :  { %v15113_v2 = vpop.f32.mrb[57].mxu0  ;;  %v15177_v55 = vpop.f32.mrb[57].mxu1 }
 0x2a9   :  { %v15115_v53 = vpop.f32.mrb[58].mxu0  ;;  %v15179_v34 = vpop.f32.mrb[58].mxu1  ;;  %15271 = vmatpush3.bf16.msra.mxu0 %v17287_v40  ;;  %15760 = vmatpush3.bf16.msra.mxu1 %v17288_v29  ;;  %v15114_v22 = vadd.f32 %v15113_v2, %v15112_v33  ;;  %v15178_v25 = vadd.f32 %v15177_v55, %v15176_v23  ;;  %v18429_v40 = vld [vmem:[%s22322_s0 + $0x28] ss:$20 sps:$4 sm:$0xff]   ;;  %v17295_v23 = vld [vmem:[#allocation3 + $0xab0] ss:$20 sps:$4 sm:$0xff]  }
 0x2aa   :  { %v15116_v18 = vpop.f32.mrb[59].mxu0  ;;  %v15180_v17 = vpop.f32.mrb[59].mxu1  ;;  %15272 = vmatprep.subr.bf16.mxu0 %v17289_v27  ;;  %15761 = vmatprep.subr.bf16.mxu1 %v17291_v19  ;;  %v18430_v29 = vld [vmem:[%s22322_s0 + $0x54] ss:$20 sps:$4 sm:$0xff]   ;;  %v17297_v2 = vld [vmem:[#allocation3 + $0xbf0] ss:$20 sps:$4 sm:$0xff]  }
 0x2ab   :  { %v19718_v41 = vadd.f32 %v15178_v25, %v15114_v22  ;;  %v15117_v9 = vadd.f32 %v15116_v18, %v15115_v53  ;;  %v15181_v56 = vadd.f32 %v15180_v17, %v15179_v34  ;;  %v17293_v27 = vld [vmem:[#allocation3 + $0x948] ss:$20 sps:$4 sm:$0xff]  }
 0x2ac   :  { %4546 = vmatmul.mubr.bf16.gmra.mrb[84].mxu0 %v19602_v26  ;;  %4657 = vmatmul.mubr.bf16.gmra.mrb[100].mxu1 %v18429_v40 }
 0x2ad   :  { %4555 = vmatprep.mubr.bf16.mxu0 %v22604_v24  ;;  %4664 = vmatprep.mubr.bf16.mxu1 %v18430_v29  ;;  %v19728_v33 = vadd.f32 %v15181_v56, %v15117_v9  ;;  %v17296_v9 = vld [vmem:[#allocation3 + $0x970] ss:$20 sps:$4 sm:$0xff]   ;;  %v17300_v29 = vld [vmem:[#allocation3 + $0xc18] ss:$20 sps:$4 sm:$0xff]  }
 0x2ae   :  { %15273 = vmatpush3.bf16.msra.mxu0 %v17290_v37  ;;  %15762 = vmatpush3.bf16.msra.mxu1 %v17291_v19  ;;  %v17298_v19 = vld [vmem:[#allocation3 + $0xad8] ss:$20 sps:$4 sm:$0xff]  }
 0x2af   :  { %v15118_v26 = vpop.f32.mrb[60].mxu0  ;;  %v15182_v55 = vpop.f32.mrb[60].mxu1  ;;  %15274 = vmatprep.subr.bf16.mxu0 %v17292_v32  ;;  %15763 = vmatprep.subr.bf16.mxu1 %v17294_v59  ;;  %v18431_v32 = vld [vmem:[%s22322_s0 + $0x50] ss:$20 sps:$4 sm:$0xff]  }
 0x2b0   :  { %v15119_v53 = vpop.f32.mrb[61].mxu0  ;;  %v15183_v34 = vpop.f32.mrb[61].mxu1 }
 0x2b1   :  { %v15120_v22 = vadd.f32 %v15119_v53, %v15118_v26  ;;  %v15184_v25 = vadd.f32 %v15183_v34, %v15182_v55  ;;  %v15121_v18 = vpop.f32.mrb[62].mxu0  ;;  %v15185_v17 = vpop.f32.mrb[62].mxu1  ;;  %v17301_v26 = vld [vmem:[#allocation3 + $0xb00] ss:$20 sps:$4 sm:$0xff]  }
 0x2b2   :  { %v15122_v40 = vpop.f32.mrb[63].mxu0  ;;  %v15186_v8 = vpop.f32.mrb[63].mxu1  ;;  %15275 = vmatpush3.bf16.msra.mxu0 %v17293_v27  ;;  %15764 = vmatpush3.bf16.msra.mxu1 %v17294_v59  ;;  %v18432_v59 = vld [vmem:[%s22322_s0 + $0x7c] ss:$20 sps:$4 sm:$0xff]   ;;  %v17299_v27 = vld [vmem:[#allocation3 + $0x998] ss:$20 sps:$4 sm:$0xff]  }
 0x2b3   :  { %v15123_v56 = vadd.f32 %v15122_v40, %v15121_v18  ;;  %v15187_v37 = vadd.f32 %v15186_v8, %v15185_v17  ;;  %15276 = vmatprep.subr.bf16.mxu0 %v17295_v23  ;;  %15765 = vmatprep.subr.bf16.mxu1 %v17297_v2  ;;  %v19730_v48 = vadd.f32 %v15184_v25, %v15120_v22  ;;  %v17303_v55 = vld [vmem:[#allocation3 + $0xc40] ss:$20 sps:$4 sm:$0xff]   ;;  %v17304_v40 = vld [vmem:[#allocation3 + $0xb28] ss:$20 sps:$4 sm:$0xff]  }
 0x2b4   :  { %4556 = vmatmul.mubr.bf16.gmra.mrb[88].mxu0 %v19627_v13  ;;  %4665 = vmatmul.mubr.bf16.gmra.mrb[104].mxu1 %v18431_v32  ;;  %v17302_v17 = vld [vmem:[#allocation3 + $0x9c0] ss:$20 sps:$4 sm:$0xff]  }
 0x2b5   :  { %4565 = vmatprep.mubr.bf16.mxu0 %v22604_v24  ;;  %4672 = vmatprep.mubr.bf16.mxu1 %v18432_v59  ;;  %v19740_v8 = vadd.f32 %v15187_v37, %v15123_v56 }
 0x2b6   :  { %15277 = vmatpush3.bf16.msra.mxu0 %v17296_v9  ;;  %15766 = vmatpush3.bf16.msra.mxu1 %v17297_v2  ;;  %v17306_v9 = vld [vmem:[#allocation3 + $0xc68] ss:$20 sps:$4 sm:$0xff]  }
 0x2b7   :  { %v15743_v23 = vpop.f32.mrb[64].mxu0  ;;  %15278 = vmatprep.subr.bf16.mxu0 %v17298_v19  ;;  %15767 = vmatprep.subr.bf16.mxu1 %v17300_v29  ;;  %v17312_v19 = vld [vmem:[#allocation3 + $0xc8c] ss:$20 sps:$4 sm:$0xff]  }
 0x2b8   :  { %v2594_v53 = vpop.f32.mrb[65].mxu0  ;;  %v19743_v34 = vadd.f32 %v15743_v23, %v19648_v5  ;;  %v18434_v5 = vld [vmem:[%s22322_s0 + $0xa4] ss:$20 sps:$4 sm:$0xff]  }
 0x2b9   :  { %v15744_v22 = vpop.f32.mrb[66].mxu0  ;;  %v19746_v25 = vadd.f32 %v2594_v53, %v19632_v28  ;;  %v18433_v28 = vld [vmem:[%s22322_s0 + $0x78] ss:$20 sps:$4 sm:$0xff]  }
 0x2ba   :  { %v2597_v18 = vpop.f32.mrb[67].mxu0  ;;  %15279 = vmatpush3.bf16.msra.mxu0 %v17299_v27  ;;  %15768 = vmatpush3.bf16.msra.mxu1 %v17300_v29  ;;  %v19749_v2 = vadd.f32 %v15744_v22, %v19659_v3  ;;  %v17305_v3 = vld [vmem:[#allocation3 + $0x9e8] ss:$20 sps:$4 sm:$0xff]  }
 0x2bb   :  { %15280 = vmatprep.subr.bf16.mxu0 %v17301_v26  ;;  %15769 = vmatprep.subr.bf16.mxu1 %v17303_v55  ;;  %v19752_v56 = vadd.f32 %v2597_v18, %v19643_v43  ;;  %v17309_v43 = vld [vmem:[#allocation3 + $0xc84] ss:$20 sps:$4 sm:$0xff]  }
 0x2bc   :  { %4566 = vmatmul.mubr.bf16.gmra.mrb[92].mxu0 %v19638_v15  ;;  %4673 = vmatmul.mubr.bf16.gmra.mrb[108].mxu1 %v18433_v28  ;;  %v18437_v28 = vld [vmem:[%s22322_s0 + $0xc8] ss:$20 sps:$4 sm:$0xff]  }
 0x2bd   :  { %22621 = vst [vmem:[#allocation86_spill] sm:$0xff] %v19752_v56  ;;  %4575 = vmatprep.mubr.bf16.mxu0 %v22604_v24  ;;  %4680 = vmatprep.mubr.bf16.mxu1 %v18434_v5 }
 0x2be   :  { %15281 = vmatpush3.bf16.msra.mxu0 %v17302_v17  ;;  %15770 = vmatpush3.bf16.msra.mxu1 %v17303_v55 }
 0x2bf   :  { %v15747_v37 = vpop.f32.mrb[68].mxu0  ;;  %15282 = vmatprep.subr.bf16.mxu0 %v17304_v40  ;;  %15771 = vmatprep.subr.bf16.mxu1 %v17306_v9 }
 0x2c0   :  { %v2610_v29 = vpop.f32.mrb[69].mxu0  ;;  %v19763_v32 = vadd.f32 %v15747_v37, %v19674_v0  ;;  %v18435_v0 = vld [vmem:[%s22322_s0 + $0xa0] ss:$20 sps:$4 sm:$0xff]  }
 0x2c1   :  { %v15748_v59 = vpop.f32.mrb[70].mxu0  ;;  %v19766_v27 = vadd.f32 %v2610_v29, %v19661_v62  ;;  %v18436_v62 = vld [vmem:[%s22322_s0 + $0xcc] ss:$20 sps:$4 sm:$0xff]   ;;  %v18439_v29 = vld [vmem:[%s22322_s0 + $0xf0] ss:$20 sps:$4 sm:$0xff]  }
 0x2c2   :  { %v2613_v23 = vpop.f32.mrb[71].mxu0  ;;  %15283 = vmatpush3.bf16.msra.mxu0 %v17305_v3  ;;  %15772 = vmatpush3.bf16.msra.mxu1 %v17306_v9  ;;  %v19769_v26 = vadd.f32 %v15748_v59, %v19685_v60  ;;  %v17307_v59 = vld [vmem:[#allocation3 + $0xc80] ss:$20 sps:$4 sm:$0xff]  }
 0x2c3   :  { %6268 = vmatprep.subr.bf16.mxu0 %v17309_v43  ;;  %6607 = vmatprep.subr.bf16.mxu1 %v17312_v19  ;;  %v19772_v55 = vadd.f32 %v2613_v23, %v19672_v21  ;;  %v17310_v23 = vld [vmem:[#allocation3 + $0xc88] ss:$20 sps:$4 sm:$0xff]  }
 0x2c4   :  { %4576 = vmatmul.mubr.bf16.gmra.mrb[96].mxu0 %v19654_v61  ;;  %4681 = vmatmul.mubr.bf16.gmra.mrb[112].mxu1 %v18435_v0  ;;  %v17315_v0 = vld [vmem:[#allocation3 + $0xcac] ss:$20 sps:$4 sm:$0xff]  }
 0x2c5   :  { %22622 = vst [vmem:[#allocation87_spill] sm:$0xff] %v19772_v55  ;;  %4585 = vmatprep.mubr.bf16.mxu0 %v22604_v24  ;;  %4688 = vmatprep.mubr.bf16.mxu1 %v18436_v62  ;;  %v17318_v62 = vld [vmem:[#allocation3 + $0xcb4] ss:$20 sps:$4 sm:$0xff]  }
 0x2c7   :  { %v15751_v60 = vpop.f32.mrb[72].mxu0 }
 0x2c8   :  { %v2626_v53 = vpop.f32.mrb[73].mxu0  ;;  %v19783_v22 = vadd.f32 %v15751_v60, %v19705_v35  ;;  %v18438_v35 = vld [vmem:[%s22322_s0 + $0xf4] ss:$20 sps:$4 sm:$0xff]  }
 0x2c9   :  { %v15752_v21 = vpop.f32.mrb[74].mxu0  ;;  %v19786_v18 = vadd.f32 %v2626_v53, %v19687_v39  ;;  %v18444_v60 = vld [vmem:[%s22322_s0 + $0x8] ss:$20 sps:$4 sm:$0xff]   ;;  %v18445_v53 = vld [vmem:[%s22322_s0 + $0x38] ss:$20 sps:$4 sm:$0xff]  }
 0x2ca   :  { %v2629_v17 = vpop.f32.mrb[75].mxu0  ;;  %v19789_v40 = vadd.f32 %v15752_v21, %v19712_v45  ;;  %v17313_v21 = vld [vmem:[#allocation3 + $0xca8] ss:$20 sps:$4 sm:$0xff]  }
 0x2cb   :  { %v19792_v9 = vadd.f32 %v2629_v17, %v19703_v46  ;;  %v17316_v17 = vld [vmem:[#allocation3 + $0xcb0] ss:$20 sps:$4 sm:$0xff]  }
 0x2cc   :  { %4586 = vmatmul.mubr.bf16.gmra.mrb[100].mxu0 %v19667_v12  ;;  %4689 = vmatmul.mubr.bf16.gmra.mrb[116].mxu1 %v18437_v28  ;;  %v17321_v28 = vld [vmem:[#allocation3 + $0xcd4] ss:$20 sps:$4 sm:$0xff]  }
 0x2cd   :  { %4595 = vmatprep.mubr.bf16.mxu0 %v22604_v24  ;;  %4696 = vmatprep.mubr.bf16.mxu1 %v18438_v35  ;;  %v17324_v35 = vld [vmem:[#allocation3 + $0xcdc] ss:$20 sps:$4 sm:$0xff]  }
 0x2cf   :  { %v15755_v39 = vpop.f32.mrb[76].mxu0 }
 0x2d0   :  { %v2642_v45 = vpop.f32.mrb[77].mxu0  ;;  %v19803_v5 = vadd.f32 %v15755_v39, %v19730_v48  ;;  %v18441_v48 = vld [vmem:[%s22322_s0 + $0x118] ss:$20 sps:$4 sm:$0xff]   ;;  %v18446_v39 = vld [vmem:[%s22322_s0 + $0x34] ss:$20 sps:$4 sm:$0xff]  }
 0x2d1   :  { %v15756_v46 = vpop.f32.mrb[78].mxu0  ;;  %v19806_v3 = vadd.f32 %v2642_v45, %v19718_v41  ;;  %v18440_v41 = vld [vmem:[%s22322_s0 + $0x11c] ss:$20 sps:$4 sm:$0xff]  }
 0x2d2   :  { %v2645_v37 = vpop.f32.mrb[79].mxu0  ;;  %v19809_v43 = vadd.f32 %v15756_v46, %v19740_v8  ;;  %v18443_v8 = vld [vmem:[%s22322_s0 + $0x10] ss:$20 sps:$4 sm:$0xff]   ;;  %v17322_v46 = vld [vmem:[#allocation3 + $0xcd8] ss:$20 sps:$4 sm:$0xff]  }
 0x2d3   :  { %v19812_v19 = vadd.f32 %v2645_v37, %v19728_v33  ;;  %v18442_v33 = vld [vmem:[%s22322_s0 + $0xc] ss:$20 sps:$4 sm:$0xff]   ;;  %v17319_v45 = vld [vmem:[#allocation3 + $0xcd0] ss:$20 sps:$4 sm:$0xff]  }
 0x2d4   :  { %22623 = vst [vmem:[#allocation88_spill] sm:$0xff] %v19809_v43  ;;  %4596 = vmatmul.mubr.bf16.gmra.mrb[104].mxu0 %v19680_v50  ;;  %4697 = vmatmul.mubr.bf16.gmra.mrb[120].mxu1 %v18439_v29  ;;  %v17327_v37 = vld [vmem:[#allocation3 + $0xcfc] ss:$20 sps:$4 sm:$0xff]   ;;  %v17330_v29 = vld [vmem:[#allocation3 + $0xd04] ss:$20 sps:$4 sm:$0xff]  }
 0x2d5   :  { %22624 = vst [vmem:[#allocation89_spill] sm:$0xff] %v19812_v19  ;;  %4605 = vmatprep.mubr.bf16.mxu0 %v22604_v24  ;;  %4704 = vmatprep.mubr.bf16.mxu1 %v18440_v41  ;;  %v18447_v41 = vld [vmem:[%s22322_s0 + $0x30] ss:$20 sps:$4 sm:$0xff]  }
 0x2dc   :  { %4606 = vmatmul.mubr.bf16.gmra.mrb[108].mxu0 %v19693_v1  ;;  %4705 = vmatmul.mubr.bf16.gmra.mrb[124].mxu1 %v18441_v48  ;;  %v17325_v48 = vld [vmem:[#allocation3 + $0xcf8] ss:$20 sps:$4 sm:$0xff]  }
 0x2dd   :  { %4745 = vmatprep.mubr.bf16.mxu0 %v18442_v33  ;;  %15773 = vmatprep.mubr.bf16.mxu1 %v18443_v8  ;;  %v17328_v33 = vld [vmem:[#allocation3 + $0xd00] ss:$20 sps:$4 sm:$0xff]   ;;  %v17333_v8 = vld [vmem:[#allocation3 + $0xd24] ss:$20 sps:$4 sm:$0xff]  }
 0x2e4   :  { %4746 = vmatmul.mubr.bf16.vlgmr.msra.gmra.mrb[112].mxu0 %v18444_v60  ;;  %15774 = vmatmul.mubr.bf16.vlgmr.msra.gmra.mrb[128].mxu1 %v18445_v53  ;;  %v17342_v60 = vld [vmem:[#allocation3 + $0xd54] ss:$20 sps:$4 sm:$0xff]   ;;  %v17340_v53 = vld [vmem:[#allocation3 + $0xd50] ss:$20 sps:$4 sm:$0xff]  }
 0x2e5   :  { %6269 = vmatpush1.bf16.msra.mxu0 %v17307_v59  ;;  %6608 = vmatpush1.bf16.msra.mxu1 %v17310_v23  ;;  %v17336_v59 = vld [vmem:[#allocation3 + $0xd2c] ss:$20 sps:$4 sm:$0xff]  }
 0x2e6   :  { %6270 = vmatprep.subr.bf16.mxu0 %v17315_v0  ;;  %6609 = vmatprep.subr.bf16.mxu1 %v17318_v62  ;;  %v17331_v23 = vld [vmem:[#allocation3 + $0xd20] ss:$20 sps:$4 sm:$0xff]   ;;  %v17334_v0 = vld [vmem:[#allocation3 + $0xd28] ss:$20 sps:$4 sm:$0xff]  }
 0x2e7   :  { %4753 = vmatprep.mubr.bf16.mxu0 %v18446_v39  ;;  %15777 = vmatprep.mubr.bf16.mxu1 %v19627_v13  ;;  %v18448_v13 = vld [vmem:[%s22322_s0 + $0x5c] ss:$20 sps:$4 sm:$0xff]   ;;  %v17339_v62 = vld [vmem:[#allocation3 + $0xd4c] ss:$20 sps:$4 sm:$0xff]  }
 0x2e8   :  { %v17346_v39 = vld [vmem:[#allocation3 + $0xd78] ss:$20 sps:$4 sm:$0xff]  }
 0x2e9   :  { %6271 = vmatpush1.bf16.msra.mxu0 %v17313_v21  ;;  %6610 = vmatpush1.bf16.msra.mxu1 %v17316_v17  ;;  %v18449_v21 = vld [vmem:[%s22322_s0 + $0x58] ss:$20 sps:$4 sm:$0xff]   ;;  %v17345_v17 = vld [vmem:[#allocation3 + $0xd74] ss:$20 sps:$4 sm:$0xff]  }
 0x2ea   :  { %6272 = vmatprep.subr.bf16.mxu0 %v17321_v28  ;;  %6611 = vmatprep.subr.bf16.mxu1 %v17324_v35  ;;  %v17348_v28 = vld [vmem:[#allocation3 + $0xd7c] ss:$20 sps:$4 sm:$0xff]  }
 0x2eb   :  { %v17343_v35 = vld [vmem:[#allocation3 + $0xd70] ss:$20 sps:$4 sm:$0xff]  }
 0x2ec   :  { %4754 = vmatmul.mubr.bf16.gmra.mrb[116].mxu0 %v18447_v41  ;;  %15778 = vmatmul.mubr.bf16.gmra.mrb[132].mxu1 %v19638_v15  ;;  %v17337_v15 = vld [vmem:[#allocation3 + $0xd48] ss:$20 sps:$4 sm:$0xff]   ;;  %v17357_v41 = vld [vmem:[#allocation3 + $0xdc4] ss:$20 sps:$4 sm:$0xff]  }
 0x2ed   :  { %6273 = vmatpush1.bf16.msra.mxu0 %v17319_v45  ;;  %6612 = vmatpush1.bf16.msra.mxu1 %v17322_v46  ;;  %v17351_v45 = vld [vmem:[#allocation3 + $0xd9c] ss:$20 sps:$4 sm:$0xff]   ;;  %v17354_v46 = vld [vmem:[#allocation3 + $0xda4] ss:$20 sps:$4 sm:$0xff]  }
 0x2ee   :  { %6274 = vmatprep.subr.bf16.mxu0 %v17327_v37  ;;  %6613 = vmatprep.subr.bf16.mxu1 %v17330_v29  ;;  %v17352_v37 = vld [vmem:[#allocation3 + $0xda0] ss:$20 sps:$4 sm:$0xff]  }
 0x2ef   :  { %4761 = vmatprep.mubr.bf16.mxu0 %v18448_v13  ;;  %15781 = vmatprep.mubr.bf16.mxu1 %v19654_v61  ;;  %v18450_v61 = vld [vmem:[%s22322_s0 + $0x84] ss:$20 sps:$4 sm:$0xff]   ;;  %v18451_v29 = vld [vmem:[%s22322_s0 + $0x80] ss:$20 sps:$4 sm:$0xff]  }
 0x2f0   :  { %v17366_v13 = vld [vmem:[#allocation3 + $0xdf4] ss:$20 sps:$4 sm:$0xff]  }
 0x2f1   :  { %6275 = vmatpush1.bf16.msra.mxu0 %v17325_v48  ;;  %6614 = vmatpush1.bf16.msra.mxu1 %v17328_v33  ;;  %v17360_v48 = vld [vmem:[#allocation3 + $0xdcc] ss:$20 sps:$4 sm:$0xff]  }
 0x2f2   :  { %6276 = vmatprep.subr.bf16.mxu0 %v17333_v8  ;;  %6615 = vmatprep.subr.bf16.mxu1 %v17336_v59  ;;  %v17355_v33 = vld [vmem:[#allocation3 + $0xdc0] ss:$20 sps:$4 sm:$0xff]   ;;  %v17358_v8 = vld [vmem:[#allocation3 + $0xdc8] ss:$20 sps:$4 sm:$0xff]  }
 0x2f3   :  { %v17363_v59 = vld [vmem:[#allocation3 + $0xdec] ss:$20 sps:$4 sm:$0xff]  }
 0x2f4   :  { %4762 = vmatmul.mubr.bf16.gmra.mrb[120].mxu0 %v18449_v21  ;;  %15782 = vmatmul.mubr.bf16.gmra.mrb[136].mxu1 %v19667_v12  ;;  %v17349_v12 = vld [vmem:[#allocation3 + $0xd98] ss:$20 sps:$4 sm:$0xff]   ;;  %v17375_v21 = vld [vmem:[#allocation3 + $0xe3c] ss:$20 sps:$4 sm:$0xff]  }
 0x2f5   :  { %6277 = vmatpush1.bf16.msra.mxu0 %v17331_v23  ;;  %6616 = vmatpush1.bf16.msra.mxu1 %v17334_v0  ;;  %v17364_v23 = vld [vmem:[#allocation3 + $0xdf0] ss:$20 sps:$4 sm:$0xff]   ;;  %v18453_v0 = vld [vmem:[%s22322_s0 + $0xa8] ss:$20 sps:$4 sm:$0xff]  }
 0x2f6   :  { %6278 = vmatprep.subr.bf16.mxu0 %v17339_v62  ;;  %6617 = vmatprep.subr.bf16.mxu1 %v17342_v60  ;;  %v17369_v62 = vld [vmem:[#allocation3 + $0xe14] ss:$20 sps:$4 sm:$0xff]   ;;  %v17372_v60 = vld [vmem:[#allocation3 + $0xe1c] ss:$20 sps:$4 sm:$0xff]  }
 0x2f7   :  { %4769 = vmatprep.mubr.bf16.mxu0 %v18450_v61  ;;  %15785 = vmatprep.mubr.bf16.mxu1 %v19680_v50  ;;  %v18452_v50 = vld [vmem:[%s22322_s0 + $0xac] ss:$20 sps:$4 sm:$0xff]  }
 0x2f8   :  { %v17376_v61 = vld [vmem:[#allocation3 + $0xe40] ss:$20 sps:$4 sm:$0xff]  }
 0x2f9   :  { %6279 = vmatpush1.bf16.msra.mxu0 %v17337_v15  ;;  %6618 = vmatpush1.bf16.msra.mxu1 %v17340_v53  ;;  %v17367_v15 = vld [vmem:[#allocation3 + $0xe10] ss:$20 sps:$4 sm:$0xff]   ;;  %v17370_v53 = vld [vmem:[#allocation3 + $0xe18] ss:$20 sps:$4 sm:$0xff]  }
 0x2fa   :  { %6280 = vmatprep.subr.bf16.mxu0 %v17345_v17  ;;  %6619 = vmatprep.subr.bf16.mxu1 %v17348_v28  ;;  %v17378_v17 = vld [vmem:[#allocation3 + $0xe44] ss:$20 sps:$4 sm:$0xff]  }
 0x2fb   :  { %v17373_v28 = vld [vmem:[#allocation3 + $0xe38] ss:$20 sps:$4 sm:$0xff]  }
 0x2fc   :  { %4770 = vmatmul.mubr.bf16.gmra.mrb[124].mxu0 %v18451_v29  ;;  %15786 = vmatmul.mubr.bf16.gmra.mrb[140].mxu1 %v19693_v1  ;;  %v17361_v1 = vld [vmem:[#allocation3 + $0xde8] ss:$20 sps:$4 sm:$0xff]   ;;  %v17387_v29 = vld [vmem:[#allocation3 + $0xe8c] ss:$20 sps:$4 sm:$0xff]  }
 0x2fd   :  { %6281 = vmatpush1.bf16.msra.mxu0 %v17343_v35  ;;  %6620 = vmatpush1.bf16.msra.mxu1 %v17346_v39  ;;  %v18455_v35 = vld [vmem:[%s22322_s0 + $0xd0] ss:$20 sps:$4 sm:$0xff]  }
 0x2fe   :  { %6282 = vmatprep.subr.bf16.mxu0 %v17351_v45  ;;  %6621 = vmatprep.subr.bf16.mxu1 %v17354_v46  ;;  %v17381_v39 = vld [vmem:[#allocation3 + $0xe64] ss:$20 sps:$4 sm:$0xff]   ;;  %v17384_v45 = vld [vmem:[#allocation3 + $0xe6c] ss:$20 sps:$4 sm:$0xff]   ;;  %v18456_v46 = vld [vmem:[%s22322_s0 + $0xfc] ss:$20 sps:$4 sm:$0xff]  }
 0x2ff   :  { %4777 = vmatprep.mubr.bf16.mxu0 %v18452_v50  ;;  %6639 = vmatprep.mubr.bf16.mxu1 %v19700_v63  ;;  %v18454_v63 = vld [vmem:[%s22322_s0 + $0xd4] ss:$20 sps:$4 sm:$0xff]   ;;  %v17388_v50 = vld [vmem:[#allocation3 + $0xe90] ss:$20 sps:$4 sm:$0xff]  }
 0x301   :  { %6283 = vmatpush1.bf16.msra.mxu0 %v17349_v12  ;;  %6622 = vmatpush1.bf16.msra.mxu1 %v17352_v37  ;;  %v17379_v12 = vld [vmem:[#allocation3 + $0xe60] ss:$20 sps:$4 sm:$0xff]   ;;  %v17382_v37 = vld [vmem:[#allocation3 + $0xe68] ss:$20 sps:$4 sm:$0xff]  }
 0x302   :  { %6284 = vmatprep.subr.bf16.mxu0 %v17357_v41  ;;  %6623 = vmatprep.subr.bf16.mxu1 %v17360_v48  ;;  %v17390_v41 = vld [vmem:[#allocation3 + $0xe94] ss:$20 sps:$4 sm:$0xff]  }
 0x303   :  { %v17385_v48 = vld [vmem:[#allocation3 + $0xe88] ss:$20 sps:$4 sm:$0xff]  }
 0x304   :  { %4778 = vmatmul.mubr.bf16.gmra.mrb[128].mxu0 %v18453_v0  ;;  %v17399_v0 = vld [vmem:[#allocation3 + $0xedc] ss:$20 sps:$4 sm:$0xff]  }
 0x305   :  { %6285 = vmatpush1.bf16.msra.mxu0 %v17355_v33  ;;  %6624 = vmatpush1.bf16.msra.mxu1 %v17358_v8  ;;  %v18457_v33 = vld [vmem:[%s22322_s0 + $0xf8] ss:$20 sps:$4 sm:$0xff]   ;;  %v17393_v8 = vld [vmem:[#allocation3 + $0xeb4] ss:$20 sps:$4 sm:$0xff]  }
 0x306   :  { %6286 = vmatprep.subr.bf16.mxu0 %v17363_v59  ;;  %6625 = vmatprep.subr.bf16.mxu1 %v17366_v13  ;;  %v17396_v59 = vld [vmem:[#allocation3 + $0xebc] ss:$20 sps:$4 sm:$0xff]   ;;  %v19884_v13 = vld [vmem:[%s22322_s0 + $0x124] ss:$20 sps:$4 sm:$0xff]  }
 0x307   :  { %4785 = vmatprep.mubr.bf16.mxu0 %v18454_v63  ;;  %v19890_v63 = vld [vmem:[%s22322_s0 + $0x120] ss:$20 sps:$4 sm:$0xff]  }
 0x309   :  { %6287 = vmatpush1.bf16.msra.mxu0 %v17361_v1  ;;  %6626 = vmatpush1.bf16.msra.mxu1 %v17364_v23  ;;  %v17391_v1 = vld [vmem:[#allocation3 + $0xeb0] ss:$20 sps:$4 sm:$0xff]   ;;  %v17394_v23 = vld [vmem:[#allocation3 + $0xeb8] ss:$20 sps:$4 sm:$0xff]  }
 0x30a   :  { %6288 = vmatprep.subr.bf16.mxu0 %v17369_v62  ;;  %6627 = vmatprep.subr.bf16.mxu1 %v17372_v60  ;;  %v17402_v62 = vld [vmem:[#allocation3 + $0xee4] ss:$20 sps:$4 sm:$0xff]  }
 0x30b   :  { %v17397_v60 = vld [vmem:[#allocation3 + $0xed8] ss:$20 sps:$4 sm:$0xff]  }
 0x30c   :  { %4786 = vmatmul.mubr.bf16.gmra.mrb[132].mxu0 %v18455_v35  ;;  %v17411_v35 = vld [vmem:[#allocation3 + $0xf2c] ss:$20 sps:$4 sm:$0xff]  }
 0x30d   :  { %6289 = vmatpush1.bf16.msra.mxu0 %v17367_v15  ;;  %6628 = vmatpush1.bf16.msra.mxu1 %v17370_v53  ;;  %v17400_v15 = vld [vmem:[#allocation3 + $0xee0] ss:$20 sps:$4 sm:$0xff]   ;;  %v17405_v53 = vld [vmem:[#allocation3 + $0xf04] ss:$20 sps:$4 sm:$0xff]  }
 0x30e   :  { %6290 = vmatprep.subr.bf16.mxu0 %v17375_v21  ;;  %6629 = vmatprep.subr.bf16.mxu1 %v17378_v17  ;;  %v17408_v21 = vld [vmem:[#allocation3 + $0xf0c] ss:$20 sps:$4 sm:$0xff]   ;;  %v18460_v17 = vld [vmem:[%s22322_s0 + $0x4] ss:$20 sps:$4 sm:$0xff]  }
 0x30f   :  { %4793 = vmatprep.mubr.bf16.mxu0 %v18456_v46  ;;  %v17412_v46 = vld [vmem:[#allocation3 + $0xf30] ss:$20 sps:$4 sm:$0xff]  }
 0x311   :  { %6291 = vmatpush1.bf16.msra.mxu0 %v17373_v28  ;;  %6630 = vmatpush1.bf16.msra.mxu1 %v17376_v61  ;;  %v17403_v28 = vld [vmem:[#allocation3 + $0xf00] ss:$20 sps:$4 sm:$0xff]   ;;  %v17406_v61 = vld [vmem:[#allocation3 + $0xf08] ss:$20 sps:$4 sm:$0xff]  }
 0x312   :  { %6292 = vmatprep.subr.bf16.mxu0 %v17381_v39  ;;  %6631 = vmatprep.subr.bf16.mxu1 %v17384_v45  ;;  %v17414_v39 = vld [vmem:[#allocation3 + $0xf34] ss:$20 sps:$4 sm:$0xff]  }
 0x313   :  { %v17409_v45 = vld [vmem:[#allocation3 + $0xf28] ss:$20 sps:$4 sm:$0xff]  }
 0x314   :  { %4794 = vmatmul.mubr.bf16.gmra.mrb[136].mxu0 %v18457_v33  ;;  %v17423_v33 = vld [vmem:[#allocation3 + $0xf7c] ss:$20 sps:$4 sm:$0xff]  }
 0x315   :  { %6293 = vmatpush1.bf16.msra.mxu0 %v17379_v12  ;;  %6632 = vmatpush1.bf16.msra.mxu1 %v17382_v37  ;;  %v18461_v12 = vld [vmem:[%s22322_s0] ss:$20 sps:$4 sm:$0xff]  }
 0x316   :  { %6294 = vmatprep.subr.bf16.mxu0 %v17387_v29  ;;  %6633 = vmatprep.subr.bf16.mxu1 %v17390_v41  ;;  %v17417_v37 = vld [vmem:[#allocation3 + $0xf54] ss:$20 sps:$4 sm:$0xff]   ;;  %v17420_v29 = vld [vmem:[#allocation3 + $0xf5c] ss:$20 sps:$4 sm:$0xff]   ;;  %v18462_v41 = vld [vmem:[%s22322_s0 + $0x2c] ss:$20 sps:$4 sm:$0xff]  }
 0x317   :  { %4801 = vmatprep.mubr.bf16.mxu0 %v19884_v13 }
 0x319   :  { %6295 = vmatpush1.bf16.msra.mxu0 %v17385_v48  ;;  %6634 = vmatpush1.bf16.msra.mxu1 %v17388_v50  ;;  %v17415_v48 = vld [vmem:[#allocation3 + $0xf50] ss:$20 sps:$4 sm:$0xff]   ;;  %v17418_v50 = vld [vmem:[#allocation3 + $0xf58] ss:$20 sps:$4 sm:$0xff]  }
 0x31a   :  { %6296 = vmatprep.subr.bf16.mxu0 %v17393_v8  ;;  %6635 = vmatprep.subr.bf16.mxu1 %v17396_v59  ;;  %v17426_v8 = vld [vmem:[#allocation3 + $0xf84] ss:$20 sps:$4 sm:$0xff]  }
 0x31b   :  { %v17421_v59 = vld [vmem:[#allocation3 + $0xf78] ss:$20 sps:$4 sm:$0xff]  }
 0x31c   :  { %4802 = vmatmul.mubr.bf16.gmra.mrb[140].mxu0 %v19890_v63 }
 0x31d   :  { %6297 = vmatpush1.bf16.msra.mxu0 %v17391_v1  ;;  %6636 = vmatpush1.bf16.msra.mxu1 %v17394_v23  ;;  %v17424_v1 = vld [vmem:[#allocation3 + $0xf80] ss:$20 sps:$4 sm:$0xff]   ;;  %v18463_v23 = vld [vmem:[%s22322_s0 + $0x28] ss:$20 sps:$4 sm:$0xff]  }
 0x31e   :  { %6298 = vmatprep.subr.bf16.mxu0 %v17399_v0  ;;  %6637 = vmatprep.subr.bf16.mxu1 %v17402_v62  ;;  %v17429_v0 = vld [vmem:[#allocation3 + $0xfa4] ss:$20 sps:$4 sm:$0xff]   ;;  %v17432_v62 = vld [vmem:[#allocation3 + $0xfac] ss:$20 sps:$4 sm:$0xff]  }
 0x31f   :  { %6300 = vmatprep.mubr.bf16.mxu0 %v18460_v17  ;;  %v17438_v17 = vld [vmem:[#allocation3 + $0xfd4] ss:$20 sps:$4 sm:$0xff]  }
 0x321   :  { %6299 = vmatpush1.bf16.msra.mxu0 %v17397_v60  ;;  %6638 = vmatpush1.bf16.msra.mxu1 %v17400_v15  ;;  %v18464_v60 = vld [vmem:[%s22322_s0 + $0x54] ss:$20 sps:$4 sm:$0xff]  }
 0x322   :  { %6381 = vmatprep.subr.bf16.mxu0 %v17405_v53  ;;  %6720 = vmatprep.subr.bf16.mxu1 %v17408_v21  ;;  %v17427_v15 = vld [vmem:[#allocation3 + $0xfa0] ss:$20 sps:$4 sm:$0xff]   ;;  %v17430_v53 = vld [vmem:[#allocation3 + $0xfa8] ss:$20 sps:$4 sm:$0xff]  }
 0x323   :  { %v17435_v21 = vld [vmem:[#allocation3 + $0xfcc] ss:$20 sps:$4 sm:$0xff]  }
 0x324   :  { %6301 = vmatmul.mubr.bf16.vlgmr.msra.gmra.mrb[144].mxu0 %v18461_v12  ;;  %6640 = vmatmul.mubr.bf16.vlgmr.msra.gmra.mrb[144].mxu1 %v18461_v12  ;;  %v18466_v12 = vld [vmem:[%s22322_s0 + $0x7c] ss:$20 sps:$4 sm:$0xff]  }
 0x325   :  { %6382 = vmatpush1.bf16.msra.mxu0 %v17403_v28  ;;  %6721 = vmatpush1.bf16.msra.mxu1 %v17406_v61  ;;  %v17433_v28 = vld [vmem:[#allocation3 + $0xfc8] ss:$20 sps:$4 sm:$0xff]   ;;  %v17436_v61 = vld [vmem:[#allocation3 + $0xfd0] ss:$20 sps:$4 sm:$0xff]  }
 0x326   :  { %6383 = vmatprep.subr.bf16.mxu0 %v17411_v35  ;;  %6722 = vmatprep.subr.bf16.mxu1 %v17414_v39  ;;  %v18465_v35 = vld [vmem:[%s22322_s0 + $0x50] ss:$20 sps:$4 sm:$0xff]   ;;  %v17441_v39 = vld [vmem:[#allocation3 + $0xff4] ss:$20 sps:$4 sm:$0xff]  }
 0x327   :  { %6310 = vmatprep.mubr.bf16.mxu0 %v18462_v41  ;;  %6649 = vmatprep.mubr.bf16.mxu1 %v18462_v41 }
 0x329   :  { %6384 = vmatpush1.bf16.msra.mxu0 %v17409_v45  ;;  %6723 = vmatpush1.bf16.msra.mxu1 %v17412_v46  ;;  %v17444_v45 = vld [vmem:[#allocation3 + $0xffc] ss:$20 sps:$4 sm:$0xff]  }
 0x32a   :  { %6385 = vmatprep.subr.bf16.mxu0 %v17417_v37  ;;  %6724 = vmatprep.subr.bf16.mxu1 %v17420_v29  ;;  %v17439_v37 = vld [vmem:[#allocation3 + $0xff0] ss:$20 sps:$4 sm:$0xff]   ;;  %v17442_v29 = vld [vmem:[#allocation3 + $0xff8] ss:$20 sps:$4 sm:$0xff]  }
 0x32c   :  { %6311 = vmatmul.mubr.bf16.gmra.mrb[148].mxu0 %v18463_v23  ;;  %6650 = vmatmul.mubr.bf16.gmra.mrb[148].mxu1 %v18463_v23  ;;  %v17471_v23 = vld [vmem:[#allocation3 + $0x10bc] ss:$20 sps:$4 sm:$0xff]  }
 0x32d   :  { %6386 = vmatpush1.bf16.msra.mxu0 %v17415_v48  ;;  %6725 = vmatpush1.bf16.msra.mxu1 %v17418_v50  ;;  %v17447_v48 = vld [vmem:[#allocation3 + $0x101c] ss:$20 sps:$4 sm:$0xff]  }
 0x32e   :  { %6387 = vmatprep.subr.bf16.mxu0 %v17423_v33  ;;  %6726 = vmatprep.subr.bf16.mxu1 %v17426_v8  ;;  %v17450_v8 = vld [vmem:[#allocation3 + $0x1024] ss:$20 sps:$4 sm:$0xff]  }
 0x32f   :  { %6320 = vmatprep.mubr.bf16.mxu0 %v18464_v60  ;;  %6659 = vmatprep.mubr.bf16.mxu1 %v18464_v60 }
 0x331   :  { %6388 = vmatpush1.bf16.msra.mxu0 %v17421_v59  ;;  %6727 = vmatpush1.bf16.msra.mxu1 %v17424_v1 }
 0x332   :  { %6389 = vmatprep.subr.bf16.mxu0 %v17429_v0  ;;  %6728 = vmatprep.subr.bf16.mxu1 %v17432_v62  ;;  %v17445_v0 = vld [vmem:[#allocation3 + $0x1018] ss:$20 sps:$4 sm:$0xff]   ;;  %v17448_v62 = vld [vmem:[#allocation3 + $0x1020] ss:$20 sps:$4 sm:$0xff]  }
 0x334   :  { %6321 = vmatmul.mubr.bf16.gmra.mrb[152].mxu0 %v18465_v35  ;;  %6660 = vmatmul.mubr.bf16.gmra.mrb[152].mxu1 %v18465_v35 }
 0x335   :  { %6390 = vmatpush1.bf16.msra.mxu0 %v17427_v15  ;;  %6729 = vmatpush1.bf16.msra.mxu1 %v17430_v53  ;;  %v18467_v15 = vld [vmem:[%s22322_s0 + $0x78] ss:$20 sps:$4 sm:$0xff]  }
 0x336   :  { %6391 = vmatprep.subr.bf16.mxu0 %v17435_v21  ;;  %6730 = vmatprep.subr.bf16.mxu1 %v17438_v17  ;;  %v17453_v53 = vld [vmem:[#allocation3 + $0x1044] ss:$20 sps:$4 sm:$0xff]   ;;  %v17456_v21 = vld [vmem:[#allocation3 + $0x104c] ss:$20 sps:$4 sm:$0xff]  }
 0x337   :  { %v19911_v46 = vpop.f32.mrb[64].mxu1  ;;  %6330 = vmatprep.mubr.bf16.mxu0 %v18466_v12  ;;  %6669 = vmatprep.mubr.bf16.mxu1 %v18466_v12  ;;  %v17454_v12 = vld [vmem:[#allocation3 + $0x1048] ss:$20 sps:$4 sm:$0xff]  }
 0x338   :  { %22625 = vst [vmem:[#allocation90_spill] sm:$0xff] %v19911_v46  ;;  %v19916_v41 = vpop.f32.mrb[65].mxu1  ;;  %v17558_v46 = vld [vmem:[#allocation3 + $0xf60] ss:$20 sps:$4 sm:$0xff]  }
 0x339   :  { %22626 = vst [vmem:[#allocation91_spill] sm:$0xff] %v19916_v41  ;;  %6392 = vmatpush1.bf16.msra.mxu0 %v17433_v28  ;;  %6731 = vmatpush1.bf16.msra.mxu1 %v17436_v61  ;;  %v19920_v33 = vpop.f32.mrb[66].mxu1  ;;  %v18468_v28 = vld [vmem:[%s22322_s0 + $0xa4] ss:$20 sps:$4 sm:$0xff]   ;;  %v17451_v61 = vld [vmem:[#allocation3 + $0x1040] ss:$20 sps:$4 sm:$0xff]  }
 0x33a   :  { %22627 = vst [vmem:[#allocation92_spill] sm:$0xff] %v19920_v33  ;;  %v19924_v1 = vpop.f32.mrb[67].mxu1  ;;  %6393 = vmatprep.subr.bf16.mxu0 %v17441_v39  ;;  %6732 = vmatprep.subr.bf16.mxu1 %v17444_v45  ;;  %v17465_v39 = vld [vmem:[#allocation3 + $0x1094] ss:$20 sps:$4 sm:$0xff]  }
 0x33b   :  { %22628 = vst [vmem:[#allocation93_spill] sm:$0xff] %v19924_v1 }
 0x33c   :  { %6331 = vmatmul.mubr.bf16.gmra.mrb[156].mxu0 %v18467_v15  ;;  %6670 = vmatmul.mubr.bf16.gmra.mrb[156].mxu1 %v18467_v15  ;;  %v18470_v15 = vld [vmem:[%s22322_s0 + $0xcc] ss:$20 sps:$4 sm:$0xff]  }
 0x33d   :  { %6394 = vmatpush1.bf16.msra.mxu0 %v17439_v37  ;;  %6733 = vmatpush1.bf16.msra.mxu1 %v17442_v29  ;;  %v17459_v37 = vld [vmem:[#allocation3 + $0x106c] ss:$20 sps:$4 sm:$0xff]   ;;  %v17460_v29 = vld [vmem:[#allocation3 + $0x1070] ss:$20 sps:$4 sm:$0xff]  }
 0x33e   :  { %6395 = vmatprep.subr.bf16.mxu0 %v17447_v48  ;;  %6734 = vmatprep.subr.bf16.mxu1 %v17450_v8  ;;  %v17462_v8 = vld [vmem:[#allocation3 + $0x1074] ss:$20 sps:$4 sm:$0xff]  }
 0x33f   :  { %v19933_v17 = vpop.f32.mrb[68].mxu1  ;;  %6340 = vmatprep.mubr.bf16.mxu0 %v18468_v28  ;;  %6679 = vmatprep.mubr.bf16.mxu1 %v18468_v28  ;;  %v17457_v28 = vld [vmem:[#allocation3 + $0x1068] ss:$20 sps:$4 sm:$0xff]  }
 0x340   :  { %22629 = vst [vmem:[#allocation94_spill] sm:$0xff] %v19933_v17  ;;  %v19938_v35 = vpop.f32.mrb[69].mxu1 }
 0x341   :  { %22630 = vst [vmem:[#allocation95_spill] sm:$0xff] %v19938_v35  ;;  %6396 = vmatpush1.bf16.msra.mxu0 %v17445_v0  ;;  %6735 = vmatpush1.bf16.msra.mxu1 %v17448_v62  ;;  %v19942_v45 = vpop.f32.mrb[70].mxu1  ;;  %v18469_v62 = vld [vmem:[%s22322_s0 + $0xa0] ss:$20 sps:$4 sm:$0xff]  }
 0x342   :  { %22631 = vst [vmem:[#allocation96_spill] sm:$0xff] %v19942_v45  ;;  %v19946_v48 = vpop.f32.mrb[71].mxu1  ;;  %6397 = vmatprep.subr.bf16.mxu0 %v17453_v53  ;;  %6736 = vmatprep.subr.bf16.mxu1 %v17456_v21  ;;  %v17468_v53 = vld [vmem:[#allocation3 + $0x109c] ss:$20 sps:$4 sm:$0xff]  }
 0x343   :  { %22632 = vst [vmem:[#allocation97_spill] sm:$0xff] %v19946_v48  ;;  %v17549_v48 = vld [vmem:[#allocation3 + $0x1050] ss:$20 sps:$4 sm:$0xff]  }
 0x344   :  { %6341 = vmatmul.mubr.bf16.gmra.mrb[160].mxu0 %v18469_v62  ;;  %6680 = vmatmul.mubr.bf16.gmra.mrb[160].mxu1 %v18469_v62  ;;  %v17472_v62 = vld [vmem:[#allocation3 + $0x10c0] ss:$20 sps:$4 sm:$0xff]  }
 0x345   :  { %6398 = vmatpush1.bf16.msra.mxu0 %v17451_v61  ;;  %6737 = vmatpush1.bf16.msra.mxu1 %v17454_v12  ;;  %v17463_v12 = vld [vmem:[#allocation3 + $0x1090] ss:$20 sps:$4 sm:$0xff]  }
 0x346   :  { %6399 = vmatprep.subr.bf16.mxu0 %v17459_v37  ;;  %6738 = vmatprep.subr.bf16.mxu1 %v17462_v8  ;;  %v17466_v37 = vld [vmem:[#allocation3 + $0x1098] ss:$20 sps:$4 sm:$0xff]  }
 0x347   :  { %v19955_v21 = vpop.f32.mrb[72].mxu1  ;;  %6350 = vmatprep.mubr.bf16.mxu0 %v18470_v15  ;;  %6689 = vmatprep.mubr.bf16.mxu1 %v18470_v15  ;;  %v17474_v15 = vld [vmem:[#allocation3 + $0x10c4] ss:$20 sps:$4 sm:$0xff]  }
 0x348   :  { %22633 = vst [vmem:[#allocation98_spill] sm:$0xff] %v19955_v21  ;;  %v19960_v0 = vpop.f32.mrb[73].mxu1  ;;  %v17469_v8 = vld [vmem:[#allocation3 + $0x10b8] ss:$20 sps:$4 sm:$0xff]  }
 0x349   :  { %22634 = vst [vmem:[#allocation99_spill] sm:$0xff] %v19960_v0  ;;  %6400 = vmatpush1.bf16.msra.mxu0 %v17457_v28  ;;  %6739 = vmatpush1.bf16.msra.mxu1 %v17460_v29  ;;  %v19964_v61 = vpop.f32.mrb[74].mxu1  ;;  %v18471_v29 = vld [vmem:[%s22322_s0 + $0xc8] ss:$20 sps:$4 sm:$0xff]   ;;  %v17538_v0 = vld [vmem:[#allocation3 + $0x1278] ss:$20 sps:$4 sm:$0xff]  }
 0x34a   :  { %22635 = vst [vmem:[#allocation100_spill] sm:$0xff] %v19964_v61  ;;  %v19968_v60 = vpop.f32.mrb[75].mxu1  ;;  %6401 = vmatprep.subr.bf16.mxu0 %v17465_v39  ;;  %6740 = vmatprep.subr.bf16.mxu1 %v17468_v53  ;;  %v17477_v39 = vld [vmem:[#allocation3 + $0x10e4] ss:$20 sps:$4 sm:$0xff]   ;;  %v17480_v53 = vld [vmem:[#allocation3 + $0x10ec] ss:$20 sps:$4 sm:$0xff]  }
 0x34b   :  { %22636 = vst [vmem:[#allocation101_spill] sm:$0xff] %v19968_v60  ;;  %v18472_v28 = vld [vmem:[%s22322_s0 + $0xf4] ss:$20 sps:$4 sm:$0xff]  }
 0x34c   :  { %6351 = vmatmul.mubr.bf16.gmra.mrb[164].mxu0 %v18471_v29  ;;  %6690 = vmatmul.mubr.bf16.gmra.mrb[164].mxu1 %v18471_v29  ;;  %v17481_v29 = vld [vmem:[#allocation3 + $0x1108] ss:$20 sps:$4 sm:$0xff]  }
 0x34d   :  { %6402 = vmatpush1.bf16.msra.mxu0 %v17463_v12  ;;  %6741 = vmatpush1.bf16.msra.mxu1 %v17466_v37  ;;  %v17484_v12 = vld [vmem:[#allocation3 + $0x1110] ss:$20 sps:$4 sm:$0xff]  }
 0x34e   :  { %6403 = vmatprep.subr.bf16.mxu0 %v17471_v23  ;;  %6742 = vmatprep.subr.bf16.mxu1 %v17474_v15  ;;  %v17475_v23 = vld [vmem:[#allocation3 + $0x10e0] ss:$20 sps:$4 sm:$0xff]   ;;  %v17478_v15 = vld [vmem:[#allocation3 + $0x10e8] ss:$20 sps:$4 sm:$0xff]  }
 0x34f   :  { %v19977_v50 = vpop.f32.mrb[76].mxu1  ;;  %6360 = vmatprep.mubr.bf16.mxu0 %v18472_v28  ;;  %6699 = vmatprep.mubr.bf16.mxu1 %v18472_v28  ;;  %v17486_v28 = vld [vmem:[#allocation3 + $0x1114] ss:$20 sps:$4 sm:$0xff]  }
 0x350   :  { %22637 = vst [vmem:[#allocation102_spill] sm:$0xff] %v19977_v50  ;;  %v19982_v59 = vpop.f32.mrb[77].mxu1  ;;  %v17534_v50 = vld [vmem:[#allocation3 + $0x1254] ss:$20 sps:$4 sm:$0xff]  }
 0x351   :  { %22638 = vst [vmem:[#allocation103_spill] sm:$0xff] %v19982_v59  ;;  %6404 = vmatpush1.bf16.msra.mxu0 %v17469_v8  ;;  %6743 = vmatpush1.bf16.msra.mxu1 %v17472_v62  ;;  %v19986_v37 = vpop.f32.mrb[78].mxu1  ;;  %v18473_v62 = vld [vmem:[%s22322_s0 + $0xf0] ss:$20 sps:$4 sm:$0xff]  }
 0x352   :  { %22639 = vst [vmem:[#allocation104_spill] sm:$0xff] %v19986_v37  ;;  %v19990_v60 = vpop.f32.mrb[79].mxu1  ;;  %6405 = vmatprep.subr.bf16.mxu0 %v17477_v39  ;;  %6744 = vmatprep.subr.bf16.mxu1 %v17480_v53  ;;  %v17489_v39 = vld [vmem:[#allocation3 + $0x1134] ss:$20 sps:$4 sm:$0xff]   ;;  %v17492_v53 = vld [vmem:[#allocation3 + $0x113c] ss:$20 sps:$4 sm:$0xff]  }
 0x353   :  { %22640 = vst [vmem:[#allocation105_spill] sm:$0xff] %v19990_v60  ;;  %v18474_v8 = vld [vmem:[%s22322_s0 + $0x11c] ss:$20 sps:$4 sm:$0xff]  }
 0x354   :  { %6361 = vmatmul.mubr.bf16.gmra.mrb[168].mxu0 %v18473_v62  ;;  %6700 = vmatmul.mubr.bf16.gmra.mrb[168].mxu1 %v18473_v62  ;;  %v17493_v62 = vld [vmem:[#allocation3 + $0x1158] ss:$20 sps:$4 sm:$0xff]  }
 0x355   :  { %6406 = vmatpush1.bf16.msra.mxu0 %v17475_v23  ;;  %6745 = vmatpush1.bf16.msra.mxu1 %v17478_v15  ;;  %v17496_v23 = vld [vmem:[#allocation3 + $0x1160] ss:$20 sps:$4 sm:$0xff]  }
 0x356   :  { %6407 = vmatprep.subr.bf16.mxu0 %v17483_v44  ;;  %6746 = vmatprep.subr.bf16.mxu1 %v17486_v28  ;;  %v17487_v44 = vld [vmem:[#allocation3 + $0x1130] ss:$20 sps:$4 sm:$0xff]   ;;  %v17490_v28 = vld [vmem:[#allocation3 + $0x1138] ss:$20 sps:$4 sm:$0xff]  }
 0x357   :  { %v19999_v59 = vpop.f32.mrb[80].mxu1  ;;  %6370 = vmatprep.mubr.bf16.mxu0 %v18474_v8  ;;  %6709 = vmatprep.mubr.bf16.mxu1 %v18474_v8  ;;  %v17498_v8 = vld [vmem:[#allocation3 + $0x1164] ss:$20 sps:$4 sm:$0xff]  }
 0x358   :  { %22641 = vst [vmem:[#allocation106_spill] sm:$0xff] %v19999_v59  ;;  %v20004_v61 = vpop.f32.mrb[81].mxu1  ;;  %v17510_v59 = vld [vmem:[#allocation3 + $0x11b4] ss:$20 sps:$4 sm:$0xff]  }
 0x359   :  { %22642 = vst [vmem:[#allocation107_spill] sm:$0xff] %v20004_v61  ;;  %6408 = vmatpush1.bf16.msra.mxu0 %v17481_v29  ;;  %6747 = vmatpush1.bf16.msra.mxu1 %v17484_v12  ;;  %v20008_v15 = vpop.f32.mrb[82].mxu1  ;;  %v18475_v12 = vld [vmem:[%s22322_s0 + $0x118] ss:$20 sps:$4 sm:$0xff]  }
 0x35a   :  { %22643 = vst [vmem:[#allocation108_spill] sm:$0xff] %v20008_v15  ;;  %v20012_v60 = vpop.f32.mrb[83].mxu1  ;;  %6409 = vmatprep.subr.bf16.mxu0 %v17489_v39  ;;  %6748 = vmatprep.subr.bf16.mxu1 %v17492_v53  ;;  %v17501_v39 = vld [vmem:[#allocation3 + $0x1184] ss:$20 sps:$4 sm:$0xff]   ;;  %v17504_v53 = vld [vmem:[#allocation3 + $0x118c] ss:$20 sps:$4 sm:$0xff]  }
 0x35b   :  { %22644 = vst [vmem:[#allocation109_spill] sm:$0xff] %v20012_v60  ;;  %v20026_v29 = vld [vmem:[%s22322_s0 + $0xc] ss:$20 sps:$4 sm:$0xff]   ;;  %v17516_v60 = vld [vmem:[#allocation3 + $0x11dc] ss:$20 sps:$4 sm:$0xff]  }
 0x35c   :  { %6371 = vmatmul.mubr.bf16.gmra.mrb[172].mxu0 %v18475_v12  ;;  %6710 = vmatmul.mubr.bf16.gmra.mrb[172].mxu1 %v18475_v12  ;;  %v20107_v15 = vld [vmem:[%s22322_s0 + $0x58] ss:$20 sps:$4 sm:$0xff]  }
 0x35d   :  { %6410 = vmatpush1.bf16.msra.mxu0 %v17487_v44  ;;  %6749 = vmatpush1.bf16.msra.mxu1 %v17490_v28  ;;  %v17499_v28 = vld [vmem:[#allocation3 + $0x1180] ss:$20 sps:$4 sm:$0xff]  }
 0x35e   :  { %6411 = vmatprep.subr.bf16.mxu0 %v17495_v42  ;;  %6750 = vmatprep.subr.bf16.mxu1 %v17498_v8  ;;  %v17502_v8 = vld [vmem:[#allocation3 + $0x1188] ss:$20 sps:$4 sm:$0xff]  }
 0x35f   :  { %v20021_v61 = vpop.f32.mrb[84].mxu1  ;;  %6413 = vmatprep.mubr.bf16.mxu0 %v20026_v29  ;;  %6752 = vmatprep.mubr.bf16.mxu1 %v20026_v29 }
 0x360   :  { %22645 = vst [vmem:[#allocation110_spill] sm:$0xff] %v20021_v61  ;;  %v20030_v12 = vpop.f32.mrb[85].mxu1  ;;  %v17511_v61 = vld [vmem:[#allocation3 + $0x11d0] ss:$20 sps:$4 sm:$0xff]  }
 0x361   :  { %22646 = vst [vmem:[#allocation111_spill] sm:$0xff] %v20030_v12  ;;  %6412 = vmatpush1.bf16.msra.mxu0 %v17493_v62  ;;  %6751 = vmatpush1.bf16.msra.mxu1 %v17496_v23  ;;  %v20034_v42 = vpop.f32.mrb[86].mxu1  ;;  %v20047_v23 = vld [vmem:[%s22322_s0 + $0x8] ss:$20 sps:$4 sm:$0xff]   ;;  %v17528_v12 = vld [vmem:[#allocation3 + $0x122c] ss:$20 sps:$4 sm:$0xff]  }
 0x362   :  { %22647 = vst [vmem:[#allocation112_spill] sm:$0xff] %v20034_v42  ;;  %v20038_v16 = vpop.f32.mrb[87].mxu1  ;;  %6494 = vmatprep.subr.bf16.mxu0 %v17501_v39  ;;  %6833 = vmatprep.subr.bf16.mxu1 %v17504_v53  ;;  %v17505_v39 = vld [vmem:[#allocation3 + $0x11a8] ss:$20 sps:$4 sm:$0xff]   ;;  %v17508_v53 = vld [vmem:[#allocation3 + $0x11b0] ss:$20 sps:$4 sm:$0xff]  }
 0x363   :  { %22649 = vst [vmem:[#allocation113_spill] sm:$0xff] %v20038_v16  ;;  %v17513_v62 = vld [vmem:[#allocation3 + $0x11d4] ss:$20 sps:$4 sm:$0xff]  }
 0x364   :  { %6414 = vmatmul.mubr.bf16.vlgmr.msra.gmra.mrb[144].mxu0 %v20047_v23  ;;  %6753 = vmatmul.mubr.bf16.vlgmr.msra.gmra.mrb[144].mxu1 %v20047_v23 }
 0x365   :  { %6495 = vmatpush1.bf16.msra.mxu0 %v17499_v28  ;;  %6834 = vmatpush1.bf16.msra.mxu1 %v17502_v8  ;;  %v17526_v28 = vld [vmem:[#allocation3 + $0x1228] ss:$20 sps:$4 sm:$0xff]  }
 0x366   :  { %6423 = vmatprep.mubr.bf16.mxu0 %v20054_v20  ;;  %6762 = vmatprep.mubr.bf16.mxu1 %v20054_v20 }
 0x367   :  { %v20058_v16 = vpop.f32.mrb[88].mxu1  ;;  %6496 = vmatprep.subr.bf16.mxu0 %v17507_v10  ;;  %6835 = vmatprep.subr.bf16.mxu1 %v17510_v59  ;;  %v17525_v59 = vld [vmem:[#allocation3 + $0x1224] ss:$20 sps:$4 sm:$0xff]  }
 0x368   :  { %22652 = vst [vmem:[#allocation114_spill] sm:$0xff] %v20058_v16  ;;  %v20060_v44 = vpop.f32.mrb[89].mxu1 }
 0x369   :  { %22653 = vst [vmem:[#allocation115_spill] sm:$0xff] %v20060_v44  ;;  %v20064_v42 = vpop.f32.mrb[90].mxu1  ;;  %6497 = vmatpush1.bf16.msra.mxu0 %v17505_v39  ;;  %6836 = vmatpush1.bf16.msra.mxu1 %v17508_v53  ;;  %v20077_v39 = vld [vmem:[%s22322_s0 + $0x30] ss:$20 sps:$4 sm:$0xff]   ;;  %v17520_v53 = vld [vmem:[#allocation3 + $0x1200] ss:$20 sps:$4 sm:$0xff]  }
 0x36a   :  { %22655 = vst [vmem:[#allocation116_spill] sm:$0xff] %v20064_v42  ;;  %v20068_v37 = vpop.f32.mrb[91].mxu1  ;;  %6498 = vmatprep.subr.bf16.mxu0 %v17513_v62  ;;  %6837 = vmatprep.subr.bf16.mxu1 %v17516_v60  ;;  %v20084_v60 = vld [vmem:[%s22322_s0 + $0x5c] ss:$20 sps:$4 sm:$0xff]   ;;  %v17517_v62 = vld [vmem:[#allocation3 + $0x11f8] ss:$20 sps:$4 sm:$0xff]  }
 0x36b   :  { %22657 = vst [vmem:[#allocation117_spill] sm:$0xff] %v20068_v37 }
 0x36c   :  { %6424 = vmatmul.mubr.bf16.gmra.mrb[148].mxu0 %v20077_v39  ;;  %6763 = vmatmul.mubr.bf16.gmra.mrb[148].mxu1 %v20077_v39 }
 0x36d   :  { %6433 = vmatprep.mubr.bf16.mxu0 %v20084_v60  ;;  %6772 = vmatprep.mubr.bf16.mxu1 %v20084_v60 }
 0x36e   :  { %6499 = vmatpush1.bf16.msra.mxu0 %v17511_v61  ;;  %6838 = vmatpush1.bf16.msra.mxu1 %v17514_v58  ;;  %v17523_v58 = vld [vmem:[#allocation3 + $0x1220] ss:$20 sps:$4 sm:$0xff]  }
 0x36f   :  { %v20088_v16 = vpop.f32.mrb[92].mxu1  ;;  %6500 = vmatprep.subr.bf16.mxu0 %v17519_v6  ;;  %6839 = vmatprep.subr.bf16.mxu1 %v17522_v49  ;;  %v17537_v6 = vld [vmem:[#allocation3 + $0x1274] ss:$20 sps:$4 sm:$0xff]  }
 0x370   :  { %22660 = vst [vmem:[#allocation118_spill] sm:$0xff] %v20088_v16  ;;  %v20090_v37 = vpop.f32.mrb[93].mxu1 }
 0x371   :  { %22661 = vst [vmem:[#allocation119_spill] sm:$0xff] %v20090_v37  ;;  %v20094_v10 = vpop.f32.mrb[94].mxu1 }
 0x372   :  { %22663 = vst [vmem:[#allocation120_spill] sm:$0xff] %v20094_v10  ;;  %v20098_v61 = vpop.f32.mrb[95].mxu1  ;;  %6501 = vmatpush1.bf16.msra.mxu0 %v17517_v62  ;;  %6840 = vmatpush1.bf16.msra.mxu1 %v17520_v53  ;;  %v20114_v62 = vld [vmem:[%s22322_s0 + $0x84] ss:$20 sps:$4 sm:$0xff]  }
 0x373   :  { %22665 = vst [vmem:[#allocation121_spill] sm:$0xff] %v20098_v61  ;;  %6502 = vmatprep.subr.bf16.mxu0 %v17525_v59  ;;  %6841 = vmatprep.subr.bf16.mxu1 %v17528_v12  ;;  %v17529_v12 = vld [vmem:[#allocation3 + $0x1248] ss:$20 sps:$4 sm:$0xff]   ;;  %v17532_v59 = vld [vmem:[#allocation3 + $0x1250] ss:$20 sps:$4 sm:$0xff]  }
 0x374   :  { %6434 = vmatmul.mubr.bf16.gmra.mrb[152].mxu0 %v20107_v15  ;;  %6773 = vmatmul.mubr.bf16.gmra.mrb[152].mxu1 %v20107_v15  ;;  %v17540_v61 = vld [vmem:[#allocation3 + $0x127c] ss:$20 sps:$4 sm:$0xff]  }
 0x375   :  { %6443 = vmatprep.mubr.bf16.mxu0 %v20114_v62  ;;  %6782 = vmatprep.mubr.bf16.mxu1 %v20114_v62 }
 0x376   :  { %6503 = vmatpush1.bf16.msra.mxu0 %v17523_v58  ;;  %6842 = vmatpush1.bf16.msra.mxu1 %v17526_v28 }
 0x377   :  { %v20118_v53 = vpop.f32.mrb[80].mxu0  ;;  %v15220_v16 = vpop.f32.mrb[96].mxu1  ;;  %6504 = vmatprep.subr.bf16.mxu0 %v17531_v52  ;;  %6843 = vmatprep.subr.bf16.mxu1 %v17534_v50  ;;  %v17535_v50 = vld [vmem:[#allocation3 + $0x1270] ss:$20 sps:$4 sm:$0xff]  }
 0x378   :  { %22668 = vst [vmem:[#allocation122_spill] sm:$0xff] %v20118_v53  ;;  %v20120_v42 = vpop.f32.mrb[81].mxu0  ;;  %v15221_v10 = vpop.f32.mrb[97].mxu1  ;;  %v20325_v53 = vld [vmem:[%s22322_s0 + $0x38] ss:$20 sps:$4 sm:$0xff]  }
 0x379   :  { %22669 = vst [vmem:[#allocation123_spill] sm:$0xff] %v20120_v42  ;;  %v20124_v44 = vpop.f32.mrb[82].mxu0  ;;  %v20126_v8 = vadd.f32 %v15221_v10, %v15220_v16  ;;  %v15223_v28 = vpop.f32.mrb[98].mxu1  ;;  %v17543_v16 = vld [vmem:[#allocation3 + $0x129c] ss:$20 sps:$4 sm:$0xff]   ;;  %22728 = vst [vmem:[#allocation154_spill] sm:$0xff] %v20325_v53 }
 0x37a   :  { %22671 = vst [vmem:[#allocation124_spill] sm:$0xff] %v20124_v44  ;;  %v20130_v7 = vpop.f32.mrb[83].mxu0  ;;  %v15224_v52 = vpop.f32.mrb[99].mxu1  ;;  %6505 = vmatpush1.bf16.msra.mxu0 %v17529_v12  ;;  %6844 = vmatpush1.bf16.msra.mxu1 %v17532_v59  ;;  %v17546_v10 = vld [vmem:[#allocation3 + $0x12a4] ss:$20 sps:$4 sm:$0xff]  }
 0x37b   :  { %22673 = vst [vmem:[#allocation125_spill] sm:$0xff] %v20130_v7  ;;  %v20134_v11 = vadd.f32 %v15224_v52, %v15223_v28  ;;  %6506 = vmatprep.subr.bf16.mxu0 %v17537_v6  ;;  %6845 = vmatprep.subr.bf16.mxu1 %v17540_v61  ;;  %v20148_v12 = vld [vmem:[%s22322_s0 + $0xac] ss:$20 sps:$4 sm:$0xff]   ;;  %v17547_v52 = vld [vmem:[#allocation3 + $0xdd0] ss:$20 sps:$4 sm:$0xff]  }
 0x37c   :  { %6444 = vmatmul.mubr.bf16.gmra.mrb[156].mxu0 %v20141_v30  ;;  %6783 = vmatmul.mubr.bf16.gmra.mrb[156].mxu1 %v20141_v30  ;;  %v17541_v61 = vld [vmem:[#allocation3 + $0x1298] ss:$20 sps:$4 sm:$0xff]   ;;  %v17544_v6 = vld [vmem:[#allocation3 + $0x12a0] ss:$20 sps:$4 sm:$0xff]   ;;  %v17548_v42 = vld [vmem:[#allocation3 + $0xc90] ss:$20 sps:$4 sm:$0xff]  }
 0x37d   :  { %6453 = vmatprep.mubr.bf16.mxu0 %v20148_v12  ;;  %6792 = vmatprep.mubr.bf16.mxu1 %v20148_v12 }
 0x37e   :  { %6507 = vmatpush1.bf16.msra.mxu0 %v17535_v50  ;;  %6846 = vmatpush1.bf16.msra.mxu1 %v17538_v0  ;;  %v17552_v50 = vld [vmem:[#allocation3 + $0xcb8] ss:$20 sps:$4 sm:$0xff]  }
 0x37f   :  { %v20152_v59 = vpop.f32.mrb[84].mxu0  ;;  %v15226_v28 = vpop.f32.mrb[100].mxu1  ;;  %6508 = vmatprep.subr.bf16.mxu0 %v17543_v16  ;;  %6847 = vmatprep.subr.bf16.mxu1 %v17546_v10 }
 0x380   :  { %22676 = vst [vmem:[#allocation126_spill] sm:$0xff] %v20152_v59  ;;  %v20154_v21 = vpop.f32.mrb[85].mxu0  ;;  %v15227_v4 = vpop.f32.mrb[101].mxu1 }
 0x381   :  { %22677 = vst [vmem:[#allocation127_spill] sm:$0xff] %v20154_v21  ;;  %v20158_v35 = vpop.f32.mrb[86].mxu0  ;;  %v20160_v54 = vadd.f32 %v15227_v4, %v15226_v28  ;;  %v15229_v0 = vpop.f32.mrb[102].mxu1  ;;  %v20175_v28 = vld [vmem:[%s22322_s0 + $0xa8] ss:$20 sps:$4 sm:$0xff]  }
 0x382   :  { %22679 = vst [vmem:[#allocation128_spill] sm:$0xff] %v20158_v35  ;;  %v20164_v38 = vpop.f32.mrb[87].mxu0  ;;  %v15230_v16 = vpop.f32.mrb[103].mxu1  ;;  %6509 = vmatpush1.bf16.msra.mxu0 %v17541_v61  ;;  %6848 = vmatpush1.bf16.msra.mxu1 %v17544_v6  ;;  %v20182_v61 = vld [vmem:[%s22322_s0 + $0xd4] ss:$20 sps:$4 sm:$0xff]  }
 0x383   :  { %22681 = vst [vmem:[#allocation129_spill] sm:$0xff] %v20164_v38  ;;  %v20168_v37 = vadd.f32 %v15230_v16, %v15229_v0  ;;  %15348 = vmatprep.subr.bf16.mxu0 %v17547_v52  ;;  %15412 = vmatprep.subr.bf16.mxu1 %v17549_v48 }
 0x384   :  { %6454 = vmatmul.mubr.bf16.gmra.mrb[160].mxu0 %v20175_v28  ;;  %6793 = vmatmul.mubr.bf16.gmra.mrb[160].mxu1 %v20175_v28 }
 0x385   :  { %6463 = vmatprep.mubr.bf16.mxu0 %v20182_v61  ;;  %6802 = vmatprep.mubr.bf16.mxu1 %v20182_v61 }
 0x387   :  { %v20186_v48 = vpop.f32.mrb[88].mxu0  ;;  %v15232_v6 = vpop.f32.mrb[104].mxu1 }
 0x388   :  { %22684 = vst [vmem:[#allocation130_spill] sm:$0xff] %v20186_v48  ;;  %v20188_v52 = vpop.f32.mrb[89].mxu0  ;;  %v15233_v0 = vpop.f32.mrb[105].mxu1 }
 0x389   :  { %22685 = vst [vmem:[#allocation131_spill] sm:$0xff] %v20188_v52  ;;  %v20192_v7 = vpop.f32.mrb[90].mxu0  ;;  %v20194_v17 = vadd.f32 %v15233_v0, %v15232_v6  ;;  %v15235_v38 = vpop.f32.mrb[106].mxu1  ;;  %v20209_v6 = vld [vmem:[%s22322_s0 + $0xd0] ss:$20 sps:$4 sm:$0xff]  }
 0x38a   :  { %22687 = vst [vmem:[#allocation132_spill] sm:$0xff] %v20192_v7  ;;  %v20198_v10 = vpop.f32.mrb[91].mxu0  ;;  %v15236_v21 = vpop.f32.mrb[107].mxu1  ;;  %22692 = vst [vmem:[#allocation134_spill] sm:$0xff] %v20209_v6  ;;  %v20216_v0 = vld [vmem:[%s22322_s0 + $0xfc] ss:$20 sps:$4 sm:$0xff]  }
 0x38b   :  { %22689 = vst [vmem:[#allocation133_spill] sm:$0xff] %v20198_v10  ;;  %v20202_v45 = vadd.f32 %v15236_v21, %v15235_v38  ;;  %22693 = vst [vmem:[#allocation135_spill] sm:$0xff] %v20216_v0 }
 0x38c   :  { %6464 = vmatmul.mubr.bf16.gmra.mrb[164].mxu0 %v20209_v6  ;;  %6803 = vmatmul.mubr.bf16.gmra.mrb[164].mxu1 %v20209_v6 }
 0x38d   :  { %6473 = vmatprep.mubr.bf16.mxu0 %v20216_v0  ;;  %6812 = vmatprep.mubr.bf16.mxu1 %v20216_v0 }
 0x38f   :  { %v20220_v38 = vpop.f32.mrb[92].mxu0  ;;  %v15238_v21 = vpop.f32.mrb[108].mxu1 }
 0x390   :  { %22694 = vst [vmem:[#allocation136_spill] sm:$0xff] %v20220_v38  ;;  %v20222_v36 = vpop.f32.mrb[93].mxu0  ;;  %v15239_v59 = vpop.f32.mrb[109].mxu1 }
 0x391   :  { %22695 = vst [vmem:[#allocation137_spill] sm:$0xff] %v20222_v36  ;;  %v20226_v10 = vpop.f32.mrb[94].mxu0  ;;  %v20228_v1 = vadd.f32 %v15239_v59, %v15238_v21  ;;  %v15241_v7 = vpop.f32.mrb[110].mxu1  ;;  %v20243_v59 = vld [vmem:[%s22322_s0 + $0xf8] ss:$20 sps:$4 sm:$0xff]  }
 0x392   :  { %22697 = vst [vmem:[#allocation138_spill] sm:$0xff] %v20226_v10  ;;  %v20232_v57 = vpop.f32.mrb[95].mxu0  ;;  %v15242_v48 = vpop.f32.mrb[111].mxu1  ;;  %22702 = vst [vmem:[#allocation140_spill] sm:$0xff] %v20243_v59 }
 0x393   :  { %22699 = vst [vmem:[#allocation139_spill] sm:$0xff] %v20232_v57  ;;  %v20236_v14 = vadd.f32 %v15242_v48, %v15241_v7 }
 0x394   :  { %6474 = vmatmul.mubr.bf16.gmra.mrb[168].mxu0 %v20243_v59  ;;  %6813 = vmatmul.mubr.bf16.gmra.mrb[168].mxu1 %v20243_v59 }
 0x395   :  { %6483 = vmatprep.mubr.bf16.mxu0 %v19884_v13  ;;  %6822 = vmatprep.mubr.bf16.mxu1 %v19884_v13 }
 0x397   :  { %v20249_v21 = vpop.f32.mrb[96].mxu0  ;;  %v15244_v7 = vpop.f32.mrb[112].mxu1 }
 0x398   :  { %22703 = vst [vmem:[#allocation141_spill] sm:$0xff] %v20249_v21  ;;  %v20251_v48 = vpop.f32.mrb[97].mxu0  ;;  %v15245_v44 = vpop.f32.mrb[113].mxu1  ;;  %v20354_v21 = vld [vmem:[%s22322_s0 + $0x60] ss:$20 sps:$4 sm:$0xff]  }
 0x399   :  { %22704 = vst [vmem:[#allocation142_spill] sm:$0xff] %v20251_v48  ;;  %v20255_v4 = vpop.f32.mrb[98].mxu0  ;;  %v20257_v57 = vadd.f32 %v15245_v44, %v15244_v7  ;;  %v15247_v33 = vpop.f32.mrb[114].mxu1  ;;  %22737 = vst [vmem:[#allocation159_spill] sm:$0xff] %v20354_v21 }
 0x39a   :  { %22706 = vst [vmem:[#allocation143_spill] sm:$0xff] %v20255_v4  ;;  %v20261_v36 = vpop.f32.mrb[99].mxu0  ;;  %v15248_v13 = vpop.f32.mrb[115].mxu1 }
 0x39b   :  { %22708 = vst [vmem:[#allocation144_spill] sm:$0xff] %v20261_v36  ;;  %v20265_v35 = vadd.f32 %v15248_v13, %v15247_v33  ;;  %v17553_v13 = vld [vmem:[#allocation3 + $0x1078] ss:$20 sps:$4 sm:$0xff]  }
 0x39c   :  { %6484 = vmatmul.mubr.bf16.gmra.mrb[172].mxu0 %v19890_v63  ;;  %6823 = vmatmul.mubr.bf16.gmra.mrb[172].mxu1 %v19890_v63  ;;  %v17550_v63 = vld [vmem:[#allocation3 + $0xf10] ss:$20 sps:$4 sm:$0xff]  }
 0x39d   :  { %6526 = vmatprep.mubr.bf16.mxu0 %v22604_v24  ;;  %6865 = vmatprep.mubr.bf16.mxu1 %v22604_v24 }
 0x39f   :  { %v20273_v44 = vpop.f32.mrb[100].mxu0  ;;  %v15250_v7 = vpop.f32.mrb[116].mxu1 }
 0x3a0   :  { %22711 = vst [vmem:[#allocation145_spill] sm:$0xff] %v20273_v44  ;;  %v20275_v16 = vpop.f32.mrb[101].mxu0  ;;  %v15251_v52 = vpop.f32.mrb[117].mxu1 }
 0x3a1   :  { %22712 = vst [vmem:[#allocation146_spill] sm:$0xff] %v20275_v16  ;;  %v20279_v38 = vpop.f32.mrb[102].mxu0  ;;  %v20281_v58 = vadd.f32 %v15251_v52, %v15250_v7  ;;  %v15253_v36 = vpop.f32.mrb[118].mxu1  ;;  %v20296_v7 = vld [vmem:[%s22322_s0 + $0x10] ss:$20 sps:$4 sm:$0xff]  }
 0x3a2   :  { %22714 = vst [vmem:[#allocation147_spill] sm:$0xff] %v20279_v38  ;;  %v20285_v48 = vpop.f32.mrb[103].mxu0  ;;  %v15254_v10 = vpop.f32.mrb[119].mxu1  ;;  %22719 = vst [vmem:[#allocation149_spill] sm:$0xff] %v20296_v7 }
 0x3a3   :  { %22716 = vst [vmem:[#allocation148_spill] sm:$0xff] %v20285_v48  ;;  %v20289_v41 = vadd.f32 %v15254_v10, %v15253_v36  ;;  %v17555_v36 = vld [vmem:[#allocation3 + $0xe20] ss:$20 sps:$4 sm:$0xff]  }
 0x3a4   :  { %6527 = vmatmul.mubr.bf16.vlgmr.msra.gmra.mrb[144].mxu0 %v20296_v7  ;;  %6866 = vmatmul.mubr.bf16.vlgmr.msra.gmra.mrb[144].mxu1 %v20296_v7  ;;  %v17557_v10 = vld [vmem:[#allocation3 + $0x10a0] ss:$20 sps:$4 sm:$0xff]   ;;  %v17566_v7 = vld [vmem:[#allocation3 + $0xfb0] ss:$20 sps:$4 sm:$0xff]  }
 0x3a5   :  { %15349 = vmatpush3.bf16.msra.mxu0 %v17548_v42  ;;  %15413 = vmatpush3.bf16.msra.mxu1 %v17550_v63  ;;  %v17565_v42 = vld [vmem:[#allocation3 + $0x10f0] ss:$20 sps:$4 sm:$0xff]  }
 0x3a6   :  { %6536 = vmatprep.mubr.bf16.mxu0 %v22604_v24  ;;  %6875 = vmatprep.mubr.bf16.mxu1 %v22604_v24 }
 0x3a7   :  { %v20302_v52 = vpop.f32.mrb[104].mxu0  ;;  %v15256_v48 = vpop.f32.mrb[120].mxu1  ;;  %15350 = vmatprep.subr.bf16.mxu0 %v17551_v47  ;;  %15414 = vmatprep.subr.bf16.mxu1 %v17553_v13  ;;  %v17556_v13 = vld [vmem:[#allocation3 + $0xce0] ss:$20 sps:$4 sm:$0xff]  }
 0x3a8   :  { %22720 = vst [vmem:[#allocation150_spill] sm:$0xff] %v20302_v52  ;;  %v20304_v44 = vpop.f32.mrb[105].mxu0  ;;  %v15257_v38 = vpop.f32.mrb[121].mxu1 }
 0x3a9   :  { %22721 = vst [vmem:[#allocation151_spill] sm:$0xff] %v20304_v44  ;;  %v20308_v63 = vpop.f32.mrb[106].mxu0  ;;  %v20310_v16 = vadd.f32 %v15257_v38, %v15256_v48  ;;  %v15259_v4 = vpop.f32.mrb[122].mxu1  ;;  %15351 = vmatpush3.bf16.msra.mxu0 %v17552_v50  ;;  %15415 = vmatpush3.bf16.msra.mxu1 %v17554_v31  ;;  %v17559_v38 = vld [vmem:[#allocation3 + $0xe48] ss:$20 sps:$4 sm:$0xff]  }
 0x3aa   :  { %22723 = vst [vmem:[#allocation152_spill] sm:$0xff] %v20308_v63  ;;  %v20314_v49 = vpop.f32.mrb[107].mxu0  ;;  %v15260_v47 = vpop.f32.mrb[123].mxu1  ;;  %15352 = vmatprep.subr.bf16.mxu0 %v17555_v36  ;;  %15416 = vmatprep.subr.bf16.mxu1 %v17557_v10  ;;  %v17561_v48 = vld [vmem:[#allocation3 + $0x10c8] ss:$20 sps:$4 sm:$0xff]  }
 0x3ab   :  { %22725 = vst [vmem:[#allocation153_spill] sm:$0xff] %v20314_v49  ;;  %v20318_v52 = vadd.f32 %v15260_v47, %v15259_v4  ;;  %v17560_v4 = vld [vmem:[#allocation3 + $0xd08] ss:$20 sps:$4 sm:$0xff]   ;;  %v17563_v31 = vld [vmem:[#allocation3 + $0xe70] ss:$20 sps:$4 sm:$0xff]  }
 0x3ac   :  { %6537 = vmatmul.mubr.bf16.gmra.mrb[148].mxu0 %v20325_v53  ;;  %6876 = vmatmul.mubr.bf16.gmra.mrb[148].mxu1 %v20325_v53  ;;  %v17562_v36 = vld [vmem:[#allocation3 + $0xf88] ss:$20 sps:$4 sm:$0xff]  }
 0x3ad   :  { %6546 = vmatprep.mubr.bf16.mxu0 %v22604_v24  ;;  %6885 = vmatprep.mubr.bf16.mxu1 %v22604_v24 }
 0x3ae   :  { %15353 = vmatpush3.bf16.msra.mxu0 %v17556_v13  ;;  %15417 = vmatpush3.bf16.msra.mxu1 %v17558_v46  ;;  %v17572_v13 = vld [vmem:[#allocation3 + $0xd80] ss:$20 sps:$4 sm:$0xff]  }
 0x3af   :  { %v20331_v10 = vpop.f32.mrb[108].mxu0  ;;  %v15262_v47 = vpop.f32.mrb[124].mxu1  ;;  %15354 = vmatprep.subr.bf16.mxu0 %v17559_v38  ;;  %15418 = vmatprep.subr.bf16.mxu1 %v17561_v48  ;;  %v17564_v48 = vld [vmem:[#allocation3 + $0xd30] ss:$20 sps:$4 sm:$0xff]  }
 0x3b0   :  { %22729 = vst [vmem:[#allocation155_spill] sm:$0xff] %v20331_v10  ;;  %v20333_v49 = vpop.f32.mrb[109].mxu0  ;;  %v15263_v50 = vpop.f32.mrb[125].mxu1 }
 0x3b1   :  { %22730 = vst [vmem:[#allocation156_spill] sm:$0xff] %v20333_v49  ;;  %v20337_v44 = vpop.f32.mrb[110].mxu0  ;;  %v20339_v33 = vadd.f32 %v15263_v50, %v15262_v47  ;;  %v15265_v46 = vpop.f32.mrb[126].mxu1  ;;  %v17567_v50 = vld [vmem:[#allocation3 + $0xe98] ss:$20 sps:$4 sm:$0xff]  }
 0x3b2   :  { %22732 = vst [vmem:[#allocation157_spill] sm:$0xff] %v20337_v44  ;;  %v20343_v53 = vpop.f32.mrb[111].mxu0  ;;  %v15266_v38 = vpop.f32.mrb[127].mxu1  ;;  %15355 = vmatpush3.bf16.msra.mxu0 %v17560_v4  ;;  %15419 = vmatpush3.bf16.msra.mxu1 %v17562_v36  ;;  %v17569_v47 = vld [vmem:[#allocation3 + $0x1118] ss:$20 sps:$4 sm:$0xff]  }
 0x3b3   :  { %22734 = vst [vmem:[#allocation158_spill] sm:$0xff] %v20343_v53  ;;  %v20347_v6 = vadd.f32 %v15266_v38, %v15265_v46  ;;  %15356 = vmatprep.subr.bf16.mxu0 %v17563_v31  ;;  %15420 = vmatprep.subr.bf16.mxu1 %v17565_v42  ;;  %v17568_v42 = vld [vmem:[#allocation3 + $0xd58] ss:$20 sps:$4 sm:$0xff]   ;;  %v17571_v46 = vld [vmem:[#allocation3 + $0xec0] ss:$20 sps:$4 sm:$0xff]  }
 0x3b4   :  { %6547 = vmatmul.mubr.bf16.gmra.mrb[152].mxu0 %v20354_v21  ;;  %6886 = vmatmul.mubr.bf16.gmra.mrb[152].mxu1 %v20354_v21  ;;  %v17570_v31 = vld [vmem:[#allocation3 + $0xfd8] ss:$20 sps:$4 sm:$0xff]   ;;  %v17573_v38 = vld [vmem:[#allocation3 + $0x1140] ss:$20 sps:$4 sm:$0xff]   ;;  %v20364_v21 = vld [vmem:[%s22322_s0 + $0x88] ss:$20 sps:$4 sm:$0xff]  }
 0x3b5   :  { %6556 = vmatprep.mubr.bf16.mxu0 %v22604_v24  ;;  %6895 = vmatprep.mubr.bf16.mxu1 %v22604_v24  ;;  %22738 = vst [vmem:[#allocation160_spill] sm:$0xff] %v20364_v21 }
 0x3b6   :  { %15357 = vmatpush3.bf16.msra.mxu0 %v17564_v48  ;;  %15421 = vmatpush3.bf16.msra.mxu1 %v17566_v7  ;;  %v17574_v48 = vld [vmem:[#allocation3 + $0x1000] ss:$20 sps:$4 sm:$0xff]  }
 0x3b7   :  { %v15284_v4 = vpop.f32.mrb[112].mxu0  ;;  %v15775_v36 = vpop.f32.mrb[128].mxu1  ;;  %15358 = vmatprep.subr.bf16.mxu0 %v17567_v50  ;;  %15422 = vmatprep.subr.bf16.mxu1 %v17569_v47  ;;  %v17575_v50 = vld [vmem:[#allocation3 + $0xee8] ss:$20 sps:$4 sm:$0xff]  }
 0x3b8   :  { %v15285_v10 = vpop.f32.mrb[113].mxu0  ;;  %v4844_v0 = vpop.f32.mrb[129].mxu1  ;;  %v17577_v47 = vld [vmem:[#allocation3 + $0x1168] ss:$20 sps:$4 sm:$0xff]  }
 0x3b9   :  { %v15286_v53 = vadd.f32 %v15285_v10, %v15284_v4  ;;  %v15287_v51 = vpop.f32.mrb[114].mxu0  ;;  %v15776_v44 = vpop.f32.mrb[130].mxu1 }
 0x3ba   :  { %v15288_v59 = vpop.f32.mrb[115].mxu0  ;;  %v4847_v49 = vpop.f32.mrb[131].mxu1  ;;  %15359 = vmatpush3.bf16.msra.mxu0 %v17568_v42  ;;  %15423 = vmatpush3.bf16.msra.mxu1 %v17570_v31 }
 0x3bb   :  { %v4748_v7 = vadd.f32 %v15286_v53, %v20126_v8  ;;  %v15289_v63 = vadd.f32 %v15288_v59, %v15287_v51  ;;  %15360 = vmatprep.subr.bf16.mxu0 %v17571_v46  ;;  %15424 = vmatprep.subr.bf16.mxu1 %v17573_v38  ;;  %v17576_v51 = vld [vmem:[#allocation3 + $0xda8] ss:$20 sps:$4 sm:$0xff]  }
 0x3bc   :  { %6557 = vmatmul.mubr.bf16.gmra.mrb[156].mxu0 %v20364_v21  ;;  %6896 = vmatmul.mubr.bf16.gmra.mrb[156].mxu1 %v20364_v21  ;;  %v17578_v8 = vld [vmem:[#allocation3 + $0x1028] ss:$20 sps:$4 sm:$0xff]  }
 0x3bd   :  { %v20368_v10 = vadd.f32 %v4844_v0, %v4748_v7  ;;  %v4751_v42 = vadd.f32 %v15289_v63, %v20134_v11  ;;  %6566 = vmatprep.mubr.bf16.mxu0 %v22604_v24  ;;  %6905 = vmatprep.mubr.bf16.mxu1 %v22604_v24  ;;  %v20379_v0 = vld [vmem:[#allocation3 + $0x1190] ss:$20 sps:$4 sm:$0xff]  }
 0x3be   :  { %15361 = vmatpush3.bf16.msra.mxu0 %v17572_v13  ;;  %15425 = vmatpush3.bf16.msra.mxu1 %v17574_v48  ;;  %v17582_v11 = vld [vmem:[#allocation3 + $0x12c4] ss:$20 sps:$4 sm:$0xff]  }
 0x3bf   :  { %v20375_v59 = vadd.f32 %v4847_v49, %v4751_v42  ;;  %v15290_v31 = vpop.f32.mrb[116].mxu0  ;;  %v20377_v4 = vpop.f32.mrb[132].mxu1  ;;  %15362 = vmatprep.subr.bf16.mxu0 %v17575_v50  ;;  %15426 = vmatprep.subr.bf16.mxu1 %v17577_v47  ;;  %v20388_v50 = vld [vmem:[%s22322_s0 + $0xb0] ss:$20 sps:$4 sm:$0xff]  }
 0x3c0   :  { %v15291_v63 = vpop.f32.mrb[117].mxu0  ;;  %v4860_v46 = vpop.f32.mrb[133].mxu1 }
 0x3c1   :  { %22739 = vst [vmem:[#allocation161_spill] sm:$0xff] %v20375_v59  ;;  %v15292_v38 = vadd.f32 %v15291_v63, %v15290_v31  ;;  %v15293_v48 = vpop.f32.mrb[118].mxu0  ;;  %v15780_v7 = vpop.f32.mrb[134].mxu1 }
 0x3c2   :  { %v15294_v21 = vpop.f32.mrb[119].mxu0  ;;  %v4863_v53 = vpop.f32.mrb[135].mxu1  ;;  %15363 = vmatpush3.bf16.msra.mxu0 %v17576_v51  ;;  %15427 = vmatpush3.bf16.msra.mxu1 %v17578_v8  ;;  %v20411_v8 = vld [vmem:[%s22322_s0 + $0xd8] ss:$20 sps:$4 sm:$0xff]  }
 0x3c3   :  { %v4756_v49 = vadd.f32 %v15292_v38, %v20160_v54  ;;  %v15295_v42 = vadd.f32 %v15294_v21, %v15293_v48  ;;  %15789 = vmatprep.subr.bf16.mxu0 %v20379_v0  ;;  %8598 = vmatprep.subr.bf16.mxu1 %v17582_v11 }
 0x3c4   :  { %6567 = vmatmul.mubr.bf16.gmra.mrb[160].mxu0 %v20388_v50  ;;  %6906 = vmatmul.mubr.bf16.gmra.mrb[160].mxu1 %v20388_v50 }
 0x3c5   :  { %v4759_v47 = vadd.f32 %v15295_v42, %v20168_v37  ;;  %6576 = vmatprep.mubr.bf16.mxu0 %v22604_v24  ;;  %6915 = vmatprep.mubr.bf16.mxu1 %v22604_v24  ;;  %v20395_v54 = vadd.f32 %v15775_v36, %v4756_v49 }
 0x3c7   :  { %v15296_v21 = vpop.f32.mrb[120].mxu0  ;;  %v20397_v51 = vpop.f32.mrb[136].mxu1  ;;  %v20401_v31 = vadd.f32 %v15776_v44, %v4759_v47 }
 0x3c8   :  { %v15297_v11 = vpop.f32.mrb[121].mxu0  ;;  %v4876_v63 = vpop.f32.mrb[137].mxu1 }
 0x3c9   :  { %v15298_v38 = vadd.f32 %v15297_v11, %v15296_v21  ;;  %v15299_v48 = vpop.f32.mrb[122].mxu0  ;;  %v20403_v13 = vpop.f32.mrb[138].mxu1 }
 0x3ca   :  { %v15300_v42 = vpop.f32.mrb[123].mxu0  ;;  %v4879_v36 = vpop.f32.mrb[139].mxu1 }
 0x3cb   :  { %v15301_v49 = vadd.f32 %v15300_v42, %v15299_v48  ;;  %v4764_v59 = vadd.f32 %v15298_v38, %v20194_v17 }
 0x3cc   :  { %6577 = vmatmul.mubr.bf16.gmra.mrb[164].mxu0 %v20411_v8  ;;  %6916 = vmatmul.mubr.bf16.gmra.mrb[164].mxu1 %v20411_v8 }
 0x3cd   :  { %v20415_v44 = vadd.f32 %v4860_v46, %v4764_v59  ;;  %v4767_v47 = vadd.f32 %v15301_v49, %v20202_v45  ;;  %6586 = vmatprep.mubr.bf16.mxu0 %v22604_v24  ;;  %6925 = vmatprep.mubr.bf16.mxu1 %v22604_v24 }
 0x3cf   :  { %22740 = vst [vmem:[#allocation162_spill] sm:$0xff] %v20415_v44  ;;  %v20422_v21 = vadd.f32 %v4863_v53, %v4767_v47  ;;  %v15302_v11 = vpop.f32.mrb[124].mxu0  ;;  %v20424_v38 = vpop.f32.mrb[140].mxu1  ;;  %v20438_v47 = vld [vmem:[%s22322_s0 + $0x100] ss:$20 sps:$4 sm:$0xff]  }
 0x3d0   :  { %v15303_v48 = vpop.f32.mrb[125].mxu0  ;;  %v20426_v42 = vpop.f32.mrb[141].mxu1 }
 0x3d1   :  { %22741 = vst [vmem:[#allocation163_spill] sm:$0xff] %v20422_v21  ;;  %v15304_v46 = vadd.f32 %v15303_v48, %v15302_v11  ;;  %v15305_v45 = vpop.f32.mrb[126].mxu0  ;;  %v20430_v49 = vpop.f32.mrb[142].mxu1 }
 0x3d2   :  { %v15306_v37 = vpop.f32.mrb[127].mxu0  ;;  %v20432_v56 = vpop.f32.mrb[143].mxu1 }
 0x3d3   :  { %v4772_v17 = vadd.f32 %v15304_v46, %v20228_v1  ;;  %v15307_v53 = vadd.f32 %v15306_v37, %v15305_v45 }
 0x3d4   :  { %6587 = vmatmul.mubr.bf16.gmra.mrb[168].mxu0 %v20438_v47  ;;  %6926 = vmatmul.mubr.bf16.gmra.mrb[168].mxu1 %v20438_v47 }
 0x3d5   :  { %v4775_v11 = vadd.f32 %v15307_v53, %v20236_v14  ;;  %6596 = vmatprep.mubr.bf16.mxu0 %v22604_v24  ;;  %6935 = vmatprep.mubr.bf16.mxu1 %v22604_v24  ;;  %v20446_v48 = vadd.f32 %v20377_v4, %v4772_v17  ;;  %v20458_v4 = vld [vmem:[%s22322_s0 + $0x128] ss:$20 sps:$4 sm:$0xff]  }
 0x3d7   :  { %v15308_v1 = vpop.f32.mrb[128].mxu0  ;;  %v20450_v46 = vadd.f32 %v15780_v7, %v4775_v11  ;;  %v20468_v11 = vld [vmem:[%s22322_s0 + $0x4] ss:$20 sps:$4 sm:$0xff]  }
 0x3d8   :  { %v15309_v45 = vpop.f32.mrb[129].mxu0 }
 0x3d9   :  { %22742 = vst [vmem:[#allocation164_spill] sm:$0xff] %v20450_v46  ;;  %v15310_v59 = vadd.f32 %v15309_v45, %v15308_v1  ;;  %v15311_v21 = vpop.f32.mrb[130].mxu0  ;;  %v17580_v45 = vld [vmem:[#allocation3 + $0x12c0] ss:$20 sps:$4 sm:$0xff]   ;;  %v17586_v46 = vld [vmem:[#allocation3 + $0x11b8] ss:$20 sps:$4 sm:$0xff]  }
 0x3da   :  { %v15312_v14 = vpop.f32.mrb[131].mxu0 }
 0x3db   :  { %v15313_v53 = vadd.f32 %v15312_v14, %v15311_v21  ;;  %v4780_v44 = vadd.f32 %v15310_v59, %v20257_v57  ;;  %v22761_v57 = vld [vmem:[#allocation24_spill] sm:$0xff] }
 0x3dc   :  { %6597 = vmatmul.mubr.bf16.gmra.mrb[172].mxu0 %v20458_v4  ;;  %6936 = vmatmul.mubr.bf16.gmra.mrb[172].mxu1 %v20458_v4 }
 0x3dd   :  { %v20462_v7 = vadd.f32 %v4876_v63, %v4780_v44  ;;  %v4783_v17 = vadd.f32 %v15313_v53, %v20265_v35  ;;  %6978 = vmatprep.mubr.bf16.mxu0 %v20468_v11  ;;  %7075 = vmatprep.mubr.bf16.mxu1 %v20026_v29  ;;  %v17585_v53 = vld [vmem:[#allocation3 + $0x12ec] ss:$20 sps:$4 sm:$0xff]   ;;  %v22751_v63 = vld [vmem:[#allocation159_spill] sm:$0xff] }
 0x3de   :  { %v20482_v29 = vld [vmem:[%s22322_s0] ss:$20 sps:$4 sm:$0xff]  }
 0x3df   :  { %v20474_v21 = vadd.f32 %v4879_v36, %v4783_v17  ;;  %v15314_v59 = vpop.f32.mrb[132].mxu0 }
 0x3e0   :  { %v15315_v1 = vpop.f32.mrb[133].mxu0 }
 0x3e1   :  { %v15316_v35 = vadd.f32 %v15315_v1, %v15314_v59  ;;  %v15317_v44 = vpop.f32.mrb[134].mxu0  ;;  %v20494_v59 = vld [vmem:[%s22322_s0 + $0x2c] ss:$20 sps:$4 sm:$0xff]   ;;  %v17589_v1 = vld [vmem:[#allocation3 + $0x1314] ss:$20 sps:$4 sm:$0xff]  }
 0x3e2   :  { %v15318_v14 = vpop.f32.mrb[135].mxu0 }
 0x3e3   :  { %v4788_v55 = vadd.f32 %v15316_v35, %v20281_v58  ;;  %v15319_v37 = vadd.f32 %v15318_v14, %v15317_v44  ;;  %v17583_v58 = vld [vmem:[#allocation3 + $0x12e8] ss:$20 sps:$4 sm:$0xff]   ;;  %v17593_v35 = vld [vmem:[#allocation3 + $0x11e0] ss:$20 sps:$4 sm:$0xff]   ;;  %v17587_v44 = vld [vmem:[#allocation3 + $0x1310] ss:$20 sps:$4 sm:$0xff]  }
 0x3e4   :  { %6979 = vmatmul.mubr.bf16.vlgmr.msra.gmra.mrb[176].mxu0 %v20482_v29  ;;  %7076 = vmatmul.mubr.bf16.vlgmr.msra.gmra.mrb[176].mxu1 %v20047_v23 }
 0x3e5   :  { %v20487_v36 = vadd.f32 %v20397_v51, %v4788_v55  ;;  %v4791_v17 = vadd.f32 %v15319_v37, %v20289_v41  ;;  %15790 = vmatpush3.bf16.msra.mxu0 %v20379_v0  ;;  %8599 = vmatpush1.bf16.msra.mxu1 %v17580_v45  ;;  %v17658_v45 = vld [vmem:[#allocation3 + $0x15bc] ss:$20 sps:$4 sm:$0xff]  }
 0x3e6   :  { %8600 = vmatprep.subr.bf16.mxu1 %v17585_v53  ;;  %6986 = vmatprep.mubr.bf16.mxu0 %v20494_v59  ;;  %v22762_v41 = vld [vmem:[#allocation91_spill] sm:$0xff] }
 0x3e7   :  { %v20498_v23 = vadd.f32 %v20403_v13, %v4791_v17  ;;  %v15320_v55 = vpop.f32.mrb[136].mxu0  ;;  %7083 = vmatprep.mubr.bf16.mxu1 %v20054_v20  ;;  %15791 = vmatprep.subr.bf16.mxu0 %v17586_v46  ;;  %v17592_v13 = vld [vmem:[#allocation3 + $0x133c] ss:$20 sps:$4 sm:$0xff]  }
 0x3e8   :  { %v15321_v0 = vpop.f32.mrb[137].mxu0  ;;  %v20509_v17 = vld [vmem:[%s22322_s0 + $0x28] ss:$20 sps:$4 sm:$0xff]  }
 0x3e9   :  { %v15322_v51 = vadd.f32 %v15321_v0, %v15320_v55  ;;  %v15323_v37 = vpop.f32.mrb[138].mxu0  ;;  %8601 = vmatpush1.bf16.msra.mxu1 %v17583_v58  ;;  %15792 = vmatpush3.bf16.msra.mxu0 %v17586_v46  ;;  %v17600_v46 = vld [vmem:[#allocation3 + $0x1208] ss:$20 sps:$4 sm:$0xff]   ;;  %v17590_v55 = vld [vmem:[#allocation3 + $0x1338] ss:$20 sps:$4 sm:$0xff]  }
 0x3ea   :  { %v15324_v14 = vpop.f32.mrb[139].mxu0  ;;  %8602 = vmatprep.subr.bf16.mxu1 %v17589_v1  ;;  %15793 = vmatprep.subr.bf16.mxu0 %v17593_v35  ;;  %v17596_v0 = vld [vmem:[#allocation3 + $0x1364] ss:$20 sps:$4 sm:$0xff]  }
 0x3eb   :  { %v15325_v53 = vadd.f32 %v15324_v14, %v15323_v37  ;;  %v4796_v20 = vadd.f32 %v15322_v51, %v20310_v16  ;;  %v20520_v16 = vld [vmem:[%s22322_s0 + $0x54] ss:$20 sps:$4 sm:$0xff]   ;;  %v17646_v37 = vld [vmem:[#allocation3 + $0x156c] ss:$20 sps:$4 sm:$0xff]  }
 0x3ec   :  { %6987 = vmatmul.mubr.bf16.gmra.mrb[180].mxu0 %v20509_v17  ;;  %7084 = vmatmul.mubr.bf16.gmra.mrb[180].mxu1 %v20077_v39 }
 0x3ed   :  { %v20514_v58 = vadd.f32 %v20426_v42, %v4796_v20  ;;  %8603 = vmatpush1.bf16.msra.mxu1 %v17587_v44  ;;  %v4799_v1 = vadd.f32 %v15325_v53, %v20318_v52  ;;  %6994 = vmatprep.mubr.bf16.mxu0 %v20520_v16 }
 0x3ee   :  { %8604 = vmatprep.subr.bf16.mxu1 %v17592_v13  ;;  %7091 = vmatprep.mubr.bf16.mxu1 %v20084_v60  ;;  %v17594_v13 = vld [vmem:[#allocation3 + $0x1360] ss:$20 sps:$4 sm:$0xff]  }
 0x3ef   :  { %22743 = vst [vmem:[#allocation165_spill] sm:$0xff] %v20514_v58  ;;  %v20527_v42 = vadd.f32 %v20432_v56, %v4799_v1  ;;  %v15326_v51 = vpop.f32.mrb[140].mxu0  ;;  %15794 = vmatpush3.bf16.msra.mxu0 %v17593_v35  ;;  %v17599_v60 = vld [vmem:[#allocation3 + $0x138c] ss:$20 sps:$4 sm:$0xff]   ;;  %v17607_v56 = vld [vmem:[#allocation3 + $0x1230] ss:$20 sps:$4 sm:$0xff]  }
 0x3f0   :  { %v15327_v52 = vpop.f32.mrb[141].mxu0  ;;  %15795 = vmatprep.subr.bf16.mxu0 %v17600_v46  ;;  %v20535_v35 = vld [vmem:[%s22322_s0 + $0x50] ss:$20 sps:$4 sm:$0xff]  }
 0x3f1   :  { %22744 = vst [vmem:[#allocation166_spill] sm:$0xff] %v20527_v42  ;;  %v15328_v44 = vadd.f32 %v15327_v52, %v15326_v51  ;;  %v15329_v14 = vpop.f32.mrb[142].mxu0  ;;  %8605 = vmatpush1.bf16.msra.mxu1 %v17590_v55  ;;  %v17603_v51 = vld [vmem:[#allocation3 + $0x13b4] ss:$20 sps:$4 sm:$0xff]   ;;  %v17606_v52 = vld [vmem:[#allocation3 + $0x13dc] ss:$20 sps:$4 sm:$0xff]   ;;  %v22763_v42 = vmax.f32 %v22761_v57, %v22762_v41 }
 0x3f2   :  { %v15330_v53 = vpop.f32.mrb[143].mxu0  ;;  %8606 = vmatprep.subr.bf16.mxu1 %v17596_v0  ;;  %v17597_v0 = vld [vmem:[#allocation3 + $0x1388] ss:$20 sps:$4 sm:$0xff]  }
 0x3f3   :  { %v4804_v20 = vadd.f32 %v15328_v44, %v20339_v33  ;;  %v15331_v39 = vadd.f32 %v15330_v53, %v15329_v14  ;;  %15796 = vmatpush3.bf16.msra.mxu0 %v17600_v46  ;;  %v20546_v33 = vld [vmem:[%s22322_s0 + $0x7c] ss:$20 sps:$4 sm:$0xff]   ;;  %v17614_v46 = vld [vmem:[#allocation3 + $0x1258] ss:$20 sps:$4 sm:$0xff]   ;;  %v17608_v53 = vld [vmem:[#allocation3 + $0x1400] ss:$20 sps:$4 sm:$0xff]  }
 0x3f4   :  { %6995 = vmatmul.mubr.bf16.gmra.mrb[184].mxu0 %v20535_v35  ;;  %7092 = vmatmul.mubr.bf16.gmra.mrb[184].mxu1 %v20107_v15  ;;  %v17604_v44 = vld [vmem:[#allocation3 + $0x13d8] ss:$20 sps:$4 sm:$0xff]  }
 0x3f5   :  { %v20540_v1 = vadd.f32 %v20424_v38, %v4804_v20  ;;  %v4807_v55 = vadd.f32 %v15331_v39, %v20347_v6  ;;  %8607 = vmatpush1.bf16.msra.mxu1 %v17594_v13  ;;  %7002 = vmatprep.mubr.bf16.mxu0 %v20546_v33  ;;  %v17601_v38 = vld [vmem:[#allocation3 + $0x13b0] ss:$20 sps:$4 sm:$0xff]   ;;  %v20574_v20 = vld [vmem:[%s22322_s0 + $0xa0] ss:$20 sps:$4 sm:$0xff]   ;;  %v17644_v6 = vld [vmem:[#allocation3 + $0x1568] ss:$20 sps:$4 sm:$0xff]  }
 0x3f6   :  { %8608 = vmatprep.subr.bf16.mxu1 %v17599_v60  ;;  %7099 = vmatprep.mubr.bf16.mxu1 %v20114_v62  ;;  %v20560_v62 = vld [vmem:[%s22322_s0 + $0x78] ss:$20 sps:$4 sm:$0xff]   ;;  %v17628_v60 = vld [vmem:[#allocation3 + $0x12a8] ss:$20 sps:$4 sm:$0xff]   ;;  %v22750_v39 = vld [vmem:[#allocation154_spill] sm:$0xff] }
 0x3f7   :  { %v20551_v15 = vadd.f32 %v20430_v49, %v4807_v55  ;;  %15797 = vmatprep.subr.bf16.mxu0 %v17607_v56  ;;  %v17621_v49 = vld [vmem:[#allocation3 + $0x1280] ss:$20 sps:$4 sm:$0xff]   ;;  %v20567_v14 = vld [vmem:[%s22322_s0 + $0xa4] ss:$20 sps:$4 sm:$0xff]  }
 0x3f8   :  { %15798 = vmatpush3.bf16.msra.mxu0 %v17607_v56  ;;  %v17610_v13 = vld [vmem:[#allocation3 + $0x1404] ss:$20 sps:$4 sm:$0xff]   ;;  %v20581_v56 = vld [vmem:[%s22322_s0 + $0xcc] ss:$20 sps:$4 sm:$0xff]  }
 0x3f9   :  { %22745 = vst [vmem:[#allocation167_spill] sm:$0xff] %v20551_v15  ;;  %8609 = vmatpush1.bf16.msra.mxu1 %v17597_v0  ;;  %15799 = vmatprep.subr.bf16.mxu0 %v17614_v46  ;;  %v17637_v55 = vld [vmem:[#allocation3 + $0x12cc] ss:$20 sps:$4 sm:$0xff]   ;;  %v17617_v0 = vld [vmem:[#allocation3 + $0x1454] ss:$20 sps:$4 sm:$0xff]  }
 0x3fa   :  { %8610 = vmatprep.subr.bf16.mxu1 %v17603_v51  ;;  %v20588_v51 = vld [vmem:[%s22322_s0 + $0xc8] ss:$20 sps:$4 sm:$0xff]  }
 0x3fb   :  { %v22765_v15 = vld [vmem:[#allocation25_spill] sm:$0xff] }
 0x3fc   :  { %7003 = vmatmul.mubr.bf16.gmra.mrb[188].mxu0 %v20560_v62  ;;  %7100 = vmatmul.mubr.bf16.gmra.mrb[188].mxu1 %v20141_v30  ;;  %v17613_v30 = vld [vmem:[#allocation3 + $0x142c] ss:$20 sps:$4 sm:$0xff]  }
 0x3fd   :  { %8611 = vmatpush1.bf16.msra.mxu1 %v17601_v38  ;;  %7010 = vmatprep.mubr.bf16.mxu0 %v20567_v14  ;;  %v22746_v38 = vld [vmem:[#allocation134_spill] sm:$0xff] }
 0x3fe   :  { %8612 = vmatprep.subr.bf16.mxu1 %v17606_v52  ;;  %7107 = vmatprep.mubr.bf16.mxu1 %v20148_v12  ;;  %v17611_v12 = vld [vmem:[#allocation3 + $0x1428] ss:$20 sps:$4 sm:$0xff]   ;;  %v17618_v52 = vld [vmem:[#allocation3 + $0x1478] ss:$20 sps:$4 sm:$0xff]  }
 0x3ff   :  { %15800 = vmatpush3.bf16.msra.mxu0 %v17614_v46  ;;  %v17615_v46 = vld [vmem:[#allocation3 + $0x1450] ss:$20 sps:$4 sm:$0xff]  }
 0x400   :  { %15801 = vmatprep.subr.bf16.mxu0 %v17621_v49 }
 0x401   :  { %8613 = vmatpush1.bf16.msra.mxu1 %v17604_v44  ;;  %v17624_v44 = vld [vmem:[#allocation3 + $0x14a4] ss:$20 sps:$4 sm:$0xff]  }
 0x402   :  { %8614 = vmatprep.subr.bf16.mxu1 %v17610_v13  ;;  %v17622_v13 = vld [vmem:[#allocation3 + $0x14a0] ss:$20 sps:$4 sm:$0xff]  }
 0x403   :  { %15802 = vmatpush3.bf16.msra.mxu0 %v17621_v49  ;;  %v22747_v49 = vld [vmem:[#allocation135_spill] sm:$0xff] }
 0x404   :  { %7011 = vmatmul.mubr.bf16.gmra.mrb[192].mxu0 %v20574_v20  ;;  %7108 = vmatmul.mubr.bf16.gmra.mrb[192].mxu1 %v20175_v28  ;;  %v17620_v28 = vld [vmem:[#allocation3 + $0x147c] ss:$20 sps:$4 sm:$0xff]  }
 0x405   :  { %8615 = vmatpush1.bf16.msra.mxu1 %v17608_v53  ;;  %7018 = vmatprep.mubr.bf16.mxu0 %v20581_v56  ;;  %v17627_v53 = vld [vmem:[#allocation3 + $0x14cc] ss:$20 sps:$4 sm:$0xff]  }
 0x406   :  { %8616 = vmatprep.subr.bf16.mxu1 %v17613_v30  ;;  %7115 = vmatprep.mubr.bf16.mxu1 %v20182_v61  ;;  %v20595_v61 = vld [vmem:[%s22322_s0 + $0xf4] ss:$20 sps:$4 sm:$0xff]   ;;  %v20602_v30 = vld [vmem:[%s22322_s0 + $0xf0] ss:$20 sps:$4 sm:$0xff]  }
 0x407   :  { %15803 = vmatprep.subr.bf16.mxu0 %v17628_v60 }
 0x408   :  { %15804 = vmatpush3.bf16.msra.mxu0 %v17628_v60  ;;  %v22748_v60 = vld [vmem:[#allocation140_spill] sm:$0xff] }
 0x409   :  { %8617 = vmatpush1.bf16.msra.mxu1 %v17611_v12  ;;  %8937 = vmatprep.subr.bf16.mxu0 %v17637_v55  ;;  %v17625_v12 = vld [vmem:[#allocation3 + $0x14c8] ss:$20 sps:$4 sm:$0xff]  }
 0x40a   :  { %8618 = vmatprep.subr.bf16.mxu1 %v17617_v0  ;;  %v20609_v55 = vld [vmem:[%s22322_s0 + $0x11c] ss:$20 sps:$4 sm:$0xff]   ;;  %v20615_v0 = vld [vmem:[%s22322_s0 + $0x124] ss:$20 sps:$4 sm:$0xff]  }
 0x40c   :  { %7019 = vmatmul.mubr.bf16.gmra.mrb[196].mxu0 %v20588_v51  ;;  %7116 = vmatmul.mubr.bf16.gmra.mrb[196].mxu1 %v22746_v38  ;;  %v17634_v38 = vld [vmem:[#allocation3 + $0x151c] ss:$20 sps:$4 sm:$0xff]  }
 0x40d   :  { %8619 = vmatpush1.bf16.msra.mxu1 %v17615_v46  ;;  %7026 = vmatprep.mubr.bf16.mxu0 %v20595_v61  ;;  %v17631_v46 = vld [vmem:[#allocation3 + $0x14f4] ss:$20 sps:$4 sm:$0xff]  }
 0x40e   :  { %8620 = vmatprep.subr.bf16.mxu1 %v17620_v28  ;;  %7123 = vmatprep.mubr.bf16.mxu1 %v22747_v49  ;;  %v17629_v28 = vld [vmem:[#allocation3 + $0x14f0] ss:$20 sps:$4 sm:$0xff]   ;;  %v20627_v49 = vld [vmem:[%s22322_s0 + $0x120] ss:$20 sps:$4 sm:$0xff]  }
 0x411   :  { %8621 = vmatpush1.bf16.msra.mxu1 %v17618_v52  ;;  %v20621_v52 = vld [vmem:[%s22322_s0 + $0x118] ss:$20 sps:$4 sm:$0xff]  }
 0x412   :  { %8622 = vmatprep.subr.bf16.mxu1 %v17624_v44  ;;  %v17632_v44 = vld [vmem:[#allocation3 + $0x1518] ss:$20 sps:$4 sm:$0xff]  }
 0x414   :  { %7027 = vmatmul.mubr.bf16.gmra.mrb[200].mxu0 %v20602_v30  ;;  %7124 = vmatmul.mubr.bf16.gmra.mrb[200].mxu1 %v22748_v60  ;;  %v17635_v60 = vld [vmem:[#allocation3 + $0x12c8] ss:$20 sps:$4 sm:$0xff]  }
 0x415   :  { %8623 = vmatpush1.bf16.msra.mxu1 %v17622_v13  ;;  %7034 = vmatprep.mubr.bf16.mxu0 %v20609_v55  ;;  %v22749_v13 = vld [vmem:[#allocation149_spill] sm:$0xff] }
 0x416   :  { %8624 = vmatprep.subr.bf16.mxu1 %v17627_v53  ;;  %7131 = vmatprep.mubr.bf16.mxu1 %v20615_v0  ;;  %v17640_v53 = vld [vmem:[#allocation3 + $0x1544] ss:$20 sps:$4 sm:$0xff]  }
 0x419   :  { %8625 = vmatpush1.bf16.msra.mxu1 %v17625_v12  ;;  %v17638_v12 = vld [vmem:[#allocation3 + $0x1540] ss:$20 sps:$4 sm:$0xff]  }
 0x41a   :  { %8626 = vmatprep.subr.bf16.mxu1 %v17631_v46  ;;  %v17643_v46 = vld [vmem:[#allocation3 + $0x12f4] ss:$20 sps:$4 sm:$0xff]  }
 0x41c   :  { %7035 = vmatmul.mubr.bf16.gmra.mrb[204].mxu0 %v20621_v52  ;;  %7132 = vmatmul.mubr.bf16.gmra.mrb[204].mxu1 %v20627_v49 }
 0x41d   :  { %8627 = vmatpush1.bf16.msra.mxu1 %v17629_v28  ;;  %15805 = vmatprep.mubr.bf16.mxu0 %v22749_v13  ;;  %v17641_v28 = vld [vmem:[#allocation3 + $0x12f0] ss:$20 sps:$4 sm:$0xff]   ;;  %v17652_v13 = vld [vmem:[#allocation3 + $0x1594] ss:$20 sps:$4 sm:$0xff]  }
 0x41e   :  { %8628 = vmatprep.subr.bf16.mxu1 %v17634_v38  ;;  %8630 = vmatprep.mubr.bf16.mxu1 %v20468_v11  ;;  %v17649_v38 = vld [vmem:[#allocation3 + $0x131c] ss:$20 sps:$4 sm:$0xff]  }
 0x421   :  { %8629 = vmatpush1.bf16.msra.mxu1 %v17632_v44  ;;  %v17647_v44 = vld [vmem:[#allocation3 + $0x1318] ss:$20 sps:$4 sm:$0xff]  }
 0x422   :  { %8711 = vmatprep.subr.bf16.mxu1 %v17640_v53  ;;  %v17650_v53 = vld [vmem:[#allocation3 + $0x1590] ss:$20 sps:$4 sm:$0xff]  }
 0x424   :  { %15806 = vmatmul.mubr.bf16.vlgmr.msra.gmra.mrb[208].mxu0 %v22750_v39  ;;  %8631 = vmatmul.mubr.bf16.vlgmr.msra.gmra.mrb[208].mxu1 %v20482_v29  ;;  %v17655_v39 = vld [vmem:[#allocation3 + $0x1344] ss:$20 sps:$4 sm:$0xff]  }
 0x425   :  { %8938 = vmatpush1.bf16.msra.mxu0 %v17635_v60  ;;  %8712 = vmatpush1.bf16.msra.mxu1 %v17638_v12  ;;  %v22752_v60 = vld [vmem:[#allocation160_spill] sm:$0xff]  ;;  %v17656_v12 = vld [vmem:[#allocation3 + $0x15b8] ss:$20 sps:$4 sm:$0xff]  }
 0x426   :  { %8939 = vmatprep.subr.bf16.mxu0 %v17643_v46  ;;  %8713 = vmatprep.subr.bf16.mxu1 %v17646_v37  ;;  %v17653_v37 = vld [vmem:[#allocation3 + $0x1340] ss:$20 sps:$4 sm:$0xff]   ;;  %v17664_v46 = vld [vmem:[#allocation3 + $0x15e4] ss:$20 sps:$4 sm:$0xff]  }
 0x427   :  { %15809 = vmatprep.mubr.bf16.mxu0 %v22751_v63  ;;  %8640 = vmatprep.mubr.bf16.mxu1 %v20494_v59  ;;  %v17661_v63 = vld [vmem:[#allocation3 + $0x136c] ss:$20 sps:$4 sm:$0xff]  }
 0x429   :  { %8940 = vmatpush1.bf16.msra.mxu0 %v17641_v28  ;;  %8714 = vmatpush1.bf16.msra.mxu1 %v17644_v6  ;;  %v17659_v6 = vld [vmem:[#allocation3 + $0x1368] ss:$20 sps:$4 sm:$0xff]   ;;  %v17662_v28 = vld [vmem:[#allocation3 + $0x15e0] ss:$20 sps:$4 sm:$0xff]  }
 0x42a   :  { %8941 = vmatprep.subr.bf16.mxu0 %v17649_v38  ;;  %8715 = vmatprep.subr.bf16.mxu1 %v17652_v13  ;;  %v17667_v38 = vld [vmem:[#allocation3 + $0x1394] ss:$20 sps:$4 sm:$0xff]   ;;  %v17670_v13 = vld [vmem:[#allocation3 + $0x160c] ss:$20 sps:$4 sm:$0xff]  }
 0x42c   :  { %15810 = vmatmul.mubr.bf16.gmra.mrb[212].mxu0 %v22752_v60  ;;  %8641 = vmatmul.mubr.bf16.gmra.mrb[212].mxu1 %v20509_v17  ;;  %v17674_v60 = vld [vmem:[#allocation3 + $0x1630] ss:$20 sps:$4 sm:$0xff]  }
 0x42d   :  { %8942 = vmatpush1.bf16.msra.mxu0 %v17647_v44  ;;  %8716 = vmatpush1.bf16.msra.mxu1 %v17650_v53  ;;  %v17668_v44 = vld [vmem:[#allocation3 + $0x1608] ss:$20 sps:$4 sm:$0xff]  }
 0x42e   :  { %8943 = vmatprep.subr.bf16.mxu0 %v17655_v39  ;;  %8717 = vmatprep.subr.bf16.mxu1 %v17658_v45  ;;  %v17665_v45 = vld [vmem:[#allocation3 + $0x1390] ss:$20 sps:$4 sm:$0xff]   ;;  %v17676_v53 = vld [vmem:[#allocation3 + $0x1634] ss:$20 sps:$4 sm:$0xff]   ;;  %v17671_v39 = vld [vmem:[#allocation3 + $0x13b8] ss:$20 sps:$4 sm:$0xff]  }
 0x42f   :  { %15813 = vmatprep.mubr.bf16.mxu0 %v20388_v50  ;;  %8650 = vmatprep.mubr.bf16.mxu1 %v20520_v16  ;;  %v17673_v50 = vld [vmem:[#allocation3 + $0x13bc] ss:$20 sps:$4 sm:$0xff]  }
 0x431   :  { %8944 = vmatpush1.bf16.msra.mxu0 %v17653_v37  ;;  %8718 = vmatpush1.bf16.msra.mxu1 %v17656_v12  ;;  %v17682_v37 = vld [vmem:[#allocation3 + $0x165c] ss:$20 sps:$4 sm:$0xff]   ;;  %v17677_v12 = vld [vmem:[#allocation3 + $0x13e0] ss:$20 sps:$4 sm:$0xff]  }
 0x432   :  { %8945 = vmatprep.subr.bf16.mxu0 %v17661_v63  ;;  %8719 = vmatprep.subr.bf16.mxu1 %v17664_v46  ;;  %v17680_v63 = vld [vmem:[#allocation3 + $0x1658] ss:$20 sps:$4 sm:$0xff]  }
 0x433   :  { %v17688_v46 = vld [vmem:[#allocation3 + $0x1684] ss:$20 sps:$4 sm:$0xff]  }
 0x434   :  { %15814 = vmatmul.mubr.bf16.gmra.mrb[216].mxu0 %v20411_v8  ;;  %8651 = vmatmul.mubr.bf16.gmra.mrb[216].mxu1 %v20535_v35  ;;  %v17679_v8 = vld [vmem:[#allocation3 + $0x13e4] ss:$20 sps:$4 sm:$0xff]  }
 0x435   :  { %8946 = vmatpush1.bf16.msra.mxu0 %v17659_v6  ;;  %8720 = vmatpush1.bf16.msra.mxu1 %v17662_v28  ;;  %v17683_v6 = vld [vmem:[#allocation3 + $0x1408] ss:$20 sps:$4 sm:$0xff]   ;;  %v17686_v28 = vld [vmem:[#allocation3 + $0x1680] ss:$20 sps:$4 sm:$0xff]  }
 0x436   :  { %8947 = vmatprep.subr.bf16.mxu0 %v17667_v38  ;;  %8721 = vmatprep.subr.bf16.mxu1 %v17670_v13  ;;  %v17694_v38 = vld [vmem:[#allocation3 + $0x16ac] ss:$20 sps:$4 sm:$0xff]   ;;  %v17689_v13 = vld [vmem:[#allocation3 + $0x1430] ss:$20 sps:$4 sm:$0xff]  }
 0x437   :  { %15817 = vmatprep.mubr.bf16.mxu0 %v20438_v47  ;;  %8660 = vmatprep.mubr.bf16.mxu1 %v20546_v33  ;;  %v17685_v47 = vld [vmem:[#allocation3 + $0x140c] ss:$20 sps:$4 sm:$0xff]  }
 0x439   :  { %8948 = vmatpush1.bf16.msra.mxu0 %v17665_v45  ;;  %8722 = vmatpush1.bf16.msra.mxu1 %v17668_v44  ;;  %v17692_v45 = vld [vmem:[#allocation3 + $0x16a8] ss:$20 sps:$4 sm:$0xff]  }
 0x43a   :  { %8949 = vmatprep.subr.bf16.mxu0 %v17673_v50  ;;  %8723 = vmatprep.subr.bf16.mxu1 %v17676_v53  ;;  %v17697_v44 = vld [vmem:[#allocation3 + $0x145c] ss:$20 sps:$4 sm:$0xff]   ;;  %v17700_v50 = vld [vmem:[#allocation3 + $0x16d4] ss:$20 sps:$4 sm:$0xff]  }
 0x43b   :  { %v17698_v53 = vld [vmem:[#allocation3 + $0x16d0] ss:$20 sps:$4 sm:$0xff]  }
 0x43c   :  { %15818 = vmatmul.mubr.bf16.gmra.mrb[220].mxu0 %v20458_v4  ;;  %8661 = vmatmul.mubr.bf16.gmra.mrb[220].mxu1 %v20560_v62  ;;  %v17691_v4 = vld [vmem:[#allocation3 + $0x1434] ss:$20 sps:$4 sm:$0xff]  }
 0x43d   :  { %8950 = vmatpush1.bf16.msra.mxu0 %v17671_v39  ;;  %8724 = vmatpush1.bf16.msra.mxu1 %v17674_v60  ;;  %v17703_v39 = vld [vmem:[#allocation3 + $0x1484] ss:$20 sps:$4 sm:$0xff]   ;;  %v17706_v60 = vld [vmem:[#allocation3 + $0x16fc] ss:$20 sps:$4 sm:$0xff]  }
 0x43e   :  { %8951 = vmatprep.subr.bf16.mxu0 %v17679_v8  ;;  %8725 = vmatprep.subr.bf16.mxu1 %v17682_v37  ;;  %v17701_v8 = vld [vmem:[#allocation3 + $0x1480] ss:$20 sps:$4 sm:$0xff]   ;;  %v17704_v37 = vld [vmem:[#allocation3 + $0x16f8] ss:$20 sps:$4 sm:$0xff]  }
 0x43f   :  { %8670 = vmatprep.mubr.bf16.mxu1 %v20567_v14  ;;  %8969 = vmatprep.mubr.bf16.mxu0 %v20468_v11  ;;  %v17695_v11 = vld [vmem:[#allocation3 + $0x1458] ss:$20 sps:$4 sm:$0xff]  }
 0x441   :  { %8952 = vmatpush1.bf16.msra.mxu0 %v17677_v12  ;;  %8726 = vmatpush1.bf16.msra.mxu1 %v17680_v63  ;;  %v17709_v12 = vld [vmem:[#allocation3 + $0x14ac] ss:$20 sps:$4 sm:$0xff]   ;;  %v17712_v63 = vld [vmem:[#allocation3 + $0x1724] ss:$20 sps:$4 sm:$0xff]  }
 0x442   :  { %8953 = vmatprep.subr.bf16.mxu0 %v17685_v47  ;;  %8727 = vmatprep.subr.bf16.mxu1 %v17688_v46  ;;  %v17707_v47 = vld [vmem:[#allocation3 + $0x14a8] ss:$20 sps:$4 sm:$0xff]   ;;  %v17710_v46 = vld [vmem:[#allocation3 + $0x1720] ss:$20 sps:$4 sm:$0xff]  }
 0x444   :  { %8671 = vmatmul.mubr.bf16.gmra.mrb[224].mxu1 %v20574_v20 }
 0x445   :  { %8954 = vmatpush1.bf16.msra.mxu0 %v17683_v6  ;;  %8728 = vmatpush1.bf16.msra.mxu1 %v17686_v28  ;;  %v17715_v6 = vld [vmem:[#allocation3 + $0x14d4] ss:$20 sps:$4 sm:$0xff]   ;;  %v17718_v28 = vld [vmem:[#allocation3 + $0x174c] ss:$20 sps:$4 sm:$0xff]  }
 0x446   :  { %8955 = vmatprep.subr.bf16.mxu0 %v17691_v4  ;;  %8729 = vmatprep.subr.bf16.mxu1 %v17694_v38  ;;  %v17713_v4 = vld [vmem:[#allocation3 + $0x14d0] ss:$20 sps:$4 sm:$0xff]   ;;  %v17716_v38 = vld [vmem:[#allocation3 + $0x1748] ss:$20 sps:$4 sm:$0xff]  }
 0x447   :  { %8680 = vmatprep.mubr.bf16.mxu1 %v20581_v56 }
 0x449   :  { %8956 = vmatpush1.bf16.msra.mxu0 %v17689_v13  ;;  %8730 = vmatpush1.bf16.msra.mxu1 %v17692_v45  ;;  %v17721_v13 = vld [vmem:[#allocation3 + $0x14fc] ss:$20 sps:$4 sm:$0xff]   ;;  %v17724_v45 = vld [vmem:[#allocation3 + $0x1774] ss:$20 sps:$4 sm:$0xff]  }
 0x44a   :  { %8957 = vmatprep.subr.bf16.mxu0 %v17697_v44  ;;  %8731 = vmatprep.subr.bf16.mxu1 %v17700_v50  ;;  %v17719_v44 = vld [vmem:[#allocation3 + $0x14f8] ss:$20 sps:$4 sm:$0xff]   ;;  %v17722_v50 = vld [vmem:[#allocation3 + $0x1770] ss:$20 sps:$4 sm:$0xff]  }
 0x44c   :  { %8681 = vmatmul.mubr.bf16.gmra.mrb[228].mxu1 %v20588_v51 }
 0x44d   :  { %8958 = vmatpush1.bf16.msra.mxu0 %v17695_v11  ;;  %8732 = vmatpush1.bf16.msra.mxu1 %v17698_v53  ;;  %v17727_v11 = vld [vmem:[#allocation3 + $0x1524] ss:$20 sps:$4 sm:$0xff]   ;;  %v17730_v53 = vld [vmem:[#allocation3 + $0x179c] ss:$20 sps:$4 sm:$0xff]  }
 0x44e   :  { %8959 = vmatprep.subr.bf16.mxu0 %v17703_v39  ;;  %8733 = vmatprep.subr.bf16.mxu1 %v17706_v60  ;;  %v17725_v39 = vld [vmem:[#allocation3 + $0x1520] ss:$20 sps:$4 sm:$0xff]   ;;  %v17728_v60 = vld [vmem:[#allocation3 + $0x1798] ss:$20 sps:$4 sm:$0xff]  }
 0x44f   :  { %8690 = vmatprep.mubr.bf16.mxu1 %v20595_v61 }
 0x451   :  { %8960 = vmatpush1.bf16.msra.mxu0 %v17701_v8  ;;  %8734 = vmatpush1.bf16.msra.mxu1 %v17704_v37  ;;  %v17733_v8 = vld [vmem:[#allocation3 + $0x154c] ss:$20 sps:$4 sm:$0xff]   ;;  %v17736_v37 = vld [vmem:[#allocation3 + $0x17c4] ss:$20 sps:$4 sm:$0xff]  }
 0x452   :  { %8961 = vmatprep.subr.bf16.mxu0 %v17709_v12  ;;  %8735 = vmatprep.subr.bf16.mxu1 %v17712_v63  ;;  %v20658_v12 = vld [vmem:[%s22322_s0 + $0xc] ss:$20 sps:$4 sm:$0xff]   ;;  %v17731_v63 = vld [vmem:[#allocation3 + $0x1548] ss:$20 sps:$4 sm:$0xff]  }
 0x454   :  { %8691 = vmatmul.mubr.bf16.gmra.mrb[232].mxu1 %v20602_v30 }
 0x455   :  { %8962 = vmatpush1.bf16.msra.mxu0 %v17707_v47  ;;  %8736 = vmatpush1.bf16.msra.mxu1 %v17710_v46  ;;  %v17734_v47 = vld [vmem:[#allocation3 + $0x17c0] ss:$20 sps:$4 sm:$0xff]  }
 0x456   :  { %8963 = vmatprep.subr.bf16.mxu0 %v17715_v6  ;;  %8737 = vmatprep.subr.bf16.mxu1 %v17718_v28  ;;  %v17739_v46 = vld [vmem:[#allocation3 + $0x1574] ss:$20 sps:$4 sm:$0xff]   ;;  %v17745_v6 = vld [vmem:[#allocation3 + $0x17ec] ss:$20 sps:$4 sm:$0xff]  }
 0x457   :  { %8700 = vmatprep.mubr.bf16.mxu1 %v20609_v55  ;;  %v20665_v28 = vld [vmem:[%s22322_s0 + $0x8] ss:$20 sps:$4 sm:$0xff]  }
 0x459   :  { %8964 = vmatpush1.bf16.msra.mxu0 %v17713_v4  ;;  %8738 = vmatpush1.bf16.msra.mxu1 %v17716_v38  ;;  %v17737_v4 = vld [vmem:[#allocation3 + $0x1570] ss:$20 sps:$4 sm:$0xff]   ;;  %v17743_v38 = vld [vmem:[#allocation3 + $0x17e8] ss:$20 sps:$4 sm:$0xff]  }
 0x45a   :  { %8965 = vmatprep.subr.bf16.mxu0 %v17721_v13  ;;  %8739 = vmatprep.subr.bf16.mxu1 %v17724_v45  ;;  %v17742_v13 = vld [vmem:[#allocation3 + $0x159c] ss:$20 sps:$4 sm:$0xff]   ;;  %v17754_v45 = vld [vmem:[#allocation3 + $0x1814] ss:$20 sps:$4 sm:$0xff]  }
 0x45c   :  { %8701 = vmatmul.mubr.bf16.gmra.mrb[236].mxu1 %v20621_v52 }
 0x45d   :  { %8966 = vmatpush1.bf16.msra.mxu0 %v17719_v44  ;;  %8740 = vmatpush1.bf16.msra.mxu1 %v17722_v50  ;;  %v17740_v44 = vld [vmem:[#allocation3 + $0x1598] ss:$20 sps:$4 sm:$0xff]  }
 0x45e   :  { %8967 = vmatprep.subr.bf16.mxu0 %v17727_v11  ;;  %8741 = vmatprep.subr.bf16.mxu1 %v17730_v53  ;;  %v17748_v50 = vld [vmem:[#allocation3 + $0x15c4] ss:$20 sps:$4 sm:$0xff]   ;;  %v17763_v53 = vld [vmem:[#allocation3 + $0x183c] ss:$20 sps:$4 sm:$0xff]  }
 0x45f   :  { %8743 = vmatprep.mubr.bf16.mxu1 %v20658_v12  ;;  %v17752_v11 = vld [vmem:[#allocation3 + $0x1810] ss:$20 sps:$4 sm:$0xff]  }
 0x461   :  { %8968 = vmatpush1.bf16.msra.mxu0 %v17725_v39  ;;  %8742 = vmatpush1.bf16.msra.mxu1 %v17728_v60  ;;  %v17746_v39 = vld [vmem:[#allocation3 + $0x15c0] ss:$20 sps:$4 sm:$0xff]   ;;  %v20686_v60 = vld [vmem:[%s22322_s0 + $0x5c] ss:$20 sps:$4 sm:$0xff]  }
 0x462   :  { %9050 = vmatprep.subr.bf16.mxu0 %v17733_v8  ;;  %8824 = vmatprep.subr.bf16.mxu1 %v17736_v37  ;;  %v17761_v8 = vld [vmem:[#allocation3 + $0x1838] ss:$20 sps:$4 sm:$0xff]   ;;  %v17749_v37 = vld [vmem:[#allocation3 + $0x15e8] ss:$20 sps:$4 sm:$0xff]  }
 0x464   :  { %8970 = vmatmul.mubr.bf16.vlgmr.msra.gmra.mrb[224].mxu0 %v20482_v29  ;;  %8744 = vmatmul.mubr.bf16.vlgmr.msra.gmra.mrb[208].mxu1 %v20665_v28  ;;  %v20672_v29 = vld [vmem:[%s22322_s0 + $0x34] ss:$20 sps:$4 sm:$0xff]  }
 0x465   :  { %9051 = vmatpush1.bf16.msra.mxu0 %v17731_v63  ;;  %8825 = vmatpush1.bf16.msra.mxu1 %v17734_v47  ;;  %v17757_v63 = vld [vmem:[#allocation3 + $0x1614] ss:$20 sps:$4 sm:$0xff]   ;;  %v17772_v47 = vld [vmem:[#allocation3 + $0x1864] ss:$20 sps:$4 sm:$0xff]  }
 0x466   :  { %9052 = vmatprep.subr.bf16.mxu0 %v17739_v46  ;;  %8979 = vmatprep.mubr.bf16.mxu0 %v20494_v59  ;;  %v20679_v59 = vld [vmem:[%s22322_s0 + $0x30] ss:$20 sps:$4 sm:$0xff]   ;;  %v17770_v46 = vld [vmem:[#allocation3 + $0x1860] ss:$20 sps:$4 sm:$0xff]  }
 0x467   :  { %8753 = vmatprep.mubr.bf16.mxu1 %v20672_v29  ;;  %8826 = vmatprep.subr.bf16.mxu1 %v17745_v6  ;;  %v17755_v6 = vld [vmem:[#allocation3 + $0x1610] ss:$20 sps:$4 sm:$0xff]  }
 0x469   :  { %9053 = vmatpush1.bf16.msra.mxu0 %v17737_v4  ;;  %8827 = vmatpush1.bf16.msra.mxu1 %v17743_v38  ;;  %v17781_v4 = vld [vmem:[#allocation3 + $0x188c] ss:$20 sps:$4 sm:$0xff]   ;;  %v20700_v38 = vld [vmem:[%s22322_s0 + $0x84] ss:$20 sps:$4 sm:$0xff]  }
 0x46a   :  { %9054 = vmatprep.subr.bf16.mxu0 %v17742_v13  ;;  %8828 = vmatprep.subr.bf16.mxu1 %v17754_v45 }
 0x46c   :  { %8980 = vmatmul.mubr.bf16.gmra.mrb[228].mxu0 %v20509_v17  ;;  %8754 = vmatmul.mubr.bf16.gmra.mrb[212].mxu1 %v20679_v59  ;;  %v17751_v17 = vld [vmem:[#allocation3 + $0x15ec] ss:$20 sps:$4 sm:$0xff]  }
 0x46d   :  { %9055 = vmatpush1.bf16.msra.mxu0 %v17740_v44  ;;  %8989 = vmatprep.mubr.bf16.mxu0 %v20520_v16  ;;  %v20693_v16 = vld [vmem:[%s22322_s0 + $0x58] ss:$20 sps:$4 sm:$0xff]   ;;  %v22753_v44 = vld [vmem:[#allocation22_spill] sm:$0xff] }
 0x46e   :  { %9056 = vmatprep.subr.bf16.mxu0 %v17748_v50  ;;  %8763 = vmatprep.mubr.bf16.mxu1 %v20686_v60  ;;  %v22754_v50 = vld [vmem:[#allocation90_spill] sm:$0xff] }
 0x46f   :  { %8829 = vmatpush1.bf16.msra.mxu1 %v17752_v11  ;;  %v22755_v11 = vmax.f32 %v22753_v44, %v22754_v50  ;;  %v17758_v50 = vld [vmem:[#allocation3 + $0x1638] ss:$20 sps:$4 sm:$0xff]  }
 0x470   :  { %8830 = vmatprep.subr.bf16.mxu1 %v17763_v53 }
 0x471   :  { %9057 = vmatpush1.bf16.msra.mxu0 %v17746_v39  ;;  %v22757_v39 = vld [vmem:[#allocation23_spill] sm:$0xff] }
 0x472   :  { %9058 = vmatprep.subr.bf16.mxu0 %v17751_v17 }
 0x473   :  { %8831 = vmatpush1.bf16.msra.mxu1 %v17761_v8 }
 0x474   :  { %8990 = vmatmul.mubr.bf16.gmra.mrb[232].mxu0 %v20535_v35  ;;  %8764 = vmatmul.mubr.bf16.gmra.mrb[216].mxu1 %v20693_v16  ;;  %v17760_v35 = vld [vmem:[#allocation3 + $0x163c] ss:$20 sps:$4 sm:$0xff]  }
 0x475   :  { %9059 = vmatpush1.bf16.msra.mxu0 %v17749_v37  ;;  %8999 = vmatprep.mubr.bf16.mxu0 %v20546_v33  ;;  %v22758_v33 = vld [vmem:[#allocation122_spill] sm:$0xff] }
 0x476   :  { %9060 = vmatprep.subr.bf16.mxu0 %v17757_v63  ;;  %8773 = vmatprep.mubr.bf16.mxu1 %v20700_v38  ;;  %v22759_v17 = vmax.f32 %v22757_v39, %v22758_v33 }
 0x477   :  { %v6528_v13 = vpop.f32.mrb[144].mxu0  ;;  %v6867_v45 = vpop.f32.mrb[144].mxu1  ;;  %8832 = vmatprep.subr.bf16.mxu1 %v17772_v47  ;;  %v22766_v47 = vld [vmem:[#allocation123_spill] sm:$0xff] }
 0x478   :  { %v20706_v53 = vmax.f32 %v22755_v11, %v6528_v13  ;;  %v20711_v8 = vmax.f32 %v22759_v17, %v6867_v45  ;;  %v6530_v37 = vpop.f32.mrb[145].mxu0  ;;  %v6869_v63 = vpop.f32.mrb[145].mxu1  ;;  %8833 = vmatpush1.bf16.msra.mxu1 %v17770_v46  ;;  %v22767_v43 = vmax.f32 %v22765_v15, %v22766_v47  ;;  %v22769_v45 = vld [vmem:[#allocation26_spill] sm:$0xff]  ;;  %v22770_v11 = vld [vmem:[#allocation92_spill] sm:$0xff]  ;;  %v22773_v46 = vld [vmem:[#allocation27_spill] sm:$0xff] }
 0x479   :  { %v20716_v19 = vmax.f32 %v22763_v42, %v6530_v37  ;;  %9061 = vmatpush1.bf16.msra.mxu0 %v17755_v6  ;;  %v6532_v13 = vpop.f32.mrb[146].mxu0  ;;  %v6871_v44 = vpop.f32.mrb[146].mxu1  ;;  %8834 = vmatprep.subr.bf16.mxu1 %v17781_v4  ;;  %v22771_v39 = vmax.f32 %v22769_v45, %v22770_v11  ;;  %v22774_v17 = vld [vmem:[#allocation124_spill] sm:$0xff]  ;;  %v22778_v6 = vld [vmem:[#allocation93_spill] sm:$0xff] }
 0x47a   :  { %22756 = vst [vmem:[#allocation134_spill] sm:$0xff] %v20706_v53  ;;  %22760 = vst [vmem:[#allocation135_spill] sm:$0xff] %v20711_v8  ;;  %v20721_v58 = vmax.f32 %v22767_v43, %v6869_v63  ;;  %v22775_v57 = vmax.f32 %v22773_v46, %v22774_v17  ;;  %v6534_v42 = vpop.f32.mrb[147].mxu0  ;;  %v6873_v37 = vpop.f32.mrb[147].mxu1  ;;  %9062 = vmatprep.subr.bf16.mxu0 %v17760_v35  ;;  %v17766_v43 = vld [vmem:[#allocation3 + $0x1664] ss:$20 sps:$4 sm:$0xff]  }
 0x47b   :  { %22764 = vst [vmem:[#allocation140_spill] sm:$0xff] %v20716_v19  ;;  %v20726_v33 = vmax.f32 %v22771_v39, %v6532_v13  ;;  %v22777_v15 = vld [vmem:[#allocation28_spill] sm:$0xff]  ;;  %v22781_v4 = vld [vmem:[#allocation29_spill] sm:$0xff]  ;;  %v22785_v17 = vld [vmem:[#allocation30_spill] sm:$0xff] }
 0x47c   :  { %22768 = vst [vmem:[#allocation149_spill] sm:$0xff] %v20721_v58  ;;  %v20731_v41 = vmax.f32 %v22775_v57, %v6871_v44  ;;  %v22779_v63 = vmax.f32 %v22777_v15, %v22778_v6  ;;  %v22782_v58 = vld [vmem:[#allocation125_spill] sm:$0xff]  ;;  %9000 = vmatmul.mubr.bf16.gmra.mrb[236].mxu0 %v20560_v62  ;;  %v20747_v44 = vld [vmem:[%s22322_s0 + $0x80] ss:$20 sps:$4 sm:$0xff]   ;;  %v17788_v46 = vld [vmem:[#allocation3 + $0x18b0] ss:$20 sps:$4 sm:$0xff]  }
 0x47d   :  { %22772 = vst [vmem:[#allocation154_spill] sm:$0xff] %v20726_v33  ;;  %v22783_v8 = vmax.f32 %v22781_v4, %v22782_v58  ;;  %v17779_v13 = vld [vmem:[#allocation3 + $0x1888] ss:$20 sps:$4 sm:$0xff]   ;;  %8774 = vmatmul.mubr.bf16.gmra.mrb[220].mxu1 %v20747_v44  ;;  %9063 = vmatpush1.bf16.msra.mxu0 %v17758_v50  ;;  %v17764_v11 = vld [vmem:[#allocation3 + $0x1660] ss:$20 sps:$4 sm:$0xff]  }
 0x47e   :  { %22776 = vst [vmem:[#allocation159_spill] sm:$0xff] %v20731_v41  ;;  %v20736_v47 = vmax.f32 %v22779_v63, %v6534_v42  ;;  %v17790_v35 = vld [vmem:[#allocation3 + $0x18b4] ss:$20 sps:$4 sm:$0xff]   ;;  %9009 = vmatprep.mubr.bf16.mxu0 %v20567_v14  ;;  %9064 = vmatprep.subr.bf16.mxu0 %v17766_v43  ;;  %v20754_v58 = vld [vmem:[%s22322_s0 + $0xac] ss:$20 sps:$4 sm:$0xff]   ;;  %v22798_v33 = vld [vmem:[#allocation127_spill] sm:$0xff] }
 0x47f   :  { %v20741_v45 = vmax.f32 %v22783_v8, %v6873_v37  ;;  %8783 = vmatprep.mubr.bf16.mxu1 %v20754_v58  ;;  %v17769_v62 = vld [vmem:[#allocation3 + $0x168c] ss:$20 sps:$4 sm:$0xff]   ;;  %v6538_v8 = vpop.f32.mrb[148].mxu0  ;;  %v6877_v39 = vpop.f32.mrb[148].mxu1  ;;  %8835 = vmatpush1.bf16.msra.mxu1 %v17779_v13  ;;  %v22786_v57 = vld [vmem:[#allocation94_spill] sm:$0xff]  ;;  %v22789_v37 = vld [vmem:[#allocation31_spill] sm:$0xff] }
 0x480   :  { %22780 = vst [vmem:[#allocation160_spill] sm:$0xff] %v20736_v47  ;;  %v22787_v42 = vmax.f32 %v22785_v17, %v22786_v57  ;;  %v22790_v14 = vld [vmem:[#allocation126_spill] sm:$0xff]  ;;  %v6540_v6 = vpop.f32.mrb[149].mxu0  ;;  %v6879_v63 = vpop.f32.mrb[149].mxu1  ;;  %8836 = vmatprep.subr.bf16.mxu1 %v17790_v35  ;;  %v22793_v4 = vld [vmem:[#allocation32_spill] sm:$0xff]  ;;  %v22797_v13 = vld [vmem:[#allocation33_spill] sm:$0xff] }
 0x481   :  { %22784 = vst [vmem:[#allocation22_spill] sm:$0xff] %v20741_v45  ;;  %v22791_v43 = vmax.f32 %v22789_v37, %v22790_v14  ;;  %v22794_v45 = vld [vmem:[#allocation95_spill] sm:$0xff]  ;;  %v22799_v19 = vmax.f32 %v22797_v13, %v22798_v33  ;;  %9065 = vmatpush1.bf16.msra.mxu0 %v17764_v11  ;;  %v6881_v17 = vpop.f32.mrb[150].mxu1  ;;  %v17775_v33 = vld [vmem:[#allocation3 + $0x16b4] ss:$20 sps:$4 sm:$0xff]  }
 0x482   :  { %v20760_v50 = vmax.f32 %v22787_v42, %v6538_v8  ;;  %v22795_v41 = vmax.f32 %v22793_v4, %v22794_v45  ;;  %v6542_v8 = vpop.f32.mrb[150].mxu0  ;;  %v17767_v57 = vld [vmem:[#allocation3 + $0x1688] ss:$20 sps:$4 sm:$0xff]   ;;  %v22801_v42 = vld [vmem:[#allocation34_spill] sm:$0xff]  ;;  %9066 = vmatprep.subr.bf16.mxu0 %v17769_v62  ;;  %v17797_v62 = vld [vmem:[#allocation3 + $0x18d8] ss:$20 sps:$4 sm:$0xff]  }
 0x483   :  { %v20765_v15 = vmax.f32 %v22791_v43, %v6877_v39  ;;  %v20775_v53 = vmax.f32 %v22799_v19, %v6879_v63  ;;  %v22802_v39 = vld [vmem:[#allocation96_spill] sm:$0xff]  ;;  %v22805_v35 = vld [vmem:[#allocation35_spill] sm:$0xff]  ;;  %v22810_v63 = vld [vmem:[#allocation97_spill] sm:$0xff]  ;;  %8837 = vmatpush1.bf16.msra.mxu1 %v17788_v46 }
 0x484   :  { %22788 = vst [vmem:[#allocation90_spill] sm:$0xff] %v20760_v50  ;;  %v20770_v47 = vmax.f32 %v22795_v41, %v6540_v6  ;;  %v22803_v37 = vmax.f32 %v22801_v42, %v22802_v39  ;;  %v22806_v43 = vld [vmem:[#allocation128_spill] sm:$0xff]  ;;  %v6544_v41 = vpop.f32.mrb[151].mxu0  ;;  %v6883_v6 = vpop.f32.mrb[151].mxu1  ;;  %v22813_v13 = vld [vmem:[#allocation37_spill] sm:$0xff]  ;;  %9010 = vmatmul.mubr.bf16.gmra.mrb[240].mxu0 %v20574_v20 }
 0x485   :  { %22792 = vst [vmem:[#allocation23_spill] sm:$0xff] %v20765_v15  ;;  %22800 = vst [vmem:[#allocation24_spill] sm:$0xff] %v20775_v53  ;;  %v22807_v15 = vmax.f32 %v22805_v35, %v22806_v43  ;;  %v22809_v19 = vld [vmem:[#allocation36_spill] sm:$0xff]  ;;  %v22814_v53 = vld [vmem:[#allocation129_spill] sm:$0xff]  ;;  %9067 = vmatpush1.bf16.msra.mxu0 %v17767_v57  ;;  %9019 = vmatprep.mubr.bf16.mxu0 %v20581_v56 }
 0x486   :  { %22796 = vst [vmem:[#allocation122_spill] sm:$0xff] %v20770_v47  ;;  %v20780_v14 = vmax.f32 %v22803_v37, %v6542_v8  ;;  %v22811_v11 = vmax.f32 %v22809_v19, %v22810_v63  ;;  %v22815_v47 = vmax.f32 %v22813_v13, %v22814_v53  ;;  %v17799_v8 = vld [vmem:[#allocation3 + $0x18dc] ss:$20 sps:$4 sm:$0xff]   ;;  %9068 = vmatprep.subr.bf16.mxu0 %v17775_v33  ;;  %v20808_v53 = vld [vmem:[%s22322_s0 + $0xd4] ss:$20 sps:$4 sm:$0xff]  }
 0x487   :  { %v20785_v45 = vmax.f32 %v22807_v15, %v6881_v17  ;;  %v20801_v15 = vld [vmem:[%s22322_s0 + $0xa8] ss:$20 sps:$4 sm:$0xff]   ;;  %v17773_v17 = vld [vmem:[#allocation3 + $0x16b0] ss:$20 sps:$4 sm:$0xff]   ;;  %v6887_v46 = vpop.f32.mrb[152].mxu1  ;;  %8838 = vmatprep.subr.bf16.mxu1 %v17799_v8 }
 0x488   :  { %22804 = vst [vmem:[#allocation91_spill] sm:$0xff] %v20780_v14  ;;  %v20790_v4 = vmax.f32 %v22811_v11, %v6544_v41  ;;  %v20795_v42 = vmax.f32 %v22815_v47, %v6883_v6  ;;  %8784 = vmatmul.mubr.bf16.gmra.mrb[224].mxu1 %v20801_v15  ;;  %v17806_v39 = vld [vmem:[#allocation3 + $0x1410] ss:$20 sps:$4 sm:$0xff]   ;;  %v6548_v47 = vpop.f32.mrb[152].mxu0  ;;  %v22821_v41 = vld [vmem:[#allocation39_spill] sm:$0xff]  ;;  %v6889_v63 = vpop.f32.mrb[153].mxu1 }
 0x489   :  { %22808 = vst [vmem:[#allocation25_spill] sm:$0xff] %v20785_v45  ;;  %8793 = vmatprep.mubr.bf16.mxu1 %v20808_v53  ;;  %v17778_v20 = vld [vmem:[#allocation3 + $0x16dc] ss:$20 sps:$4 sm:$0xff]   ;;  %v6550_v19 = vpop.f32.mrb[153].mxu0  ;;  %8839 = vmatpush1.bf16.msra.mxu1 %v17797_v62  ;;  %v22825_v11 = vld [vmem:[#allocation40_spill] sm:$0xff] }
 0x48a   :  { %22812 = vst [vmem:[#allocation123_spill] sm:$0xff] %v20790_v4  ;;  %22816 = vst [vmem:[#allocation26_spill] sm:$0xff] %v20795_v42  ;;  %v22817_v37 = vld [vmem:[#allocation38_spill] sm:$0xff]  ;;  %v22826_v13 = vld [vmem:[#allocation99_spill] sm:$0xff]  ;;  %9069 = vmatpush1.bf16.msra.mxu0 %v17773_v17  ;;  %15492 = vmatprep.subr.bf16.mxu1 %v17806_v39 }
 0x48b   :  { %v22818_v35 = vld [vmem:[#allocation98_spill] sm:$0xff]  ;;  %v22827_v42 = vmax.f32 %v22825_v11, %v22826_v13  ;;  %v22829_v4 = vld [vmem:[#allocation41_spill] sm:$0xff]  ;;  %v22830_v8 = vld [vmem:[#allocation131_spill] sm:$0xff]  ;;  %9070 = vmatprep.subr.bf16.mxu0 %v17778_v20 }
 0x48c   :  { %v22819_v43 = vmax.f32 %v22817_v37, %v22818_v35  ;;  %v22822_v56 = vld [vmem:[#allocation130_spill] sm:$0xff]  ;;  %v22831_v14 = vmax.f32 %v22829_v4, %v22830_v8  ;;  %v6891_v37 = vpop.f32.mrb[154].mxu1  ;;  %v17776_v35 = vld [vmem:[#allocation3 + $0x16d8] ss:$20 sps:$4 sm:$0xff]   ;;  %v22841_v4 = vld [vmem:[#allocation44_spill] sm:$0xff]  ;;  %9020 = vmatmul.mubr.bf16.gmra.mrb[244].mxu0 %v20588_v51 }
 0x48d   :  { %v22823_v6 = vmax.f32 %v22821_v41, %v22822_v56  ;;  %v20824_v45 = vmax.f32 %v22827_v42, %v6550_v19  ;;  %v22837_v62 = vld [vmem:[#allocation43_spill] sm:$0xff]  ;;  %v6893_v13 = vpop.f32.mrb[155].mxu1  ;;  %v22842_v17 = vld [vmem:[#allocation101_spill] sm:$0xff]  ;;  %v17782_v20 = vld [vmem:[#allocation3 + $0x1700] ss:$20 sps:$4 sm:$0xff]   ;;  %9029 = vmatprep.mubr.bf16.mxu0 %v20595_v61 }
 0x48e   :  { %v20814_v57 = vmax.f32 %v22819_v43, %v6548_v47  ;;  %v20829_v50 = vmax.f32 %v22831_v14, %v6889_v63  ;;  %v6552_v47 = vpop.f32.mrb[154].mxu0  ;;  %v22834_v43 = vld [vmem:[#allocation100_spill] sm:$0xff]  ;;  %v22843_v63 = vmax.f32 %v22841_v4, %v22842_v17  ;;  %v22845_v39 = vld [vmem:[#allocation45_spill] sm:$0xff]  ;;  %9071 = vmatpush1.bf16.msra.mxu0 %v17776_v35  ;;  %v22853_v35 = vld [vmem:[#allocation47_spill] sm:$0xff] }
 0x48f   :  { %v20819_v33 = vmax.f32 %v22823_v6, %v6887_v46  ;;  %22828 = vst [vmem:[#allocation124_spill] sm:$0xff] %v20824_v45  ;;  %v22833_v46 = vld [vmem:[#allocation42_spill] sm:$0xff]  ;;  %v22838_v6 = vld [vmem:[#allocation132_spill] sm:$0xff]  ;;  %v6554_v19 = vpop.f32.mrb[155].mxu0  ;;  %v22858_v17 = vld [vmem:[#allocation103_spill] sm:$0xff] }
 0x490   :  { %22820 = vst [vmem:[#allocation92_spill] sm:$0xff] %v20814_v57  ;;  %22832 = vst [vmem:[#allocation28_spill] sm:$0xff] %v20829_v50  ;;  %v22835_v41 = vmax.f32 %v22833_v46, %v22834_v43  ;;  %v22839_v11 = vmax.f32 %v22837_v62, %v22838_v6  ;;  %v17784_v14 = vld [vmem:[#allocation3 + $0x1704] ss:$20 sps:$4 sm:$0xff]   ;;  %v20844_v8 = vmax.f32 %v22843_v63, %v6554_v19  ;;  %v22846_v50 = vld [vmem:[#allocation133_spill] sm:$0xff] }
 0x491   :  { %22824 = vst [vmem:[#allocation27_spill] sm:$0xff] %v20819_v33  ;;  %v22847_v33 = vmax.f32 %v22845_v39, %v22846_v50  ;;  %9072 = vmatprep.subr.bf16.mxu0 %v17784_v14  ;;  %v20862_v50 = vld [vmem:[%s22322_s0 + $0xfc] ss:$20 sps:$4 sm:$0xff]   ;;  %v17787_v51 = vld [vmem:[#allocation3 + $0x172c] ss:$20 sps:$4 sm:$0xff]  }
 0x492   :  { %v20834_v56 = vmax.f32 %v22835_v41, %v6552_v47  ;;  %v20839_v42 = vmax.f32 %v22839_v11, %v6891_v37  ;;  %22844 = vst [vmem:[#allocation125_spill] sm:$0xff] %v20844_v8  ;;  %v20855_v47 = vld [vmem:[%s22322_s0 + $0xd0] ss:$20 sps:$4 sm:$0xff]   ;;  %v6897_v37 = vpop.f32.mrb[156].mxu1  ;;  %9073 = vmatpush1.bf16.msra.mxu0 %v17782_v20  ;;  %v17852_v45 = vld [vmem:[#allocation3 + $0x1708] ss:$20 sps:$4 sm:$0xff]  }
 0x493   :  { %v20849_v46 = vmax.f32 %v22847_v33, %v6893_v13  ;;  %8794 = vmatmul.mubr.bf16.gmra.mrb[228].mxu1 %v20855_v47  ;;  %v6558_v33 = vpop.f32.mrb[156].mxu0  ;;  %v22849_v43 = vld [vmem:[#allocation46_spill] sm:$0xff]  ;;  %v22854_v11 = vld [vmem:[#allocation136_spill] sm:$0xff]  ;;  %v6899_v14 = vpop.f32.mrb[157].mxu1  ;;  %9074 = vmatprep.subr.bf16.mxu0 %v17787_v51  ;;  %v17854_v57 = vld [vmem:[#allocation3 + $0x1848] ss:$20 sps:$4 sm:$0xff]  }
 0x494   :  { %22836 = vst [vmem:[#allocation93_spill] sm:$0xff] %v20834_v56  ;;  %22840 = vst [vmem:[#allocation29_spill] sm:$0xff] %v20839_v42  ;;  %8803 = vmatprep.mubr.bf16.mxu1 %v20862_v50  ;;  %v22850_v41 = vld [vmem:[#allocation102_spill] sm:$0xff]  ;;  %v22855_v19 = vmax.f32 %v22853_v35, %v22854_v11  ;;  %v6560_v13 = vpop.f32.mrb[157].mxu0  ;;  %v22857_v4 = vld [vmem:[#allocation48_spill] sm:$0xff]  ;;  %9030 = vmatmul.mubr.bf16.gmra.mrb[248].mxu0 %v20602_v30 }
 0x495   :  { %22848 = vst [vmem:[#allocation30_spill] sm:$0xff] %v20849_v46  ;;  %v22851_v62 = vmax.f32 %v22849_v43, %v22850_v41  ;;  %v22859_v63 = vmax.f32 %v22857_v4, %v22858_v17  ;;  %v22861_v46 = vld [vmem:[#allocation49_spill] sm:$0xff]  ;;  %v6901_v43 = vpop.f32.mrb[158].mxu1  ;;  %v22866_v35 = vld [vmem:[#allocation104_spill] sm:$0xff]  ;;  %9039 = vmatprep.mubr.bf16.mxu0 %v20609_v55  ;;  %v22890_v55 = vld [vmem:[#allocation107_spill] sm:$0xff] }
 0x496   :  { %v20873_v61 = vmax.f32 %v22855_v19, %v6897_v37  ;;  %v22862_v42 = vld [vmem:[#allocation137_spill] sm:$0xff]  ;;  %v22869_v19 = vld [vmem:[#allocation51_spill] sm:$0xff]  ;;  %v6903_v17 = vpop.f32.mrb[159].mxu1  ;;  %v17791_v51 = vld [vmem:[#allocation3 + $0x1750] ss:$20 sps:$4 sm:$0xff]  }
 0x497   :  { %v20868_v6 = vmax.f32 %v22851_v62, %v6558_v33  ;;  %v20878_v39 = vmax.f32 %v22859_v63, %v6560_v13  ;;  %v22863_v8 = vmax.f32 %v22861_v46, %v22862_v42  ;;  %v6562_v33 = vpop.f32.mrb[158].mxu0  ;;  %v17785_v41 = vld [vmem:[#allocation3 + $0x1728] ss:$20 sps:$4 sm:$0xff]   ;;  %v22865_v62 = vld [vmem:[#allocation50_spill] sm:$0xff] }
 0x498   :  { %22856 = vst [vmem:[#allocation31_spill] sm:$0xff] %v20873_v61  ;;  %v22867_v37 = vmax.f32 %v22865_v62, %v22866_v35  ;;  %v22870_v61 = vld [vmem:[#allocation138_spill] sm:$0xff]  ;;  %v6564_v13 = vpop.f32.mrb[159].mxu0  ;;  %v22874_v46 = vld [vmem:[#allocation105_spill] sm:$0xff]  ;;  %9075 = vmatpush1.bf16.msra.mxu0 %v17785_v41 }
 0x499   :  { %22852 = vst [vmem:[#allocation94_spill] sm:$0xff] %v20868_v6  ;;  %22860 = vst [vmem:[#allocation126_spill] sm:$0xff] %v20878_v39  ;;  %v20883_v56 = vmax.f32 %v22863_v8, %v6899_v14  ;;  %v22871_v6 = vmax.f32 %v22869_v19, %v22870_v61  ;;  %v17793_v42 = vld [vmem:[#allocation3 + $0x1754] ss:$20 sps:$4 sm:$0xff]   ;;  %v22873_v8 = vld [vmem:[#allocation52_spill] sm:$0xff] }
 0x49a   :  { %v20888_v11 = vmax.f32 %v22867_v37, %v6562_v33  ;;  %v22875_v20 = vmax.f32 %v22873_v8, %v22874_v46  ;;  %v22877_v63 = vld [vmem:[#allocation53_spill] sm:$0xff]  ;;  %9076 = vmatprep.subr.bf16.mxu0 %v17793_v42  ;;  %v17796_v61 = vld [vmem:[#allocation3 + $0x177c] ss:$20 sps:$4 sm:$0xff]   ;;  %v22889_v46 = vld [vmem:[#allocation56_spill] sm:$0xff] }
 0x49b   :  { %22864 = vst [vmem:[#allocation32_spill] sm:$0xff] %v20883_v56  ;;  %v20893_v4 = vmax.f32 %v22871_v6, %v6901_v43  ;;  %v22878_v56 = vld [vmem:[#allocation139_spill] sm:$0xff]  ;;  %v22881_v33 = vld [vmem:[#allocation54_spill] sm:$0xff]  ;;  %v22886_v19 = vld [vmem:[#allocation141_spill] sm:$0xff]  ;;  %v22891_v42 = vmax.f32 %v22889_v46, %v22890_v55 }
 0x49c   :  { %22868 = vst [vmem:[#allocation95_spill] sm:$0xff] %v20888_v11  ;;  %v20898_v14 = vmax.f32 %v22875_v20, %v6564_v13  ;;  %v22879_v39 = vmax.f32 %v22877_v63, %v22878_v56  ;;  %v20909_v6 = vld [vmem:[%s22322_s0 + $0xf8] ss:$20 sps:$4 sm:$0xff]   ;;  %v6568_v56 = vpop.f32.mrb[160].mxu0  ;;  %v22882_v43 = vld [vmem:[#allocation106_spill] sm:$0xff]  ;;  %9077 = vmatpush1.bf16.msra.mxu0 %v17791_v51 }
 0x49d   :  { %22872 = vst [vmem:[#allocation33_spill] sm:$0xff] %v20893_v4  ;;  %8804 = vmatmul.mubr.bf16.gmra.mrb[232].mxu1 %v20909_v6  ;;  %v22883_v30 = vmax.f32 %v22881_v33, %v22882_v43  ;;  %v22885_v37 = vld [vmem:[#allocation55_spill] sm:$0xff]  ;;  %v6570_v41 = vpop.f32.mrb[161].mxu0  ;;  %v22894_v63 = vld [vmem:[#allocation142_spill] sm:$0xff]  ;;  %9078 = vmatprep.subr.bf16.mxu0 %v17796_v61  ;;  %v17805_v61 = vld [vmem:[#allocation3 + $0x17cc] ss:$20 sps:$4 sm:$0xff]  }
 0x49e   :  { %22876 = vst [vmem:[#allocation127_spill] sm:$0xff] %v20898_v14  ;;  %v20903_v62 = vmax.f32 %v22879_v39, %v6903_v17  ;;  %8813 = vmatprep.mubr.bf16.mxu1 %v20615_v0  ;;  %v6907_v39 = vpop.f32.mrb[160].mxu1  ;;  %v22887_v13 = vmax.f32 %v22885_v37, %v22886_v19  ;;  %v20927_v20 = vmax.f32 %v22891_v42, %v6570_v41  ;;  %v22893_v0 = vld [vmem:[#allocation57_spill] sm:$0xff]  ;;  %v22898_v37 = vld [vmem:[#allocation108_spill] sm:$0xff] }
 0x49f   :  { %v20917_v35 = vmax.f32 %v22883_v30, %v6568_v56  ;;  %v6909_v8 = vpop.f32.mrb[161].mxu1  ;;  %v6572_v56 = vpop.f32.mrb[162].mxu0  ;;  %v17794_v43 = vld [vmem:[#allocation3 + $0x1778] ss:$20 sps:$4 sm:$0xff]   ;;  %v22897_v30 = vld [vmem:[#allocation58_spill] sm:$0xff]  ;;  %9040 = vmatmul.mubr.bf16.gmra.mrb[252].mxu0 %v20621_v52 }
 0x4a0   :  { %22880 = vst [vmem:[#allocation34_spill] sm:$0xff] %v20903_v62  ;;  %v20922_v17 = vmax.f32 %v22887_v13, %v6907_v39  ;;  %22892 = vst [vmem:[#allocation128_spill] sm:$0xff] %v20927_v20  ;;  %v22895_v62 = vmax.f32 %v22893_v0, %v22894_v63  ;;  %v6911_v33 = vpop.f32.mrb[162].mxu1  ;;  %v22899_v39 = vmax.f32 %v22897_v30, %v22898_v37  ;;  %v22901_v13 = vld [vmem:[#allocation59_spill] sm:$0xff]  ;;  %v6574_v41 = vpop.f32.mrb[163].mxu0  ;;  %v22909_v63 = vld [vmem:[#allocation61_spill] sm:$0xff]  ;;  %9079 = vmatpush1.bf16.msra.mxu0 %v17794_v43 }
 0x4a1   :  { %22884 = vst [vmem:[#allocation96_spill] sm:$0xff] %v20917_v35  ;;  %v6913_v55 = vpop.f32.mrb[163].mxu1  ;;  %v17802_v42 = vld [vmem:[#allocation3 + $0x17a4] ss:$20 sps:$4 sm:$0xff]   ;;  %9082 = vmatprep.mubr.bf16.mxu0 %v20658_v12  ;;  %v22914_v37 = vld [vmem:[#allocation110_spill] sm:$0xff] }
 0x4a2   :  { %22888 = vst [vmem:[#allocation35_spill] sm:$0xff] %v20922_v17  ;;  %v20932_v4 = vmax.f32 %v22895_v62, %v6909_v8  ;;  %v20937_v19 = vmax.f32 %v22899_v39, %v6572_v56  ;;  %v22902_v17 = vld [vmem:[#allocation143_spill] sm:$0xff]  ;;  %v22905_v62 = vld [vmem:[#allocation60_spill] sm:$0xff]  ;;  %v22906_v8 = vld [vmem:[#allocation109_spill] sm:$0xff]  ;;  %9080 = vmatprep.subr.bf16.mxu0 %v17802_v42  ;;  %v6917_v56 = vpop.f32.mrb[164].mxu1 }
 0x4a3   :  { %v22903_v35 = vmax.f32 %v22901_v13, %v22902_v17  ;;  %v22907_v51 = vmax.f32 %v22905_v62, %v22906_v8  ;;  %v6578_v17 = vpop.f32.mrb[164].mxu0  ;;  %v22918_v13 = vld [vmem:[#allocation145_spill] sm:$0xff]  ;;  %v6919_v43 = vpop.f32.mrb[165].mxu1  ;;  %v22922_v12 = vld [vmem:[#allocation111_spill] sm:$0xff] }
 0x4a4   :  { %22896 = vst [vmem:[#allocation36_spill] sm:$0xff] %v20932_v4  ;;  %22900 = vst [vmem:[#allocation97_spill] sm:$0xff] %v20937_v19  ;;  %v22910_v4 = vld [vmem:[#allocation144_spill] sm:$0xff]  ;;  %v22925_v8 = vld [vmem:[#allocation65_spill] sm:$0xff] }
 0x4a5   :  { %v20942_v46 = vmax.f32 %v22903_v35, %v6911_v33  ;;  %v20947_v0 = vmax.f32 %v22907_v51, %v6574_v41  ;;  %v22911_v20 = vmax.f32 %v22909_v63, %v22910_v4  ;;  %8814 = vmatmul.mubr.bf16.gmra.mrb[236].mxu1 %v20627_v49  ;;  %v17800_v35 = vld [vmem:[#allocation3 + $0x17a0] ss:$20 sps:$4 sm:$0xff]   ;;  %v6580_v49 = vpop.f32.mrb[165].mxu0  ;;  %v17846_v19 = vld [vmem:[#allocation3 + $0x16b8] ss:$20 sps:$4 sm:$0xff]  }
 0x4a6   :  { %8856 = vmatprep.mubr.bf16.mxu1 %v22604_v24  ;;  %v22913_v33 = vld [vmem:[#allocation62_spill] sm:$0xff]  ;;  %9081 = vmatpush1.bf16.msra.mxu0 %v17800_v35  ;;  %v17848_v14 = vld [vmem:[#allocation3 + $0x17f8] ss:$20 sps:$4 sm:$0xff]  }
 0x4a7   :  { %22904 = vst [vmem:[#allocation37_spill] sm:$0xff] %v20942_v46  ;;  %22908 = vst [vmem:[#allocation129_spill] sm:$0xff] %v20947_v0  ;;  %v20952_v30 = vmax.f32 %v22911_v20, %v6913_v55  ;;  %v22915_v39 = vmax.f32 %v22913_v33, %v22914_v37  ;;  %v22917_v20 = vld [vmem:[#allocation63_spill] sm:$0xff]  ;;  %v22921_v55 = vld [vmem:[#allocation64_spill] sm:$0xff]  ;;  %v6921_v33 = vpop.f32.mrb[166].mxu1  ;;  %9163 = vmatprep.subr.bf16.mxu0 %v17805_v61 }
 0x4a8   :  { %v22919_v52 = vmax.f32 %v22917_v20, %v22918_v13  ;;  %v22923_v42 = vmax.f32 %v22921_v55, %v22922_v12  ;;  %v22926_v51 = vld [vmem:[#allocation146_spill] sm:$0xff]  ;;  %v17803_v37 = vld [vmem:[#allocation3 + $0x17c8] ss:$20 sps:$4 sm:$0xff]  }
 0x4a9   :  { %22912 = vst [vmem:[#allocation38_spill] sm:$0xff] %v20952_v30  ;;  %v20961_v4 = vmax.f32 %v22915_v39, %v6578_v17  ;;  %v22927_v63 = vmax.f32 %v22925_v8, %v22926_v51  ;;  %v6582_v17 = vpop.f32.mrb[166].mxu0  ;;  %v17807_v39 = vld [vmem:[#allocation3 + $0x12d0] ss:$20 sps:$4 sm:$0xff]   ;;  %v22934_v46 = vld [vmem:[#allocation147_spill] sm:$0xff]  ;;  %v22938_v8 = vld [vmem:[#allocation113_spill] sm:$0xff]  ;;  %9083 = vmatmul.mubr.bf16.vlgmr.msra.gmra.mrb[224].mxu0 %v20665_v28 }
 0x4aa   :  { %v20966_v41 = vmax.f32 %v22919_v52, %v6917_v56  ;;  %v20971_v62 = vmax.f32 %v22923_v42, %v6580_v49  ;;  %v22929_v20 = vld [vmem:[#allocation66_spill] sm:$0xff]  ;;  %v22930_v56 = vld [vmem:[#allocation112_spill] sm:$0xff]  ;;  %v6584_v12 = vpop.f32.mrb[167].mxu0  ;;  %v6923_v42 = vpop.f32.mrb[167].mxu1  ;;  %9164 = vmatpush1.bf16.msra.mxu0 %v17803_v37  ;;  %9092 = vmatprep.mubr.bf16.mxu0 %v20672_v29 }
 0x4ab   :  { %22916 = vst [vmem:[#allocation98_spill] sm:$0xff] %v20961_v4  ;;  %v20976_v30 = vmax.f32 %v22927_v63, %v6919_v43  ;;  %v22931_v13 = vmax.f32 %v22929_v20, %v22930_v56  ;;  %v22937_v43 = vld [vmem:[#allocation68_spill] sm:$0xff]  ;;  %v22941_v63 = vld [vmem:[#allocation69_spill] sm:$0xff]  ;;  %v6927_v56 = vpop.f32.mrb[168].mxu1  ;;  %v22945_v28 = vld [vmem:[#allocation70_spill] sm:$0xff] }
 0x4ac   :  { %22920 = vst [vmem:[#allocation39_spill] sm:$0xff] %v20966_v41  ;;  %22924 = vst [vmem:[#allocation130_spill] sm:$0xff] %v20971_v62  ;;  %v22933_v41 = vld [vmem:[#allocation67_spill] sm:$0xff]  ;;  %v22939_v35 = vmax.f32 %v22937_v43, %v22938_v8  ;;  %v17808_v61 = vld [vmem:[#allocation3 + $0x17f0] ss:$20 sps:$4 sm:$0xff]   ;;  %v6929_v29 = vpop.f32.mrb[169].mxu1 }
 0x4ad   :  { %22928 = vst [vmem:[#allocation40_spill] sm:$0xff] %v20976_v30  ;;  %v20981_v52 = vmax.f32 %v22931_v13, %v6582_v17  ;;  %v22935_v55 = vmax.f32 %v22933_v41, %v22934_v46  ;;  %v22942_v30 = vld [vmem:[#allocation148_spill] sm:$0xff]  ;;  %v17810_v17 = vld [vmem:[#allocation3 + $0x17f4] ss:$20 sps:$4 sm:$0xff]   ;;  %v17811_v20 = vld [vmem:[#allocation3 + $0x1438] ss:$20 sps:$4 sm:$0xff]  }
 0x4ae   :  { %v20991_v51 = vmax.f32 %v22939_v35, %v6584_v12  ;;  %v22943_v62 = vmax.f32 %v22941_v63, %v22942_v30  ;;  %v21002_v46 = vld [vmem:[%s22322_s0 + $0x10] ss:$20 sps:$4 sm:$0xff]   ;;  %v17812_v41 = vld [vmem:[#allocation3 + $0x12f8] ss:$20 sps:$4 sm:$0xff]   ;;  %9165 = vmatprep.subr.bf16.mxu0 %v17810_v17 }
 0x4af   :  { %22932 = vst [vmem:[#allocation99_spill] sm:$0xff] %v20981_v52  ;;  %v20986_v49 = vmax.f32 %v22935_v55, %v6921_v33  ;;  %8857 = vmatmul.mubr.bf16.vlgmr.msra.gmra.mrb[208].mxu1 %v21002_v46  ;;  %v17815_v30 = vld [vmem:[#allocation3 + $0x181c] ss:$20 sps:$4 sm:$0xff]   ;;  %v6588_v33 = vpop.f32.mrb[168].mxu0  ;;  %v22953_v35 = vld [vmem:[#allocation72_spill] sm:$0xff]  ;;  %9166 = vmatpush1.bf16.msra.mxu0 %v17808_v61 }
 0x4b0   :  { %22940 = vst [vmem:[#allocation131_spill] sm:$0xff] %v20991_v51  ;;  %v20996_v4 = vmax.f32 %v22943_v62, %v6923_v42  ;;  %15493 = vmatpush3.bf16.msra.mxu1 %v17807_v39  ;;  %8866 = vmatprep.mubr.bf16.mxu1 %v22604_v24  ;;  %v17816_v62 = vld [vmem:[#allocation3 + $0x1460] ss:$20 sps:$4 sm:$0xff]   ;;  %v22949_v42 = vld [vmem:[#allocation71_spill] sm:$0xff]  ;;  %v6590_v8 = vpop.f32.mrb[169].mxu0  ;;  %v22957_v51 = vld [vmem:[#allocation73_spill] sm:$0xff] }
 0x4b1   :  { %22936 = vst [vmem:[#allocation41_spill] sm:$0xff] %v20986_v49  ;;  %15494 = vmatprep.subr.bf16.mxu1 %v17811_v20  ;;  %v22946_v13 = vld [vmem:[#allocation114_spill] sm:$0xff]  ;;  %v22954_v63 = vld [vmem:[#allocation115_spill] sm:$0xff]  ;;  %9167 = vmatprep.subr.bf16.mxu0 %v17815_v30 }
 0x4b2   :  { %22944 = vst [vmem:[#allocation42_spill] sm:$0xff] %v20996_v4  ;;  %v22947_v55 = vmax.f32 %v22945_v28, %v22946_v13  ;;  %v22950_v37 = vld [vmem:[#allocation150_spill] sm:$0xff]  ;;  %v22955_v4 = vmax.f32 %v22953_v35, %v22954_v63  ;;  %v22958_v17 = vld [vmem:[#allocation151_spill] sm:$0xff]  ;;  %v6592_v28 = vpop.f32.mrb[170].mxu0  ;;  %9093 = vmatmul.mubr.bf16.gmra.mrb[228].mxu0 %v20679_v59  ;;  %v17825_v59 = vld [vmem:[#allocation3 + $0x186c] ss:$20 sps:$4 sm:$0xff]  }
 0x4b3   :  { %v22951_v39 = vmax.f32 %v22949_v42, %v22950_v37  ;;  %v22959_v20 = vmax.f32 %v22957_v51, %v22958_v17  ;;  %v22961_v13 = vld [vmem:[#allocation74_spill] sm:$0xff]  ;;  %v22965_v37 = vld [vmem:[#allocation75_spill] sm:$0xff]  ;;  %v22970_v17 = vld [vmem:[#allocation117_spill] sm:$0xff]  ;;  %9102 = vmatprep.mubr.bf16.mxu0 %v20686_v60 }
 0x4b4   :  { %v21010_v12 = vmax.f32 %v22947_v55, %v6588_v33  ;;  %v21020_v49 = vmax.f32 %v22955_v4, %v6590_v8  ;;  %v6931_v33 = vpop.f32.mrb[170].mxu1  ;;  %15495 = vmatpush3.bf16.msra.mxu1 %v17812_v41  ;;  %v22962_v55 = vld [vmem:[#allocation116_spill] sm:$0xff]  ;;  %v6594_v4 = vpop.f32.mrb[171].mxu0  ;;  %v17813_v63 = vld [vmem:[#allocation3 + $0x1818] ss:$20 sps:$4 sm:$0xff]  }
 0x4b5   :  { %v21015_v43 = vmax.f32 %v22951_v39, %v6927_v56  ;;  %v21025_v52 = vmax.f32 %v22959_v20, %v6929_v29  ;;  %v22963_v56 = vmax.f32 %v22961_v13, %v22962_v55  ;;  %v22966_v39 = vld [vmem:[#allocation152_spill] sm:$0xff]  ;;  %v6933_v8 = vpop.f32.mrb[171].mxu1  ;;  %15496 = vmatprep.subr.bf16.mxu1 %v17816_v62  ;;  %v22973_v20 = vld [vmem:[#allocation77_spill] sm:$0xff]  ;;  %9168 = vmatpush1.bf16.msra.mxu0 %v17813_v63 }
 0x4b6   :  { %22948 = vst [vmem:[#allocation100_spill] sm:$0xff] %v21010_v12  ;;  %22956 = vst [vmem:[#allocation132_spill] sm:$0xff] %v21020_v49  ;;  %v17817_v51 = vld [vmem:[#allocation3 + $0x1320] ss:$20 sps:$4 sm:$0xff]   ;;  %v22974_v13 = vld [vmem:[#allocation153_spill] sm:$0xff] }
 0x4b7   :  { %22952 = vst [vmem:[#allocation43_spill] sm:$0xff] %v21015_v43  ;;  %22960 = vst [vmem:[#allocation44_spill] sm:$0xff] %v21025_v52  ;;  %v21030_v42 = vmax.f32 %v22963_v56, %v6592_v28  ;;  %v22967_v43 = vmax.f32 %v22965_v37, %v22966_v39  ;;  %v22969_v29 = vld [vmem:[#allocation76_spill] sm:$0xff]  ;;  %v22975_v28 = vmax.f32 %v22973_v20, %v22974_v13  ;;  %v17821_v37 = vld [vmem:[#allocation3 + $0x1488] ss:$20 sps:$4 sm:$0xff]   ;;  %v6937_v39 = vpop.f32.mrb[172].mxu1 }
 0x4b8   :  { %v22971_v61 = vmax.f32 %v22969_v29, %v22970_v17  ;;  %v17820_v56 = vld [vmem:[#allocation3 + $0x1844] ss:$20 sps:$4 sm:$0xff]   ;;  %15497 = vmatpush3.bf16.msra.mxu1 %v17817_v51  ;;  %v17818_v62 = vld [vmem:[#allocation3 + $0x1840] ss:$20 sps:$4 sm:$0xff]   ;;  %v6939_v51 = vpop.f32.mrb[173].mxu1 }
 0x4b9   :  { %22964 = vst [vmem:[#allocation101_spill] sm:$0xff] %v21030_v42  ;;  %v21035_v35 = vmax.f32 %v22967_v43, %v6931_v33  ;;  %v21045_v55 = vmax.f32 %v22975_v28, %v6933_v8  ;;  %v21051_v30 = vld [vmem:[%s22322_s0 + $0x38] ss:$20 sps:$4 sm:$0xff]   ;;  %v17822_v43 = vld [vmem:[#allocation3 + $0x1348] ss:$20 sps:$4 sm:$0xff]   ;;  %v6598_v33 = vpop.f32.mrb[172].mxu0  ;;  %9169 = vmatprep.subr.bf16.mxu0 %v17820_v56  ;;  %15498 = vmatprep.subr.bf16.mxu1 %v17821_v37 }
 0x4ba   :  { %v21040_v41 = vmax.f32 %v22971_v61, %v6594_v4  ;;  %8867 = vmatmul.mubr.bf16.gmra.mrb[212].mxu1 %v21051_v30  ;;  %v17826_v4 = vld [vmem:[#allocation3 + $0x14b0] ss:$20 sps:$4 sm:$0xff]   ;;  %v22981_v20 = vld [vmem:[#allocation79_spill] sm:$0xff]  ;;  %v6600_v63 = vpop.f32.mrb[173].mxu0  ;;  %v22989_v56 = vld [vmem:[#allocation81_spill] sm:$0xff]  ;;  %9170 = vmatpush1.bf16.msra.mxu0 %v17818_v62 }
 0x4bb   :  { %22968 = vst [vmem:[#allocation45_spill] sm:$0xff] %v21035_v35  ;;  %22976 = vst [vmem:[#allocation46_spill] sm:$0xff] %v21045_v55  ;;  %8876 = vmatprep.mubr.bf16.mxu1 %v22604_v24  ;;  %v22977_v8 = vld [vmem:[#allocation78_spill] sm:$0xff]  ;;  %v22982_v13 = vld [vmem:[#allocation155_spill] sm:$0xff]  ;;  %9171 = vmatprep.subr.bf16.mxu0 %v17825_v59 }
 0x4bc   :  { %22972 = vst [vmem:[#allocation133_spill] sm:$0xff] %v21040_v41  ;;  %v22978_v29 = vld [vmem:[#allocation118_spill] sm:$0xff]  ;;  %v22983_v60 = vmax.f32 %v22981_v20, %v22982_v13  ;;  %v22985_v55 = vld [vmem:[#allocation80_spill] sm:$0xff]  ;;  %v22986_v35 = vld [vmem:[#allocation119_spill] sm:$0xff]  ;;  %15499 = vmatpush3.bf16.msra.mxu1 %v17822_v43  ;;  %9103 = vmatmul.mubr.bf16.gmra.mrb[232].mxu0 %v20693_v16 }
 0x4bd   :  { %v22979_v17 = vmax.f32 %v22977_v8, %v22978_v29  ;;  %v22987_v52 = vmax.f32 %v22985_v55, %v22986_v35  ;;  %v22990_v37 = vld [vmem:[#allocation156_spill] sm:$0xff]  ;;  %v6602_v8 = vpop.f32.mrb[174].mxu0  ;;  %v22993_v29 = vld [vmem:[#allocation82_spill] sm:$0xff]  ;;  %v22998_v13 = vld [vmem:[#allocation157_spill] sm:$0xff]  ;;  %15500 = vmatprep.subr.bf16.mxu1 %v17826_v4  ;;  %9112 = vmatprep.mubr.bf16.mxu0 %v20700_v38 }
 0x4be   :  { %v21064_v28 = vmax.f32 %v22983_v60, %v6937_v39  ;;  %v22991_v42 = vmax.f32 %v22989_v56, %v22990_v37  ;;  %v22997_v39 = vld [vmem:[#allocation83_spill] sm:$0xff]  ;;  %v6604_v35 = vpop.f32.mrb[175].mxu0  ;;  %v21100_v62 = vld [vmem:[%s22322_s0 + $0x60] ss:$20 sps:$4 sm:$0xff]  }
 0x4bf   :  { %v21059_v61 = vmax.f32 %v22979_v17, %v6598_v33  ;;  %v21069_v41 = vmax.f32 %v22987_v52, %v6600_v63  ;;  %v6941_v33 = vpop.f32.mrb[174].mxu1  ;;  %v22994_v17 = vld [vmem:[#allocation120_spill] sm:$0xff]  ;;  %v22999_v60 = vmax.f32 %v22997_v39, %v22998_v13  ;;  %v17823_v55 = vld [vmem:[#allocation3 + $0x1868] ss:$20 sps:$4 sm:$0xff]   ;;  %v17832_v43 = vld [vmem:[#allocation3 + $0x1398] ss:$20 sps:$4 sm:$0xff]  }
 0x4c0   :  { %22984 = vst [vmem:[#allocation47_spill] sm:$0xff] %v21064_v28  ;;  %v21074_v49 = vmax.f32 %v22991_v42, %v6939_v51  ;;  %v6943_v52 = vpop.f32.mrb[175].mxu1  ;;  %v17827_v63 = vld [vmem:[#allocation3 + $0x1370] ss:$20 sps:$4 sm:$0xff]   ;;  %v23002_v51 = vld [vmem:[#allocation121_spill] sm:$0xff]  ;;  %9172 = vmatpush1.bf16.msra.mxu0 %v17823_v55  ;;  %v15364_v59 = vpop.f32.mrb[176].mxu0 }
 0x4c1   :  { %22980 = vst [vmem:[#allocation102_spill] sm:$0xff] %v21059_v61  ;;  %22988 = vst [vmem:[#allocation136_spill] sm:$0xff] %v21069_v41  ;;  %v22995_v61 = vmax.f32 %v22993_v29, %v22994_v17  ;;  %v21084_v28 = vmax.f32 %v22999_v60, %v6941_v33  ;;  %v23001_v42 = vld [vmem:[#allocation84_spill] sm:$0xff]  ;;  %v23006_v29 = vld [vmem:[#allocation158_spill] sm:$0xff]  ;;  %15501 = vmatpush3.bf16.msra.mxu1 %v17827_v63  ;;  %v15428_v4 = vpop.f32.mrb[176].mxu1  ;;  %v15365_v13 = vpop.f32.mrb[177].mxu0 }
 0x4c2   :  { %22992 = vst [vmem:[#allocation48_spill] sm:$0xff] %v21074_v49  ;;  %v23003_v56 = vmax.f32 %v23001_v42, %v23002_v51  ;;  %v23005_v49 = vld [vmem:[#allocation85_spill] sm:$0xff]  ;;  %8877 = vmatmul.mubr.bf16.gmra.mrb[216].mxu1 %v21100_v62  ;;  %v17835_v16 = vld [vmem:[#allocation3 + $0x18bc] ss:$20 sps:$4 sm:$0xff]   ;;  %v17836_v39 = vld [vmem:[#allocation3 + $0x1500] ss:$20 sps:$4 sm:$0xff]  }
 0x4c3   :  { %v21079_v20 = vmax.f32 %v22995_v61, %v6602_v8  ;;  %23000 = vst [vmem:[#allocation49_spill] sm:$0xff] %v21084_v28  ;;  %v23007_v61 = vmax.f32 %v23005_v49, %v23006_v29  ;;  %v17830_v33 = vld [vmem:[#allocation3 + $0x1894] ss:$20 sps:$4 sm:$0xff]   ;;  %v17831_v17 = vld [vmem:[#allocation3 + $0x14d8] ss:$20 sps:$4 sm:$0xff]   ;;  %8886 = vmatprep.mubr.bf16.mxu1 %v22604_v24  ;;  %v15429_v60 = vpop.f32.mrb[177].mxu1 }
 0x4c4   :  { %v21089_v37 = vmax.f32 %v23003_v56, %v6604_v35  ;;  %v17828_v49 = vld [vmem:[#allocation3 + $0x1890] ss:$20 sps:$4 sm:$0xff]   ;;  %9173 = vmatprep.subr.bf16.mxu0 %v17830_v33  ;;  %15502 = vmatprep.subr.bf16.mxu1 %v17831_v17  ;;  %v15366_v35 = vadd.f32 %v15365_v13, %v15364_v59  ;;  %v15367_v42 = vpop.f32.mrb[178].mxu0  ;;  %v15431_v51 = vpop.f32.mrb[178].mxu1  ;;  %v17833_v55 = vld [vmem:[#allocation3 + $0x18b8] ss:$20 sps:$4 sm:$0xff]  }
 0x4c5   :  { %22996 = vst [vmem:[#allocation103_spill] sm:$0xff] %v21079_v20  ;;  %v21094_v8 = vmax.f32 %v23007_v61, %v6943_v52  ;;  %v15430_v52 = vadd.f32 %v15429_v60, %v15428_v4  ;;  %v15368_v56 = vpop.f32.mrb[179].mxu0  ;;  %v15432_v38 = vpop.f32.mrb[179].mxu1  ;;  %9174 = vmatpush1.bf16.msra.mxu0 %v17828_v49  ;;  %15503 = vmatpush3.bf16.msra.mxu1 %v17832_v43  ;;  %v17837_v63 = vld [vmem:[#allocation3 + $0x13c0] ss:$20 sps:$4 sm:$0xff]  }
 0x4c6   :  { %23004 = vst [vmem:[#allocation137_spill] sm:$0xff] %v21089_v37  ;;  %v15369_v29 = vadd.f32 %v15368_v56, %v15367_v42  ;;  %v15433_v61 = vadd.f32 %v15432_v38, %v15431_v51  ;;  %9175 = vmatprep.subr.bf16.mxu0 %v17835_v16  ;;  %15504 = vmatprep.subr.bf16.mxu1 %v17836_v39  ;;  %v17840_v33 = vld [vmem:[#allocation3 + $0x18e4] ss:$20 sps:$4 sm:$0xff]   ;;  %v17841_v17 = vld [vmem:[#allocation3 + $0x1528] ss:$20 sps:$4 sm:$0xff]   ;;  %v15370_v16 = vpop.f32.mrb[180].mxu0 }
 0x4c7   :  { %23008 = vst [vmem:[#allocation50_spill] sm:$0xff] %v21094_v8  ;;  %v21105_v8 = vadd.f32 %v15430_v52, %v15366_v35  ;;  %9113 = vmatmul.mubr.bf16.gmra.mrb[236].mxu0 %v20747_v44  ;;  %v21111_v59 = vld [vmem:[%s22322_s0 + $0x88] ss:$20 sps:$4 sm:$0xff]   ;;  %v17838_v43 = vld [vmem:[#allocation3 + $0x18e0] ss:$20 sps:$4 sm:$0xff]   ;;  %v15434_v39 = vpop.f32.mrb[180].mxu1 }
 0x4c8   :  { %9122 = vmatprep.mubr.bf16.mxu0 %v20754_v58  ;;  %v21116_v49 = vadd.f32 %v15433_v61, %v15369_v29  ;;  %v17842_v4 = vld [vmem:[#allocation3 + $0x13e8] ss:$20 sps:$4 sm:$0xff]   ;;  %v17843_v44 = vld [vmem:[#allocation3 + $0x1690] ss:$20 sps:$4 sm:$0xff]   ;;  %v15371_v60 = vpop.f32.mrb[181].mxu0  ;;  %v15435_v35 = vpop.f32.mrb[181].mxu1 }
 0x4c9   :  { %9176 = vmatpush1.bf16.msra.mxu0 %v17833_v55  ;;  %15505 = vmatpush3.bf16.msra.mxu1 %v17837_v63  ;;  %v21118_v13 = vld [vmem:[#allocation3 + $0x17d0] ss:$20 sps:$4 sm:$0xff]   ;;  %v15372_v52 = vadd.f32 %v15371_v60, %v15370_v16  ;;  %v15436_v42 = vadd.f32 %v15435_v35, %v15434_v39  ;;  %v15373_v58 = vpop.f32.mrb[182].mxu0  ;;  %v15437_v51 = vpop.f32.mrb[182].mxu1  ;;  %v21170_v37 = vld [vmem:[%s22322_s0 + $0x120] ss:$20 sps:$4 sm:$0xff]  }
 0x4ca   :  { %8887 = vmatmul.mubr.bf16.gmra.mrb[220].mxu1 %v21111_v59  ;;  %9177 = vmatprep.subr.bf16.mxu0 %v17840_v33  ;;  %v15374_v56 = vpop.f32.mrb[183].mxu0  ;;  %v15438_v38 = vpop.f32.mrb[183].mxu1  ;;  %v21127_v61 = vld [vmem:[%s22322_s0 + $0xb0] ss:$20 sps:$4 sm:$0xff]   ;;  %23010 = vst [vmem:[#allocation51_spill] sm:$0xff] %v21170_v37 }
 0x4cb   :  { %8896 = vmatprep.mubr.bf16.mxu1 %v22604_v24  ;;  %15506 = vmatprep.subr.bf16.mxu1 %v17841_v17  ;;  %v15375_v55 = vadd.f32 %v15374_v56, %v15373_v58  ;;  %v15439_v63 = vadd.f32 %v15438_v38, %v15437_v51  ;;  %v21121_v29 = vadd.f32 %v15436_v42, %v15372_v52  ;;  %v15376_v17 = vpop.f32.mrb[184].mxu0 }
 0x4cd   :  { %9178 = vmatpush1.bf16.msra.mxu0 %v17838_v43  ;;  %15507 = vmatpush3.bf16.msra.mxu1 %v17842_v4  ;;  %v21132_v33 = vadd.f32 %v15439_v63, %v15375_v55  ;;  %v15440_v43 = vpop.f32.mrb[184].mxu1  ;;  %v15377_v4 = vpop.f32.mrb[185].mxu0 }
 0x4ce   :  { %15556 = vmatprep.subr.bf16.mxu0 %v17843_v44  ;;  %15821 = vmatprep.subr.bf16.mxu1 %v21118_v13  ;;  %v15441_v16 = vpop.f32.mrb[185].mxu1  ;;  %v15378_v39 = vadd.f32 %v15377_v4, %v15376_v17 }
 0x4cf   :  { %9123 = vmatmul.mubr.bf16.gmra.mrb[240].mxu0 %v20801_v15  ;;  %v15442_v44 = vadd.f32 %v15441_v16, %v15440_v43  ;;  %v15379_v15 = vpop.f32.mrb[186].mxu0  ;;  %v15443_v60 = vpop.f32.mrb[186].mxu1 }
 0x4d0   :  { %9132 = vmatprep.mubr.bf16.mxu0 %v20808_v53  ;;  %v15380_v35 = vpop.f32.mrb[187].mxu0  ;;  %v15444_v52 = vpop.f32.mrb[187].mxu1  ;;  %v21140_v53 = vld [vmem:[%s22322_s0 + $0xd8] ss:$20 sps:$4 sm:$0xff]  }
 0x4d1   :  { %v15381_v42 = vadd.f32 %v15380_v35, %v15379_v15  ;;  %v15445_v58 = vadd.f32 %v15444_v52, %v15443_v60  ;;  %v21134_v51 = vadd.f32 %v15442_v44, %v15378_v39  ;;  %v15382_v38 = vpop.f32.mrb[188].mxu0  ;;  %v15446_v55 = vpop.f32.mrb[188].mxu1  ;;  %v21159_v52 = vld [vmem:[%s22322_s0 + $0x124] ss:$20 sps:$4 sm:$0xff]  }
 0x4d2   :  { %8897 = vmatmul.mubr.bf16.gmra.mrb[224].mxu1 %v21127_v61  ;;  %v15383_v63 = vpop.f32.mrb[189].mxu0  ;;  %v15447_v17 = vpop.f32.mrb[189].mxu1  ;;  %23009 = vst [vmem:[#allocation104_spill] sm:$0xff] %v21159_v52 }
 0x4d3   :  { %8906 = vmatprep.mubr.bf16.mxu1 %v22604_v24  ;;  %v21145_v56 = vadd.f32 %v15445_v58, %v15381_v42  ;;  %v15384_v43 = vadd.f32 %v15383_v63, %v15382_v38  ;;  %v15448_v4 = vadd.f32 %v15447_v17, %v15446_v55  ;;  %v15449_v16 = vpop.f32.mrb[190].mxu1 }
 0x4d4   :  { %v15450_v44 = vpop.f32.mrb[191].mxu1 }
 0x4d5   :  { %v15451_v60 = vadd.f32 %v15450_v44, %v15449_v16  ;;  %v21147_v35 = vadd.f32 %v15448_v4, %v15384_v43 }
 0x4d7   :  { %9133 = vmatmul.mubr.bf16.gmra.mrb[244].mxu0 %v20855_v47  ;;  %v15385_v47 = vpop.f32.mrb[190].mxu0 }
 0x4d8   :  { %9142 = vmatprep.mubr.bf16.mxu0 %v20862_v50  ;;  %v15386_v39 = vpop.f32.mrb[191].mxu0  ;;  %v21153_v50 = vld [vmem:[%s22322_s0 + $0x100] ss:$20 sps:$4 sm:$0xff]  }
 0x4d9   :  { %v15387_v15 = vadd.f32 %v15386_v39, %v15385_v47  ;;  %v15388_v58 = vpop.f32.mrb[192].mxu0 }
 0x4da   :  { %8907 = vmatmul.mubr.bf16.gmra.mrb[228].mxu1 %v21140_v53  ;;  %v15389_v38 = vpop.f32.mrb[193].mxu0 }
 0x4db   :  { %8916 = vmatprep.mubr.bf16.mxu1 %v22604_v24  ;;  %v21163_v42 = vadd.f32 %v15451_v60, %v15387_v15  ;;  %v15390_v63 = vadd.f32 %v15389_v38, %v15388_v58  ;;  %v15391_v43 = vpop.f32.mrb[194].mxu0  ;;  %v21176_v15 = vld [vmem:[%s22322_s0 + $0x128] ss:$20 sps:$4 sm:$0xff]   ;;  %v18540_v60 = vld [vmem:[%s22322_s0 + $0x4] ss:$20 sps:$4 sm:$0xff]  }
 0x4dc   :  { %v15392_v47 = vpop.f32.mrb[195].mxu0 }
 0x4dd   :  { %v15393_v39 = vadd.f32 %v15392_v47, %v15391_v43 }
 0x4df   :  { %9143 = vmatmul.mubr.bf16.gmra.mrb[248].mxu0 %v20909_v6  ;;  %v15452_v6 = vpop.f32.mrb[192].mxu1 }
 0x4e0   :  { %9152 = vmatprep.mubr.bf16.mxu0 %v21159_v52  ;;  %v15453_v55 = vpop.f32.mrb[193].mxu1 }
 0x4e1   :  { %v15454_v17 = vadd.f32 %v15453_v55, %v15452_v6  ;;  %v15455_v4 = vpop.f32.mrb[194].mxu1  ;;  %v15394_v6 = vpop.f32.mrb[196].mxu0 }
 0x4e2   :  { %8917 = vmatmul.mubr.bf16.gmra.mrb[232].mxu1 %v21153_v50  ;;  %v15456_v16 = vpop.f32.mrb[195].mxu1  ;;  %v15395_v55 = vpop.f32.mrb[197].mxu0 }
 0x4e3   :  { %8926 = vmatprep.mubr.bf16.mxu1 %v22604_v24  ;;  %v15457_v44 = vadd.f32 %v15456_v16, %v15455_v4  ;;  %v21165_v28 = vadd.f32 %v15454_v17, %v15390_v63  ;;  %v15458_v38 = vpop.f32.mrb[196].mxu1  ;;  %v15396_v17 = vadd.f32 %v15395_v55, %v15394_v6  ;;  %v15397_v4 = vpop.f32.mrb[198].mxu0  ;;  %v17844_v16 = vld [vmem:[#allocation3 + $0x1550] ss:$20 sps:$4 sm:$0xff]   ;;  %v17851_v6 = vld [vmem:[#allocation3 + $0x1820] ss:$20 sps:$4 sm:$0xff]  }
 0x4e4   :  { %v15459_v63 = vpop.f32.mrb[197].mxu1  ;;  %v15398_v20 = vpop.f32.mrb[199].mxu0 }
 0x4e5   :  { %v21183_v58 = vadd.f32 %v15457_v44, %v15393_v39  ;;  %v15460_v43 = vadd.f32 %v15459_v63, %v15458_v38  ;;  %v15461_v47 = vpop.f32.mrb[198].mxu1  ;;  %v15399_v12 = vadd.f32 %v15398_v20, %v15397_v4  ;;  %v18541_v39 = vld [vmem:[%s22322_s0] ss:$20 sps:$4 sm:$0xff]   ;;  %v17847_v44 = vld [vmem:[#allocation3 + $0x1578] ss:$20 sps:$4 sm:$0xff]  }
 0x4e6   :  { %v15462_v41 = vpop.f32.mrb[199].mxu1  ;;  %v17849_v20 = vld [vmem:[#allocation3 + $0x16e0] ss:$20 sps:$4 sm:$0xff]  }
 0x4e7   :  { %9153 = vmatmul.mubr.bf16.gmra.mrb[252].mxu0 %v21170_v37  ;;  %v15463_v0 = vadd.f32 %v15462_v41, %v15461_v47  ;;  %v21185_v11 = vadd.f32 %v15460_v43, %v15396_v17  ;;  %v18542_v41 = vld [vmem:[%s22322_s0 + $0x2c] ss:$20 sps:$4 sm:$0xff]   ;;  %v15400_v38 = vpop.f32.mrb[200].mxu0  ;;  %v15464_v55 = vpop.f32.mrb[200].mxu1 }
 0x4e8   :  { %9195 = vmatprep.mubr.bf16.mxu0 %v22604_v24  ;;  %v15401_v63 = vpop.f32.mrb[201].mxu0  ;;  %v15465_v17 = vpop.f32.mrb[201].mxu1 }
 0x4e9   :  { %v15402_v43 = vadd.f32 %v15401_v63, %v15400_v38  ;;  %v15403_v4 = vpop.f32.mrb[202].mxu0  ;;  %v17855_v63 = vld [vmem:[#allocation3 + $0x1730] ss:$20 sps:$4 sm:$0xff]  }
 0x4ea   :  { %8927 = vmatmul.mubr.bf16.gmra.mrb[236].mxu1 %v21176_v15 }
 0x4eb   :  { %9308 = vmatprep.mubr.bf16.mxu1 %v18540_v60  ;;  %v21192_v60 = vadd.f32 %v15463_v0, %v15399_v12  ;;  %v15467_v0 = vpop.f32.mrb[202].mxu1  ;;  %v15404_v12 = vpop.f32.mrb[203].mxu0 }
 0x4ec   :  { %v15468_v47 = vpop.f32.mrb[203].mxu1 }
 0x4ef   :  { %9196 = vmatmul.mubr.bf16.vlgmr.msra.gmra.mrb[224].mxu0 %v21002_v46  ;;  %v15406_v38 = vpop.f32.mrb[204].mxu0 }
 0x4f0   :  { %15557 = vmatpush3.bf16.msra.mxu0 %v17844_v16  ;;  %9205 = vmatprep.mubr.bf16.mxu0 %v22604_v24  ;;  %v17850_v16 = vld [vmem:[#allocation3 + $0x15a0] ss:$20 sps:$4 sm:$0xff]  }
 0x4f1   :  { %15558 = vmatprep.subr.bf16.mxu0 %v17846_v19  ;;  %v18543_v19 = vld [vmem:[%s22322_s0 + $0x28] ss:$20 sps:$4 sm:$0xff]  }
 0x4f2   :  { %9309 = vmatmul.mubr.bf16.vlgmr.msra.gmra.mrb[240].mxu1 %v18541_v39  ;;  %v15405_v39 = vadd.f32 %v15404_v12, %v15403_v4 }
 0x4f3   :  { %15822 = vmatpush3.bf16.msra.mxu1 %v21118_v13  ;;  %9316 = vmatprep.mubr.bf16.mxu1 %v18542_v41  ;;  %v15466_v13 = vadd.f32 %v15465_v17, %v15464_v55  ;;  %v15469_v41 = vadd.f32 %v15468_v47, %v15467_v0  ;;  %v15470_v55 = vpop.f32.mrb[204].mxu1  ;;  %v17857_v17 = vld [vmem:[#allocation3 + $0x1870] ss:$20 sps:$4 sm:$0xff]  }
 0x4f4   :  { %15823 = vmatprep.subr.bf16.mxu1 %v17848_v14  ;;  %15559 = vmatpush3.bf16.msra.mxu0 %v17847_v44 }
 0x4f5   :  { %15560 = vmatprep.subr.bf16.mxu0 %v17849_v20  ;;  %v21198_v37 = vadd.f32 %v15466_v13, %v15402_v43  ;;  %v21208_v44 = vadd.f32 %v15469_v41, %v15405_v39  ;;  %v17853_v20 = vld [vmem:[#allocation3 + $0x15c8] ss:$20 sps:$4 sm:$0xff]   ;;  %v15407_v43 = vpop.f32.mrb[205].mxu0  ;;  %v15471_v13 = vpop.f32.mrb[205].mxu1  ;;  %v17856_v39 = vld [vmem:[#allocation3 + $0x15f0] ss:$20 sps:$4 sm:$0xff]  }
 0x4f6   :  { %v15408_v4 = vadd.f32 %v15407_v43, %v15406_v38  ;;  %v15472_v0 = vadd.f32 %v15471_v13, %v15470_v55  ;;  %v15409_v12 = vpop.f32.mrb[206].mxu0  ;;  %v15473_v47 = vpop.f32.mrb[206].mxu1  ;;  %v17858_v41 = vld [vmem:[#allocation3 + $0x1758] ss:$20 sps:$4 sm:$0xff]   ;;  %v18545_v38 = vld [vmem:[%s22322_s0 + $0x50] ss:$20 sps:$4 sm:$0xff]  }
 0x4f7   :  { %15824 = vmatpush3.bf16.msra.mxu1 %v17848_v14  ;;  %9206 = vmatmul.mubr.bf16.gmra.mrb[228].mxu0 %v21051_v30  ;;  %v18544_v14 = vld [vmem:[%s22322_s0 + $0x54] ss:$20 sps:$4 sm:$0xff]   ;;  %v15474_v52 = vpop.f32.mrb[207].mxu1 }
 0x4f8   :  { %15825 = vmatprep.subr.bf16.mxu1 %v17851_v6  ;;  %9215 = vmatprep.mubr.bf16.mxu0 %v22604_v24  ;;  %v17863_v43 = vld [vmem:[#allocation3 + $0x18c0] ss:$20 sps:$4 sm:$0xff]  }
 0x4f9   :  { %15561 = vmatpush3.bf16.msra.mxu0 %v17850_v16 }
 0x4fa   :  { %9317 = vmatmul.mubr.bf16.gmra.mrb[244].mxu1 %v18543_v19  ;;  %15562 = vmatprep.subr.bf16.mxu0 %v17852_v45  ;;  %v15410_v19 = vpop.f32.mrb[207].mxu0  ;;  %v21210_v45 = vadd.f32 %v15472_v0, %v15408_v4 }
 0x4fb   :  { %9324 = vmatprep.mubr.bf16.mxu1 %v18544_v14  ;;  %15826 = vmatpush3.bf16.msra.mxu1 %v17851_v6  ;;  %v15411_v16 = vadd.f32 %v15410_v19, %v15409_v12  ;;  %v15475_v6 = vadd.f32 %v15474_v52, %v15473_v47  ;;  %v17860_v14 = vld [vmem:[#allocation3 + $0x1898] ss:$20 sps:$4 sm:$0xff]   ;;  %v15807_v55 = vpop.f32.mrb[208].mxu0  ;;  %v23011_v47 = vmax.f32 %v19743_v34, %v20395_v54 }
 0x4fc   :  { %15827 = vmatprep.subr.bf16.mxu1 %v17854_v57  ;;  %v7183_v13 = vadd.f32 %v15807_v55, %v21121_v29  ;;  %v7174_v4 = vpop.f32.mrb[209].mxu0  ;;  %v23013_v34 = vmax.f32 %v19749_v2, %v20401_v31  ;;  %v18548_v2 = vld [vmem:[%s22322_s0 + $0xa4] ss:$20 sps:$4 sm:$0xff]   ;;  %v17865_v31 = vld [vmem:[#allocation3 + $0x1668] ss:$20 sps:$4 sm:$0xff]  }
 0x4fd   :  { %15563 = vmatpush3.bf16.msra.mxu0 %v17853_v20  ;;  %v21220_v52 = vadd.f32 %v15475_v6, %v15411_v16  ;;  %v17859_v20 = vld [vmem:[#allocation3 + $0x1618] ss:$20 sps:$4 sm:$0xff]   ;;  %v7175_v0 = vadd.f32 %v7174_v4, %v21105_v8  ;;  %v15808_v12 = vpop.f32.mrb[210].mxu0  ;;  %v17862_v16 = vld [vmem:[#allocation3 + $0x1640] ss:$20 sps:$4 sm:$0xff]   ;;  %v23012_v6 = vmax.f32 %v19746_v25, %v20368_v10 }
 0x4fe   :  { %15564 = vmatprep.subr.bf16.mxu0 %v17855_v63  ;;  %v17861_v63 = vld [vmem:[#allocation3 + $0x1780] ss:$20 sps:$4 sm:$0xff]   ;;  %v21227_v19 = vmax.f32 %v23011_v47, %v7183_v13  ;;  %v17864_v8 = vld [vmem:[#allocation3 + $0x17a8] ss:$20 sps:$4 sm:$0xff]  }
 0x4ff   :  { %15828 = vmatpush3.bf16.msra.mxu1 %v17854_v57  ;;  %9216 = vmatmul.mubr.bf16.gmra.mrb[232].mxu0 %v21100_v62  ;;  %v18546_v57 = vld [vmem:[%s22322_s0 + $0x7c] ss:$20 sps:$4 sm:$0xff]   ;;  %v23015_v10 = vld [vmem:[#allocation161_spill] sm:$0xff] }
 0x500   :  { %15829 = vmatprep.subr.bf16.mxu1 %v17857_v17  ;;  %9225 = vmatprep.mubr.bf16.mxu0 %v22604_v24  ;;  %v23014_v25 = vld [vmem:[#allocation86_spill] sm:$0xff] }
 0x501   :  { %15565 = vmatpush3.bf16.msra.mxu0 %v17856_v39  ;;  %v7186_v39 = vadd.f32 %v15808_v12, %v21132_v33  ;;  %v18547_v33 = vld [vmem:[%s22322_s0 + $0x78] ss:$20 sps:$4 sm:$0xff]   ;;  %v23017_v12 = vmax.f32 %v19763_v32, %v20446_v48  ;;  %v18549_v48 = vld [vmem:[%s22322_s0 + $0xa0] ss:$20 sps:$4 sm:$0xff]  }
 0x502   :  { %9325 = vmatmul.mubr.bf16.gmra.mrb[248].mxu1 %v18545_v38  ;;  %15566 = vmatprep.subr.bf16.mxu0 %v17858_v41  ;;  %v21233_v41 = vmax.f32 %v23012_v6, %v7175_v0  ;;  %v17866_v38 = vld [vmem:[#allocation3 + $0x18e8] ss:$20 sps:$4 sm:$0xff]  }
 0x503   :  { %9332 = vmatprep.mubr.bf16.mxu1 %v18546_v57  ;;  %15830 = vmatpush3.bf16.msra.mxu1 %v17857_v17  ;;  %v7177_v17 = vpop.f32.mrb[211].mxu0  ;;  %v21239_v54 = vmax.f32 %v23013_v34, %v7186_v39  ;;  %v17872_v55 = vld [vmem:[#allocation7 + $0x284] ss:$8 sps:$4 sm:$0xff]  }
 0x504   :  { %15831 = vmatprep.subr.bf16.mxu1 %v17860_v14  ;;  %v7178_v29 = vadd.f32 %v7177_v17, %v21116_v49  ;;  %v15811_v57 = vpop.f32.mrb[212].mxu0  ;;  %v23018_v17 = vld [vmem:[#allocation162_spill] sm:$0xff] }
 0x505   :  { %15567 = vmatpush3.bf16.msra.mxu0 %v17859_v20  ;;  %v17869_v20 = vld [vmem:[#allocation7 + $0x4] ss:$8 sps:$4 sm:$0xff]   ;;  %v7190_v13 = vpop.f32.mrb[213].mxu0 }
 0x506   :  { %15568 = vmatprep.subr.bf16.mxu0 %v17861_v63  ;;  %v7199_v63 = vadd.f32 %v15811_v57, %v21147_v35  ;;  %v7191_v4 = vadd.f32 %v7190_v13, %v21134_v51  ;;  %v15812_v0 = vpop.f32.mrb[214].mxu0  ;;  %v23020_v51 = vld [vmem:[#allocation164_spill] sm:$0xff] }
 0x507   :  { %15832 = vmatpush3.bf16.msra.mxu1 %v17860_v14  ;;  %9226 = vmatmul.mubr.bf16.gmra.mrb[236].mxu0 %v21111_v59  ;;  %v23016_v14 = vmax.f32 %v23014_v25, %v23015_v10  ;;  %v7202_v39 = vadd.f32 %v15812_v0, %v21163_v42  ;;  %v23022_v42 = vld [vmem:[#allocation87_spill] sm:$0xff] }
 0x508   :  { %15833 = vmatprep.subr.bf16.mxu1 %v17863_v43  ;;  %9235 = vmatprep.mubr.bf16.mxu0 %v22604_v24  ;;  %v21259_v47 = vmax.f32 %v23017_v12, %v7199_v63  ;;  %v23030_v12 = vld [vmem:[#allocation165_spill] sm:$0xff] }
 0x509   :  { %v21248_v49 = vmax.f32 %v23016_v14, %v7178_v29  ;;  %15569 = vmatpush3.bf16.msra.mxu0 %v17862_v16  ;;  %v23019_v16 = vmax.f32 %v19766_v27, %v23018_v17  ;;  %v23021_v29 = vmax.f32 %v19769_v26, %v23020_v51  ;;  %v23023_v27 = vld [vmem:[#allocation163_spill] sm:$0xff]  ;;  %v18550_v26 = vld [vmem:[%s22322_s0 + $0xcc] ss:$20 sps:$4 sm:$0xff]   ;;  %v23025_v14 = vmax.f32 %v19783_v22, %v20487_v36 }
 0x50a   :  { %9333 = vmatmul.mubr.bf16.gmra.mrb[252].mxu1 %v18547_v33  ;;  %15570 = vmatprep.subr.bf16.mxu0 %v17864_v8  ;;  %v23024_v8 = vmax.f32 %v23022_v42, %v23023_v27  ;;  %v18551_v22 = vld [vmem:[%s22322_s0 + $0xc8] ss:$20 sps:$4 sm:$0xff]   ;;  %v23028_v36 = vmax.f32 %v19792_v9, %v20474_v21 }
 0x50b   :  { %9340 = vmatprep.mubr.bf16.mxu1 %v18548_v2  ;;  %15834 = vmatpush3.bf16.msra.mxu1 %v17863_v43  ;;  %v7193_v43 = vpop.f32.mrb[215].mxu0  ;;  %v21265_v6 = vmax.f32 %v23019_v16, %v7191_v4  ;;  %v21271_v32 = vmax.f32 %v23021_v29, %v7202_v39  ;;  %v23029_v4 = vmax.f32 %v19803_v5, %v20540_v1  ;;  %v23033_v16 = vld [vmem:[#allocation167_spill] sm:$0xff]  ;;  %v18553_v5 = vld [vmem:[%s22322_s0 + $0xf0] ss:$20 sps:$4 sm:$0xff]   ;;  %v23035_v1 = vld [vmem:[#allocation89_spill] sm:$0xff] }
 0x50c   :  { %15835 = vmatprep.subr.bf16.mxu1 %v17866_v38  ;;  %v7194_v35 = vadd.f32 %v7193_v43, %v21145_v56  ;;  %v15815_v56 = vpop.f32.mrb[216].mxu0  ;;  %v23031_v39 = vmax.f32 %v19806_v3, %v23030_v12  ;;  %v18555_v29 = vld [vmem:[%s22322_s0 + $0x118] ss:$20 sps:$4 sm:$0xff]  }
 0x50d   :  { %15571 = vmatpush3.bf16.msra.mxu0 %v17865_v31  ;;  %v7215_v34 = vadd.f32 %v15815_v56, %v21185_v11  ;;  %v7206_v33 = vpop.f32.mrb[217].mxu0  ;;  %v23027_v11 = vmax.f32 %v19789_v40, %v20498_v23  ;;  %v18552_v40 = vld [vmem:[%s22322_s0 + $0xf4] ss:$20 sps:$4 sm:$0xff]  }
 0x50e   :  { %10354 = vmatprep.subr.bf16.mxu0 %v17869_v20  ;;  %v7207_v25 = vadd.f32 %v7206_v33, %v21165_v28  ;;  %v15816_v10 = vpop.f32.mrb[218].mxu0  ;;  %v23026_v20 = vmax.f32 %v19786_v18, %v20462_v7  ;;  %v17867_v42 = vld [vmem:[#allocation7] ss:$8 sps:$4 sm:$0xff]   ;;  %v17876_v33 = vld [vmem:[#allocation7 + $0x290] ss:$8 sps:$4 sm:$0xff]  }
 0x50f   :  { %15836 = vmatpush3.bf16.msra.mxu1 %v17866_v38  ;;  %9236 = vmatmul.mubr.bf16.gmra.mrb[240].mxu0 %v21127_v61  ;;  %v21280_v38 = vmax.f32 %v23024_v8, %v7194_v35  ;;  %v21291_v2 = vmax.f32 %v23025_v14, %v7215_v34  ;;  %v7218_v31 = vadd.f32 %v15816_v10, %v21192_v60  ;;  %v7209_v57 = vpop.f32.mrb[219].mxu0  ;;  %v17870_v27 = vld [vmem:[#allocation7 + $0x280] ss:$8 sps:$4 sm:$0xff]   ;;  %v17875_v8 = vld [vmem:[#allocation7 + $0x14] ss:$8 sps:$4 sm:$0xff]  }
 0x510   :  { %11174 = vmatprep.subr.bf16.mxu1 %v17872_v55  ;;  %9245 = vmatprep.mubr.bf16.mxu0 %v22604_v24  ;;  %v21297_v55 = vmax.f32 %v23026_v20, %v7207_v25  ;;  %v7210_v63 = vadd.f32 %v7209_v57, %v21183_v58  ;;  %v15819_v7 = vpop.f32.mrb[220].mxu0  ;;  %v18557_v56 = vld [vmem:[%s22322_s0 + $0x8] ss:$20 sps:$4 sm:$0xff]  }
 0x511   :  { %v21303_v28 = vmax.f32 %v23027_v11, %v7218_v31  ;;  %v7231_v23 = vadd.f32 %v15819_v7, %v21210_v45  ;;  %v7222_v58 = vpop.f32.mrb[221].mxu0  ;;  %v23032_v45 = vld [vmem:[#allocation88_spill] sm:$0xff]  ;;  %v18558_v34 = vld [vmem:[%s22322_s0 + $0x34] ss:$20 sps:$4 sm:$0xff]   ;;  %v18560_v20 = vld [vmem:[%s22322_s0 + $0x5c] ss:$20 sps:$4 sm:$0xff]  }
 0x512   :  { %9341 = vmatmul.mubr.bf16.gmra.mrb[0].mxu1 %v18549_v48  ;;  %v21312_v18 = vmax.f32 %v23028_v36, %v7210_v63  ;;  %v7223_v60 = vadd.f32 %v7222_v58, %v21198_v37  ;;  %v15820_v13 = vpop.f32.mrb[222].mxu0  ;;  %v23034_v35 = vmax.f32 %v23032_v45, %v23033_v16  ;;  %v18556_v48 = vld [vmem:[%s22322_s0 + $0xc] ss:$20 sps:$4 sm:$0xff]   ;;  %v18562_v58 = vld [vmem:[%s22322_s0 + $0x84] ss:$20 sps:$4 sm:$0xff]  }
 0x513   :  { %9348 = vmatprep.mubr.bf16.mxu1 %v18550_v26  ;;  %v21323_v9 = vmax.f32 %v23029_v4, %v7231_v23  ;;  %v7234_v21 = vadd.f32 %v15820_v13, %v21220_v52  ;;  %v7225_v0 = vpop.f32.mrb[223].mxu0  ;;  %v23036_v52 = vld [vmem:[#allocation166_spill] sm:$0xff]  ;;  %v17878_v26 = vld [vmem:[#allocation7 + $0x294] ss:$8 sps:$4 sm:$0xff]  }
 0x514   :  { %v21329_v43 = vmax.f32 %v23031_v39, %v7223_v60  ;;  %v7226_v17 = vadd.f32 %v7225_v0, %v21208_v44  ;;  %v23037_v51 = vmax.f32 %v23035_v1, %v23036_v52  ;;  %v18554_v44 = vld [vmem:[%s22322_s0 + $0x11c] ss:$20 sps:$4 sm:$0xff]  }
 0x515   :  { %v21335_v37 = vmax.f32 %v23034_v35, %v7234_v21  ;;  %v17881_v25 = vld [vmem:[#allocation7 + $0x24] ss:$8 sps:$4 sm:$0xff]   ;;  %v17879_v14 = vld [vmem:[#allocation7 + $0x20] ss:$8 sps:$4 sm:$0xff]   ;;  %v17890_v57 = vld [vmem:[#allocation7 + $0x2b4] ss:$8 sps:$4 sm:$0xff]  }
 0x516   :  { %v21344_v3 = vmax.f32 %v23037_v51, %v7226_v17  ;;  %v17884_v10 = vld [vmem:[#allocation7 + $0x2a4] ss:$8 sps:$4 sm:$0xff]   ;;  %v17882_v31 = vld [vmem:[#allocation7 + $0x2a0] ss:$8 sps:$4 sm:$0xff]   ;;  %v17885_v63 = vld [vmem:[#allocation7 + $0x30] ss:$8 sps:$4 sm:$0xff]  }
 0x517   :  { %9246 = vmatmul.mubr.bf16.gmra.mrb[244].mxu0 %v21140_v53  ;;  %v17888_v11 = vld [vmem:[#allocation7 + $0x2b0] ss:$8 sps:$4 sm:$0xff]   ;;  %v17896_v36 = vld [vmem:[#allocation7 + $0x2c4] ss:$8 sps:$4 sm:$0xff]   ;;  %v17894_v7 = vld [vmem:[#allocation7 + $0x2c0] ss:$8 sps:$4 sm:$0xff]  }
 0x518   :  { %9255 = vmatprep.mubr.bf16.mxu0 %v22604_v24  ;;  %v17902_v23 = vld [vmem:[#allocation7 + $0x2d4] ss:$8 sps:$4 sm:$0xff]   ;;  %v17897_v60 = vld [vmem:[#allocation7 + $0x50] ss:$8 sps:$4 sm:$0xff]   ;;  %v17905_v4 = vld [vmem:[#allocation7 + $0x64] ss:$8 sps:$4 sm:$0xff]  }
 0x519   :  { %v17900_v13 = vld [vmem:[#allocation7 + $0x2d0] ss:$8 sps:$4 sm:$0xff]   ;;  %v17908_v21 = vld [vmem:[#allocation7 + $0x2e4] ss:$8 sps:$4 sm:$0xff]   ;;  %v17903_v0 = vld [vmem:[#allocation7 + $0x60] ss:$8 sps:$4 sm:$0xff]  }
 0x51a   :  { %9349 = vmatmul.mubr.bf16.gmra.mrb[4].mxu1 %v18551_v22  ;;  %v17893_v22 = vld [vmem:[#allocation7 + $0x44] ss:$8 sps:$4 sm:$0xff]   ;;  %v17906_v12 = vld [vmem:[#allocation7 + $0x2e0] ss:$8 sps:$4 sm:$0xff]   ;;  %v17914_v39 = vld [vmem:[#allocation7 + $0x2f4] ss:$8 sps:$4 sm:$0xff]  }
 0x51b   :  { %9356 = vmatprep.mubr.bf16.mxu1 %v18552_v40  ;;  %v17891_v40 = vld [vmem:[#allocation7 + $0x40] ss:$8 sps:$4 sm:$0xff]   ;;  %v17909_v45 = vld [vmem:[#allocation7 + $0x70] ss:$8 sps:$4 sm:$0xff]   ;;  %v17917_v35 = vld [vmem:[#allocation7 + $0x84] ss:$8 sps:$4 sm:$0xff]  }
 0x51c   :  { %v18564_v17 = vld [vmem:[%s22322_s0 + $0xac] ss:$20 sps:$4 sm:$0xff]  }
 0x51d   :  { %v17912_v16 = vld [vmem:[#allocation7 + $0x2f0] ss:$8 sps:$4 sm:$0xff]   ;;  %v17915_v1 = vld [vmem:[#allocation7 + $0x80] ss:$8 sps:$4 sm:$0xff]   ;;  %v17926_v51 = vld [vmem:[#allocation7 + $0x314] ss:$8 sps:$4 sm:$0xff]  }
 0x51e   :  { %v17918_v52 = vld [vmem:[#allocation7 + $0x300] ss:$8 sps:$4 sm:$0xff]  }
 0x51f   :  { %9256 = vmatmul.mubr.bf16.gmra.mrb[248].mxu0 %v21153_v50 }
 0x520   :  { %9265 = vmatprep.mubr.bf16.mxu0 %v22604_v24 }
 0x522   :  { %9357 = vmatmul.mubr.bf16.gmra.mrb[8].mxu1 %v18553_v5  ;;  %v17920_v5 = vld [vmem:[#allocation7 + $0x304] ss:$8 sps:$4 sm:$0xff]  }
 0x523   :  { %9364 = vmatprep.mubr.bf16.mxu1 %v18554_v44  ;;  %v18565_v44 = vld [vmem:[%s22322_s0 + $0xa8] ss:$20 sps:$4 sm:$0xff]  }
 0x527   :  { %9266 = vmatmul.mubr.bf16.gmra.mrb[252].mxu0 %v21176_v15 }
 0x528   :  { %9405 = vmatprep.mubr.bf16.mxu0 %v18556_v48  ;;  %v17921_v48 = vld [vmem:[#allocation7 + $0x90] ss:$8 sps:$4 sm:$0xff]  }
 0x52a   :  { %9365 = vmatmul.mubr.bf16.gmra.mrb[12].mxu1 %v18555_v29  ;;  %v18566_v29 = vld [vmem:[%s22322_s0 + $0xd4] ss:$20 sps:$4 sm:$0xff]  }
 0x52b   :  { %15837 = vmatprep.mubr.bf16.mxu1 %v21002_v46  ;;  %v17873_v46 = vld [vmem:[#allocation7 + $0x10] ss:$8 sps:$4 sm:$0xff]  }
 0x52f   :  { %9406 = vmatmul.mubr.bf16.vlgmr.msra.gmra.mrb[0].mxu0 %v18557_v56  ;;  %v17930_v56 = vld [vmem:[#allocation7 + $0x320] ss:$8 sps:$4 sm:$0xff]  }
 0x530   :  { %9413 = vmatprep.mubr.bf16.mxu0 %v18558_v34  ;;  %10355 = vmatpush1.bf16.msra.mxu0 %v17867_v42  ;;  %v17924_v42 = vld [vmem:[#allocation7 + $0x310] ss:$8 sps:$4 sm:$0xff]   ;;  %v17935_v34 = vld [vmem:[#allocation7 + $0xb4] ss:$8 sps:$4 sm:$0xff]  }
 0x531   :  { %10356 = vmatprep.subr.bf16.mxu0 %v17875_v8  ;;  %v17932_v8 = vld [vmem:[#allocation7 + $0x324] ss:$8 sps:$4 sm:$0xff]  }
 0x532   :  { %15838 = vmatmul.mubr.bf16.vlgmr.msra.gmra.mrb[16].mxu1 %v21051_v30  ;;  %v17887_v30 = vld [vmem:[#allocation7 + $0x34] ss:$8 sps:$4 sm:$0xff]  }
 0x533   :  { %15841 = vmatprep.mubr.bf16.mxu1 %v21100_v62  ;;  %11175 = vmatpush1.bf16.msra.mxu1 %v17870_v27  ;;  %v18559_v62 = vld [vmem:[%s22322_s0 + $0x30] ss:$20 sps:$4 sm:$0xff]  }
 0x534   :  { %11176 = vmatprep.subr.bf16.mxu1 %v17878_v26  ;;  %10357 = vmatpush1.bf16.msra.mxu0 %v17873_v46  ;;  %v17929_v27 = vld [vmem:[#allocation7 + $0xa4] ss:$8 sps:$4 sm:$0xff]   ;;  %v17927_v26 = vld [vmem:[#allocation7 + $0xa0] ss:$8 sps:$4 sm:$0xff]   ;;  %v17938_v46 = vld [vmem:[#allocation7 + $0x334] ss:$8 sps:$4 sm:$0xff]  }
 0x535   :  { %10358 = vmatprep.subr.bf16.mxu0 %v17881_v25  ;;  %v18568_v25 = vld [vmem:[%s22322_s0 + $0xfc] ss:$20 sps:$4 sm:$0xff]  }
 0x537   :  { %11177 = vmatpush1.bf16.msra.mxu1 %v17876_v33  ;;  %9414 = vmatmul.mubr.bf16.gmra.mrb[4].mxu0 %v18559_v62  ;;  %v18567_v33 = vld [vmem:[%s22322_s0 + $0xd0] ss:$20 sps:$4 sm:$0xff]  }
 0x538   :  { %11178 = vmatprep.subr.bf16.mxu1 %v17884_v10  ;;  %9421 = vmatprep.mubr.bf16.mxu0 %v18560_v20  ;;  %v17933_v10 = vld [vmem:[#allocation7 + $0xb0] ss:$8 sps:$4 sm:$0xff]   ;;  %v17942_v62 = vld [vmem:[#allocation7 + $0x340] ss:$8 sps:$4 sm:$0xff]   ;;  %v17947_v20 = vld [vmem:[#allocation7 + $0xd4] ss:$8 sps:$4 sm:$0xff]  }
 0x539   :  { %10359 = vmatpush1.bf16.msra.mxu0 %v17879_v14  ;;  %v17936_v14 = vld [vmem:[#allocation7 + $0x330] ss:$8 sps:$4 sm:$0xff]  }
 0x53a   :  { %15842 = vmatmul.mubr.bf16.gmra.mrb[20].mxu1 %v21111_v59  ;;  %10360 = vmatprep.subr.bf16.mxu0 %v17887_v30  ;;  %v17899_v59 = vld [vmem:[#allocation7 + $0x54] ss:$8 sps:$4 sm:$0xff]   ;;  %v17944_v30 = vld [vmem:[#allocation7 + $0x344] ss:$8 sps:$4 sm:$0xff]  }
 0x53b   :  { %15845 = vmatprep.mubr.bf16.mxu1 %v21127_v61  ;;  %11179 = vmatpush1.bf16.msra.mxu1 %v17882_v31  ;;  %v18561_v61 = vld [vmem:[%s22322_s0 + $0x58] ss:$20 sps:$4 sm:$0xff]  }
 0x53c   :  { %11180 = vmatprep.subr.bf16.mxu1 %v17890_v57  ;;  %v17941_v31 = vld [vmem:[#allocation7 + $0xc4] ss:$8 sps:$4 sm:$0xff]   ;;  %v17939_v57 = vld [vmem:[#allocation7 + $0xc0] ss:$8 sps:$4 sm:$0xff]  }
 0x53d   :  { %10361 = vmatpush1.bf16.msra.mxu0 %v17885_v63  ;;  %v17950_v63 = vld [vmem:[#allocation7 + $0x354] ss:$8 sps:$4 sm:$0xff]  }
 0x53e   :  { %10362 = vmatprep.subr.bf16.mxu0 %v17893_v22  ;;  %v23038_v22 = vld [vmem:[#allocation104_spill] sm:$0xff] }
 0x53f   :  { %11181 = vmatpush1.bf16.msra.mxu1 %v17888_v11  ;;  %9422 = vmatmul.mubr.bf16.gmra.mrb[8].mxu0 %v18561_v61  ;;  %v18569_v11 = vld [vmem:[%s22322_s0 + $0xf8] ss:$20 sps:$4 sm:$0xff]  }
 0x540   :  { %11182 = vmatprep.subr.bf16.mxu1 %v17896_v36  ;;  %9429 = vmatprep.mubr.bf16.mxu0 %v18562_v58  ;;  %v17945_v36 = vld [vmem:[#allocation7 + $0xd0] ss:$8 sps:$4 sm:$0xff]   ;;  %v17954_v61 = vld [vmem:[#allocation7 + $0x360] ss:$8 sps:$4 sm:$0xff]   ;;  %v17959_v58 = vld [vmem:[#allocation7 + $0xf4] ss:$8 sps:$4 sm:$0xff]  }
 0x541   :  { %10363 = vmatpush1.bf16.msra.mxu0 %v17891_v40  ;;  %v17948_v40 = vld [vmem:[#allocation7 + $0x350] ss:$8 sps:$4 sm:$0xff]  }
 0x542   :  { %15846 = vmatmul.mubr.bf16.gmra.mrb[24].mxu1 %v21140_v53  ;;  %10364 = vmatprep.subr.bf16.mxu0 %v17899_v59  ;;  %v17911_v53 = vld [vmem:[#allocation7 + $0x74] ss:$8 sps:$4 sm:$0xff]   ;;  %v17956_v59 = vld [vmem:[#allocation7 + $0x364] ss:$8 sps:$4 sm:$0xff]  }
 0x543   :  { %15849 = vmatprep.mubr.bf16.mxu1 %v21153_v50  ;;  %11183 = vmatpush1.bf16.msra.mxu1 %v17894_v7  ;;  %v18563_v50 = vld [vmem:[%s22322_s0 + $0x80] ss:$20 sps:$4 sm:$0xff]  }
 0x544   :  { %11184 = vmatprep.subr.bf16.mxu1 %v17902_v23  ;;  %v17953_v7 = vld [vmem:[#allocation7 + $0xe4] ss:$8 sps:$4 sm:$0xff]   ;;  %v17951_v23 = vld [vmem:[#allocation7 + $0xe0] ss:$8 sps:$4 sm:$0xff]  }
 0x545   :  { %10365 = vmatpush1.bf16.msra.mxu0 %v17897_v60  ;;  %v17962_v60 = vld [vmem:[#allocation7 + $0x374] ss:$8 sps:$4 sm:$0xff]  }
 0x546   :  { %10366 = vmatprep.subr.bf16.mxu0 %v17905_v4  ;;  %v17957_v4 = vld [vmem:[#allocation7 + $0xf0] ss:$8 sps:$4 sm:$0xff]  }
 0x547   :  { %11185 = vmatpush1.bf16.msra.mxu1 %v17900_v13  ;;  %9430 = vmatmul.mubr.bf16.gmra.mrb[12].mxu0 %v18563_v50  ;;  %v23039_v13 = vld [vmem:[#allocation51_spill] sm:$0xff] }
 0x548   :  { %11186 = vmatprep.subr.bf16.mxu1 %v17908_v21  ;;  %9437 = vmatprep.mubr.bf16.mxu0 %v18564_v17  ;;  %v17960_v21 = vld [vmem:[#allocation7 + $0x370] ss:$8 sps:$4 sm:$0xff]  }
 0x549   :  { %10367 = vmatpush1.bf16.msra.mxu0 %v17903_v0  ;;  %v17965_v0 = vld [vmem:[#allocation7 + $0x104] ss:$8 sps:$4 sm:$0xff]   ;;  %v21409_v17 = vld [vmem:[#allocation5] sm:$0x1f] }
 0x54a   :  { %15850 = vmatmul.mubr.bf16.gmra.mrb[28].mxu1 %v21176_v15  ;;  %10368 = vmatprep.subr.bf16.mxu0 %v17911_v53  ;;  %v17923_v15 = vld [vmem:[#allocation7 + $0x94] ss:$8 sps:$4 sm:$0xff]   ;;  %v9649_v53 = vlaneseq }
 0x54b   :  { %11187 = vmatpush1.bf16.msra.mxu1 %v17906_v12  ;;  %v17968_v12 = vld [vmem:[#allocation7 + $0x384] ss:$8 sps:$4 sm:$0xff]  }
 0x54c   :  { %11188 = vmatprep.subr.bf16.mxu1 %v17914_v39  ;;  %v21406_v39 = vshrl.u32 %v9649_v53, 7 }
 0x54d   :  { %10369 = vmatpush1.bf16.msra.mxu0 %v17909_v45 }
 0x54e   :  { %10370 = vmatprep.subr.bf16.mxu0 %v17917_v35  ;;  %23040 = vst [vmem:[#allocation138_spill] sm:$0xff] %v21406_v39  ;;  %v22485_v50 = vsub.s32 0, %v21406_v39  ;;  %v22484_v45 = vsub.s32 1, %v21406_v39 }
 0x54f   :  { %11189 = vmatpush1.bf16.msra.mxu1 %v17912_v16  ;;  %9438 = vmatmul.mubr.bf16.gmra.mrb[16].mxu0 %v18565_v44 }
 0x550   :  { %11190 = vmatprep.subr.bf16.mxu1 %v17920_v5  ;;  %9445 = vmatprep.mubr.bf16.mxu0 %v18566_v29  ;;  %v21415_v16 = vrot.slane %v21409_v17, %v22485_v50  ;;  %v21420_v5 = vrot.slane %v21409_v17, %v22484_v45 }
 0x551   :  { %10371 = vmatpush1.bf16.msra.mxu0 %v17915_v1  ;;  %v23041_v1 = vld [vmem:[#allocation134_spill] sm:$0xff] }
 0x552   :  { %10372 = vmatprep.subr.bf16.mxu0 %v17923_v15 }
 0x553   :  { %11191 = vmatpush1.bf16.msra.mxu1 %v17918_v52 }
 0x554   :  { %11192 = vmatprep.subr.bf16.mxu1 %v17926_v51  ;;  %v23042_v51 = vld [vmem:[#allocation140_spill] sm:$0xff] }
 0x555   :  { %10373 = vmatpush1.bf16.msra.mxu0 %v17921_v48 }
 0x556   :  { %10374 = vmatprep.subr.bf16.mxu0 %v17929_v27 }
 0x557   :  { %11193 = vmatpush1.bf16.msra.mxu1 %v17924_v42  ;;  %9446 = vmatmul.mubr.bf16.gmra.mrb[20].mxu0 %v18567_v33  ;;  %v23043_v42 = vld [vmem:[#allocation154_spill] sm:$0xff] }
 0x558   :  { %11194 = vmatprep.subr.bf16.mxu1 %v17932_v8  ;;  %9453 = vmatprep.mubr.bf16.mxu0 %v18568_v25 }
 0x559   :  { %10375 = vmatpush1.bf16.msra.mxu0 %v17927_v26 }
 0x55a   :  { %10376 = vmatprep.subr.bf16.mxu0 %v17935_v34 }
 0x55b   :  { %11195 = vmatpush1.bf16.msra.mxu1 %v17930_v56  ;;  %v23044_v56 = vld [vmem:[#allocation160_spill] sm:$0xff] }
 0x55c   :  { %11196 = vmatprep.subr.bf16.mxu1 %v17938_v46 }
 0x55d   :  { %10377 = vmatpush1.bf16.msra.mxu0 %v17933_v10 }
 0x55e   :  { %10378 = vmatprep.subr.bf16.mxu0 %v17941_v31 }
 0x55f   :  { %11197 = vmatpush1.bf16.msra.mxu1 %v17936_v14  ;;  %9454 = vmatmul.mubr.bf16.gmra.mrb[24].mxu0 %v18569_v11 }
 0x560   :  { %11198 = vmatprep.subr.bf16.mxu1 %v17944_v30  ;;  %9461 = vmatprep.mubr.bf16.mxu0 %v23038_v22  ;;  %v23046_v22 = vld [vmem:[#allocation122_spill] sm:$0xff] }
 0x561   :  { %10379 = vmatpush1.bf16.msra.mxu0 %v17939_v57 }
 0x562   :  { %10380 = vmatprep.subr.bf16.mxu0 %v17947_v20 }
 0x563   :  { %11199 = vmatpush1.bf16.msra.mxu1 %v17942_v62  ;;  %v23045_v62 = vld [vmem:[#allocation90_spill] sm:$0xff] }
 0x564   :  { %11200 = vmatprep.subr.bf16.mxu1 %v17950_v63 }
 0x565   :  { %10381 = vmatpush1.bf16.msra.mxu0 %v17945_v36 }
 0x566   :  { %10382 = vmatprep.subr.bf16.mxu0 %v17953_v7  ;;  %v17963_v7 = vld [vmem:[#allocation7 + $0x100] ss:$8 sps:$4 sm:$0xff]  }
 0x567   :  { %11201 = vmatpush1.bf16.msra.mxu1 %v17948_v40  ;;  %9462 = vmatmul.mubr.bf16.gmra.mrb[28].mxu0 %v23039_v13  ;;  %v17971_v13 = vld [vmem:[#allocation7 + $0x114] ss:$8 sps:$4 sm:$0xff]  }
 0x568   :  { %11202 = vmatprep.subr.bf16.mxu1 %v17956_v59  ;;  %v17966_v59 = vld [vmem:[#allocation7 + $0x380] ss:$8 sps:$4 sm:$0xff]  }
 0x569   :  { %10383 = vmatpush1.bf16.msra.mxu0 %v17951_v23 }
 0x56a   :  { %10384 = vmatprep.subr.bf16.mxu0 %v17959_v58 }
 0x56b   :  { %11203 = vmatpush1.bf16.msra.mxu1 %v17954_v61  ;;  %v23047_v61 = vld [vmem:[#allocation91_spill] sm:$0xff] }
 0x56c   :  { %11204 = vmatprep.subr.bf16.mxu1 %v17962_v60 }
 0x56d   :  { %10385 = vmatpush1.bf16.msra.mxu0 %v17957_v4  ;;  %v17974_v4 = vld [vmem:[#allocation7 + $0x394] ss:$8 sps:$4 sm:$0xff]  }
 0x56e   :  { %10467 = vmatprep.subr.bf16.mxu0 %v17965_v0  ;;  %v23048_v0 = vld [vmem:[#allocation123_spill] sm:$0xff] }
 0x56f   :  { %11205 = vmatpush1.bf16.msra.mxu1 %v17960_v21 }
 0x570   :  { %11287 = vmatprep.subr.bf16.mxu1 %v17968_v12 }
 0x582   :  { %v8858_v35 = vpop.f32.mrb[208].mxu1 }
 0x583   :  { %v9567_v52 = vmax.f32 %v23041_v1, %v8858_v35  ;;  %v8860_v15 = vpop.f32.mrb[209].mxu1  ;;  %v17969_v1 = vld [vmem:[#allocation7 + $0x110] ss:$8 sps:$4 sm:$0xff]  }
 0x584   :  { %v9568_v44 = vmax.f32 %v23042_v51, %v8860_v15  ;;  %v8862_v29 = vpop.f32.mrb[210].mxu1 }
 0x585   :  { %v9674_v48 = vadd.f32 %v21415_v16, %v9567_v52  ;;  %v9572_v27 = vmax.f32 %v23043_v42, %v8862_v29  ;;  %v8864_v8 = vpop.f32.mrb[211].mxu1  ;;  %v17972_v52 = vld [vmem:[#allocation7 + $0x390] ss:$8 sps:$4 sm:$0xff]   ;;  %v17980_v29 = vld [vmem:[#allocation7 + $0x3a4] ss:$8 sps:$4 sm:$0xff]  }
 0x586   :  { %v9675_v26 = vadd.f32 %v21420_v5, %v9568_v44  ;;  %v9573_v34 = vmax.f32 %v23044_v56, %v8864_v8  ;;  %v17977_v44 = vld [vmem:[#allocation7 + $0x124] ss:$8 sps:$4 sm:$0xff]  }
 0x587   :  { %v9679_v46 = vadd.f32 %v21415_v16, %v9572_v27  ;;  %v9754_v25 = vmax.f32 %v9674_v48, 0.0 }
 0x588   :  { %v9680_v33 = vadd.f32 %v21420_v5, %v9573_v34  ;;  %v9755_v14 = vmax.f32 %v9675_v26, 0.0  ;;  %v23049_v26 = vld [vmem:[#allocation92_spill] sm:$0xff] }
 0x589   :  { %v9759_v10 = vmax.f32 %v9679_v46, 0.0 }
 0x58a   :  { %v9760_v31 = vmax.f32 %v9680_v33, 0.0  ;;  %v23050_v33 = vld [vmem:[#allocation124_spill] sm:$0xff] }
 0x58b   :  { %v21430_v57 = vpack.c.bf16 %v9759_v10, %v9754_v25 }
 0x58c   :  { %v21433_v11 = vpack.c.bf16 %v9760_v31, %v9755_v14  ;;  %v17975_v14 = vld [vmem:[#allocation7 + $0x120] ss:$8 sps:$4 sm:$0xff]  }
 0x58d   :  { %v8868_v30 = vpop.f32.mrb[212].mxu1  ;;  %v17978_v31 = vld [vmem:[#allocation7 + $0x3a0] ss:$8 sps:$4 sm:$0xff]  }
 0x58e   :  { %v9577_v20 = vmax.f32 %v23045_v62, %v8868_v30  ;;  %v8870_v63 = vpop.f32.mrb[213].mxu1  ;;  %10386 = vmatprep.mubr.bf16.mxu0 %v21433_v11  ;;  %11206 = vmatprep.mubr.bf16.mxu1 %v21433_v11  ;;  %v23051_v62 = vld [vmem:[#allocation93_spill] sm:$0xff] }
 0x58f   :  { %v9578_v36 = vmax.f32 %v23046_v22, %v8870_v63  ;;  %v8872_v40 = vpop.f32.mrb[214].mxu1  ;;  %10387 = vmatmul.mubr.bf16.vlgmr.msra.gmra.mrb[32].mxu0 %v21430_v57  ;;  %11207 = vmatmul.mubr.bf16.vlgmr.msra.gmra.mrb[32].mxu1 %v21430_v57  ;;  %v17983_v22 = vld [vmem:[#allocation7 + $0x134] ss:$8 sps:$4 sm:$0xff]  }
 0x590   :  { %v9684_v23 = vadd.f32 %v21415_v16, %v9577_v20  ;;  %v9582_v58 = vmax.f32 %v23047_v61, %v8872_v40  ;;  %v8874_v60 = vpop.f32.mrb[215].mxu1  ;;  %10468 = vmatpush1.bf16.msra.mxu0 %v17963_v7  ;;  %11288 = vmatpush1.bf16.msra.mxu1 %v17966_v59  ;;  %v23052_v7 = vld [vmem:[#allocation125_spill] sm:$0xff] }
 0x591   :  { %v9685_v21 = vadd.f32 %v21420_v5, %v9578_v36  ;;  %v9583_v12 = vmax.f32 %v23048_v0, %v8874_v60  ;;  %10469 = vmatprep.subr.bf16.mxu0 %v17971_v13  ;;  %11289 = vmatprep.subr.bf16.mxu1 %v17974_v4  ;;  %v17986_v36 = vld [vmem:[#allocation7 + $0x3b4] ss:$8 sps:$4 sm:$0xff]   ;;  %v17984_v60 = vld [vmem:[#allocation7 + $0x3b0] ss:$8 sps:$4 sm:$0xff]   ;;  %v17992_v0 = vld [vmem:[#allocation7 + $0x3c4] ss:$8 sps:$4 sm:$0xff]  }
 0x592   :  { %v9689_v53 = vadd.f32 %v21415_v16, %v9582_v58  ;;  %v9764_v15 = vmax.f32 %v9684_v23, 0.0  ;;  %v17981_v58 = vld [vmem:[#allocation7 + $0x130] ss:$8 sps:$4 sm:$0xff]  }
 0x593   :  { %v9690_v35 = vadd.f32 %v21420_v5, %v9583_v12  ;;  %v9765_v48 = vmax.f32 %v9685_v21, 0.0  ;;  %v17989_v21 = vld [vmem:[#allocation7 + $0x144] ss:$8 sps:$4 sm:$0xff]  }
 0x594   :  { %v9769_v51 = vmax.f32 %v9689_v53, 0.0  ;;  %10470 = vmatpush1.bf16.msra.mxu0 %v17969_v1  ;;  %11290 = vmatpush1.bf16.msra.mxu1 %v17972_v52  ;;  %v23053_v52 = vld [vmem:[#allocation94_spill] sm:$0xff] }
 0x595   :  { %v9770_v42 = vmax.f32 %v9690_v35, 0.0  ;;  %v8878_v27 = vpop.f32.mrb[216].mxu1  ;;  %10471 = vmatprep.subr.bf16.mxu0 %v17977_v44  ;;  %11291 = vmatprep.subr.bf16.mxu1 %v17980_v29  ;;  %v23054_v29 = vld [vmem:[#allocation126_spill] sm:$0xff] }
 0x596   :  { %v21446_v8 = vpack.c.bf16 %v9769_v51, %v9764_v15  ;;  %v9587_v56 = vmax.f32 %v23049_v26, %v8878_v27  ;;  %v8880_v34 = vpop.f32.mrb[217].mxu1  ;;  %v17987_v27 = vld [vmem:[#allocation7 + $0x140] ss:$8 sps:$4 sm:$0xff]  }
 0x597   :  { %v21449_v46 = vpack.c.bf16 %v9770_v42, %v9765_v48  ;;  %v9588_v25 = vmax.f32 %v23050_v33, %v8880_v34  ;;  %v8882_v10 = vpop.f32.mrb[218].mxu1  ;;  %v17990_v26 = vld [vmem:[#allocation7 + $0x3c0] ss:$8 sps:$4 sm:$0xff]   ;;  %v23055_v34 = vld [vmem:[#allocation95_spill] sm:$0xff] }
 0x598   :  { %v9694_v30 = vadd.f32 %v21415_v16, %v9587_v56  ;;  %v9592_v20 = vmax.f32 %v23051_v62, %v8882_v10  ;;  %v8884_v63 = vpop.f32.mrb[219].mxu1  ;;  %10472 = vmatpush1.bf16.msra.mxu0 %v17975_v14  ;;  %11292 = vmatpush1.bf16.msra.mxu1 %v17978_v31  ;;  %v17995_v10 = vld [vmem:[#allocation7 + $0x154] ss:$8 sps:$4 sm:$0xff]  }
 0x599   :  { %v9695_v40 = vadd.f32 %v21420_v5, %v9588_v25  ;;  %v9593_v59 = vmax.f32 %v23052_v7, %v8884_v63  ;;  %10396 = vmatprep.mubr.bf16.mxu0 %v21449_v46  ;;  %11216 = vmatprep.mubr.bf16.mxu1 %v21449_v46  ;;  %v17998_v14 = vld [vmem:[#allocation7 + $0x3d4] ss:$8 sps:$4 sm:$0xff]  }
 0x59a   :  { %v9699_v23 = vadd.f32 %v21415_v16, %v9592_v20  ;;  %10397 = vmatmul.mubr.bf16.gmra.mrb[36].mxu0 %v21446_v8  ;;  %11217 = vmatmul.mubr.bf16.gmra.mrb[36].mxu1 %v21446_v8  ;;  %v9774_v13 = vmax.f32 %v9694_v30, 0.0  ;;  %v23056_v30 = vld [vmem:[#allocation127_spill] sm:$0xff] }
 0x59b   :  { %v9700_v61 = vadd.f32 %v21420_v5, %v9593_v59  ;;  %10473 = vmatprep.subr.bf16.mxu0 %v17983_v22  ;;  %11293 = vmatprep.subr.bf16.mxu1 %v17986_v36  ;;  %v9775_v12 = vmax.f32 %v9695_v40, 0.0  ;;  %v17993_v22 = vld [vmem:[#allocation7 + $0x150] ss:$8 sps:$4 sm:$0xff]   ;;  %v18001_v59 = vld [vmem:[#allocation7 + $0x164] ss:$8 sps:$4 sm:$0xff]  }
 0x59c   :  { %v9779_v4 = vmax.f32 %v9699_v23, 0.0  ;;  %10474 = vmatpush1.bf16.msra.mxu0 %v17981_v58  ;;  %11294 = vmatpush1.bf16.msra.mxu1 %v17984_v60  ;;  %v17996_v36 = vld [vmem:[#allocation7 + $0x3d0] ss:$8 sps:$4 sm:$0xff]   ;;  %v18004_v23 = vld [vmem:[#allocation7 + $0x3e4] ss:$8 sps:$4 sm:$0xff]  }
 0x59d   :  { %v9780_v53 = vmax.f32 %v9700_v61, 0.0  ;;  %v8888_v35 = vpop.f32.mrb[220].mxu1  ;;  %10475 = vmatprep.subr.bf16.mxu0 %v17989_v21  ;;  %11295 = vmatprep.subr.bf16.mxu1 %v17992_v0 }
 0x59e   :  { %v21462_v1 = vpack.c.bf16 %v9779_v4, %v9774_v13  ;;  %v9597_v15 = vmax.f32 %v23053_v52, %v8888_v35  ;;  %v8890_v51 = vpop.f32.mrb[221].mxu1  ;;  %v23058_v4 = vld [vmem:[#allocation96_spill] sm:$0xff] }
 0x59f   :  { %v21465_v44 = vpack.c.bf16 %v9780_v53, %v9775_v12  ;;  %v9598_v48 = vmax.f32 %v23054_v29, %v8890_v51  ;;  %v8892_v42 = vpop.f32.mrb[222].mxu1  ;;  %v23059_v53 = vld [vmem:[#allocation128_spill] sm:$0xff] }
 0x5a0   :  { %v9704_v56 = vadd.f32 %v21415_v16, %v9597_v15  ;;  %v9602_v33 = vmax.f32 %v23055_v34, %v8892_v42  ;;  %v8894_v25 = vpop.f32.mrb[223].mxu1  ;;  %10476 = vmatpush1.bf16.msra.mxu0 %v17987_v27  ;;  %11296 = vmatpush1.bf16.msra.mxu1 %v17990_v26  ;;  %v17999_v15 = vld [vmem:[#allocation7 + $0x160] ss:$8 sps:$4 sm:$0xff]   ;;  %v18007_v26 = vld [vmem:[#allocation7 + $0x174] ss:$8 sps:$4 sm:$0xff]  }
 0x5a1   :  { %v9705_v31 = vadd.f32 %v21420_v5, %v9598_v48  ;;  %v9603_v62 = vmax.f32 %v23056_v30, %v8894_v25  ;;  %10406 = vmatprep.mubr.bf16.mxu0 %v21465_v44  ;;  %11226 = vmatprep.mubr.bf16.mxu1 %v21465_v44  ;;  %v18002_v51 = vld [vmem:[#allocation7 + $0x3e0] ss:$8 sps:$4 sm:$0xff]   ;;  %v18008_v30 = vld [vmem:[#allocation7 + $0x3f0] ss:$8 sps:$4 sm:$0xff]  }
 0x5a2   :  { %v9709_v20 = vadd.f32 %v21415_v16, %v9602_v33  ;;  %10407 = vmatmul.mubr.bf16.gmra.mrb[40].mxu0 %v21462_v1  ;;  %11227 = vmatmul.mubr.bf16.gmra.mrb[40].mxu1 %v21462_v1  ;;  %v9784_v40 = vmax.f32 %v9704_v56, 0.0  ;;  %v23060_v48 = vld [vmem:[#allocation97_spill] sm:$0xff]  ;;  %v18010_v56 = vld [vmem:[#allocation7 + $0x3f4] ss:$8 sps:$4 sm:$0xff]  }
 0x5a3   :  { %v9710_v63 = vadd.f32 %v21420_v5, %v9603_v62  ;;  %10477 = vmatprep.subr.bf16.mxu0 %v17995_v10  ;;  %11297 = vmatprep.subr.bf16.mxu1 %v17998_v14  ;;  %v9785_v61 = vmax.f32 %v9705_v31, 0.0  ;;  %v23061_v33 = vld [vmem:[#allocation129_spill] sm:$0xff]  ;;  %v18005_v31 = vld [vmem:[#allocation7 + $0x170] ss:$8 sps:$4 sm:$0xff]  }
 0x5a4   :  { %v9789_v7 = vmax.f32 %v9709_v20, 0.0  ;;  %10478 = vmatpush1.bf16.msra.mxu0 %v17993_v22  ;;  %11298 = vmatpush1.bf16.msra.mxu1 %v17996_v36  ;;  %v18016_v22 = vld [vmem:[#allocation7 + $0x404] ss:$8 sps:$4 sm:$0xff]  }
 0x5a5   :  { %v9790_v58 = vmax.f32 %v9710_v63, 0.0  ;;  %v8898_v60 = vpop.f32.mrb[224].mxu1  ;;  %10479 = vmatprep.subr.bf16.mxu0 %v18001_v59  ;;  %11299 = vmatprep.subr.bf16.mxu1 %v18004_v23  ;;  %v18013_v63 = vld [vmem:[#allocation7 + $0x184] ss:$8 sps:$4 sm:$0xff]  }
 0x5a6   :  { %v21478_v13 = vpack.c.bf16 %v9789_v7, %v9784_v40  ;;  %v9607_v21 = vmax.f32 %v23058_v4, %v8898_v60  ;;  %v8900_v0 = vpop.f32.mrb[225].mxu1  ;;  %v23063_v23 = vld [vmem:[#allocation98_spill] sm:$0xff] }
 0x5a7   :  { %v21481_v12 = vpack.c.bf16 %v9790_v58, %v9785_v61  ;;  %v9608_v35 = vmax.f32 %v23059_v53, %v8900_v0  ;;  %v8902_v52 = vpop.f32.mrb[226].mxu1  ;;  %v23065_v4 = vld [vmem:[#allocation130_spill] sm:$0xff] }
 0x5a8   :  { %23057 = vst [vmem:[#allocation52_spill] sm:$0xff] %v21478_v13  ;;  %v9714_v29 = vadd.f32 %v21415_v16, %v9607_v21  ;;  %v9612_v42 = vmax.f32 %v23060_v48, %v8902_v52  ;;  %v8904_v27 = vpop.f32.mrb[227].mxu1  ;;  %10480 = vmatpush1.bf16.msra.mxu0 %v17999_v15  ;;  %11300 = vmatpush1.bf16.msra.mxu1 %v18002_v51  ;;  %v18011_v53 = vld [vmem:[#allocation7 + $0x180] ss:$8 sps:$4 sm:$0xff]   ;;  %v23066_v15 = vld [vmem:[#allocation99_spill] sm:$0xff] }
 0x5a9   :  { %v9715_v34 = vadd.f32 %v21420_v5, %v9608_v35  ;;  %v9613_v25 = vmax.f32 %v23061_v33, %v8904_v27  ;;  %10416 = vmatprep.mubr.bf16.mxu0 %v21481_v12  ;;  %11236 = vmatprep.mubr.bf16.mxu1 %v21481_v12  ;;  %v18014_v35 = vld [vmem:[#allocation7 + $0x400] ss:$8 sps:$4 sm:$0xff]   ;;  %v18019_v48 = vld [vmem:[#allocation7 + $0x194] ss:$8 sps:$4 sm:$0xff]  }
 0x5aa   :  { %v9719_v10 = vadd.f32 %v21415_v16, %v9612_v42  ;;  %10417 = vmatmul.mubr.bf16.gmra.mrb[44].mxu0 %v21478_v13  ;;  %11237 = vmatmul.mubr.bf16.gmra.mrb[44].mxu1 %v21478_v13  ;;  %v9794_v62 = vmax.f32 %v9714_v29, 0.0  ;;  %v18022_v42 = vld [vmem:[#allocation7 + $0x414] ss:$8 sps:$4 sm:$0xff]  }
 0x5ab   :  { %v9720_v14 = vadd.f32 %v21420_v5, %v9613_v25  ;;  %10481 = vmatprep.subr.bf16.mxu0 %v18007_v26  ;;  %11301 = vmatprep.subr.bf16.mxu1 %v18010_v56  ;;  %v9795_v36 = vmax.f32 %v9715_v34, 0.0  ;;  %v23067_v26 = vld [vmem:[#allocation131_spill] sm:$0xff] }
 0x5ac   :  { %v9799_v20 = vmax.f32 %v9719_v10, 0.0  ;;  %10482 = vmatpush1.bf16.msra.mxu0 %v18005_v31  ;;  %11302 = vmatpush1.bf16.msra.mxu1 %v18008_v30  ;;  %v18017_v25 = vld [vmem:[#allocation7 + $0x190] ss:$8 sps:$4 sm:$0xff]   ;;  %v18025_v30 = vld [vmem:[#allocation7 + $0x1a4] ss:$8 sps:$4 sm:$0xff]  }
 0x5ad   :  { %v9800_v40 = vmax.f32 %v9720_v14, 0.0  ;;  %v8908_v7 = vpop.f32.mrb[228].mxu1  ;;  %10483 = vmatprep.subr.bf16.mxu0 %v18013_v63  ;;  %11303 = vmatprep.subr.bf16.mxu1 %v18016_v22  ;;  %v18020_v10 = vld [vmem:[#allocation7 + $0x410] ss:$8 sps:$4 sm:$0xff]  }
 0x5ae   :  { %v21494_v59 = vpack.c.bf16 %v9799_v20, %v9794_v62  ;;  %v9617_v61 = vmax.f32 %v23063_v23, %v8908_v7  ;;  %v8910_v58 = vpop.f32.mrb[229].mxu1  ;;  %v18028_v62 = vld [vmem:[#allocation7 + $0x424] ss:$8 sps:$4 sm:$0xff]  }
 0x5af   :  { %v21497_v60 = vpack.c.bf16 %v9800_v40, %v9795_v36  ;;  %v9618_v21 = vmax.f32 %v23065_v4, %v8910_v58  ;;  %v8912_v0 = vpop.f32.mrb[230].mxu1  ;;  %v23069_v40 = vld [vmem:[#allocation100_spill] sm:$0xff] }
 0x5b0   :  { %23062 = vst [vmem:[#allocation105_spill] sm:$0xff] %v21494_v59  ;;  %v9724_v52 = vadd.f32 %v21415_v16, %v9617_v61  ;;  %v9622_v51 = vmax.f32 %v23066_v15, %v8912_v0  ;;  %v8914_v29 = vpop.f32.mrb[231].mxu1  ;;  %10484 = vmatpush1.bf16.msra.mxu0 %v18011_v53  ;;  %11304 = vmatpush1.bf16.msra.mxu1 %v18014_v35  ;;  %v23071_v58 = vld [vmem:[#allocation132_spill] sm:$0xff] }
 0x5b1   :  { %23064 = vst [vmem:[#allocation53_spill] sm:$0xff] %v21497_v60  ;;  %v9725_v27 = vadd.f32 %v21420_v5, %v9618_v21  ;;  %v9623_v56 = vmax.f32 %v23067_v26, %v8914_v29  ;;  %10426 = vmatprep.mubr.bf16.mxu0 %v21497_v60  ;;  %11246 = vmatprep.mubr.bf16.mxu1 %v21497_v60  ;;  %v18023_v0 = vld [vmem:[#allocation7 + $0x1a0] ss:$8 sps:$4 sm:$0xff]   ;;  %v18031_v29 = vld [vmem:[#allocation7 + $0x1b4] ss:$8 sps:$4 sm:$0xff]  }
 0x5b2   :  { %v9729_v34 = vadd.f32 %v21415_v16, %v9622_v51  ;;  %10427 = vmatmul.mubr.bf16.gmra.mrb[48].mxu0 %v21494_v59  ;;  %11247 = vmatmul.mubr.bf16.gmra.mrb[48].mxu1 %v21494_v59  ;;  %v9804_v14 = vmax.f32 %v9724_v52, 0.0  ;;  %v18026_v53 = vld [vmem:[#allocation7 + $0x420] ss:$8 sps:$4 sm:$0xff]  }
 0x5b3   :  { %v9730_v33 = vadd.f32 %v21420_v5, %v9623_v56  ;;  %10485 = vmatprep.subr.bf16.mxu0 %v18019_v48  ;;  %11305 = vmatprep.subr.bf16.mxu1 %v18022_v42  ;;  %v9805_v20 = vmax.f32 %v9725_v27, 0.0  ;;  %v23072_v52 = vld [vmem:[#allocation101_spill] sm:$0xff]  ;;  %v18034_v48 = vld [vmem:[#allocation7 + $0x434] ss:$8 sps:$4 sm:$0xff]  }
 0x5b4   :  { %v9809_v31 = vmax.f32 %v9729_v34, 0.0  ;;  %10486 = vmatpush1.bf16.msra.mxu0 %v18017_v25  ;;  %11306 = vmatpush1.bf16.msra.mxu1 %v18020_v10  ;;  %v23073_v27 = vld [vmem:[#allocation133_spill] sm:$0xff]  ;;  %v18032_v25 = vld [vmem:[#allocation7 + $0x430] ss:$8 sps:$4 sm:$0xff]  }
 0x5b5   :  { %v9810_v63 = vmax.f32 %v9730_v33, 0.0  ;;  %v8918_v22 = vpop.f32.mrb[232].mxu1  ;;  %10487 = vmatprep.subr.bf16.mxu0 %v18025_v30  ;;  %11307 = vmatprep.subr.bf16.mxu1 %v18028_v62  ;;  %v18029_v33 = vld [vmem:[#allocation7 + $0x1b0] ss:$8 sps:$4 sm:$0xff]   ;;  %v18040_v30 = vld [vmem:[#allocation7 + $0x444] ss:$8 sps:$4 sm:$0xff]  }
 0x5b6   :  { %v21510_v36 = vpack.c.bf16 %v9809_v31, %v9804_v14  ;;  %v9627_v7 = vmax.f32 %v23069_v40, %v8918_v22  ;;  %v8920_v23 = vpop.f32.mrb[233].mxu1  ;;  %v18037_v31 = vld [vmem:[#allocation7 + $0x1c4] ss:$8 sps:$4 sm:$0xff]  }
 0x5b7   :  { %v21513_v61 = vpack.c.bf16 %v9810_v63, %v9805_v20  ;;  %v9628_v4 = vmax.f32 %v23071_v58, %v8920_v23  ;;  %v8922_v21 = vpop.f32.mrb[234].mxu1  ;;  %v23075_v40 = vld [vmem:[#allocation102_spill] sm:$0xff] }
 0x5b8   :  { %23068 = vst [vmem:[#allocation139_spill] sm:$0xff] %v21510_v36  ;;  %v9734_v35 = vadd.f32 %v21415_v16, %v9627_v7  ;;  %v9632_v15 = vmax.f32 %v23072_v52, %v8922_v21  ;;  %v8924_v51 = vpop.f32.mrb[235].mxu1  ;;  %10488 = vmatpush1.bf16.msra.mxu0 %v18023_v0  ;;  %11308 = vmatpush1.bf16.msra.mxu1 %v18026_v53  ;;  %v18035_v53 = vld [vmem:[#allocation7 + $0x1c0] ss:$8 sps:$4 sm:$0xff]  }
 0x5b9   :  { %23070 = vst [vmem:[#allocation54_spill] sm:$0xff] %v21513_v61  ;;  %v9735_v42 = vadd.f32 %v21420_v5, %v9628_v4  ;;  %v9633_v26 = vmax.f32 %v23073_v27, %v8924_v51  ;;  %10436 = vmatprep.mubr.bf16.mxu0 %v21513_v61  ;;  %11256 = vmatprep.mubr.bf16.mxu1 %v21513_v61  ;;  %v23077_v4 = vld [vmem:[#allocation136_spill] sm:$0xff] }
 0x5ba   :  { %v9739_v56 = vadd.f32 %v21415_v16, %v9632_v15  ;;  %10437 = vmatmul.mubr.bf16.gmra.mrb[52].mxu0 %v21510_v36  ;;  %11257 = vmatmul.mubr.bf16.gmra.mrb[52].mxu1 %v21510_v36  ;;  %v9814_v10 = vmax.f32 %v9734_v35, 0.0  ;;  %v18038_v35 = vld [vmem:[#allocation7 + $0x440] ss:$8 sps:$4 sm:$0xff]   ;;  %v23078_v15 = vld [vmem:[#allocation103_spill] sm:$0xff] }
 0x5bb   :  { %v9740_v34 = vadd.f32 %v21420_v5, %v9633_v26  ;;  %10489 = vmatprep.subr.bf16.mxu0 %v18031_v29  ;;  %11309 = vmatprep.subr.bf16.mxu1 %v18034_v48  ;;  %v9815_v62 = vmax.f32 %v9735_v42, 0.0  ;;  %v9659_v48 = vsub.s32 2, %v21406_v39  ;;  %v18043_v42 = vld [vmem:[#allocation7 + $0x1d4] ss:$8 sps:$4 sm:$0xff]  }
 0x5bc   :  { %v9819_v14 = vmax.f32 %v9739_v56, 0.0  ;;  %10490 = vmatpush1.bf16.msra.mxu0 %v18029_v33  ;;  %11310 = vmatpush1.bf16.msra.mxu1 %v18032_v25  ;;  %v18046_v27 = vld [vmem:[#allocation7 + $0x454] ss:$8 sps:$4 sm:$0xff]   ;;  %v23079_v56 = vld [vmem:[#allocation137_spill] sm:$0xff]  ;;  %v9663_v33 = vsub.s32 3, %v21406_v39 }
 0x5bd   :  { %v9820_v20 = vmax.f32 %v9740_v34, 0.0  ;;  %v8928_v63 = vpop.f32.mrb[236].mxu1  ;;  %10491 = vmatprep.subr.bf16.mxu0 %v18037_v31  ;;  %11311 = vmatprep.subr.bf16.mxu1 %v18040_v30  ;;  %v18044_v31 = vld [vmem:[#allocation7 + $0x450] ss:$8 sps:$4 sm:$0xff]  }
 0x5be   :  { %v21526_v22 = vpack.c.bf16 %v9819_v14, %v9814_v10  ;;  %v9637_v7 = vmax.f32 %v23075_v40, %v8928_v63  ;;  %v8930_v23 = vpop.f32.mrb[237].mxu1  ;;  %v18041_v14 = vld [vmem:[#allocation7 + $0x1d0] ss:$8 sps:$4 sm:$0xff]   ;;  %v18049_v63 = vld [vmem:[#allocation7 + $0x1e4] ss:$8 sps:$4 sm:$0xff]  }
 0x5bf   :  { %v21529_v58 = vpack.c.bf16 %v9820_v20, %v9815_v62  ;;  %v9638_v21 = vmax.f32 %v23077_v4, %v8930_v23  ;;  %v8932_v0 = vpop.f32.mrb[238].mxu1  ;;  %v21545_v20 = vrot.slane %v21409_v17, %v9659_v48  ;;  %v18052_v40 = vld [vmem:[#allocation7 + $0x464] ss:$8 sps:$4 sm:$0xff]   ;;  %v21548_v4 = vrot.slane %v21409_v17, %v9663_v33  ;;  %v18050_v17 = vld [vmem:[#allocation7 + $0x460] ss:$8 sps:$4 sm:$0xff]  }
 0x5c0   :  { %23074 = vst [vmem:[#allocation106_spill] sm:$0xff] %v21526_v22  ;;  %v9744_v52 = vadd.f32 %v21415_v16, %v9637_v7  ;;  %v9642_v51 = vmax.f32 %v23078_v15, %v8932_v0  ;;  %v8934_v29 = vpop.f32.mrb[239].mxu1  ;;  %10492 = vmatpush1.bf16.msra.mxu0 %v18035_v53  ;;  %11312 = vmatpush1.bf16.msra.mxu1 %v18038_v35  ;;  %v23081_v0 = vld [vmem:[#allocation135_spill] sm:$0xff] }
 0x5c1   :  { %23076 = vst [vmem:[#allocation55_spill] sm:$0xff] %v21529_v58  ;;  %v9745_v26 = vadd.f32 %v21420_v5, %v9638_v21  ;;  %v9643_v34 = vmax.f32 %v23079_v56, %v8934_v29  ;;  %10446 = vmatprep.mubr.bf16.mxu0 %v21529_v58  ;;  %11266 = vmatprep.mubr.bf16.mxu1 %v21529_v58 }
 0x5c2   :  { %v9749_v25 = vadd.f32 %v21415_v16, %v9642_v51  ;;  %10447 = vmatmul.mubr.bf16.gmra.mrb[56].mxu0 %v21526_v22  ;;  %11267 = vmatmul.mubr.bf16.gmra.mrb[56].mxu1 %v21526_v22  ;;  %v9824_v30 = vmax.f32 %v9744_v52, 0.0  ;;  %v9197_v23 = vpop.f32.mrb[224].mxu0  ;;  %v23083_v51 = vld [vmem:[#allocation149_spill] sm:$0xff] }
 0x5c3   :  { %v9750_v10 = vadd.f32 %v21420_v5, %v9643_v34  ;;  %10493 = vmatprep.subr.bf16.mxu0 %v18043_v42  ;;  %11313 = vmatprep.subr.bf16.mxu1 %v18046_v27  ;;  %v9825_v16 = vmax.f32 %v9745_v26, 0.0  ;;  %v9569_v53 = vmax.f32 %v23081_v0, %v9197_v23  ;;  %v9199_v35 = vpop.f32.mrb[225].mxu0  ;;  %v18047_v26 = vld [vmem:[#allocation7 + $0x1e0] ss:$8 sps:$4 sm:$0xff]   ;;  %v23084_v34 = vld [vmem:[#allocation159_spill] sm:$0xff] }
 0x5c4   :  { %v9829_v62 = vmax.f32 %v9749_v25, 0.0  ;;  %v9570_v29 = vmax.f32 %v23083_v51, %v9199_v35  ;;  %v9201_v48 = vpop.f32.mrb[226].mxu0  ;;  %10494 = vmatpush1.bf16.msra.mxu0 %v18041_v14  ;;  %11314 = vmatpush1.bf16.msra.mxu1 %v18044_v31  ;;  %v18061_v35 = vld [vmem:[#allocation7 + $0x204] ss:$8 sps:$4 sm:$0xff]  }
 0x5c5   :  { %v9830_v7 = vmax.f32 %v9750_v10, 0.0  ;;  %v15508_v5 = vpop.f32.mrb[240].mxu1  ;;  %v9676_v56 = vadd.f32 %v21545_v20, %v9569_v53  ;;  %v9574_v33 = vmax.f32 %v23084_v34, %v9201_v48  ;;  %v9203_v25 = vpop.f32.mrb[227].mxu0  ;;  %10495 = vmatprep.subr.bf16.mxu0 %v18049_v63  ;;  %11315 = vmatprep.subr.bf16.mxu1 %v18052_v40  ;;  %v18053_v63 = vld [vmem:[#allocation7 + $0x1f0] ss:$8 sps:$4 sm:$0xff]  }
 0x5c6   :  { %v21550_v21 = vpack.c.bf16 %v9829_v62, %v9824_v30  ;;  %v15509_v52 = vpop.f32.mrb[241].mxu1  ;;  %v18055_v30 = vld [vmem:[#allocation7 + $0x1f4] ss:$8 sps:$4 sm:$0xff]   ;;  %v18056_v40 = vld [vmem:[#allocation7 + $0x470] ss:$8 sps:$4 sm:$0xff]  }
 0x5c7   :  { %v21553_v15 = vpack.c.bf16 %v9830_v7, %v9825_v16  ;;  %v21556_v42 = vadd.f32 %v15509_v52, %v15508_v5  ;;  %v15511_v27 = vpop.f32.mrb[242].mxu1  ;;  %v18058_v62 = vld [vmem:[#allocation7 + $0x474] ss:$8 sps:$4 sm:$0xff]   ;;  %v9677_v16 = vadd.f32 %v21548_v4, %v9570_v29  ;;  %v23085_v7 = vld [vmem:[#allocation22_spill] sm:$0xff]  ;;  %v9681_v14 = vadd.f32 %v21545_v20, %v9574_v33 }
 0x5c8   :  { %23080 = vst [vmem:[#allocation141_spill] sm:$0xff] %v21550_v21  ;;  %v15512_v10 = vpop.f32.mrb[243].mxu1  ;;  %v9575_v23 = vmax.f32 %v23085_v7, %v9203_v25  ;;  %10496 = vmatpush1.bf16.msra.mxu0 %v18047_v26  ;;  %11316 = vmatpush1.bf16.msra.mxu1 %v18050_v17  ;;  %v9756_v0 = vmax.f32 %v9676_v56, 0.0  ;;  %v18064_v52 = vld [vmem:[#allocation7 + $0x484] ss:$8 sps:$4 sm:$0xff]   ;;  %v23087_v33 = vld [vmem:[#allocation23_spill] sm:$0xff] }
 0x5c9   :  { %23082 = vst [vmem:[#allocation56_spill] sm:$0xff] %v21553_v15  ;;  %v21562_v5 = vadd.f32 %v15512_v10, %v15511_v27  ;;  %10456 = vmatprep.mubr.bf16.mxu0 %v21553_v15  ;;  %11276 = vmatprep.mubr.bf16.mxu1 %v21553_v15  ;;  %v9761_v53 = vmax.f32 %v9681_v14, 0.0  ;;  %v9757_v51 = vmax.f32 %v9677_v16, 0.0  ;;  %v23089_v17 = vld [vmem:[#allocation24_spill] sm:$0xff] }
 0x5ca   :  { %10457 = vmatmul.mubr.bf16.gmra.mrb[60].mxu0 %v21550_v21  ;;  %11277 = vmatmul.mubr.bf16.gmra.mrb[60].mxu1 %v21550_v21  ;;  %v9682_v31 = vadd.f32 %v21548_v4, %v9575_v23  ;;  %v9207_v48 = vpop.f32.mrb[228].mxu0  ;;  %v18062_v16 = vld [vmem:[#allocation7 + $0x480] ss:$8 sps:$4 sm:$0xff]  }
 0x5cb   :  { %10497 = vmatprep.subr.bf16.mxu0 %v18055_v30  ;;  %11317 = vmatprep.subr.bf16.mxu1 %v18058_v62  ;;  %v21570_v34 = vpack.c.bf16 %v9761_v53, %v9756_v0  ;;  %v9579_v25 = vmax.f32 %v23087_v33, %v9207_v48  ;;  %v9209_v10 = vpop.f32.mrb[229].mxu0  ;;  %v18059_v62 = vld [vmem:[#allocation7 + $0x200] ss:$8 sps:$4 sm:$0xff]  }
 0x5cc   :  { %v9762_v29 = vmax.f32 %v9682_v31, 0.0  ;;  %v9580_v23 = vmax.f32 %v23089_v17, %v9209_v10  ;;  %v9211_v56 = vpop.f32.mrb[230].mxu0  ;;  %10498 = vmatpush1.bf16.msra.mxu0 %v18053_v63  ;;  %11318 = vmatpush1.bf16.msra.mxu1 %v18056_v40  ;;  %v23090_v0 = vld [vmem:[#allocation25_spill] sm:$0xff]  ;;  %v23091_v10 = vld [vmem:[#allocation26_spill] sm:$0xff] }
 0x5cd   :  { %v15514_v27 = vpop.f32.mrb[244].mxu1  ;;  %23086 = vst [vmem:[#allocation107_spill] sm:$0xff] %v21570_v34  ;;  %v9686_v31 = vadd.f32 %v21545_v20, %v9579_v25  ;;  %v9584_v53 = vmax.f32 %v23090_v0, %v9211_v56  ;;  %v9213_v45 = vpop.f32.mrb[231].mxu0  ;;  %10580 = vmatprep.subr.bf16.mxu0 %v18061_v35  ;;  %11400 = vmatprep.subr.bf16.mxu1 %v18064_v52  ;;  %v18065_v35 = vld [vmem:[#allocation7 + $0x210] ss:$8 sps:$4 sm:$0xff]  }
 0x5ce   :  { %v15515_v7 = vpop.f32.mrb[245].mxu1  ;;  %v21573_v26 = vpack.c.bf16 %v9762_v29, %v9757_v51  ;;  %v18067_v51 = vld [vmem:[#allocation7 + $0x214] ss:$8 sps:$4 sm:$0xff]   ;;  %v9687_v33 = vadd.f32 %v21548_v4, %v9580_v23  ;;  %v18068_v52 = vld [vmem:[#allocation7 + $0x490] ss:$8 sps:$4 sm:$0xff]  }
 0x5cf   :  { %v21576_v14 = vadd.f32 %v15515_v7, %v15514_v27  ;;  %v15517_v30 = vpop.f32.mrb[246].mxu1  ;;  %v18070_v29 = vld [vmem:[#allocation7 + $0x494] ss:$8 sps:$4 sm:$0xff]   ;;  %v9585_v27 = vmax.f32 %v23091_v10, %v9213_v45  ;;  %v9691_v63 = vadd.f32 %v21545_v20, %v9584_v53  ;;  %v9766_v25 = vmax.f32 %v9686_v31, 0.0  ;;  %v18073_v17 = vld [vmem:[#allocation7 + $0x224] ss:$8 sps:$4 sm:$0xff]  }
 0x5d0   :  { %23088 = vst [vmem:[#allocation57_spill] sm:$0xff] %v21573_v26  ;;  %v15518_v48 = vpop.f32.mrb[247].mxu1  ;;  %10499 = vmatprep.mubr.bf16.mxu0 %v21573_v26  ;;  %11319 = vmatprep.mubr.bf16.mxu1 %v21573_v26  ;;  %v18076_v23 = vld [vmem:[#allocation7 + $0x4a4] ss:$8 sps:$4 sm:$0xff]   ;;  %v9767_v56 = vmax.f32 %v9687_v33, 0.0  ;;  %v23093_v10 = vld [vmem:[#allocation27_spill] sm:$0xff] }
 0x5d1   :  { %v21582_v7 = vadd.f32 %v15518_v48, %v15517_v30  ;;  %v9692_v40 = vadd.f32 %v21548_v4, %v9585_v27  ;;  %v9771_v45 = vmax.f32 %v9691_v63, 0.0  ;;  %v18074_v33 = vld [vmem:[#allocation7 + $0x4a0] ss:$8 sps:$4 sm:$0xff]  }
 0x5d2   :  { %10500 = vmatmul.mubr.bf16.vlgmr.msra.gmra.mrb[32].mxu0 %v21570_v34  ;;  %11320 = vmatmul.mubr.bf16.vlgmr.msra.gmra.mrb[32].mxu1 %v21570_v34  ;;  %v9217_v0 = vpop.f32.mrb[232].mxu0 }
 0x5d3   :  { %10581 = vmatpush1.bf16.msra.mxu0 %v18059_v62  ;;  %11401 = vmatpush1.bf16.msra.mxu1 %v18062_v16  ;;  %v9772_v30 = vmax.f32 %v9692_v40, 0.0  ;;  %v21590_v48 = vpack.c.bf16 %v9771_v45, %v9766_v25  ;;  %v9589_v50 = vmax.f32 %v23093_v10, %v9217_v0  ;;  %v9219_v34 = vpop.f32.mrb[233].mxu0  ;;  %v23095_v16 = vld [vmem:[#allocation28_spill] sm:$0xff]  ;;  %v23096_v25 = vld [vmem:[#allocation29_spill] sm:$0xff]  ;;  %v23097_v10 = vld [vmem:[#allocation30_spill] sm:$0xff] }
 0x5d4   :  { %10582 = vmatprep.subr.bf16.mxu0 %v18067_v51  ;;  %11402 = vmatprep.subr.bf16.mxu1 %v18070_v29  ;;  %v9590_v26 = vmax.f32 %v23095_v16, %v9219_v34  ;;  %v9221_v31 = vpop.f32.mrb[234].mxu0  ;;  %v18071_v29 = vld [vmem:[#allocation7 + $0x220] ss:$8 sps:$4 sm:$0xff]   ;;  %v18088_v16 = vld [vmem:[#allocation7 + $0x4c4] ss:$8 sps:$4 sm:$0xff]  }
 0x5d5   :  { %v15520_v53 = vpop.f32.mrb[248].mxu1  ;;  %23092 = vst [vmem:[#allocation142_spill] sm:$0xff] %v21590_v48  ;;  %v21593_v62 = vpack.c.bf16 %v9772_v30, %v9767_v56  ;;  %v9696_v40 = vadd.f32 %v21545_v20, %v9589_v50  ;;  %v9594_v45 = vmax.f32 %v23096_v25, %v9221_v31  ;;  %v9223_v21 = vpop.f32.mrb[235].mxu0  ;;  %v18079_v56 = vld [vmem:[#allocation7 + $0x234] ss:$8 sps:$4 sm:$0xff]  }
 0x5d6   :  { %v15521_v27 = vpop.f32.mrb[249].mxu1  ;;  %v18082_v30 = vld [vmem:[#allocation7 + $0x4b4] ss:$8 sps:$4 sm:$0xff]   ;;  %v9697_v34 = vadd.f32 %v21548_v4, %v9590_v26  ;;  %v18080_v26 = vld [vmem:[#allocation7 + $0x4b0] ss:$8 sps:$4 sm:$0xff]  }
 0x5d7   :  { %23094 = vst [vmem:[#allocation58_spill] sm:$0xff] %v21593_v62  ;;  %v21596_v63 = vadd.f32 %v15521_v27, %v15520_v53  ;;  %v15523_v51 = vpop.f32.mrb[250].mxu1  ;;  %10583 = vmatpush1.bf16.msra.mxu0 %v18065_v35  ;;  %11403 = vmatpush1.bf16.msra.mxu1 %v18068_v52  ;;  %v9595_v53 = vmax.f32 %v23097_v10, %v9223_v21  ;;  %v18077_v52 = vld [vmem:[#allocation7 + $0x230] ss:$8 sps:$4 sm:$0xff]  }
 0x5d8   :  { %v15524_v0 = vpop.f32.mrb[251].mxu1  ;;  %10584 = vmatprep.subr.bf16.mxu0 %v18073_v17  ;;  %11404 = vmatprep.subr.bf16.mxu1 %v18076_v23  ;;  %v9701_v50 = vadd.f32 %v21545_v20, %v9594_v45  ;;  %v9776_v17 = vmax.f32 %v9696_v40, 0.0  ;;  %v18085_v23 = vld [vmem:[#allocation7 + $0x244] ss:$8 sps:$4 sm:$0xff]   ;;  %v9777_v31 = vmax.f32 %v9697_v34, 0.0  ;;  %v23099_v10 = vld [vmem:[#allocation31_spill] sm:$0xff] }
 0x5d9   :  { %v21602_v27 = vadd.f32 %v15524_v0, %v15523_v51  ;;  %10509 = vmatprep.mubr.bf16.mxu0 %v21593_v62  ;;  %11329 = vmatprep.mubr.bf16.mxu1 %v21593_v62  ;;  %v9702_v35 = vadd.f32 %v21548_v4, %v9595_v53  ;;  %v18086_v34 = vld [vmem:[#allocation7 + $0x4c0] ss:$8 sps:$4 sm:$0xff]  }
 0x5da   :  { %10510 = vmatmul.mubr.bf16.gmra.mrb[36].mxu0 %v21590_v48  ;;  %11330 = vmatmul.mubr.bf16.gmra.mrb[36].mxu1 %v21590_v48  ;;  %v9781_v21 = vmax.f32 %v9701_v50, 0.0  ;;  %v9227_v25 = vpop.f32.mrb[236].mxu0 }
 0x5db   :  { %10585 = vmatpush1.bf16.msra.mxu0 %v18071_v29  ;;  %11405 = vmatpush1.bf16.msra.mxu1 %v18074_v33  ;;  %v9782_v51 = vmax.f32 %v9702_v35, 0.0  ;;  %v9599_v48 = vmax.f32 %v23099_v10, %v9227_v25  ;;  %v9229_v62 = vpop.f32.mrb[237].mxu0  ;;  %v23101_v33 = vld [vmem:[#allocation32_spill] sm:$0xff]  ;;  %v23103_v10 = vld [vmem:[#allocation34_spill] sm:$0xff] }
 0x5dc   :  { %10586 = vmatprep.subr.bf16.mxu0 %v18079_v56  ;;  %11406 = vmatprep.subr.bf16.mxu1 %v18082_v30  ;;  %v21610_v0 = vpack.c.bf16 %v9781_v21, %v9776_v17  ;;  %v9600_v15 = vmax.f32 %v23101_v33, %v9229_v62  ;;  %v9231_v40 = vpop.f32.mrb[238].mxu0  ;;  %v18083_v30 = vld [vmem:[#allocation7 + $0x240] ss:$8 sps:$4 sm:$0xff]   ;;  %v18100_v33 = vld [vmem:[#allocation7 + $0x4e4] ss:$8 sps:$4 sm:$0xff]  }
 0x5dd   :  { %v15526_v45 = vpop.f32.mrb[252].mxu1  ;;  %v21613_v29 = vpack.c.bf16 %v9782_v51, %v9777_v31  ;;  %v9706_v35 = vadd.f32 %v21545_v20, %v9599_v48  ;;  %v23102_v17 = vld [vmem:[#allocation33_spill] sm:$0xff]  ;;  %v9233_v22 = vpop.f32.mrb[239].mxu0  ;;  %v18091_v31 = vld [vmem:[#allocation7 + $0x254] ss:$8 sps:$4 sm:$0xff]  }
 0x5de   :  { %23098 = vst [vmem:[#allocation108_spill] sm:$0xff] %v21610_v0  ;;  %v15527_v53 = vpop.f32.mrb[253].mxu1  ;;  %v9604_v21 = vmax.f32 %v23102_v17, %v9231_v40  ;;  %v18094_v51 = vld [vmem:[#allocation7 + $0x4d4] ss:$8 sps:$4 sm:$0xff]   ;;  %v9707_v62 = vadd.f32 %v21548_v4, %v9600_v15  ;;  %v18092_v15 = vld [vmem:[#allocation7 + $0x4d0] ss:$8 sps:$4 sm:$0xff]  }
 0x5df   :  { %23100 = vst [vmem:[#allocation59_spill] sm:$0xff] %v21613_v29  ;;  %v21616_v50 = vadd.f32 %v15527_v53, %v15526_v45  ;;  %v15529_v56 = vpop.f32.mrb[254].mxu1  ;;  %10587 = vmatpush1.bf16.msra.mxu0 %v18077_v52  ;;  %11407 = vmatpush1.bf16.msra.mxu1 %v18080_v26  ;;  %v9605_v45 = vmax.f32 %v23103_v10, %v9233_v22  ;;  %v18089_v26 = vld [vmem:[#allocation7 + $0x250] ss:$8 sps:$4 sm:$0xff]  }
 0x5e0   :  { %v15530_v25 = vpop.f32.mrb[255].mxu1  ;;  %10588 = vmatprep.subr.bf16.mxu0 %v18085_v23  ;;  %11408 = vmatprep.subr.bf16.mxu1 %v18088_v16  ;;  %v9711_v48 = vadd.f32 %v21545_v20, %v9604_v21  ;;  %v9786_v23 = vmax.f32 %v9706_v35, 0.0  ;;  %v18097_v16 = vld [vmem:[#allocation7 + $0x264] ss:$8 sps:$4 sm:$0xff]   ;;  %v9787_v40 = vmax.f32 %v9707_v62, 0.0  ;;  %v23105_v10 = vld [vmem:[#allocation35_spill] sm:$0xff] }
 0x5e1   :  { %v21622_v53 = vadd.f32 %v15530_v25, %v15529_v56  ;;  %10519 = vmatprep.mubr.bf16.mxu0 %v21613_v29  ;;  %11339 = vmatprep.mubr.bf16.mxu1 %v21613_v29  ;;  %v9712_v52 = vadd.f32 %v21548_v4, %v9605_v45  ;;  %v18098_v62 = vld [vmem:[#allocation7 + $0x4e0] ss:$8 sps:$4 sm:$0xff]  }
 0x5e2   :  { %10520 = vmatmul.mubr.bf16.gmra.mrb[40].mxu0 %v21610_v0  ;;  %11340 = vmatmul.mubr.bf16.gmra.mrb[40].mxu1 %v21610_v0  ;;  %v9791_v22 = vmax.f32 %v9711_v48, 0.0  ;;  %v9237_v17 = vpop.f32.mrb[240].mxu0 }
 0x5e3   :  { %10589 = vmatpush1.bf16.msra.mxu0 %v18083_v30  ;;  %11409 = vmatpush1.bf16.msra.mxu1 %v18086_v34  ;;  %v9792_v56 = vmax.f32 %v9712_v52, 0.0  ;;  %v9609_v0 = vmax.f32 %v23105_v10, %v9237_v17  ;;  %v9239_v29 = vpop.f32.mrb[241].mxu0  ;;  %v23107_v34 = vld [vmem:[#allocation36_spill] sm:$0xff]  ;;  %v23109_v10 = vld [vmem:[#allocation38_spill] sm:$0xff] }
 0x5e4   :  { %10590 = vmatprep.subr.bf16.mxu0 %v18091_v31  ;;  %11410 = vmatprep.subr.bf16.mxu1 %v18094_v51  ;;  %v21630_v25 = vpack.c.bf16 %v9791_v22, %v9786_v23  ;;  %v9610_v58 = vmax.f32 %v23107_v34, %v9239_v29  ;;  %v9241_v35 = vpop.f32.mrb[242].mxu0  ;;  %v18095_v51 = vld [vmem:[#allocation7 + $0x260] ss:$8 sps:$4 sm:$0xff]   ;;  %v18112_v34 = vld [vmem:[#allocation7 + $0x784] ss:$8 sps:$4 sm:$0xff]  }
 0x5e5   :  { %v15532_v21 = vpop.f32.mrb[0].mxu1  ;;  %v21633_v30 = vpack.c.bf16 %v9792_v56, %v9787_v40  ;;  %v9716_v52 = vadd.f32 %v21545_v20, %v9609_v0  ;;  %v23108_v23 = vld [vmem:[#allocation37_spill] sm:$0xff]  ;;  %v9243_v36 = vpop.f32.mrb[243].mxu0  ;;  %v18103_v40 = vld [vmem:[#allocation7 + $0x274] ss:$8 sps:$4 sm:$0xff]  }
 0x5e6   :  { %23104 = vst [vmem:[#allocation143_spill] sm:$0xff] %v21630_v25  ;;  %v15533_v45 = vpop.f32.mrb[1].mxu1  ;;  %v9614_v22 = vmax.f32 %v23108_v23, %v9241_v35  ;;  %v18106_v56 = vld [vmem:[#allocation7 + $0x4f4] ss:$8 sps:$4 sm:$0xff]   ;;  %v9717_v29 = vadd.f32 %v21548_v4, %v9610_v58  ;;  %v18104_v58 = vld [vmem:[#allocation7 + $0x4f0] ss:$8 sps:$4 sm:$0xff]  }
 0x5e7   :  { %23106 = vst [vmem:[#allocation60_spill] sm:$0xff] %v21633_v30  ;;  %v21636_v48 = vadd.f32 %v15533_v45, %v15532_v21  ;;  %v15535_v31 = vpop.f32.mrb[2].mxu1  ;;  %10591 = vmatpush1.bf16.msra.mxu0 %v18089_v26  ;;  %11411 = vmatpush1.bf16.msra.mxu1 %v18092_v15  ;;  %v9615_v21 = vmax.f32 %v23109_v10, %v9243_v36  ;;  %v18101_v15 = vld [vmem:[#allocation7 + $0x270] ss:$8 sps:$4 sm:$0xff]  }
 0x5e8   :  { %v15536_v17 = vpop.f32.mrb[3].mxu1  ;;  %10592 = vmatprep.subr.bf16.mxu0 %v18097_v16  ;;  %11412 = vmatprep.subr.bf16.mxu1 %v18100_v33  ;;  %v9721_v0 = vadd.f32 %v21545_v20, %v9614_v22  ;;  %v9796_v16 = vmax.f32 %v9716_v52, 0.0  ;;  %v18109_v33 = vld [vmem:[#allocation7 + $0x504] ss:$8 sps:$4 sm:$0xff]   ;;  %v9797_v35 = vmax.f32 %v9717_v29, 0.0  ;;  %v23111_v10 = vld [vmem:[#allocation39_spill] sm:$0xff] }
 0x5e9   :  { %v21642_v45 = vadd.f32 %v15536_v17, %v15535_v31  ;;  %10529 = vmatprep.mubr.bf16.mxu0 %v21633_v30  ;;  %11349 = vmatprep.mubr.bf16.mxu1 %v21633_v30  ;;  %v9722_v26 = vadd.f32 %v21548_v4, %v9615_v21  ;;  %v23114_v29 = vld [vmem:[#allocation41_spill] sm:$0xff] }
 0x5ea   :  { %10530 = vmatmul.mubr.bf16.gmra.mrb[44].mxu0 %v21630_v25  ;;  %11350 = vmatmul.mubr.bf16.gmra.mrb[44].mxu1 %v21630_v25  ;;  %v9801_v36 = vmax.f32 %v9721_v0, 0.0  ;;  %v9247_v23 = vpop.f32.mrb[244].mxu0 }
 0x5eb   :  { %10593 = vmatpush1.bf16.msra.mxu0 %v18095_v51  ;;  %11413 = vmatpush1.bf16.msra.mxu1 %v18098_v62  ;;  %v9802_v31 = vmax.f32 %v9722_v26, 0.0  ;;  %v9619_v25 = vmax.f32 %v23111_v10, %v9247_v23  ;;  %v9249_v30 = vpop.f32.mrb[245].mxu0  ;;  %v23113_v62 = vld [vmem:[#allocation40_spill] sm:$0xff] }
 0x5ec   :  { %10594 = vmatprep.subr.bf16.mxu0 %v18103_v40  ;;  %11414 = vmatprep.subr.bf16.mxu1 %v18106_v56  ;;  %v21650_v17 = vpack.c.bf16 %v9801_v36, %v9796_v16  ;;  %v9620_v61 = vmax.f32 %v23113_v62, %v9249_v30  ;;  %v9251_v52 = vpop.f32.mrb[246].mxu0  ;;  %v23117_v62 = vld [vmem:[#allocation43_spill] sm:$0xff] }
 0x5ed   :  { %v15538_v22 = vpop.f32.mrb[4].mxu1  ;;  %v21653_v51 = vpack.c.bf16 %v9802_v31, %v9797_v35  ;;  %v9726_v56 = vadd.f32 %v21545_v20, %v9619_v25  ;;  %v9624_v26 = vmax.f32 %v23114_v29, %v9251_v52  ;;  %v9253_v16 = vpop.f32.mrb[247].mxu0  ;;  %v23115_v35 = vld [vmem:[#allocation42_spill] sm:$0xff] }
 0x5ee   :  { %23110 = vst [vmem:[#allocation109_spill] sm:$0xff] %v21650_v17  ;;  %v15539_v21 = vpop.f32.mrb[5].mxu1  ;;  %v9727_v23 = vadd.f32 %v21548_v4, %v9620_v61  ;;  %v9625_v31 = vmax.f32 %v23115_v35, %v9253_v16 }
 0x5ef   :  { %23112 = vst [vmem:[#allocation61_spill] sm:$0xff] %v21653_v51  ;;  %v21656_v0 = vadd.f32 %v15539_v21, %v15538_v22  ;;  %v15541_v40 = vpop.f32.mrb[6].mxu1  ;;  %10595 = vmatpush1.bf16.msra.mxu0 %v18101_v15  ;;  %11415 = vmatpush1.bf16.msra.mxu1 %v18104_v58  ;;  %v9731_v30 = vadd.f32 %v21545_v20, %v9624_v26  ;;  %v9806_v15 = vmax.f32 %v9726_v56, 0.0  ;;  %v23119_v26 = vld [vmem:[#allocation44_spill] sm:$0xff] }
 0x5f0   :  { %v15542_v36 = vpop.f32.mrb[7].mxu1  ;;  %12026 = vmatprep.subr.bf16.mxu0 %v18109_v33  ;;  %12878 = vmatprep.subr.bf16.mxu1 %v18112_v34  ;;  %v9732_v25 = vadd.f32 %v21548_v4, %v9625_v31  ;;  %v9807_v33 = vmax.f32 %v9727_v23, 0.0  ;;  %v23120_v23 = vld [vmem:[#allocation45_spill] sm:$0xff] }
 0x5f1   :  { %v21662_v10 = vadd.f32 %v15542_v36, %v15541_v40  ;;  %10539 = vmatprep.mubr.bf16.mxu0 %v21653_v51  ;;  %11359 = vmatprep.mubr.bf16.mxu1 %v21653_v51  ;;  %v9811_v58 = vmax.f32 %v9731_v30, 0.0 }
 0x5f2   :  { %10540 = vmatmul.mubr.bf16.gmra.mrb[48].mxu0 %v21650_v17  ;;  %11360 = vmatmul.mubr.bf16.gmra.mrb[48].mxu1 %v21650_v17  ;;  %v9812_v61 = vmax.f32 %v9732_v25, 0.0  ;;  %v9257_v34 = vpop.f32.mrb[248].mxu0 }
 0x5f3   :  { %v21670_v21 = vpack.c.bf16 %v9811_v58, %v9806_v15  ;;  %v9629_v52 = vmax.f32 %v23117_v62, %v9257_v34  ;;  %v9259_v40 = vpop.f32.mrb[249].mxu0  ;;  %v23121_v58 = vld [vmem:[#allocation46_spill] sm:$0xff] }
 0x5f4   :  { %v21673_v16 = vpack.c.bf16 %v9812_v61, %v9807_v33  ;;  %v9630_v36 = vmax.f32 %v23119_v26, %v9259_v40  ;;  %v9261_v35 = vpop.f32.mrb[250].mxu0 }
 0x5f5   :  { %v15544_v22 = vpop.f32.mrb[8].mxu1  ;;  %23116 = vst [vmem:[#allocation144_spill] sm:$0xff] %v21670_v21  ;;  %v9736_v56 = vadd.f32 %v21545_v20, %v9629_v52  ;;  %v9634_v30 = vmax.f32 %v23120_v23, %v9261_v35  ;;  %v9263_v25 = vpop.f32.mrb[251].mxu0  ;;  %v23123_v35 = vld [vmem:[#allocation47_spill] sm:$0xff] }
 0x5f6   :  { %v15545_v29 = vpop.f32.mrb[9].mxu1  ;;  %23118 = vst [vmem:[#allocation62_spill] sm:$0xff] %v21673_v16  ;;  %v9737_v15 = vadd.f32 %v21548_v4, %v9630_v36  ;;  %v9635_v34 = vmax.f32 %v23121_v58, %v9263_v25  ;;  %10549 = vmatprep.mubr.bf16.mxu0 %v21673_v16  ;;  %11369 = vmatprep.mubr.bf16.mxu1 %v21673_v16 }
 0x5f7   :  { %v21676_v17 = vadd.f32 %v15545_v29, %v15544_v22  ;;  %v15547_v31 = vpop.f32.mrb[10].mxu1  ;;  %v9741_v33 = vadd.f32 %v21545_v20, %v9634_v30  ;;  %v9816_v22 = vmax.f32 %v9736_v56, 0.0  ;;  %v23125_v30 = vld [vmem:[#allocation48_spill] sm:$0xff] }
 0x5f8   :  { %v15548_v51 = vpop.f32.mrb[11].mxu1  ;;  %v9742_v61 = vadd.f32 %v21548_v4, %v9635_v34  ;;  %v9817_v40 = vmax.f32 %v9737_v15, 0.0  ;;  %v23126_v15 = vld [vmem:[#allocation49_spill] sm:$0xff] }
 0x5f9   :  { %v21682_v62 = vadd.f32 %v15548_v51, %v15547_v31  ;;  %v9821_v52 = vmax.f32 %v9741_v33, 0.0 }
 0x5fa   :  { %10550 = vmatmul.mubr.bf16.gmra.mrb[52].mxu0 %v21670_v21  ;;  %11370 = vmatmul.mubr.bf16.gmra.mrb[52].mxu1 %v21670_v21  ;;  %v9822_v29 = vmax.f32 %v9742_v61, 0.0  ;;  %v9267_v26 = vpop.f32.mrb[252].mxu0 }
 0x5fb   :  { %v21690_v51 = vpack.c.bf16 %v9821_v52, %v9816_v22  ;;  %v9639_v31 = vmax.f32 %v23123_v35, %v9267_v26  ;;  %v9269_v23 = vpop.f32.mrb[253].mxu0  ;;  %v23127_v52 = vld [vmem:[#allocation50_spill] sm:$0xff] }
 0x5fc   :  { %v21693_v58 = vpack.c.bf16 %v9822_v29, %v9817_v40  ;;  %v9640_v16 = vmax.f32 %v23125_v30, %v9269_v23  ;;  %v9271_v59 = vpop.f32.mrb[254].mxu0 }
 0x5fd   :  { %v15550_v36 = vpop.f32.mrb[12].mxu1  ;;  %23122 = vst [vmem:[#allocation110_spill] sm:$0xff] %v21690_v51  ;;  %v9746_v56 = vadd.f32 %v21545_v20, %v9639_v31  ;;  %v9644_v33 = vmax.f32 %v23126_v15, %v9271_v59  ;;  %v9273_v61 = vpop.f32.mrb[255].mxu0 }
 0x5fe   :  { %v15551_v25 = vpop.f32.mrb[13].mxu1  ;;  %23124 = vst [vmem:[#allocation63_spill] sm:$0xff] %v21693_v58  ;;  %v9747_v22 = vadd.f32 %v21548_v4, %v9640_v16  ;;  %v9645_v26 = vmax.f32 %v23127_v52, %v9273_v61  ;;  %10559 = vmatprep.mubr.bf16.mxu0 %v21693_v58  ;;  %11379 = vmatprep.mubr.bf16.mxu1 %v21693_v58 }
 0x5ff   :  { %v21696_v21 = vadd.f32 %v15551_v25, %v15550_v36  ;;  %v15553_v34 = vpop.f32.mrb[14].mxu1  ;;  %v9751_v40 = vadd.f32 %v21545_v20, %v9644_v33  ;;  %v9826_v29 = vmax.f32 %v9746_v56, 0.0  ;;  %v9667_v33 = vsub.s32 4, %v21406_v39  ;;  %v18107_v39 = vld [vmem:[#allocation7 + $0x500] ss:$8 sps:$4 sm:$0xff]  }
 0x600   :  { %v15554_v60 = vpop.f32.mrb[15].mxu1  ;;  %v9752_v59 = vadd.f32 %v21548_v4, %v9645_v26  ;;  %v9827_v31 = vmax.f32 %v9747_v22, 0.0  ;;  %v18570_v26 = vld [vmem:[#allocation5] sm:$0x1f] }
 0x601   :  { %v21702_v35 = vadd.f32 %v15554_v60, %v15553_v34  ;;  %v9831_v36 = vmax.f32 %v9751_v40, 0.0  ;;  %v21720_v40 = vrot.slane %v18570_v26, %v9667_v33 }
 0x602   :  { %10560 = vmatmul.mubr.bf16.gmra.mrb[56].mxu0 %v21690_v51  ;;  %11380 = vmatmul.mubr.bf16.gmra.mrb[56].mxu1 %v21690_v51  ;;  %v9832_v16 = vmax.f32 %v9752_v59, 0.0  ;;  %v15572_v23 = vpop.f32.mrb[0].mxu0 }
 0x603   :  { %v21710_v60 = vpack.c.bf16 %v9831_v36, %v9826_v29  ;;  %v15573_v30 = vpop.f32.mrb[1].mxu0 }
 0x604   :  { %v21712_v15 = vpack.c.bf16 %v9832_v16, %v9827_v31  ;;  %v15574_v61 = vadd.f32 %v15573_v30, %v15572_v23  ;;  %v15575_v20 = vpop.f32.mrb[2].mxu0 }
 0x605   :  { %v15839_v25 = vpop.f32.mrb[16].mxu1  ;;  %23128 = vst [vmem:[#allocation145_spill] sm:$0xff] %v21710_v60  ;;  %v15576_v51 = vpop.f32.mrb[3].mxu0 }
 0x606   :  { %v9504_v34 = vpop.f32.mrb[17].mxu1  ;;  %23129 = vst [vmem:[#allocation64_spill] sm:$0xff] %v21712_v15  ;;  %v9408_v4 = vadd.f32 %v15574_v61, %v21556_v42  ;;  %v15577_v56 = vadd.f32 %v15576_v51, %v15575_v20  ;;  %10569 = vmatprep.mubr.bf16.mxu0 %v21712_v15  ;;  %11389 = vmatprep.mubr.bf16.mxu1 %v21712_v15  ;;  %v18118_v15 = vld [vmem:[#allocation7 + $0x794] ss:$8 sps:$4 sm:$0xff]  }
 0x607   :  { %v15840_v52 = vpop.f32.mrb[18].mxu1 }
 0x608   :  { %v9507_v58 = vpop.f32.mrb[19].mxu1  ;;  %v9505_v22 = vadd.f32 %v9504_v34, %v9408_v4  ;;  %v9411_v59 = vadd.f32 %v15577_v56, %v21562_v5 }
 0x60a   :  { %10570 = vmatmul.mubr.bf16.gmra.mrb[60].mxu0 %v21710_v60  ;;  %11390 = vmatmul.mubr.bf16.gmra.mrb[60].mxu1 %v21710_v60  ;;  %v9571_v42 = vmax.f32 %v21233_v41, %v9505_v22  ;;  %v9508_v51 = vadd.f32 %v9507_v58, %v9411_v59  ;;  %v15578_v29 = vpop.f32.mrb[4].mxu0 }
 0x60b   :  { %10612 = vmatprep.mubr.bf16.mxu0 %v22604_v24  ;;  %11432 = vmatprep.mubr.bf16.mxu1 %v22604_v24  ;;  %v15579_v31 = vpop.f32.mrb[5].mxu0 }
 0x60c   :  { %v9678_v23 = vadd.f32 %v21720_v40, %v9571_v42  ;;  %v9576_v30 = vmax.f32 %v21248_v49, %v9508_v51  ;;  %v15580_v34 = vadd.f32 %v15579_v31, %v15578_v29  ;;  %v15581_v61 = vpop.f32.mrb[6].mxu0  ;;  %v18110_v42 = vld [vmem:[#allocation7 + $0x780] ss:$8 sps:$4 sm:$0xff]   ;;  %v18115_v31 = vld [vmem:[#allocation7 + $0x514] ss:$8 sps:$4 sm:$0xff]  }
 0x60d   :  { %v21726_v36 = vpop.f32.mrb[20].mxu1  ;;  %v15582_v5 = vpop.f32.mrb[7].mxu0 }
 0x60e   :  { %v9520_v16 = vpop.f32.mrb[21].mxu1  ;;  %v9683_v4 = vadd.f32 %v21720_v40, %v9576_v30  ;;  %v9416_v41 = vadd.f32 %v15580_v34, %v21576_v14  ;;  %v15583_v58 = vadd.f32 %v15582_v5, %v15581_v61  ;;  %v9758_v56 = vmax.f32 %v9678_v23, 0.0  ;;  %v18113_v61 = vld [vmem:[#allocation7 + $0x510] ss:$8 sps:$4 sm:$0xff]  }
 0x60f   :  { %v21730_v20 = vpop.f32.mrb[22].mxu1  ;;  %v18116_v5 = vld [vmem:[#allocation7 + $0x790] ss:$8 sps:$4 sm:$0xff]  }
 0x610   :  { %v9523_v33 = vpop.f32.mrb[23].mxu1  ;;  %v9763_v22 = vmax.f32 %v9683_v4, 0.0  ;;  %v9513_v26 = vadd.f32 %v15839_v25, %v9416_v41  ;;  %v9419_v59 = vadd.f32 %v15583_v58, %v21582_v7 }
 0x612   :  { %v21735_v60 = vpack.c.bf16 %v9763_v22, %v9758_v56  ;;  %v9581_v49 = vmax.f32 %v21227_v19, %v9513_v26  ;;  %v9516_v51 = vadd.f32 %v15840_v52, %v9419_v59  ;;  %v15584_v29 = vpop.f32.mrb[8].mxu0  ;;  %v18121_v56 = vld [vmem:[#allocation7 + $0x524] ss:$8 sps:$4 sm:$0xff]  }
 0x613   :  { %v15585_v30 = vpop.f32.mrb[9].mxu0  ;;  %v18124_v22 = vld [vmem:[#allocation7 + $0x7a4] ss:$8 sps:$4 sm:$0xff]  }
 0x614   :  { %v9688_v23 = vadd.f32 %v21720_v40, %v9581_v49  ;;  %v9586_v25 = vmax.f32 %v21239_v54, %v9516_v51  ;;  %v15586_v7 = vadd.f32 %v15585_v30, %v15584_v29  ;;  %v15587_v34 = vpop.f32.mrb[10].mxu0  ;;  %10613 = vmatmul.mubr.bf16.vlgmr.msra.gmra.mrb[32].mxu0 %v21735_v60  ;;  %11433 = vmatmul.mubr.bf16.vlgmr.msra.gmra.mrb[32].mxu1 %v21735_v60  ;;  %v18119_v49 = vld [vmem:[#allocation7 + $0x520] ss:$8 sps:$4 sm:$0xff]   ;;  %v18127_v30 = vld [vmem:[#allocation7 + $0x534] ss:$8 sps:$4 sm:$0xff]  }
 0x615   :  { %v21738_v13 = vpop.f32.mrb[24].mxu1  ;;  %v15588_v52 = vpop.f32.mrb[11].mxu0  ;;  %12027 = vmatpush1.bf16.msra.mxu0 %v18107_v39  ;;  %12879 = vmatpush1.bf16.msra.mxu1 %v18110_v42  ;;  %v18122_v51 = vld [vmem:[#allocation7 + $0x7a0] ss:$8 sps:$4 sm:$0xff]  }
 0x616   :  { %v21740_v14 = vpop.f32.mrb[25].mxu1  ;;  %v9693_v41 = vadd.f32 %v21720_v40, %v9586_v25  ;;  %v9424_v58 = vadd.f32 %v15586_v7, %v21596_v63  ;;  %v15589_v54 = vadd.f32 %v15588_v52, %v15587_v34  ;;  %12028 = vmatprep.subr.bf16.mxu0 %v18115_v31  ;;  %12880 = vmatprep.subr.bf16.mxu1 %v18118_v15  ;;  %v9768_v26 = vmax.f32 %v9688_v23, 0.0  ;;  %v18130_v25 = vld [vmem:[#allocation7 + $0x7b4] ss:$8 sps:$4 sm:$0xff]  }
 0x617   :  { %v21746_v19 = vpop.f32.mrb[26].mxu1  ;;  %10622 = vmatprep.mubr.bf16.mxu0 %v22604_v24  ;;  %11442 = vmatprep.mubr.bf16.mxu1 %v22604_v24 }
 0x618   :  { %v21748_v4 = vpop.f32.mrb[27].mxu1  ;;  %v9773_v39 = vmax.f32 %v9693_v41, 0.0  ;;  %v9521_v59 = vadd.f32 %v9520_v16, %v9424_v58  ;;  %v9427_v42 = vadd.f32 %v15589_v54, %v21602_v27  ;;  %v18128_v41 = vld [vmem:[#allocation7 + $0x7b0] ss:$8 sps:$4 sm:$0xff]  }
 0x619   :  { %12029 = vmatpush1.bf16.msra.mxu0 %v18113_v61  ;;  %12881 = vmatpush1.bf16.msra.mxu1 %v18116_v5  ;;  %v18125_v5 = vld [vmem:[#allocation7 + $0x530] ss:$8 sps:$4 sm:$0xff]  }
 0x61a   :  { %v21755_v29 = vpack.c.bf16 %v9773_v39, %v9768_v26  ;;  %v9591_v63 = vmax.f32 %v21265_v6, %v9521_v59  ;;  %v9524_v15 = vadd.f32 %v9523_v33, %v9427_v42  ;;  %v15590_v31 = vpop.f32.mrb[12].mxu0  ;;  %12030 = vmatprep.subr.bf16.mxu0 %v18121_v56  ;;  %12882 = vmatprep.subr.bf16.mxu1 %v18124_v22  ;;  %v18133_v22 = vld [vmem:[#allocation7 + $0x544] ss:$8 sps:$4 sm:$0xff]  }
 0x61b   :  { %v15591_v23 = vpop.f32.mrb[13].mxu0  ;;  %v18136_v26 = vld [vmem:[#allocation7 + $0x7c4] ss:$8 sps:$4 sm:$0xff]  }
 0x61c   :  { %v9698_v27 = vadd.f32 %v21720_v40, %v9591_v63  ;;  %v9596_v34 = vmax.f32 %v21280_v38, %v9524_v15  ;;  %v15592_v52 = vadd.f32 %v15591_v23, %v15590_v31  ;;  %v15593_v61 = vpop.f32.mrb[14].mxu0  ;;  %10623 = vmatmul.mubr.bf16.gmra.mrb[36].mxu0 %v21755_v29  ;;  %11443 = vmatmul.mubr.bf16.gmra.mrb[36].mxu1 %v21755_v29  ;;  %v18134_v63 = vld [vmem:[#allocation7 + $0x7c0] ss:$8 sps:$4 sm:$0xff]   ;;  %v18142_v23 = vld [vmem:[#allocation7 + $0x7d4] ss:$8 sps:$4 sm:$0xff]  }
 0x61d   :  { %v21758_v7 = vpop.f32.mrb[28].mxu1  ;;  %v15594_v33 = vpop.f32.mrb[15].mxu0  ;;  %12031 = vmatpush1.bf16.msra.mxu0 %v18119_v49  ;;  %12883 = vmatpush1.bf16.msra.mxu1 %v18122_v51  ;;  %v18131_v51 = vld [vmem:[#allocation7 + $0x540] ss:$8 sps:$4 sm:$0xff]  }
 0x61e   :  { %v21760_v16 = vpop.f32.mrb[29].mxu1  ;;  %v9703_v54 = vadd.f32 %v21720_v40, %v9596_v34  ;;  %v9432_v56 = vadd.f32 %v15592_v52, %v21616_v50  ;;  %v15595_v38 = vadd.f32 %v15594_v33, %v15593_v61  ;;  %12032 = vmatprep.subr.bf16.mxu0 %v18127_v30  ;;  %12884 = vmatprep.subr.bf16.mxu1 %v18130_v25  ;;  %v9778_v39 = vmax.f32 %v9698_v27, 0.0  ;;  %v18139_v25 = vld [vmem:[#allocation7 + $0x554] ss:$8 sps:$4 sm:$0xff]  }
 0x61f   :  { %v21766_v6 = vpop.f32.mrb[30].mxu1  ;;  %10632 = vmatprep.mubr.bf16.mxu0 %v22604_v24  ;;  %11452 = vmatprep.mubr.bf16.mxu1 %v22604_v24 }
 0x620   :  { %v21768_v58 = vpop.f32.mrb[31].mxu1  ;;  %v9783_v59 = vmax.f32 %v9703_v54, 0.0  ;;  %v9529_v42 = vadd.f32 %v21726_v36, %v9432_v56  ;;  %v9435_v49 = vadd.f32 %v15595_v38, %v21622_v53  ;;  %v18145_v54 = vld [vmem:[#allocation7 + $0x564] ss:$8 sps:$4 sm:$0xff]  }
 0x621   :  { %12033 = vmatpush1.bf16.msra.mxu0 %v18125_v5  ;;  %12885 = vmatpush1.bf16.msra.mxu1 %v18128_v41 }
 0x622   :  { %v21776_v50 = vpack.c.bf16 %v9783_v59, %v9778_v39  ;;  %v9601_v15 = vmax.f32 %v21259_v47, %v9529_v42  ;;  %v9532_v31 = vadd.f32 %v21730_v20, %v9435_v49  ;;  %v15596_v30 = vpop.f32.mrb[16].mxu0  ;;  %12034 = vmatprep.subr.bf16.mxu0 %v18133_v22  ;;  %12886 = vmatprep.subr.bf16.mxu1 %v18136_v26  ;;  %v18137_v47 = vld [vmem:[#allocation7 + $0x550] ss:$8 sps:$4 sm:$0xff]   ;;  %v18143_v39 = vld [vmem:[#allocation7 + $0x560] ss:$8 sps:$4 sm:$0xff]  }
 0x623   :  { %v15597_v27 = vpop.f32.mrb[17].mxu0  ;;  %v18140_v20 = vld [vmem:[#allocation7 + $0x7d0] ss:$8 sps:$4 sm:$0xff]   ;;  %v18146_v59 = vld [vmem:[#allocation7 + $0x7e0] ss:$8 sps:$4 sm:$0xff]  }
 0x624   :  { %v9708_v36 = vadd.f32 %v21720_v40, %v9601_v15  ;;  %v9606_v53 = vmax.f32 %v21271_v32, %v9532_v31  ;;  %v15598_v34 = vadd.f32 %v15597_v27, %v15596_v30  ;;  %v15599_v52 = vpop.f32.mrb[18].mxu0  ;;  %10633 = vmatmul.mubr.bf16.gmra.mrb[40].mxu0 %v21776_v50  ;;  %11453 = vmatmul.mubr.bf16.gmra.mrb[40].mxu1 %v21776_v50  ;;  %v18148_v32 = vld [vmem:[#allocation7 + $0x7e4] ss:$8 sps:$4 sm:$0xff]   ;;  %v18154_v15 = vld [vmem:[#allocation7 + $0x7f4] ss:$8 sps:$4 sm:$0xff]  }
 0x625   :  { %v15600_v61 = vpop.f32.mrb[19].mxu0  ;;  %12035 = vmatpush1.bf16.msra.mxu0 %v18131_v51  ;;  %12887 = vmatpush1.bf16.msra.mxu1 %v18134_v63  ;;  %v18151_v63 = vld [vmem:[#allocation7 + $0x574] ss:$8 sps:$4 sm:$0xff]  }
 0x626   :  { %v9713_v33 = vadd.f32 %v21720_v40, %v9606_v53  ;;  %v9440_v5 = vadd.f32 %v15598_v34, %v21636_v48  ;;  %v15601_v41 = vadd.f32 %v15600_v61, %v15599_v52  ;;  %12036 = vmatprep.subr.bf16.mxu0 %v18139_v25  ;;  %12888 = vmatprep.subr.bf16.mxu1 %v18142_v23  ;;  %v9788_v56 = vmax.f32 %v9708_v36, 0.0  ;;  %v18157_v34 = vld [vmem:[#allocation7 + $0x584] ss:$8 sps:$4 sm:$0xff]  }
 0x627   :  { %10642 = vmatprep.mubr.bf16.mxu0 %v22604_v24  ;;  %11462 = vmatprep.mubr.bf16.mxu1 %v22604_v24 }
 0x628   :  { %v9793_v38 = vmax.f32 %v9713_v33, 0.0  ;;  %v9537_v22 = vadd.f32 %v21740_v14, %v9440_v5  ;;  %v9443_v26 = vadd.f32 %v15601_v41, %v21642_v45  ;;  %v18155_v33 = vld [vmem:[#allocation7 + $0x580] ss:$8 sps:$4 sm:$0xff]  }
 0x629   :  { %12037 = vmatpush1.bf16.msra.mxu0 %v18137_v47  ;;  %12889 = vmatpush1.bf16.msra.mxu1 %v18140_v20  ;;  %v18158_v5 = vld [vmem:[#allocation7 + $0x800] ss:$8 sps:$4 sm:$0xff]  }
 0x62a   :  { %v21790_v48 = vpack.c.bf16 %v9793_v38, %v9788_v56  ;;  %v9611_v42 = vmax.f32 %v21297_v55, %v9537_v22  ;;  %v9540_v49 = vadd.f32 %v21748_v4, %v9443_v26  ;;  %v15602_v51 = vpop.f32.mrb[20].mxu0  ;;  %12038 = vmatprep.subr.bf16.mxu0 %v18145_v54  ;;  %12890 = vmatprep.subr.bf16.mxu1 %v18148_v32  ;;  %v18149_v55 = vld [vmem:[#allocation7 + $0x570] ss:$8 sps:$4 sm:$0xff]   ;;  %v18163_v56 = vld [vmem:[#allocation7 + $0x594] ss:$8 sps:$4 sm:$0xff]  }
 0x62b   :  { %v15603_v31 = vpop.f32.mrb[21].mxu0  ;;  %v18152_v4 = vld [vmem:[#allocation7 + $0x7f0] ss:$8 sps:$4 sm:$0xff]   ;;  %v18166_v38 = vld [vmem:[#allocation7 + $0x814] ss:$8 sps:$4 sm:$0xff]  }
 0x62c   :  { %v9718_v14 = vadd.f32 %v21720_v40, %v9611_v42  ;;  %v9616_v45 = vmax.f32 %v21312_v18, %v9540_v49  ;;  %v15604_v30 = vadd.f32 %v15603_v31, %v15602_v51  ;;  %v15605_v25 = vpop.f32.mrb[22].mxu0  ;;  %10643 = vmatmul.mubr.bf16.gmra.mrb[44].mxu0 %v21790_v48  ;;  %11463 = vmatmul.mubr.bf16.gmra.mrb[44].mxu1 %v21790_v48  ;;  %v18160_v18 = vld [vmem:[#allocation7 + $0x804] ss:$8 sps:$4 sm:$0xff]  }
 0x62d   :  { %v15606_v23 = vpop.f32.mrb[23].mxu0  ;;  %12039 = vmatpush1.bf16.msra.mxu0 %v18143_v39  ;;  %12891 = vmatpush1.bf16.msra.mxu1 %v18146_v59 }
 0x62e   :  { %v9723_v27 = vadd.f32 %v21720_v40, %v9616_v45  ;;  %v9448_v36 = vadd.f32 %v15604_v30, %v21656_v0  ;;  %v15607_v53 = vadd.f32 %v15606_v23, %v15605_v25  ;;  %12040 = vmatprep.subr.bf16.mxu0 %v18151_v63  ;;  %12892 = vmatprep.subr.bf16.mxu1 %v18154_v15  ;;  %v9798_v52 = vmax.f32 %v9718_v14, 0.0  ;;  %v18169_v63 = vld [vmem:[#allocation7 + $0x5a4] ss:$8 sps:$4 sm:$0xff]   ;;  %v18167_v30 = vld [vmem:[#allocation7 + $0x5a0] ss:$8 sps:$4 sm:$0xff]  }
 0x62f   :  { %10652 = vmatprep.mubr.bf16.mxu0 %v22604_v24  ;;  %11472 = vmatprep.mubr.bf16.mxu1 %v22604_v24  ;;  %v18170_v25 = vld [vmem:[#allocation7 + $0x820] ss:$8 sps:$4 sm:$0xff]  }
 0x630   :  { %v9803_v61 = vmax.f32 %v9723_v27, 0.0  ;;  %v9545_v47 = vadd.f32 %v21738_v13, %v9448_v36  ;;  %v9451_v20 = vadd.f32 %v15607_v53, %v21662_v10  ;;  %v18175_v27 = vld [vmem:[#allocation7 + $0x5b4] ss:$8 sps:$4 sm:$0xff]  }
 0x631   :  { %12041 = vmatpush1.bf16.msra.mxu0 %v18149_v55  ;;  %12893 = vmatpush1.bf16.msra.mxu1 %v18152_v4  ;;  %v18178_v36 = vld [vmem:[#allocation7 + $0x834] ss:$8 sps:$4 sm:$0xff]  }
 0x632   :  { %v21804_v0 = vpack.c.bf16 %v9803_v61, %v9798_v52  ;;  %v9621_v41 = vmax.f32 %v21291_v2, %v9545_v47  ;;  %v9548_v54 = vadd.f32 %v21746_v19, %v9451_v20  ;;  %v15608_v32 = vpop.f32.mrb[24].mxu0  ;;  %12042 = vmatprep.subr.bf16.mxu0 %v18157_v34  ;;  %12894 = vmatprep.subr.bf16.mxu1 %v18160_v18  ;;  %v18161_v2 = vld [vmem:[#allocation7 + $0x590] ss:$8 sps:$4 sm:$0xff]  }
 0x633   :  { %v15609_v22 = vpop.f32.mrb[25].mxu0  ;;  %v18164_v19 = vld [vmem:[#allocation7 + $0x810] ss:$8 sps:$4 sm:$0xff]  }
 0x634   :  { %v9728_v13 = vadd.f32 %v21720_v40, %v9621_v41  ;;  %v9626_v10 = vmax.f32 %v21303_v28, %v9548_v54  ;;  %v15610_v26 = vadd.f32 %v15609_v22, %v15608_v32  ;;  %v15611_v39 = vpop.f32.mrb[26].mxu0  ;;  %10653 = vmatmul.mubr.bf16.gmra.mrb[48].mxu0 %v21804_v0  ;;  %11473 = vmatmul.mubr.bf16.gmra.mrb[48].mxu1 %v21804_v0  ;;  %v18172_v28 = vld [vmem:[#allocation7 + $0x824] ss:$8 sps:$4 sm:$0xff]  }
 0x635   :  { %v15612_v59 = vpop.f32.mrb[27].mxu0  ;;  %12043 = vmatpush1.bf16.msra.mxu0 %v18155_v33  ;;  %12895 = vmatpush1.bf16.msra.mxu1 %v18158_v5  ;;  %v18181_v33 = vld [vmem:[#allocation7 + $0x5c4] ss:$8 sps:$4 sm:$0xff]  }
 0x636   :  { %v9733_v42 = vadd.f32 %v21720_v40, %v9626_v10  ;;  %v9456_v49 = vadd.f32 %v15610_v26, %v21676_v17  ;;  %v15613_v51 = vadd.f32 %v15612_v59, %v15611_v39  ;;  %12044 = vmatprep.subr.bf16.mxu0 %v18163_v56  ;;  %12896 = vmatprep.subr.bf16.mxu1 %v18166_v38  ;;  %v9808_v15 = vmax.f32 %v9728_v13, 0.0  ;;  %v18179_v56 = vld [vmem:[#allocation7 + $0x5c0] ss:$8 sps:$4 sm:$0xff]   ;;  %v18187_v10 = vld [vmem:[#allocation7 + $0x5d4] ss:$8 sps:$4 sm:$0xff]  }
 0x637   :  { %10662 = vmatprep.mubr.bf16.mxu0 %v22604_v24  ;;  %11482 = vmatprep.mubr.bf16.mxu1 %v22604_v24  ;;  %v18182_v38 = vld [vmem:[#allocation7 + $0x840] ss:$8 sps:$4 sm:$0xff]   ;;  %v18190_v26 = vld [vmem:[#allocation7 + $0x854] ss:$8 sps:$4 sm:$0xff]   ;;  %v18188_v59 = vld [vmem:[#allocation7 + $0x850] ss:$8 sps:$4 sm:$0xff]  }
 0x638   :  { %v9813_v31 = vmax.f32 %v9733_v42, 0.0  ;;  %v9553_v14 = vadd.f32 %v21760_v16, %v9456_v49  ;;  %v9459_v45 = vadd.f32 %v15613_v51, %v21682_v62  ;;  %v18191_v42 = vld [vmem:[#allocation7 + $0x5e0] ss:$8 sps:$4 sm:$0xff]  }
 0x639   :  { %12045 = vmatpush1.bf16.msra.mxu0 %v18161_v2  ;;  %12897 = vmatpush1.bf16.msra.mxu1 %v18164_v19  ;;  %v18196_v2 = vld [vmem:[#allocation7 + $0x864] ss:$8 sps:$4 sm:$0xff]   ;;  %v18194_v51 = vld [vmem:[#allocation7 + $0x860] ss:$8 sps:$4 sm:$0xff]  }
 0x63a   :  { %v21818_v17 = vpack.c.bf16 %v9813_v31, %v9808_v15  ;;  %v9631_v23 = vmax.f32 %v21329_v43, %v9553_v14  ;;  %v9556_v55 = vadd.f32 %v21768_v58, %v9459_v45  ;;  %v15614_v4 = vpop.f32.mrb[28].mxu0  ;;  %12046 = vmatprep.subr.bf16.mxu0 %v18169_v63  ;;  %12898 = vmatprep.subr.bf16.mxu1 %v18172_v28  ;;  %v18173_v43 = vld [vmem:[#allocation7 + $0x5b0] ss:$8 sps:$4 sm:$0xff]   ;;  %v18199_v63 = vld [vmem:[#allocation7 + $0x5f4] ss:$8 sps:$4 sm:$0xff]  }
 0x63b   :  { %v15615_v53 = vpop.f32.mrb[29].mxu0  ;;  %v18176_v58 = vld [vmem:[#allocation7 + $0x830] ss:$8 sps:$4 sm:$0xff]   ;;  %v18205_v31 = vld [vmem:[#allocation7 + $0x604] ss:$8 sps:$4 sm:$0xff]  }
 0x63c   :  { %v9738_v16 = vadd.f32 %v21720_v40, %v9631_v23  ;;  %v9636_v62 = vmax.f32 %v21344_v3, %v9556_v55  ;;  %v15616_v34 = vadd.f32 %v15615_v53, %v15614_v4  ;;  %v15617_v18 = vpop.f32.mrb[30].mxu0  ;;  %10663 = vmatmul.mubr.bf16.gmra.mrb[52].mxu0 %v21818_v17  ;;  %11483 = vmatmul.mubr.bf16.gmra.mrb[52].mxu1 %v21818_v17  ;;  %v18184_v3 = vld [vmem:[#allocation7 + $0x844] ss:$8 sps:$4 sm:$0xff]   ;;  %v18197_v28 = vld [vmem:[#allocation7 + $0x5f0] ss:$8 sps:$4 sm:$0xff]  }
 0x63d   :  { %v15618_v52 = vpop.f32.mrb[31].mxu0  ;;  %12047 = vmatpush1.bf16.msra.mxu0 %v18167_v30  ;;  %12899 = vmatpush1.bf16.msra.mxu1 %v18170_v25  ;;  %v18200_v15 = vld [vmem:[#allocation7 + $0x870] ss:$8 sps:$4 sm:$0xff]   ;;  %v18208_v14 = vld [vmem:[#allocation7 + $0x884] ss:$8 sps:$4 sm:$0xff]  }
 0x63e   :  { %v9743_v61 = vadd.f32 %v21720_v40, %v9636_v62  ;;  %v9464_v47 = vadd.f32 %v15616_v34, %v21696_v21  ;;  %v15619_v20 = vadd.f32 %v15618_v52, %v15617_v18  ;;  %12048 = vmatprep.subr.bf16.mxu0 %v18175_v27  ;;  %12900 = vmatprep.subr.bf16.mxu1 %v18178_v36  ;;  %v9818_v5 = vmax.f32 %v9738_v16, 0.0  ;;  %v18203_v45 = vld [vmem:[#allocation7 + $0x600] ss:$8 sps:$4 sm:$0xff]   ;;  %v18211_v25 = vld [vmem:[#allocation7 + $0x614] ss:$8 sps:$4 sm:$0xff]  }
 0x63f   :  { %10672 = vmatprep.mubr.bf16.mxu0 %v22604_v24  ;;  %11492 = vmatprep.mubr.bf16.mxu1 %v22604_v24  ;;  %v18206_v30 = vld [vmem:[#allocation7 + $0x880] ss:$8 sps:$4 sm:$0xff]   ;;  %v18214_v23 = vld [vmem:[#allocation7 + $0x894] ss:$8 sps:$4 sm:$0xff]   ;;  %v18212_v55 = vld [vmem:[#allocation7 + $0x890] ss:$8 sps:$4 sm:$0xff]  }
 0x640   :  { %v9823_v41 = vmax.f32 %v9743_v61, 0.0  ;;  %v9561_v54 = vadd.f32 %v21758_v7, %v9464_v47  ;;  %v9467_v32 = vadd.f32 %v15619_v20, %v21702_v35  ;;  %v18185_v35 = vld [vmem:[#allocation7 + $0x5d0] ss:$8 sps:$4 sm:$0xff]   ;;  %v18217_v4 = vld [vmem:[#allocation7 + $0x624] ss:$8 sps:$4 sm:$0xff]  }
 0x641   :  { %12049 = vmatpush1.bf16.msra.mxu0 %v18173_v43  ;;  %12901 = vmatpush1.bf16.msra.mxu1 %v18176_v58  ;;  %v18220_v27 = vld [vmem:[#allocation7 + $0x8a4] ss:$8 sps:$4 sm:$0xff]   ;;  %v18215_v36 = vld [vmem:[#allocation7 + $0x620] ss:$8 sps:$4 sm:$0xff]   ;;  %v18223_v16 = vld [vmem:[#allocation7 + $0x634] ss:$8 sps:$4 sm:$0xff]  }
 0x642   :  { %v21832_v21 = vpack.c.bf16 %v9823_v41, %v9818_v5  ;;  %v9641_v22 = vmax.f32 %v21323_v9, %v9561_v54  ;;  %v9564_v13 = vadd.f32 %v21766_v6, %v9467_v32  ;;  %12050 = vmatprep.subr.bf16.mxu0 %v18181_v33  ;;  %12902 = vmatprep.subr.bf16.mxu1 %v18184_v3  ;;  %v18193_v6 = vld [vmem:[#allocation7 + $0x5e4] ss:$8 sps:$4 sm:$0xff]   ;;  %v18218_v53 = vld [vmem:[#allocation7 + $0x8a0] ss:$8 sps:$4 sm:$0xff]   ;;  %v18224_v62 = vld [vmem:[#allocation7 + $0x8b0] ss:$8 sps:$4 sm:$0xff]  }
 0x643   :  { %v18229_v34 = vld [vmem:[#allocation7 + $0x644] ss:$8 sps:$4 sm:$0xff]   ;;  %v18227_v52 = vld [vmem:[#allocation7 + $0x640] ss:$8 sps:$4 sm:$0xff]   ;;  %v18235_v58 = vld [vmem:[#allocation7 + $0x654] ss:$8 sps:$4 sm:$0xff]  }
 0x644   :  { %v9748_v39 = vadd.f32 %v21720_v40, %v9641_v22  ;;  %v9646_v7 = vmax.f32 %v21335_v37, %v9564_v13  ;;  %10673 = vmatmul.mubr.bf16.gmra.mrb[56].mxu0 %v21832_v21  ;;  %11493 = vmatmul.mubr.bf16.gmra.mrb[56].mxu1 %v21832_v21  ;;  %v18232_v18 = vld [vmem:[#allocation7 + $0x8c4] ss:$8 sps:$4 sm:$0xff]   ;;  %v18230_v43 = vld [vmem:[#allocation7 + $0x8c0] ss:$8 sps:$4 sm:$0xff]   ;;  %v18236_v61 = vld [vmem:[#allocation7 + $0x8d0] ss:$8 sps:$4 sm:$0xff]  }
 0x645   :  { %12051 = vmatpush1.bf16.msra.mxu0 %v18179_v56  ;;  %12903 = vmatpush1.bf16.msra.mxu1 %v18182_v38  ;;  %v18241_v47 = vld [vmem:[#allocation7 + $0x664] ss:$8 sps:$4 sm:$0xff]   ;;  %v18239_v33 = vld [vmem:[#allocation7 + $0x660] ss:$8 sps:$4 sm:$0xff]   ;;  %v18247_v5 = vld [vmem:[#allocation7 + $0x674] ss:$8 sps:$4 sm:$0xff]  }
 0x646   :  { %v9753_v9 = vadd.f32 %v21720_v40, %v9646_v7  ;;  %12052 = vmatprep.subr.bf16.mxu0 %v18187_v10  ;;  %12904 = vmatprep.subr.bf16.mxu1 %v18190_v26  ;;  %v9828_v19 = vmax.f32 %v9748_v39, 0.0  ;;  %v18202_v40 = vld [vmem:[#allocation7 + $0x874] ss:$8 sps:$4 sm:$0xff]   ;;  %v18244_v20 = vld [vmem:[#allocation7 + $0x8e4] ss:$8 sps:$4 sm:$0xff]  }
 0x647   :  { %10682 = vmatprep.mubr.bf16.mxu0 %v22604_v24  ;;  %11502 = vmatprep.mubr.bf16.mxu1 %v22604_v24  ;;  %v18242_v3 = vld [vmem:[#allocation7 + $0x8e0] ss:$8 sps:$4 sm:$0xff]   ;;  %v18245_v54 = vld [vmem:[#allocation7 + $0x670] ss:$8 sps:$4 sm:$0xff]   ;;  %v18253_v56 = vld [vmem:[#allocation7 + $0x684] ss:$8 sps:$4 sm:$0xff]  }
 0x648   :  { %v9833_v37 = vmax.f32 %v9753_v9, 0.0  ;;  %v23130_v41 = vld [vmem:[#allocation52_spill] sm:$0xff]  ;;  %v18256_v38 = vld [vmem:[#allocation7 + $0x904] ss:$8 sps:$4 sm:$0xff]  }
 0x649   :  { %12053 = vmatpush1.bf16.msra.mxu0 %v18185_v35  ;;  %12905 = vmatpush1.bf16.msra.mxu1 %v18188_v59  ;;  %v18248_v32 = vld [vmem:[#allocation7 + $0x8f0] ss:$8 sps:$4 sm:$0xff]   ;;  %v18251_v22 = vld [vmem:[#allocation7 + $0x680] ss:$8 sps:$4 sm:$0xff]   ;;  %v18259_v10 = vld [vmem:[#allocation7 + $0x694] ss:$8 sps:$4 sm:$0xff]  }
 0x64a   :  { %v21843_v49 = vpack.c.bf16 %v9833_v37, %v9828_v19  ;;  %12054 = vmatprep.subr.bf16.mxu0 %v18193_v6  ;;  %12906 = vmatprep.subr.bf16.mxu1 %v18196_v2  ;;  %v18254_v13 = vld [vmem:[#allocation7 + $0x900] ss:$8 sps:$4 sm:$0xff]   ;;  %v18262_v39 = vld [vmem:[#allocation7 + $0x914] ss:$8 sps:$4 sm:$0xff]   ;;  %v18257_v35 = vld [vmem:[#allocation7 + $0x690] ss:$8 sps:$4 sm:$0xff]  }
 0x64b   :  { %v23132_v26 = vld [vmem:[#allocation105_spill] sm:$0xff]  ;;  %v23133_v7 = vld [vmem:[#allocation54_spill] sm:$0xff]  ;;  %v18271_v37 = vld [vmem:[#allocation7 + $0x6b4] ss:$8 sps:$4 sm:$0xff]  }
 0x64c   :  { %10683 = vmatmul.mubr.bf16.gmra.mrb[60].mxu0 %v21843_v49  ;;  %11503 = vmatmul.mubr.bf16.gmra.mrb[60].mxu1 %v21843_v49  ;;  %v18260_v59 = vld [vmem:[#allocation7 + $0x910] ss:$8 sps:$4 sm:$0xff]   ;;  %v18265_v9 = vld [vmem:[#allocation7 + $0x6a4] ss:$8 sps:$4 sm:$0xff]   ;;  %v18263_v2 = vld [vmem:[#allocation7 + $0x6a0] ss:$8 sps:$4 sm:$0xff]  }
 0x64d   :  { %12055 = vmatpush1.bf16.msra.mxu0 %v18191_v42  ;;  %12058 = vmatprep.mubr.bf16.mxu0 %v21433_v11  ;;  %v18268_v6 = vld [vmem:[#allocation7 + $0x924] ss:$8 sps:$4 sm:$0xff]   ;;  %v18266_v19 = vld [vmem:[#allocation7 + $0x920] ss:$8 sps:$4 sm:$0xff]   ;;  %v23134_v42 = vld [vmem:[#allocation139_spill] sm:$0xff] }
 0x64e   :  { %12907 = vmatpush1.bf16.msra.mxu1 %v18194_v51  ;;  %12910 = vmatprep.mubr.bf16.mxu1 %v21433_v11  ;;  %v18209_v11 = vld [vmem:[#allocation7 + $0x610] ss:$8 sps:$4 sm:$0xff]   ;;  %v18274_v51 = vld [vmem:[#allocation7 + $0x934] ss:$8 sps:$4 sm:$0xff]  }
 0x64f   :  { %12056 = vmatprep.subr.bf16.mxu0 %v18199_v63  ;;  %12908 = vmatprep.subr.bf16.mxu1 %v18202_v40  ;;  %v23135_v63 = vld [vmem:[#allocation55_spill] sm:$0xff] }
 0x650   :  { %v18269_v40 = vld [vmem:[#allocation7 + $0x6b0] ss:$8 sps:$4 sm:$0xff]  }
 0x651   :  { %12057 = vmatpush1.bf16.msra.mxu0 %v18197_v28  ;;  %v18272_v28 = vld [vmem:[#allocation7 + $0x930] ss:$8 sps:$4 sm:$0xff]  }
 0x652   :  { %12909 = vmatpush1.bf16.msra.mxu1 %v18200_v15  ;;  %12139 = vmatprep.subr.bf16.mxu0 %v18205_v31  ;;  %v18277_v15 = vld [vmem:[#allocation7 + $0x6c4] ss:$8 sps:$4 sm:$0xff]  }
 0x653   :  { %12991 = vmatprep.subr.bf16.mxu1 %v18208_v14  ;;  %v18280_v31 = vld [vmem:[#allocation7 + $0x944] ss:$8 sps:$4 sm:$0xff]   ;;  %v18275_v14 = vld [vmem:[#allocation7 + $0x6c0] ss:$8 sps:$4 sm:$0xff]  }
 0x654   :  { %12059 = vmatmul.mubr.bf16.vlgmr.msra.gmra.mrb[64].mxu0 %v21430_v57 }
 0x655   :  { %12911 = vmatmul.mubr.bf16.vlgmr.msra.gmra.mrb[64].mxu1 %v21430_v57  ;;  %12068 = vmatprep.mubr.bf16.mxu0 %v21449_v46  ;;  %v18226_v57 = vld [vmem:[#allocation7 + $0x8b4] ss:$8 sps:$4 sm:$0xff]  }
 0x656   :  { %12140 = vmatpush1.bf16.msra.mxu0 %v18203_v45  ;;  %12920 = vmatprep.mubr.bf16.mxu1 %v21449_v46  ;;  %v18221_v46 = vld [vmem:[#allocation7 + $0x630] ss:$8 sps:$4 sm:$0xff]   ;;  %v18278_v45 = vld [vmem:[#allocation7 + $0x940] ss:$8 sps:$4 sm:$0xff]  }
 0x657   :  { %12992 = vmatpush1.bf16.msra.mxu1 %v18206_v30  ;;  %12141 = vmatprep.subr.bf16.mxu0 %v18211_v25  ;;  %v18283_v30 = vld [vmem:[#allocation7 + $0x6d4] ss:$8 sps:$4 sm:$0xff]   ;;  %v23136_v25 = vld [vmem:[#allocation106_spill] sm:$0xff] }
 0x658   :  { %12993 = vmatprep.subr.bf16.mxu1 %v18214_v23  ;;  %v18286_v23 = vld [vmem:[#allocation7 + $0x954] ss:$8 sps:$4 sm:$0xff]  }
 0x65a   :  { %12142 = vmatpush1.bf16.msra.mxu0 %v18209_v11  ;;  %v23137_v11 = vld [vmem:[#allocation56_spill] sm:$0xff] }
 0x65b   :  { %12994 = vmatpush1.bf16.msra.mxu1 %v18212_v55  ;;  %12143 = vmatprep.subr.bf16.mxu0 %v18217_v4  ;;  %v18281_v55 = vld [vmem:[#allocation7 + $0x6d0] ss:$8 sps:$4 sm:$0xff]  }
 0x65c   :  { %12069 = vmatmul.mubr.bf16.gmra.mrb[68].mxu0 %v21446_v8  ;;  %12995 = vmatprep.subr.bf16.mxu1 %v18220_v27  ;;  %v18284_v4 = vld [vmem:[#allocation7 + $0x950] ss:$8 sps:$4 sm:$0xff]   ;;  %v18289_v27 = vld [vmem:[#allocation7 + $0x6e4] ss:$8 sps:$4 sm:$0xff]  }
 0x65d   :  { %12921 = vmatmul.mubr.bf16.gmra.mrb[68].mxu1 %v21446_v8  ;;  %12078 = vmatprep.mubr.bf16.mxu0 %v21465_v44  ;;  %v18238_v8 = vld [vmem:[#allocation7 + $0x8d4] ss:$8 sps:$4 sm:$0xff]  }
 0x65e   :  { %12144 = vmatpush1.bf16.msra.mxu0 %v18215_v36  ;;  %12930 = vmatprep.mubr.bf16.mxu1 %v21465_v44  ;;  %v18233_v44 = vld [vmem:[#allocation7 + $0x650] ss:$8 sps:$4 sm:$0xff]   ;;  %v18292_v36 = vld [vmem:[#allocation7 + $0x964] ss:$8 sps:$4 sm:$0xff]  }
 0x65f   :  { %12996 = vmatpush1.bf16.msra.mxu1 %v18218_v53  ;;  %12145 = vmatprep.subr.bf16.mxu0 %v18223_v16  ;;  %v18287_v53 = vld [vmem:[#allocation7 + $0x6e0] ss:$8 sps:$4 sm:$0xff]  }
 0x660   :  { %12997 = vmatprep.subr.bf16.mxu1 %v18226_v57  ;;  %v18290_v16 = vld [vmem:[#allocation7 + $0x960] ss:$8 sps:$4 sm:$0xff]   ;;  %v18295_v57 = vld [vmem:[#allocation7 + $0x6f4] ss:$8 sps:$4 sm:$0xff]  }
 0x662   :  { %12146 = vmatpush1.bf16.msra.mxu0 %v18221_v46  ;;  %v23138_v46 = vld [vmem:[#allocation141_spill] sm:$0xff] }
 0x663   :  { %12998 = vmatpush1.bf16.msra.mxu1 %v18224_v62  ;;  %12147 = vmatprep.subr.bf16.mxu0 %v18229_v34  ;;  %v18298_v62 = vld [vmem:[#allocation7 + $0x974] ss:$8 sps:$4 sm:$0xff]   ;;  %v23139_v34 = vld [vmem:[#allocation57_spill] sm:$0xff] }
 0x664   :  { %12079 = vmatmul.mubr.bf16.gmra.mrb[72].mxu0 %v21462_v1  ;;  %12999 = vmatprep.subr.bf16.mxu1 %v18232_v18  ;;  %v18293_v18 = vld [vmem:[#allocation7 + $0x6f0] ss:$8 sps:$4 sm:$0xff]  }
 0x665   :  { %12931 = vmatmul.mubr.bf16.gmra.mrb[72].mxu1 %v21462_v1  ;;  %12088 = vmatprep.mubr.bf16.mxu0 %v21481_v12  ;;  %v18250_v1 = vld [vmem:[#allocation7 + $0x8f4] ss:$8 sps:$4 sm:$0xff]  }
 0x666   :  { %12148 = vmatpush1.bf16.msra.mxu0 %v18227_v52  ;;  %12940 = vmatprep.mubr.bf16.mxu1 %v21481_v12  ;;  %v23131_v12 = vld [vmem:[#allocation53_spill] sm:$0xff]  ;;  %v18296_v52 = vld [vmem:[#allocation7 + $0x970] ss:$8 sps:$4 sm:$0xff]  }
 0x667   :  { %13000 = vmatpush1.bf16.msra.mxu1 %v18230_v43  ;;  %12149 = vmatprep.subr.bf16.mxu0 %v18235_v58  ;;  %v18301_v43 = vld [vmem:[#allocation7 + $0x704] ss:$8 sps:$4 sm:$0xff]  }
 0x668   :  { %13001 = vmatprep.subr.bf16.mxu1 %v18238_v8  ;;  %v18304_v58 = vld [vmem:[#allocation7 + $0x984] ss:$8 sps:$4 sm:$0xff]   ;;  %v18299_v8 = vld [vmem:[#allocation7 + $0x700] ss:$8 sps:$4 sm:$0xff]  }
 0x66a   :  { %12150 = vmatpush1.bf16.msra.mxu0 %v18233_v44  ;;  %v18302_v44 = vld [vmem:[#allocation7 + $0x980] ss:$8 sps:$4 sm:$0xff]  }
 0x66b   :  { %13002 = vmatpush1.bf16.msra.mxu1 %v18236_v61  ;;  %12151 = vmatprep.subr.bf16.mxu0 %v18241_v47  ;;  %v18307_v61 = vld [vmem:[#allocation7 + $0x714] ss:$8 sps:$4 sm:$0xff]  }
 0x66c   :  { %12089 = vmatmul.mubr.bf16.gmra.mrb[76].mxu0 %v23130_v41  ;;  %13003 = vmatprep.subr.bf16.mxu1 %v18244_v20  ;;  %v23140_v47 = vld [vmem:[#allocation107_spill] sm:$0xff] }
 0x66d   :  { %12941 = vmatmul.mubr.bf16.gmra.mrb[76].mxu1 %v23130_v41  ;;  %12098 = vmatprep.mubr.bf16.mxu0 %v23131_v12  ;;  %v18310_v20 = vld [vmem:[#allocation7 + $0x994] ss:$8 sps:$4 sm:$0xff]   ;;  %v18313_v41 = vld [vmem:[#allocation7 + $0x724] ss:$8 sps:$4 sm:$0xff]  }
 0x66e   :  { %12152 = vmatpush1.bf16.msra.mxu0 %v18239_v33  ;;  %12950 = vmatprep.mubr.bf16.mxu1 %v23131_v12  ;;  %v23141_v33 = vld [vmem:[#allocation58_spill] sm:$0xff] }
 0x66f   :  { %13004 = vmatpush1.bf16.msra.mxu1 %v18242_v3  ;;  %12153 = vmatprep.subr.bf16.mxu0 %v18247_v5  ;;  %v18305_v3 = vld [vmem:[#allocation7 + $0x710] ss:$8 sps:$4 sm:$0xff]   ;;  %v18311_v12 = vld [vmem:[#allocation7 + $0x720] ss:$8 sps:$4 sm:$0xff]  }
 0x670   :  { %13005 = vmatprep.subr.bf16.mxu1 %v18250_v1  ;;  %v18308_v5 = vld [vmem:[#allocation7 + $0x990] ss:$8 sps:$4 sm:$0xff]   ;;  %v18316_v1 = vld [vmem:[#allocation7 + $0x9a4] ss:$8 sps:$4 sm:$0xff]  }
 0x672   :  { %12154 = vmatpush1.bf16.msra.mxu0 %v18245_v54  ;;  %v18314_v54 = vld [vmem:[#allocation7 + $0x9a0] ss:$8 sps:$4 sm:$0xff]  }
 0x673   :  { %13006 = vmatpush1.bf16.msra.mxu1 %v18248_v32  ;;  %12155 = vmatprep.subr.bf16.mxu0 %v18253_v56  ;;  %v18319_v32 = vld [vmem:[#allocation7 + $0x734] ss:$8 sps:$4 sm:$0xff]   ;;  %v23142_v56 = vld [vmem:[#allocation142_spill] sm:$0xff] }
 0x674   :  { %12099 = vmatmul.mubr.bf16.gmra.mrb[80].mxu0 %v23132_v26  ;;  %13007 = vmatprep.subr.bf16.mxu1 %v18256_v38  ;;  %v18322_v38 = vld [vmem:[#allocation7 + $0x9b4] ss:$8 sps:$4 sm:$0xff]  }
 0x675   :  { %12951 = vmatmul.mubr.bf16.gmra.mrb[80].mxu1 %v23132_v26  ;;  %12108 = vmatprep.mubr.bf16.mxu0 %v23133_v7  ;;  %v18325_v26 = vld [vmem:[#allocation7 + $0x744] ss:$8 sps:$4 sm:$0xff]  }
 0x676   :  { %12156 = vmatpush1.bf16.msra.mxu0 %v18251_v22  ;;  %12960 = vmatprep.mubr.bf16.mxu1 %v23133_v7  ;;  %v23143_v22 = vld [vmem:[#allocation59_spill] sm:$0xff]  ;;  %v18323_v7 = vld [vmem:[#allocation7 + $0x740] ss:$8 sps:$4 sm:$0xff]  }
 0x677   :  { %13008 = vmatpush1.bf16.msra.mxu1 %v18254_v13  ;;  %12157 = vmatprep.subr.bf16.mxu0 %v18259_v10  ;;  %v18317_v13 = vld [vmem:[#allocation7 + $0x730] ss:$8 sps:$4 sm:$0xff]  }
 0x678   :  { %13009 = vmatprep.subr.bf16.mxu1 %v18262_v39  ;;  %v18320_v10 = vld [vmem:[#allocation7 + $0x9b0] ss:$8 sps:$4 sm:$0xff]   ;;  %v18328_v39 = vld [vmem:[#allocation7 + $0x9c4] ss:$8 sps:$4 sm:$0xff]  }
 0x67a   :  { %12158 = vmatpush1.bf16.msra.mxu0 %v18257_v35  ;;  %v18326_v35 = vld [vmem:[#allocation7 + $0x9c0] ss:$8 sps:$4 sm:$0xff]  }
 0x67b   :  { %13010 = vmatpush1.bf16.msra.mxu1 %v18260_v59  ;;  %12159 = vmatprep.subr.bf16.mxu0 %v18265_v9  ;;  %v18331_v59 = vld [vmem:[#allocation7 + $0x754] ss:$8 sps:$4 sm:$0xff]  }
 0x67c   :  { %12109 = vmatmul.mubr.bf16.gmra.mrb[84].mxu0 %v23134_v42  ;;  %13011 = vmatprep.subr.bf16.mxu1 %v18268_v6  ;;  %v23144_v9 = vld [vmem:[#allocation108_spill] sm:$0xff] }
 0x67d   :  { %12961 = vmatmul.mubr.bf16.gmra.mrb[84].mxu1 %v23134_v42  ;;  %12118 = vmatprep.mubr.bf16.mxu0 %v23135_v63  ;;  %v18334_v6 = vld [vmem:[#allocation7 + $0x9d4] ss:$8 sps:$4 sm:$0xff]   ;;  %v18337_v42 = vld [vmem:[#allocation7 + $0x764] ss:$8 sps:$4 sm:$0xff]  }
 0x67e   :  { %12160 = vmatpush1.bf16.msra.mxu0 %v18263_v2  ;;  %12970 = vmatprep.mubr.bf16.mxu1 %v23135_v63  ;;  %v23145_v2 = vld [vmem:[#allocation60_spill] sm:$0xff] }
 0x67f   :  { %13012 = vmatpush1.bf16.msra.mxu1 %v18266_v19  ;;  %12161 = vmatprep.subr.bf16.mxu0 %v18271_v37  ;;  %v18329_v19 = vld [vmem:[#allocation7 + $0x750] ss:$8 sps:$4 sm:$0xff]   ;;  %v18335_v63 = vld [vmem:[#allocation7 + $0x760] ss:$8 sps:$4 sm:$0xff]  }
 0x680   :  { %13013 = vmatprep.subr.bf16.mxu1 %v18274_v51  ;;  %v18332_v37 = vld [vmem:[#allocation7 + $0x9d0] ss:$8 sps:$4 sm:$0xff]   ;;  %v18340_v51 = vld [vmem:[#allocation7 + $0x9e4] ss:$8 sps:$4 sm:$0xff]  }
 0x682   :  { %12162 = vmatpush1.bf16.msra.mxu0 %v18269_v40  ;;  %v18338_v40 = vld [vmem:[#allocation7 + $0x9e0] ss:$8 sps:$4 sm:$0xff]  }
 0x683   :  { %13014 = vmatpush1.bf16.msra.mxu1 %v18272_v28  ;;  %12163 = vmatprep.subr.bf16.mxu0 %v18277_v15  ;;  %v18343_v28 = vld [vmem:[#allocation7 + $0x774] ss:$8 sps:$4 sm:$0xff]  }
 0x684   :  { %12119 = vmatmul.mubr.bf16.gmra.mrb[88].mxu0 %v23136_v25  ;;  %13015 = vmatprep.subr.bf16.mxu1 %v18280_v31  ;;  %v23146_v15 = vld [vmem:[#allocation143_spill] sm:$0xff] }
 0x685   :  { %12971 = vmatmul.mubr.bf16.gmra.mrb[88].mxu1 %v23136_v25  ;;  %12128 = vmatprep.mubr.bf16.mxu0 %v23137_v11  ;;  %v18346_v31 = vld [vmem:[#allocation7 + $0x9f4] ss:$8 sps:$4 sm:$0xff]   ;;  %v18347_v25 = vld [vmem:[#allocation10 + $0x40] sm:$0xff]  }
 0x686   :  { %12164 = vmatpush1.bf16.msra.mxu0 %v18275_v14  ;;  %12980 = vmatprep.mubr.bf16.mxu1 %v23137_v11  ;;  %v23147_v14 = vld [vmem:[#allocation61_spill] sm:$0xff]  ;;  %v23149_v11 = vld [vmem:[#allocation62_spill] sm:$0xff] }
 0x687   :  { %13016 = vmatpush1.bf16.msra.mxu1 %v18278_v45  ;;  %12165 = vmatprep.subr.bf16.mxu0 %v18283_v30  ;;  %v18341_v45 = vld [vmem:[#allocation7 + $0x770] ss:$8 sps:$4 sm:$0xff]  }
 0x688   :  { %13017 = vmatprep.subr.bf16.mxu1 %v18286_v23  ;;  %v18344_v30 = vld [vmem:[#allocation7 + $0x9f0] ss:$8 sps:$4 sm:$0xff]   ;;  %v23148_v23 = vld [vmem:[#allocation109_spill] sm:$0xff] }
 0x68a   :  { %12166 = vmatpush1.bf16.msra.mxu0 %v18281_v55  ;;  %v23150_v55 = vld [vmem:[#allocation144_spill] sm:$0xff] }
 0x68b   :  { %13018 = vmatpush1.bf16.msra.mxu1 %v18284_v4  ;;  %12167 = vmatprep.subr.bf16.mxu0 %v18289_v27  ;;  %v23151_v4 = vld [vmem:[#allocation63_spill] sm:$0xff]  ;;  %v23152_v27 = vld [vmem:[#allocation110_spill] sm:$0xff] }
 0x68c   :  { %12129 = vmatmul.mubr.bf16.gmra.mrb[92].mxu0 %v23138_v46  ;;  %13019 = vmatprep.subr.bf16.mxu1 %v18292_v36  ;;  %v23153_v36 = vld [vmem:[#allocation64_spill] sm:$0xff] }
 0x68d   :  { %12981 = vmatmul.mubr.bf16.gmra.mrb[92].mxu1 %v23138_v46  ;;  %12171 = vmatprep.mubr.bf16.mxu0 %v23139_v34  ;;  %v18350_v46 = vld [vmem:[#allocation10 + $0x8] sm:$0xff]  }
 0x68e   :  { %12168 = vmatpush1.bf16.msra.mxu0 %v18287_v53  ;;  %13023 = vmatprep.mubr.bf16.mxu1 %v23139_v34  ;;  %v23154_v53 = vld [vmem:[#allocation145_spill] sm:$0xff]  ;;  %v18352_v34 = vld [vmem:[#allocation10 + $0x10] sm:$0xff]  }
 0x68f   :  { %13020 = vmatpush1.bf16.msra.mxu1 %v18290_v16  ;;  %12169 = vmatprep.subr.bf16.mxu0 %v18295_v57  ;;  %v18348_v16 = vld [vmem:[#allocation10] sm:$0xff]   ;;  %v18349_v57 = vld [vmem:[#allocation10 + $0x48] sm:$0xff]  }
 0x690   :  { %13021 = vmatprep.subr.bf16.mxu1 %v18298_v62  ;;  %v18351_v62 = vld [vmem:[#allocation10 + $0x50] sm:$0xff]  }
 0x692   :  { %12170 = vmatpush1.bf16.msra.mxu0 %v18293_v18  ;;  %v18353_v18 = vld [vmem:[#allocation10 + $0x58] sm:$0xff]  }
 0x693   :  { %13022 = vmatpush1.bf16.msra.mxu1 %v18296_v52  ;;  %12252 = vmatprep.subr.bf16.mxu0 %v18301_v43  ;;  %v18355_v52 = vld [vmem:[#allocation10 + $0x60] sm:$0xff]  }
 0x694   :  { %13104 = vmatprep.subr.bf16.mxu1 %v18304_v58  ;;  %v18356_v43 = vld [vmem:[#allocation10 + $0x20] sm:$0xff]   ;;  %v18357_v58 = vld [vmem:[#allocation10 + $0x68] sm:$0xff]  }
 0x695   :  { %12172 = vmatmul.mubr.bf16.vlgmr.msra.gmra.mrb[64].mxu0 %v23140_v47 }
 0x696   :  { %13024 = vmatmul.mubr.bf16.vlgmr.msra.gmra.mrb[64].mxu1 %v23140_v47  ;;  %12181 = vmatprep.mubr.bf16.mxu0 %v23141_v33 }
 0x697   :  { %12253 = vmatpush1.bf16.msra.mxu0 %v18299_v8  ;;  %13033 = vmatprep.mubr.bf16.mxu1 %v23141_v33  ;;  %v18359_v33 = vld [vmem:[#allocation10 + $0x70] sm:$0xff]  }
 0x698   :  { %13105 = vmatpush1.bf16.msra.mxu1 %v18302_v44  ;;  %12254 = vmatprep.subr.bf16.mxu0 %v18307_v61  ;;  %v18358_v44 = vld [vmem:[#allocation10 + $0x28] sm:$0xff]  }
 0x699   :  { %13106 = vmatprep.subr.bf16.mxu1 %v18310_v20 }
 0x69b   :  { %12255 = vmatpush1.bf16.msra.mxu0 %v18305_v3 }
 0x69c   :  { %13107 = vmatpush1.bf16.msra.mxu1 %v18308_v5  ;;  %12256 = vmatprep.subr.bf16.mxu0 %v18313_v41 }
 0x69d   :  { %12182 = vmatmul.mubr.bf16.gmra.mrb[68].mxu0 %v23142_v56  ;;  %13108 = vmatprep.subr.bf16.mxu1 %v18316_v1 }
 0x69e   :  { %13034 = vmatmul.mubr.bf16.gmra.mrb[68].mxu1 %v23142_v56  ;;  %12191 = vmatprep.mubr.bf16.mxu0 %v23143_v22 }
 0x69f   :  { %13043 = vmatprep.mubr.bf16.mxu1 %v23143_v22  ;;  %12257 = vmatpush1.bf16.msra.mxu0 %v18311_v12 }
 0x6a0   :  { %13109 = vmatpush1.bf16.msra.mxu1 %v18314_v54  ;;  %12258 = vmatprep.subr.bf16.mxu0 %v18319_v32 }
 0x6a1   :  { %13110 = vmatprep.subr.bf16.mxu1 %v18322_v38 }
 0x6a3   :  { %12259 = vmatpush1.bf16.msra.mxu0 %v18317_v13 }
 0x6a4   :  { %13111 = vmatpush1.bf16.msra.mxu1 %v18320_v10  ;;  %12260 = vmatprep.subr.bf16.mxu0 %v18325_v26 }
 0x6a5   :  { %12192 = vmatmul.mubr.bf16.gmra.mrb[72].mxu0 %v23144_v9  ;;  %13112 = vmatprep.subr.bf16.mxu1 %v18328_v39 }
 0x6a6   :  { %13044 = vmatmul.mubr.bf16.gmra.mrb[72].mxu1 %v23144_v9  ;;  %12201 = vmatprep.mubr.bf16.mxu0 %v23145_v2 }
 0x6a7   :  { %13053 = vmatprep.mubr.bf16.mxu1 %v23145_v2  ;;  %12261 = vmatpush1.bf16.msra.mxu0 %v18323_v7 }
 0x6a8   :  { %13113 = vmatpush1.bf16.msra.mxu1 %v18326_v35  ;;  %12262 = vmatprep.subr.bf16.mxu0 %v18331_v59 }
 0x6a9   :  { %13114 = vmatprep.subr.bf16.mxu1 %v18334_v6 }
 0x6ab   :  { %12263 = vmatpush1.bf16.msra.mxu0 %v18329_v19 }
 0x6ac   :  { %13115 = vmatpush1.bf16.msra.mxu1 %v18332_v37  ;;  %12264 = vmatprep.subr.bf16.mxu0 %v18337_v42 }
 0x6ad   :  { %12202 = vmatmul.mubr.bf16.gmra.mrb[76].mxu0 %v23146_v15  ;;  %13116 = vmatprep.subr.bf16.mxu1 %v18340_v51 }
 0x6ae   :  { %13054 = vmatmul.mubr.bf16.gmra.mrb[76].mxu1 %v23146_v15  ;;  %12211 = vmatprep.mubr.bf16.mxu0 %v23147_v14 }
 0x6af   :  { %13063 = vmatprep.mubr.bf16.mxu1 %v23147_v14  ;;  %12265 = vmatpush1.bf16.msra.mxu0 %v18335_v63 }
 0x6b0   :  { %13117 = vmatpush1.bf16.msra.mxu1 %v18338_v40  ;;  %12266 = vmatprep.subr.bf16.mxu0 %v18343_v28 }
 0x6b1   :  { %13118 = vmatprep.subr.bf16.mxu1 %v18346_v31 }
 0x6b3   :  { %12267 = vmatpush1.bf16.msra.mxu0 %v18341_v45 }
 0x6b4   :  { %13119 = vmatpush1.bf16.msra.mxu1 %v18344_v30  ;;  %15636 = vmatprep.subr.bf16.mxu0 %v18347_v25 }
 0x6b5   :  { %12212 = vmatmul.mubr.bf16.gmra.mrb[80].mxu0 %v23148_v23 }
 0x6b6   :  { %13064 = vmatmul.mubr.bf16.gmra.mrb[80].mxu1 %v23148_v23  ;;  %12221 = vmatprep.mubr.bf16.mxu0 %v23149_v11 }
 0x6b7   :  { %13073 = vmatprep.mubr.bf16.mxu1 %v23149_v11 }
 0x6bd   :  { %12222 = vmatmul.mubr.bf16.gmra.mrb[84].mxu0 %v23150_v55 }
 0x6be   :  { %13074 = vmatmul.mubr.bf16.gmra.mrb[84].mxu1 %v23150_v55  ;;  %12231 = vmatprep.mubr.bf16.mxu0 %v23151_v4 }
 0x6bf   :  { %13083 = vmatprep.mubr.bf16.mxu1 %v23151_v4 }
 0x6c5   :  { %12232 = vmatmul.mubr.bf16.gmra.mrb[88].mxu0 %v23152_v27 }
 0x6c6   :  { %13084 = vmatmul.mubr.bf16.gmra.mrb[88].mxu1 %v23152_v27  ;;  %12241 = vmatprep.mubr.bf16.mxu0 %v23153_v36 }
 0x6c7   :  { %13093 = vmatprep.mubr.bf16.mxu1 %v23153_v36 }
 0x6cd   :  { %12242 = vmatmul.mubr.bf16.gmra.mrb[92].mxu0 %v23154_v53 }
 0x6ce   :  { %13094 = vmatmul.mubr.bf16.gmra.mrb[92].mxu1 %v23154_v53  ;;  %12284 = vmatprep.mubr.bf16.mxu0 %v22604_v24 }
 0x6cf   :  { %13136 = vmatprep.mubr.bf16.mxu1 %v22604_v24 }
 0x6d5   :  { %12285 = vmatmul.mubr.bf16.vlgmr.msra.gmra.mrb[64].mxu0 %v21735_v60 }
 0x6d6   :  { %13137 = vmatmul.mubr.bf16.vlgmr.msra.gmra.mrb[64].mxu1 %v21735_v60  ;;  %12294 = vmatprep.mubr.bf16.mxu0 %v22604_v24  ;;  %v18354_v60 = vld [vmem:[#allocation10 + $0x18] sm:$0xff]  }
 0x6d7   :  { %13146 = vmatprep.mubr.bf16.mxu1 %v22604_v24  ;;  %15637 = vmatpush3.bf16.msra.mxu0 %v18348_v16 }
 0x6d8   :  { %15638 = vmatprep.subr.bf16.mxu0 %v18349_v57  ;;  %v18366_v57 = vld [vmem:[#allocation13 + $0x18] sm:$0xff]  }
 0x6db   :  { %15639 = vmatpush3.bf16.msra.mxu0 %v18350_v46 }
 0x6dc   :  { %15640 = vmatprep.subr.bf16.mxu0 %v18351_v62 }
 0x6dd   :  { %12295 = vmatmul.mubr.bf16.gmra.mrb[68].mxu0 %v21755_v29 }
 0x6de   :  { %13147 = vmatmul.mubr.bf16.gmra.mrb[68].mxu1 %v21755_v29  ;;  %12304 = vmatprep.mubr.bf16.mxu0 %v22604_v24 }
 0x6df   :  { %13156 = vmatprep.mubr.bf16.mxu1 %v22604_v24  ;;  %15641 = vmatpush3.bf16.msra.mxu0 %v18352_v34 }
 0x6e0   :  { %15642 = vmatprep.subr.bf16.mxu0 %v18353_v18 }
 0x6e3   :  { %15643 = vmatpush3.bf16.msra.mxu0 %v18354_v60 }
 0x6e4   :  { %15644 = vmatprep.subr.bf16.mxu0 %v18355_v52 }
 0x6e5   :  { %12305 = vmatmul.mubr.bf16.gmra.mrb[72].mxu0 %v21776_v50 }
 0x6e6   :  { %13157 = vmatmul.mubr.bf16.gmra.mrb[72].mxu1 %v21776_v50  ;;  %12314 = vmatprep.mubr.bf16.mxu0 %v22604_v24 }
 0x6e7   :  { %v21924_v8 = vpop.f32.mrb[32].mxu0  ;;  %v21926_v29 = vpop.f32.mrb[32].mxu1  ;;  %13166 = vmatprep.mubr.bf16.mxu1 %v22604_v24  ;;  %15645 = vmatpush3.bf16.msra.mxu0 %v18356_v43 }
 0x6e8   :  { %v21931_v47 = vpop.f32.mrb[33].mxu0  ;;  %v21933_v20 = vpop.f32.mrb[33].mxu1  ;;  %15646 = vmatprep.subr.bf16.mxu0 %v18357_v58 }
 0x6e9   :  { %v21937_v3 = vpop.f32.mrb[34].mxu0  ;;  %v21939_v5 = vpop.f32.mrb[34].mxu1 }
 0x6ea   :  { %v21943_v1 = vpop.f32.mrb[35].mxu0  ;;  %v21945_v12 = vpop.f32.mrb[35].mxu1 }
 0x6eb   :  { %15647 = vmatpush3.bf16.msra.mxu0 %v18358_v44 }
 0x6ec   :  { %15648 = vmatprep.subr.bf16.mxu0 %v18359_v33  ;;  %v18363_v33 = vld [vmem:[#allocation13] sm:$0xff]  }
 0x6ed   :  { %12315 = vmatmul.mubr.bf16.gmra.mrb[76].mxu0 %v21790_v48  ;;  %15853 = vmatprep.subr.bf16.mxu1 %v18363_v33 }
 0x6ee   :  { %13167 = vmatmul.mubr.bf16.gmra.mrb[76].mxu1 %v21790_v48  ;;  %12324 = vmatprep.mubr.bf16.mxu0 %v22604_v24 }
 0x6ef   :  { %v21952_v32 = vpop.f32.mrb[36].mxu0  ;;  %v21954_v56 = vpop.f32.mrb[36].mxu1  ;;  %13176 = vmatprep.mubr.bf16.mxu1 %v22604_v24  ;;  %15854 = vmatpush3.bf16.msra.mxu1 %v18363_v33 }
 0x6f0   :  { %v21959_v22 = vpop.f32.mrb[37].mxu0  ;;  %v21961_v13 = vpop.f32.mrb[37].mxu1 }
 0x6f1   :  { %v21965_v26 = vpop.f32.mrb[38].mxu0  ;;  %v21967_v48 = vpop.f32.mrb[38].mxu1 }
 0x6f2   :  { %v21971_v7 = vpop.f32.mrb[39].mxu0  ;;  %v21973_v35 = vpop.f32.mrb[39].mxu1 }
 0x6f5   :  { %12325 = vmatmul.mubr.bf16.gmra.mrb[80].mxu0 %v21804_v0 }
 0x6f6   :  { %13177 = vmatmul.mubr.bf16.gmra.mrb[80].mxu1 %v21804_v0  ;;  %12334 = vmatprep.mubr.bf16.mxu0 %v22604_v24 }
 0x6f7   :  { %v21980_v9 = vpop.f32.mrb[40].mxu0  ;;  %v21982_v6 = vpop.f32.mrb[40].mxu1  ;;  %13186 = vmatprep.mubr.bf16.mxu1 %v22604_v24 }
 0x6f8   :  { %v21987_v19 = vpop.f32.mrb[41].mxu0  ;;  %v21989_v37 = vpop.f32.mrb[41].mxu1 }
 0x6f9   :  { %v21993_v51 = vpop.f32.mrb[42].mxu0  ;;  %v21995_v0 = vpop.f32.mrb[42].mxu1 }
 0x6fa   :  { %v21999_v40 = vpop.f32.mrb[43].mxu0  ;;  %v22001_v28 = vpop.f32.mrb[43].mxu1 }
 0x6fd   :  { %12335 = vmatmul.mubr.bf16.gmra.mrb[84].mxu0 %v21818_v17 }
 0x6fe   :  { %13187 = vmatmul.mubr.bf16.gmra.mrb[84].mxu1 %v21818_v17  ;;  %12344 = vmatprep.mubr.bf16.mxu0 %v22604_v24 }
 0x6ff   :  { %v22008_v31 = vpop.f32.mrb[44].mxu0  ;;  %v22010_v14 = vpop.f32.mrb[44].mxu1  ;;  %13196 = vmatprep.mubr.bf16.mxu1 %v22604_v24 }
 0x700   :  { %v22015_v30 = vpop.f32.mrb[45].mxu0  ;;  %v22017_v25 = vpop.f32.mrb[45].mxu1 }
 0x701   :  { %v22021_v11 = vpop.f32.mrb[46].mxu0  ;;  %v22023_v17 = vpop.f32.mrb[46].mxu1 }
 0x702   :  { %v22027_v4 = vpop.f32.mrb[47].mxu0  ;;  %v22029_v27 = vpop.f32.mrb[47].mxu1 }
 0x705   :  { %12345 = vmatmul.mubr.bf16.gmra.mrb[88].mxu0 %v21832_v21 }
 0x706   :  { %13197 = vmatmul.mubr.bf16.gmra.mrb[88].mxu1 %v21832_v21  ;;  %12354 = vmatprep.mubr.bf16.mxu0 %v22604_v24 }
 0x707   :  { %v22036_v53 = vpop.f32.mrb[48].mxu0  ;;  %v22038_v16 = vpop.f32.mrb[48].mxu1  ;;  %13206 = vmatprep.mubr.bf16.mxu1 %v22604_v24 }
 0x708   :  { %v22043_v46 = vpop.f32.mrb[49].mxu0  ;;  %v22045_v62 = vpop.f32.mrb[49].mxu1 }
 0x709   :  { %v22049_v18 = vpop.f32.mrb[50].mxu0  ;;  %v22051_v21 = vpop.f32.mrb[50].mxu1 }
 0x70a   :  { %v22055_v52 = vpop.f32.mrb[51].mxu0  ;;  %v22057_v24 = vpop.f32.mrb[51].mxu1 }
 0x70d   :  { %12355 = vmatmul.mubr.bf16.gmra.mrb[92].mxu0 %v21843_v49 }
 0x70e   :  { %13207 = vmatmul.mubr.bf16.gmra.mrb[92].mxu1 %v21843_v49  ;;  %v18368_v49 = vld [vmem:[#allocation13 + $0x28] sm:$0xff]  }
 0x70f   :  { %v22063_v58 = vpop.f32.mrb[52].mxu0  ;;  %v22065_v44 = vpop.f32.mrb[52].mxu1 }
 0x710   :  { %v22069_v34 = vpop.f32.mrb[53].mxu0  ;;  %v22071_v60 = vpop.f32.mrb[53].mxu1 }
 0x711   :  { %v22075_v36 = vpop.f32.mrb[54].mxu0  ;;  %v22077_v43 = vpop.f32.mrb[54].mxu1 }
 0x712   :  { %v22081_v55 = vpop.f32.mrb[55].mxu0  ;;  %v22083_v23 = vpop.f32.mrb[55].mxu1 }
 0x713   :  { %23155 = vst [vmem:[#allocation111_spill] sm:$0xff] %v22081_v55  ;;  %23156 = vst [vmem:[#allocation65_spill] sm:$0xff] %v22083_v23  ;;  %v23179_v23 = vmax.f32 %v21943_v1, %v21945_v12 }
 0x717   :  { %v22087_v45 = vpop.f32.mrb[56].mxu0  ;;  %v22089_v15 = vpop.f32.mrb[56].mxu1 }
 0x718   :  { %23157 = vst [vmem:[#allocation146_spill] sm:$0xff] %v22087_v45  ;;  %23158 = vst [vmem:[#allocation66_spill] sm:$0xff] %v22089_v15  ;;  %v22093_v63 = vpop.f32.mrb[57].mxu0  ;;  %v22095_v42 = vpop.f32.mrb[57].mxu1 }
 0x719   :  { %23159 = vst [vmem:[#allocation112_spill] sm:$0xff] %v22093_v63  ;;  %23160 = vst [vmem:[#allocation67_spill] sm:$0xff] %v22095_v42  ;;  %v22099_v2 = vpop.f32.mrb[58].mxu0  ;;  %v22101_v59 = vpop.f32.mrb[58].mxu1 }
 0x71a   :  { %23161 = vst [vmem:[#allocation147_spill] sm:$0xff] %v22099_v2  ;;  %23162 = vst [vmem:[#allocation68_spill] sm:$0xff] %v22101_v59  ;;  %v22105_v39 = vpop.f32.mrb[59].mxu0  ;;  %v22107_v10 = vpop.f32.mrb[59].mxu1  ;;  %v18362_v2 = vld [vmem:[#allocation10 + $0x38] sm:$0xff]  }
 0x71b   :  { %23163 = vst [vmem:[#allocation113_spill] sm:$0xff] %v22105_v39  ;;  %23164 = vst [vmem:[#allocation69_spill] sm:$0xff] %v22107_v10 }
 0x71f   :  { %v22111_v38 = vpop.f32.mrb[60].mxu0  ;;  %v22113_v54 = vpop.f32.mrb[60].mxu1 }
 0x720   :  { %23165 = vst [vmem:[#allocation148_spill] sm:$0xff] %v22111_v38  ;;  %23166 = vst [vmem:[#allocation70_spill] sm:$0xff] %v22113_v54  ;;  %v22117_v41 = vpop.f32.mrb[61].mxu0  ;;  %v22119_v50 = vpop.f32.mrb[61].mxu1  ;;  %v18360_v54 = vld [vmem:[#allocation10 + $0x30] sm:$0xff]   ;;  %v18361_v38 = vld [vmem:[#allocation10 + $0x78] sm:$0xff]  }
 0x721   :  { %23167 = vst [vmem:[#allocation114_spill] sm:$0xff] %v22117_v41  ;;  %23168 = vst [vmem:[#allocation71_spill] sm:$0xff] %v22119_v50  ;;  %v22123_v61 = vpop.f32.mrb[62].mxu0  ;;  %v22125_v59 = vpop.f32.mrb[62].mxu1  ;;  %15649 = vmatpush3.bf16.msra.mxu0 %v18360_v54  ;;  %v18364_v50 = vld [vmem:[#allocation13 + $0x8] sm:$0xff]   ;;  %v18365_v41 = vld [vmem:[#allocation13 + $0x10] sm:$0xff]  }
 0x722   :  { %23169 = vst [vmem:[#allocation150_spill] sm:$0xff] %v22123_v61  ;;  %23170 = vst [vmem:[#allocation72_spill] sm:$0xff] %v22125_v59  ;;  %v22129_v10 = vpop.f32.mrb[63].mxu0  ;;  %v22131_v39 = vpop.f32.mrb[63].mxu1  ;;  %15650 = vmatprep.subr.bf16.mxu0 %v18361_v38  ;;  %15855 = vmatprep.subr.bf16.mxu1 %v18364_v50  ;;  %v18367_v59 = vld [vmem:[#allocation13 + $0x20] sm:$0xff]  }
 0x723   :  { %23171 = vst [vmem:[#allocation115_spill] sm:$0xff] %v22129_v10  ;;  %23172 = vst [vmem:[#allocation73_spill] sm:$0xff] %v22131_v39  ;;  %15856 = vmatpush3.bf16.msra.mxu1 %v18364_v50  ;;  %v13249_v54 = vld [vmem:[#allocation8] sm:$0x3]  ;;  %v23174_v10 = vld [vmem:[#allocation138_spill] sm:$0xff] }
 0x724   :  { %15857 = vmatprep.subr.bf16.mxu1 %v18365_v41  ;;  %v23175_v50 = vsub.s32 0, %v23174_v10 }
 0x725   :  { %15651 = vmatpush3.bf16.msra.mxu0 %v18362_v2  ;;  %v23173_v2 = vmax.f32 %v21924_v8, %v21926_v29  ;;  %v23178_v8 = vmax.f32 %v21937_v3, %v21939_v5 }
 0x726   :  { %v22140_v61 = vrot.slane %v13249_v54, %v23175_v50 }
 0x727   :  { %15858 = vmatpush3.bf16.msra.mxu1 %v18365_v41 }
 0x728   :  { %15859 = vmatprep.subr.bf16.mxu1 %v18366_v57 }
 0x72b   :  { %15860 = vmatpush3.bf16.msra.mxu1 %v18366_v57  ;;  %v23176_v57 = vmax.f32 %v21931_v47, %v21933_v20 }
 0x72c   :  { %15861 = vmatprep.subr.bf16.mxu1 %v18367_v59 }
 0x72f   :  { %15862 = vmatpush3.bf16.msra.mxu1 %v18367_v59  ;;  %v23177_v59 = vsub.s32 1, %v23174_v10 }
 0x730   :  { %15863 = vmatprep.subr.bf16.mxu1 %v18368_v49 }
 0x733   :  { %15864 = vmatpush3.bf16.msra.mxu1 %v18368_v49  ;;  %v22147_v49 = vrot.slane %v13249_v54, %v23177_v59 }
 0x7a8   :  { %v12286_v38 = vpop.f32.mrb[64].mxu0 }
 0x7a9   :  { %v12365_v33 = vmax.f32 %v23173_v2, %v12286_v38  ;;  %v13138_v39 = vpop.f32.mrb[64].mxu1  ;;  %v12288_v41 = vpop.f32.mrb[65].mxu0 }
 0x7aa   :  { %v12366_v42 = vmax.f32 %v23176_v57, %v12288_v41  ;;  %v13140_v63 = vpop.f32.mrb[65].mxu1  ;;  %v12290_v15 = vpop.f32.mrb[66].mxu0 }
 0x7ab   :  { %v13217_v45 = vmax.f32 %v12365_v33, %v13138_v39  ;;  %v12367_v29 = vmax.f32 %v23178_v8, %v12290_v15  ;;  %v13142_v38 = vpop.f32.mrb[66].mxu1  ;;  %v12292_v2 = vpop.f32.mrb[67].mxu0 }
 0x7ac   :  { %v13218_v50 = vmax.f32 %v12366_v42, %v13140_v63  ;;  %v12368_v55 = vmax.f32 %v23179_v23, %v12292_v2  ;;  %v13144_v47 = vpop.f32.mrb[67].mxu1  ;;  %v23180_v42 = vmax.f32 %v21952_v32, %v21954_v56  ;;  %v23182_v2 = vmax.f32 %v21965_v26, %v21967_v48 }
 0x7ad   :  { %v13261_v20 = vadd.f32 %v22140_v61, %v13217_v45  ;;  %v13219_v41 = vmax.f32 %v12367_v29, %v13142_v38  ;;  %v23181_v45 = vmax.f32 %v21959_v22, %v21961_v13  ;;  %v23183_v56 = vmax.f32 %v21971_v7, %v21973_v35 }
 0x7ae   :  { %v13262_v10 = vadd.f32 %v22147_v49, %v13218_v50  ;;  %v13220_v54 = vmax.f32 %v12368_v55, %v13144_v47  ;;  %v23184_v7 = vmax.f32 %v21980_v9, %v21982_v6  ;;  %v23187_v6 = vmax.f32 %v21999_v40, %v22001_v28 }
 0x7af   :  { %v13263_v39 = vadd.f32 %v22140_v61, %v13219_v41  ;;  %v13293_v5 = vmax.f32 %v13261_v20, 0.0  ;;  %v23188_v40 = vmax.f32 %v22008_v31, %v22010_v14  ;;  %v23191_v14 = vmax.f32 %v22027_v4, %v22029_v27 }
 0x7b0   :  { %v13264_v33 = vadd.f32 %v22147_v49, %v13220_v54  ;;  %v12296_v3 = vpop.f32.mrb[68].mxu0  ;;  %v13294_v23 = vmax.f32 %v13262_v10, 0.0  ;;  %v23192_v4 = vmax.f32 %v22036_v53, %v22038_v16  ;;  %v23195_v16 = vmax.f32 %v22055_v52, %v22057_v24 }
 0x7b1   :  { %v13295_v15 = vmax.f32 %v13263_v39, 0.0  ;;  %v12369_v63 = vmax.f32 %v23180_v42, %v12296_v3  ;;  %v13148_v1 = vpop.f32.mrb[68].mxu1  ;;  %v12298_v12 = vpop.f32.mrb[69].mxu0  ;;  %v23196_v52 = vmax.f32 %v22063_v58, %v22065_v44  ;;  %v23199_v44 = vld [vmem:[#allocation111_spill] sm:$0xff] }
 0x7b2   :  { %v13296_v57 = vmax.f32 %v13264_v33, 0.0  ;;  %v12370_v59 = vmax.f32 %v23181_v45, %v12298_v12  ;;  %v13150_v55 = vpop.f32.mrb[69].mxu1  ;;  %v12300_v8 = vpop.f32.mrb[70].mxu0 }
 0x7b3   :  { %v13325_v29 = vpack.c.bf16 %v13295_v15, %v13293_v5  ;;  %v13221_v38 = vmax.f32 %v12369_v63, %v13148_v1  ;;  %v12371_v50 = vmax.f32 %v23182_v2, %v12300_v8  ;;  %v13152_v47 = vpop.f32.mrb[70].mxu1  ;;  %v12302_v20 = vpop.f32.mrb[71].mxu0 }
 0x7b4   :  { %v13222_v32 = vmax.f32 %v12370_v59, %v13150_v55  ;;  %v12372_v41 = vmax.f32 %v23183_v56, %v12302_v20  ;;  %v13154_v10 = vpop.f32.mrb[71].mxu1  ;;  %v13326_v54 = vpack.c.bf16 %v13296_v57, %v13294_v23  ;;  %v23185_v23 = vmax.f32 %v21987_v19, %v21989_v37 }
 0x7b5   :  { %v13265_v22 = vadd.f32 %v22140_v61, %v13221_v38  ;;  %v13223_v13 = vmax.f32 %v12371_v50, %v13152_v47 }
 0x7b6   :  { %v13266_v39 = vadd.f32 %v22147_v49, %v13222_v32  ;;  %v13224_v33 = vmax.f32 %v12372_v41, %v13154_v10  ;;  %13508 = vmatprep.mubr.bf16.mxu0 %v13326_v54 }
 0x7b7   :  { %v13267_v3 = vadd.f32 %v22140_v61, %v13223_v13  ;;  %13509 = vmatmul.mubr.bf16.vlgmr.msra.gmra.mrb[96].mxu0 %v13325_v29  ;;  %v13297_v5 = vmax.f32 %v13265_v22, 0.0  ;;  %v23186_v29 = vmax.f32 %v21993_v51, %v21995_v0 }
 0x7b8   :  { %v13268_v26 = vadd.f32 %v22147_v49, %v13224_v33  ;;  %v12306_v48 = vpop.f32.mrb[72].mxu0  ;;  %v13298_v1 = vmax.f32 %v13266_v39, 0.0 }
 0x7b9   :  { %v13299_v15 = vmax.f32 %v13267_v3, 0.0  ;;  %v12373_v35 = vmax.f32 %v23184_v7, %v12306_v48  ;;  %v13158_v42 = vpop.f32.mrb[72].mxu1  ;;  %v12308_v63 = vpop.f32.mrb[73].mxu0 }
 0x7ba   :  { %v13300_v12 = vmax.f32 %v13268_v26, 0.0  ;;  %v12374_v57 = vmax.f32 %v23185_v23, %v12308_v63  ;;  %v13160_v45 = vpop.f32.mrb[73].mxu1  ;;  %v12310_v59 = vpop.f32.mrb[74].mxu0  ;;  %v23189_v26 = vmax.f32 %v22015_v30, %v22017_v25 }
 0x7bb   :  { %v13327_v55 = vpack.c.bf16 %v13299_v15, %v13297_v5  ;;  %v13225_v8 = vmax.f32 %v12373_v35, %v13158_v42  ;;  %v12375_v38 = vmax.f32 %v23186_v29, %v12310_v59  ;;  %v13162_v2 = vpop.f32.mrb[74].mxu1  ;;  %v12312_v50 = vpop.f32.mrb[75].mxu0  ;;  %v23190_v42 = vmax.f32 %v22021_v11, %v22023_v17 }
 0x7bc   :  { %v13226_v9 = vmax.f32 %v12374_v57, %v13160_v45  ;;  %v12376_v47 = vmax.f32 %v23187_v6, %v12312_v50  ;;  %v13164_v20 = vpop.f32.mrb[75].mxu1  ;;  %v13328_v32 = vpack.c.bf16 %v13300_v12, %v13298_v1 }
 0x7bd   :  { %v13269_v19 = vadd.f32 %v22140_v61, %v13225_v8  ;;  %v13227_v37 = vmax.f32 %v12375_v38, %v13162_v2 }
 0x7be   :  { %v13270_v56 = vadd.f32 %v22147_v49, %v13226_v9  ;;  %v13228_v41 = vmax.f32 %v12376_v47, %v13164_v20  ;;  %13516 = vmatprep.mubr.bf16.mxu0 %v13328_v32  ;;  %v23193_v47 = vmax.f32 %v22043_v46, %v22045_v62 }
 0x7bf   :  { %v13271_v10 = vadd.f32 %v22140_v61, %v13227_v37  ;;  %13517 = vmatmul.mubr.bf16.gmra.mrb[100].mxu0 %v13327_v55  ;;  %v13301_v54 = vmax.f32 %v13269_v19, 0.0 }
 0x7c0   :  { %v13272_v51 = vadd.f32 %v22147_v49, %v13228_v41  ;;  %v12316_v0 = vpop.f32.mrb[76].mxu0  ;;  %v13302_v33 = vmax.f32 %v13270_v56, 0.0  ;;  %v23194_v41 = vmax.f32 %v22049_v18, %v22051_v21 }
 0x7c1   :  { %v13303_v22 = vmax.f32 %v13271_v10, 0.0  ;;  %v12377_v28 = vmax.f32 %v23188_v40, %v12316_v0  ;;  %v13168_v13 = vpop.f32.mrb[76].mxu1  ;;  %v12318_v39 = vpop.f32.mrb[77].mxu0 }
 0x7c2   :  { %v13304_v3 = vmax.f32 %v13272_v51, 0.0  ;;  %v12378_v48 = vmax.f32 %v23189_v26, %v12318_v39  ;;  %v13170_v5 = vpop.f32.mrb[77].mxu1  ;;  %v12320_v15 = vpop.f32.mrb[78].mxu0 }
 0x7c3   :  { %v13329_v7 = vpack.c.bf16 %v13303_v22, %v13301_v54  ;;  %v13229_v35 = vmax.f32 %v12377_v28, %v13168_v13  ;;  %v12379_v63 = vmax.f32 %v23190_v42, %v12320_v15  ;;  %v13172_v1 = vpop.f32.mrb[78].mxu1  ;;  %v12322_v12 = vpop.f32.mrb[79].mxu0 }
 0x7c4   :  { %v13230_v31 = vmax.f32 %v12378_v48, %v13170_v5  ;;  %v12380_v23 = vmax.f32 %v23191_v14, %v12322_v12  ;;  %v13174_v57 = vpop.f32.mrb[79].mxu1  ;;  %v13330_v45 = vpack.c.bf16 %v13304_v3, %v13302_v33 }
 0x7c5   :  { %v13273_v30 = vadd.f32 %v22140_v61, %v13229_v35  ;;  %v13231_v25 = vmax.f32 %v12379_v63, %v13172_v1 }
 0x7c6   :  { %v13274_v59 = vadd.f32 %v22147_v49, %v13230_v31  ;;  %v13232_v55 = vmax.f32 %v12380_v23, %v13174_v57  ;;  %13524 = vmatprep.mubr.bf16.mxu0 %v13330_v45  ;;  %v23198_v31 = vmax.f32 %v22075_v36, %v22077_v43  ;;  %v23200_v45 = vld [vmem:[#allocation65_spill] sm:$0xff] }
 0x7c7   :  { %v13275_v8 = vadd.f32 %v22140_v61, %v13231_v25  ;;  %13525 = vmatmul.mubr.bf16.gmra.mrb[104].mxu0 %v13329_v7  ;;  %v13305_v29 = vmax.f32 %v13273_v30, 0.0  ;;  %v23197_v7 = vmax.f32 %v22069_v34, %v22071_v60  ;;  %v23201_v30 = vmax.f32 %v23199_v44, %v23200_v45  ;;  %v23218_v44 = vld [vmem:[#allocation71_spill] sm:$0xff] }
 0x7c8   :  { %v13276_v11 = vadd.f32 %v22147_v49, %v13232_v55  ;;  %v12326_v17 = vpop.f32.mrb[80].mxu0  ;;  %v13306_v9 = vmax.f32 %v13274_v59, 0.0 }
 0x7c9   :  { %v13307_v38 = vmax.f32 %v13275_v8, 0.0  ;;  %v12381_v27 = vmax.f32 %v23192_v4, %v12326_v17  ;;  %v13178_v2 = vpop.f32.mrb[80].mxu1  ;;  %v12328_v50 = vpop.f32.mrb[81].mxu0  ;;  %v23202_v4 = vld [vmem:[#allocation146_spill] sm:$0xff] }
 0x7ca   :  { %v13308_v6 = vmax.f32 %v13276_v11, 0.0  ;;  %v12382_v20 = vmax.f32 %v23193_v47, %v12328_v50  ;;  %v13180_v32 = vpop.f32.mrb[81].mxu1  ;;  %v12330_v19 = vpop.f32.mrb[82].mxu0 }
 0x7cb   :  { %v13331_v37 = vpack.c.bf16 %v13307_v38, %v13305_v29  ;;  %v13233_v56 = vmax.f32 %v12381_v27, %v13178_v2  ;;  %v12383_v10 = vmax.f32 %v23194_v41, %v12330_v19  ;;  %v13182_v51 = vpop.f32.mrb[82].mxu1  ;;  %v12332_v0 = vpop.f32.mrb[83].mxu0  ;;  %v23203_v27 = vld [vmem:[#allocation66_spill] sm:$0xff]  ;;  %v23206_v19 = vld [vmem:[#allocation67_spill] sm:$0xff] }
 0x7cc   :  { %v13234_v53 = vmax.f32 %v12382_v20, %v13180_v32  ;;  %v12384_v54 = vmax.f32 %v23195_v16, %v12332_v0  ;;  %v13184_v22 = vpop.f32.mrb[83].mxu1  ;;  %v13332_v40 = vpack.c.bf16 %v13308_v6, %v13306_v9  ;;  %v23204_v2 = vmax.f32 %v23202_v4, %v23203_v27  ;;  %v23205_v32 = vld [vmem:[#allocation112_spill] sm:$0xff]  ;;  %v23224_v4 = vld [vmem:[#allocation73_spill] sm:$0xff] }
 0x7cd   :  { %v13277_v46 = vadd.f32 %v22140_v61, %v13233_v56  ;;  %v13235_v62 = vmax.f32 %v12383_v10, %v13182_v51  ;;  %v23209_v16 = vld [vmem:[#allocation68_spill] sm:$0xff] }
 0x7ce   :  { %v13278_v28 = vadd.f32 %v22147_v49, %v13234_v53  ;;  %v13236_v13 = vmax.f32 %v12384_v54, %v13184_v22  ;;  %13532 = vmatprep.mubr.bf16.mxu0 %v13332_v40  ;;  %v23208_v53 = vld [vmem:[#allocation147_spill] sm:$0xff] }
 0x7cf   :  { %v13279_v39 = vadd.f32 %v22140_v61, %v13235_v62  ;;  %13533 = vmatmul.mubr.bf16.gmra.mrb[108].mxu0 %v13331_v37  ;;  %v13309_v33 = vmax.f32 %v13277_v46, 0.0  ;;  %v23207_v37 = vmax.f32 %v23205_v32, %v23206_v19  ;;  %v23210_v54 = vmax.f32 %v23208_v53, %v23209_v16  ;;  %v18369_v16 = vld [vmem:[#allocation13 + $0x30] sm:$0xff]  }
 0x7d0   :  { %v13280_v18 = vadd.f32 %v22147_v49, %v13236_v13  ;;  %v12336_v21 = vpop.f32.mrb[84].mxu0  ;;  %v13310_v5 = vmax.f32 %v13278_v28, 0.0  ;;  %v23211_v28 = vld [vmem:[#allocation113_spill] sm:$0xff]  ;;  %15865 = vmatprep.subr.bf16.mxu1 %v18369_v16 }
 0x7d1   :  { %v13311_v3 = vmax.f32 %v13279_v39, 0.0  ;;  %v12385_v24 = vmax.f32 %v23196_v52, %v12336_v21  ;;  %v13188_v26 = vpop.f32.mrb[84].mxu1  ;;  %v12338_v48 = vpop.f32.mrb[85].mxu0  ;;  %v23212_v13 = vld [vmem:[#allocation69_spill] sm:$0xff]  ;;  %15866 = vmatpush3.bf16.msra.mxu1 %v18369_v16 }
 0x7d2   :  { %v13312_v15 = vmax.f32 %v13280_v18, 0.0  ;;  %v12386_v35 = vmax.f32 %v23197_v7, %v12338_v48  ;;  %v13190_v42 = vpop.f32.mrb[85].mxu1  ;;  %v12340_v63 = vpop.f32.mrb[86].mxu0  ;;  %v23213_v39 = vmax.f32 %v23211_v28, %v23212_v13 }
 0x7d3   :  { %v13333_v1 = vpack.c.bf16 %v13311_v3, %v13309_v33  ;;  %v13237_v12 = vmax.f32 %v12385_v24, %v13188_v26  ;;  %v12387_v14 = vmax.f32 %v23198_v31, %v12340_v63  ;;  %v13192_v23 = vpop.f32.mrb[86].mxu1  ;;  %v12342_v57 = vpop.f32.mrb[87].mxu0  ;;  %v23215_v63 = vld [vmem:[#allocation70_spill] sm:$0xff] }
 0x7d4   :  { %v13238_v58 = vmax.f32 %v12386_v35, %v13190_v42  ;;  %v12388_v25 = vmax.f32 %v23201_v30, %v12342_v57  ;;  %v13194_v59 = vpop.f32.mrb[87].mxu1  ;;  %v13334_v55 = vpack.c.bf16 %v13312_v15, %v13310_v5  ;;  %v23214_v42 = vld [vmem:[#allocation148_spill] sm:$0xff] }
 0x7d5   :  { %v13281_v34 = vadd.f32 %v22140_v61, %v13237_v12  ;;  %v13239_v60 = vmax.f32 %v12387_v14, %v13192_v23 }
 0x7d6   :  { %v13282_v8 = vadd.f32 %v22147_v49, %v13238_v58  ;;  %v13240_v11 = vmax.f32 %v12388_v25, %v13194_v59  ;;  %13540 = vmatprep.mubr.bf16.mxu0 %v13334_v55  ;;  %v23217_v58 = vld [vmem:[#allocation114_spill] sm:$0xff] }
 0x7d7   :  { %v13283_v17 = vadd.f32 %v22140_v61, %v13239_v60  ;;  %13541 = vmatmul.mubr.bf16.gmra.mrb[112].mxu0 %v13333_v1  ;;  %v13313_v29 = vmax.f32 %v13281_v34, 0.0  ;;  %v23216_v1 = vmax.f32 %v23214_v42, %v23215_v63  ;;  %v23219_v45 = vmax.f32 %v23217_v58, %v23218_v44  ;;  %v23220_v60 = vld [vmem:[#allocation150_spill] sm:$0xff] }
 0x7d8   :  { %v13284_v36 = vadd.f32 %v22147_v49, %v13240_v11  ;;  %v12346_v43 = vpop.f32.mrb[88].mxu0  ;;  %v13314_v47 = vmax.f32 %v13282_v8, 0.0  ;;  %v23221_v8 = vld [vmem:[#allocation72_spill] sm:$0xff] }
 0x7d9   :  { %v13315_v38 = vmax.f32 %v13283_v17, 0.0  ;;  %v12389_v50 = vmax.f32 %v23204_v2, %v12346_v43  ;;  %v13198_v9 = vpop.f32.mrb[88].mxu1  ;;  %v12348_v6 = vpop.f32.mrb[89].mxu0  ;;  %v23222_v11 = vmax.f32 %v23220_v60, %v23221_v8 }
 0x7da   :  { %v13316_v20 = vmax.f32 %v13284_v36, 0.0  ;;  %v12390_v56 = vmax.f32 %v23207_v37, %v12348_v6  ;;  %v13200_v41 = vpop.f32.mrb[89].mxu1  ;;  %v12350_v10 = vpop.f32.mrb[90].mxu0 }
 0x7db   :  { %v13335_v51 = vpack.c.bf16 %v13315_v38, %v13313_v29  ;;  %v13241_v0 = vmax.f32 %v12389_v50, %v13198_v9  ;;  %v12391_v22 = vmax.f32 %v23210_v54, %v12350_v10  ;;  %v13202_v40 = vpop.f32.mrb[90].mxu1  ;;  %v12352_v46 = vpop.f32.mrb[91].mxu0  ;;  %v23223_v38 = vld [vmem:[#allocation115_spill] sm:$0xff]  ;;  %v18370_v54 = vld [vmem:[#allocation13 + $0x38] sm:$0xff]  }
 0x7dc   :  { %v13242_v62 = vmax.f32 %v12390_v56, %v13200_v41  ;;  %v12392_v18 = vmax.f32 %v23213_v39, %v12352_v46  ;;  %v13204_v21 = vpop.f32.mrb[91].mxu1  ;;  %v13336_v33 = vpack.c.bf16 %v13316_v20, %v13314_v47  ;;  %v23225_v27 = vmax.f32 %v23223_v38, %v23224_v4  ;;  %15867 = vmatprep.subr.bf16.mxu1 %v18370_v54 }
 0x7dd   :  { %v13285_v3 = vadd.f32 %v22140_v61, %v13241_v0  ;;  %v13243_v52 = vmax.f32 %v12391_v22, %v13202_v40  ;;  %15868 = vmatpush3.bf16.msra.mxu1 %v18370_v54  ;;  %v22271_v40 = vld [vmem:[#allocation11] ss:$0 sm:$0xff] }
 0x7de   :  { %v13286_v24 = vadd.f32 %v22147_v49, %v13242_v62  ;;  %v13244_v26 = vmax.f32 %v12392_v18, %v13204_v21  ;;  %13548 = vmatprep.mubr.bf16.mxu0 %v13336_v33 }
 0x7df   :  { %v13287_v48 = vadd.f32 %v22140_v61, %v13243_v52  ;;  %13549 = vmatmul.mubr.bf16.gmra.mrb[116].mxu0 %v13335_v51  ;;  %v13317_v7 = vmax.f32 %v13285_v3, 0.0 }
 0x7e0   :  { %v13288_v5 = vadd.f32 %v22147_v49, %v13244_v26  ;;  %v12356_v15 = vpop.f32.mrb[92].mxu0  ;;  %v13318_v23 = vmax.f32 %v13286_v24, 0.0 }
 0x7e1   :  { %v13319_v35 = vmax.f32 %v13287_v48, 0.0  ;;  %v12393_v12 = vmax.f32 %v23216_v1, %v12356_v15  ;;  %v13208_v31 = vpop.f32.mrb[92].mxu1  ;;  %v12358_v14 = vpop.f32.mrb[93].mxu0 }
 0x7e2   :  { %v13320_v57 = vmax.f32 %v13288_v5, 0.0  ;;  %v12394_v30 = vmax.f32 %v23219_v45, %v12358_v14  ;;  %v13210_v25 = vpop.f32.mrb[93].mxu1  ;;  %v12360_v59 = vpop.f32.mrb[94].mxu0 }
 0x7e3   :  { %v13337_v55 = vpack.c.bf16 %v13319_v35, %v13317_v7  ;;  %v13245_v34 = vmax.f32 %v12393_v12, %v13208_v31  ;;  %v12395_v17 = vmax.f32 %v23222_v11, %v12360_v59  ;;  %v13212_v36 = vpop.f32.mrb[94].mxu1  ;;  %v12362_v43 = vpop.f32.mrb[95].mxu0 }
 0x7e4   :  { %v13246_v29 = vmax.f32 %v12394_v30, %v13210_v25  ;;  %v12396_v2 = vmax.f32 %v23225_v27, %v12362_v43  ;;  %v13214_v50 = vpop.f32.mrb[95].mxu1  ;;  %v13338_v9 = vpack.c.bf16 %v13320_v57, %v13318_v23 }
 0x7e5   :  { %v13289_v6 = vadd.f32 %v22140_v61, %v13245_v34  ;;  %v13247_v47 = vmax.f32 %v12395_v17, %v13212_v36 }
 0x7e6   :  { %v13290_v20 = vadd.f32 %v22147_v49, %v13246_v29  ;;  %v13248_v32 = vmax.f32 %v12396_v2, %v13214_v50  ;;  %13556 = vmatprep.mubr.bf16.mxu0 %v13338_v9 }
 0x7e7   :  { %v13291_v19 = vadd.f32 %v22140_v61, %v13247_v47  ;;  %13557 = vmatmul.mubr.bf16.gmra.mrb[120].mxu0 %v13337_v55  ;;  %v13321_v56 = vmax.f32 %v13289_v6, 0.0 }
 0x7e8   :  { %v13292_v37 = vadd.f32 %v22147_v49, %v13248_v32  ;;  %v13322_v10 = vmax.f32 %v13290_v20, 0.0 }
 0x7e9   :  { %v13323_v41 = vmax.f32 %v13291_v19, 0.0 }
 0x7ea   :  { %v13324_v51 = vmax.f32 %v13292_v37, 0.0 }
 0x7eb   :  { %v13339_v0 = vpack.c.bf16 %v13323_v41, %v13321_v56 }
 0x7ec   :  { %v13340_v53 = vpack.c.bf16 %v13324_v51, %v13322_v10 }
 0x7ee   :  { %13564 = vmatprep.mubr.bf16.mxu0 %v13340_v53 }
 0x7ef   :  { %13565 = vmatmul.mubr.bf16.gmra.mrb[124].mxu0 %v13339_v0 }
 0x88a   :  { %v15652_v22 = vpop.f32.mrb[96].mxu0 }
 0x88b   :  { %v15653_v61 = vpop.f32.mrb[97].mxu0 }
 0x88c   :  { %v15654_v46 = vadd.f32 %v15653_v61, %v15652_v22  ;;  %v15655_v49 = vpop.f32.mrb[98].mxu0 }
 0x88d   :  { %v15656_v62 = vpop.f32.mrb[99].mxu0 }
 0x88e   :  { %v13511_v28 = vadd.f32 %v15654_v46, %v22271_v40  ;;  %v15657_v13 = vadd.f32 %v15656_v62, %v15655_v49 }
 0x890   :  { %v13514_v39 = vadd.f32 %v15657_v13, %v22271_v40  ;;  %v13573_v18 = vmax.f32 %v13511_v28, 0.0 }
 0x892   :  { %v13574_v21 = vmax.f32 %v13514_v39, 0.0  ;;  %v15658_v33 = vpop.f32.mrb[100].mxu0 }
 0x893   :  { %v15659_v3 = vpop.f32.mrb[101].mxu0 }
 0x894   :  { %v15660_v52 = vadd.f32 %v15659_v3, %v15658_v33  ;;  %v15661_v24 = vpop.f32.mrb[102].mxu0  ;;  %v13589_v26 = vpack.c.bf16 %v13574_v21, %v13573_v18 }
 0x895   :  { %v15662_v48 = vpop.f32.mrb[103].mxu0 }
 0x896   :  { %v13519_v5 = vadd.f32 %v15660_v52, %v22271_v40  ;;  %v15663_v15 = vadd.f32 %v15662_v48, %v15661_v24  ;;  %15869 = vmatprep.mubr.bf16.mxu1 %v13589_v26 }
 0x898   :  { %v13522_v7 = vadd.f32 %v15663_v15, %v22271_v40  ;;  %v13575_v35 = vmax.f32 %v13519_v5, 0.0 }
 0x89a   :  { %v13576_v42 = vmax.f32 %v13522_v7, 0.0  ;;  %v15664_v63 = vpop.f32.mrb[104].mxu0 }
 0x89b   :  { %v15665_v1 = vpop.f32.mrb[105].mxu0 }
 0x89c   :  { %v13590_v12 = vpack.c.bf16 %v13576_v42, %v13575_v35  ;;  %v15666_v31 = vadd.f32 %v15665_v1, %v15664_v63  ;;  %v15667_v14 = vpop.f32.mrb[106].mxu0 }
 0x89d   :  { %v15668_v23 = vpop.f32.mrb[107].mxu0 }
 0x89e   :  { %v13527_v57 = vadd.f32 %v15666_v31, %v22271_v40  ;;  %v15669_v58 = vadd.f32 %v15668_v23, %v15667_v14  ;;  %15870 = vmatmul.mubr.bf16.vlgmr.msra.gmra.mrb[96].mxu1 %v13590_v12  ;;  %v22289_v14 = vld [vmem:[#allocation14] ss:$0 sm:$0xff] }
 0x8a0   :  { %v13530_v44 = vadd.f32 %v15669_v58, %v22271_v40  ;;  %v13577_v45 = vmax.f32 %v13527_v57, 0.0 }
 0x8a2   :  { %v13578_v30 = vmax.f32 %v13530_v44, 0.0  ;;  %v15670_v25 = vpop.f32.mrb[108].mxu0 }
 0x8a3   :  { %v15671_v59 = vpop.f32.mrb[109].mxu0 }
 0x8a4   :  { %v15672_v55 = vadd.f32 %v15671_v59, %v15670_v25  ;;  %v15673_v34 = vpop.f32.mrb[110].mxu0  ;;  %v13591_v60 = vpack.c.bf16 %v13578_v30, %v13577_v45 }
 0x8a5   :  { %v15674_v8 = vpop.f32.mrb[111].mxu0 }
 0x8a6   :  { %v13535_v11 = vadd.f32 %v15672_v55, %v22271_v40  ;;  %v15675_v17 = vadd.f32 %v15674_v8, %v15673_v34  ;;  %15873 = vmatprep.mubr.bf16.mxu1 %v13591_v60  ;;  %v18795_v60 = vmov 0.0  }
 0x8a7   :  { %15885 = vmatprep.subr.bf16.mxu1 %v18795_v60 }
 0x8a8   :  { %v13538_v36 = vadd.f32 %v15675_v17, %v22271_v40  ;;  %v13579_v43 = vmax.f32 %v13535_v11, 0.0 }
 0x8aa   :  { %v13580_v29 = vmax.f32 %v13538_v36, 0.0  ;;  %v15676_v38 = vpop.f32.mrb[112].mxu0 }
 0x8ab   :  { %v15677_v4 = vpop.f32.mrb[113].mxu0 }
 0x8ac   :  { %v13592_v27 = vpack.c.bf16 %v13580_v29, %v13579_v43  ;;  %v15678_v2 = vadd.f32 %v15677_v4, %v15676_v38  ;;  %v15679_v50 = vpop.f32.mrb[114].mxu0 }
 0x8ad   :  { %v15680_v9 = vpop.f32.mrb[115].mxu0 }
 0x8ae   :  { %v13543_v6 = vadd.f32 %v15678_v2, %v22271_v40  ;;  %v15681_v47 = vadd.f32 %v15680_v9, %v15679_v50  ;;  %15874 = vmatmul.mubr.bf16.gmra.mrb[100].mxu1 %v13592_v27 }
 0x8b0   :  { %v13546_v20 = vadd.f32 %v15681_v47, %v22271_v40  ;;  %v13581_v32 = vmax.f32 %v13543_v6, 0.0 }
 0x8b2   :  { %v13582_v19 = vmax.f32 %v13546_v20, 0.0  ;;  %v15682_v37 = vpop.f32.mrb[116].mxu0 }
 0x8b3   :  { %v15683_v56 = vpop.f32.mrb[117].mxu0 }
 0x8b4   :  { %v15684_v41 = vadd.f32 %v15683_v56, %v15682_v37  ;;  %v15685_v10 = vpop.f32.mrb[118].mxu0  ;;  %v13593_v51 = vpack.c.bf16 %v13582_v19, %v13581_v32 }
 0x8b5   :  { %v15686_v0 = vpop.f32.mrb[119].mxu0 }
 0x8b6   :  { %v13551_v53 = vadd.f32 %v15684_v41, %v22271_v40  ;;  %v15687_v16 = vadd.f32 %v15686_v0, %v15685_v10  ;;  %15877 = vmatprep.mubr.bf16.mxu1 %v13593_v51 }
 0x8b8   :  { %v13554_v54 = vadd.f32 %v15687_v16, %v22271_v40  ;;  %v13583_v22 = vmax.f32 %v13551_v53, 0.0 }
 0x8ba   :  { %v13584_v61 = vmax.f32 %v13554_v54, 0.0  ;;  %v15688_v46 = vpop.f32.mrb[120].mxu0 }
 0x8bb   :  { %v15689_v49 = vpop.f32.mrb[121].mxu0 }
 0x8bc   :  { %v13594_v62 = vpack.c.bf16 %v13584_v61, %v13583_v22  ;;  %v15690_v28 = vadd.f32 %v15689_v49, %v15688_v46  ;;  %v15691_v13 = vpop.f32.mrb[122].mxu0 }
 0x8bd   :  { %v15692_v39 = vpop.f32.mrb[123].mxu0 }
 0x8be   :  { %v13559_v18 = vadd.f32 %v15690_v28, %v22271_v40  ;;  %v15693_v21 = vadd.f32 %v15692_v39, %v15691_v13  ;;  %15878 = vmatmul.mubr.bf16.gmra.mrb[104].mxu1 %v13594_v62 }
 0x8c0   :  { %v13562_v33 = vadd.f32 %v15693_v21, %v22271_v40  ;;  %v13585_v3 = vmax.f32 %v13559_v18, 0.0 }
 0x8c2   :  { %v13586_v52 = vmax.f32 %v13562_v33, 0.0  ;;  %v15694_v24 = vpop.f32.mrb[124].mxu0 }
 0x8c3   :  { %v15695_v26 = vpop.f32.mrb[125].mxu0 }
 0x8c4   :  { %v15696_v48 = vadd.f32 %v15695_v26, %v15694_v24  ;;  %v15697_v5 = vpop.f32.mrb[126].mxu0  ;;  %v13595_v15 = vpack.c.bf16 %v13586_v52, %v13585_v3 }
 0x8c5   :  { %v15698_v7 = vpop.f32.mrb[127].mxu0 }
 0x8c6   :  { %v13567_v35 = vadd.f32 %v15696_v48, %v22271_v40  ;;  %v15699_v42 = vadd.f32 %v15698_v7, %v15697_v5  ;;  %15881 = vmatprep.mubr.bf16.mxu1 %v13595_v15 }
 0x8c8   :  { %v13570_v63 = vadd.f32 %v15699_v42, %v22271_v40  ;;  %v13587_v1 = vmax.f32 %v13567_v35, 0.0 }
 0x8ca   :  { %v13588_v12 = vmax.f32 %v13570_v63, 0.0 }
 0x8cc   :  { %v13596_v31 = vpack.c.bf16 %v13588_v12, %v13587_v1 }
 0x8ce   :  { %15882 = vmatmul.mubr.bf16.gmra.mrb[108].mxu1 %v13596_v31 }
 0x8cf   :  { %15901 = vmatprep.mubr.msk.bf16.mxu1 %vm18796_vm0, %v18795_v60 }
 0x971   :  { %v15871_v23 = vpop.f32.mrb[96].mxu1 }
 0x972   :  { %v13702_v57 = vpop.f32.mrb[97].mxu1  ;;  %v13711_v59 = vadd.f32 %v15871_v23, %v22289_v14 }
 0x973   :  { %v15872_v58 = vpop.f32.mrb[98].mxu1  ;;  %v13703_v44 = vadd.f32 %v22289_v14, %v13702_v57 }
 0x974   :  { %v13705_v45 = vpop.f32.mrb[99].mxu1  ;;  %v13767_v40 = vmax.f32 %v13711_v59, 0.0  ;;  %v13714_v34 = vadd.f32 %v15872_v58, %v22289_v14 }
 0x975   :  { %v13706_v30 = vadd.f32 %v22289_v14, %v13705_v45  ;;  %v13765_v25 = vmax.f32 %v13703_v44, 0.0 }
 0x976   :  { %v13768_v8 = vmax.f32 %v13714_v34, 0.0  ;;  %v13823_v34 = vstv %s22332_s10 }
 0x977   :  { %13781 = vxpose.xlu0.b32.start [1/16] %v13765_v25, 128  ;;  %v13766_v55 = vmax.f32 %v13706_v30, 0.0 }
 0x97b   :  { %13782 = vxpose.xlu0.b32.cont [2/16] %v13766_v55, 128 }
 0x97f   :  { %13783 = vxpose.xlu0.b32.cont [3/16] %v13767_v40, 128  ;;  %v13821_v40 = vld [vmem:[#allocation16] sm:$0xf] }
 0x981   :  { %v15875_v11 = vpop.f32.mrb[100].mxu1 }
 0x982   :  { %v13718_v17 = vpop.f32.mrb[101].mxu1  ;;  %v13727_v27 = vadd.f32 %v15875_v11, %v22289_v14 }
 0x983   :  { %v13719_v36 = vadd.f32 %v22289_v14, %v13718_v17  ;;  %v15876_v43 = vpop.f32.mrb[102].mxu1  ;;  %13784 = vxpose.xlu0.b32.cont [4/16] %v13768_v8, 128 }
 0x984   :  { %v13721_v29 = vpop.f32.mrb[103].mxu1  ;;  %v13771_v50 = vmax.f32 %v13727_v27, 0.0  ;;  %v13730_v9 = vadd.f32 %v15876_v43, %v22289_v14 }
 0x985   :  { %v13769_v38 = vmax.f32 %v13719_v36, 0.0  ;;  %v13722_v4 = vadd.f32 %v22289_v14, %v13721_v29 }
 0x986   :  { %v13772_v6 = vmax.f32 %v13730_v9, 0.0 }
 0x987   :  { %13785 = vxpose.xlu0.b32.cont [5/16] %v13769_v38, 128  ;;  %v13770_v2 = vmax.f32 %v13722_v4, 0.0 }
 0x98b   :  { %13786 = vxpose.xlu0.b32.cont [6/16] %v13770_v2, 128 }
 0x98f   :  { %13787 = vxpose.xlu0.b32.cont [7/16] %v13771_v50, 128 }
 0x991   :  { %v15879_v47 = vpop.f32.mrb[104].mxu1 }
 0x992   :  { %v13734_v20 = vpop.f32.mrb[105].mxu1  ;;  %v13743_v10 = vadd.f32 %v15879_v47, %v22289_v14 }
 0x993   :  { %v13735_v32 = vadd.f32 %v22289_v14, %v13734_v20  ;;  %v15880_v19 = vpop.f32.mrb[106].mxu1  ;;  %13788 = vxpose.xlu0.b32.cont [8/16] %v13772_v6, 128 }
 0x994   :  { %v13737_v37 = vpop.f32.mrb[107].mxu1  ;;  %v13775_v0 = vmax.f32 %v13743_v10, 0.0  ;;  %v13746_v53 = vadd.f32 %v15880_v19, %v22289_v14 }
 0x995   :  { %v13773_v56 = vmax.f32 %v13735_v32, 0.0  ;;  %v13738_v41 = vadd.f32 %v22289_v14, %v13737_v37 }
 0x996   :  { %v13776_v16 = vmax.f32 %v13746_v53, 0.0 }
 0x997   :  { %13789 = vxpose.xlu0.b32.cont [9/16] %v13773_v56, 128  ;;  %v13774_v51 = vmax.f32 %v13738_v41, 0.0 }
 0x99b   :  { %13790 = vxpose.xlu0.b32.cont [10/16] %v13774_v51, 128 }
 0x99f   :  { %13791 = vxpose.xlu0.b32.cont [11/16] %v13775_v0, 128 }
 0x9a1   :  { %v15883_v54 = vpop.f32.mrb[108].mxu1 }
 0x9a2   :  { %v13750_v22 = vpop.f32.mrb[109].mxu1  ;;  %v13759_v13 = vadd.f32 %v15883_v54, %v22289_v14 }
 0x9a3   :  { %v13751_v61 = vadd.f32 %v22289_v14, %v13750_v22  ;;  %v15884_v46 = vpop.f32.mrb[110].mxu1  ;;  %13792 = vxpose.xlu0.b32.cont [12/16] %v13776_v16, 128 }
 0x9a4   :  { %v13753_v49 = vpop.f32.mrb[111].mxu1  ;;  %v13779_v18 = vmax.f32 %v13759_v13, 0.0  ;;  %v13762_v21 = vadd.f32 %v15884_v46, %v22289_v14 }
 0x9a5   :  { %v13777_v62 = vmax.f32 %v13751_v61, 0.0  ;;  %v13754_v28 = vadd.f32 %v22289_v14, %v13753_v49 }
 0x9a6   :  { %v13780_v33 = vmax.f32 %v13762_v21, 0.0 }
 0x9a7   :  { %13793 = vxpose.xlu0.b32.cont [13/16] %v13777_v62, 128  ;;  %v13778_v39 = vmax.f32 %v13754_v28, 0.0 }
 0x9ab   :  { %13794 = vxpose.xlu0.b32.cont [14/16] %v13778_v39, 128 }
 0x9af   :  { %13795 = vxpose.xlu0.b32.cont [15/16] %v13779_v18, 128 }
 0x9b3   :  { %13796 = vxpose.xlu0.b32.end [16/16] %v13780_v33, 128 }
 0x9f7   :  { %v13797_v3 = vpop.trf.xlu0 }
 0x9fb   :  { %v13798_v52 = vpop.trf.xlu0 }
 0x9fc   :  { %v13813_v24 = vpack.c.bf16 %v13798_v52, %v13797_v3 }
 0x9fe   :  { %15886 = vmatpush3.bf16.msra.mxu1 %v13813_v24 }
 0x9ff   :  { %v13799_v26 = vpop.trf.xlu0  ;;  %15887 = vmatprep.subr.bf16.mxu1 %v18795_v60 }
 0xa03   :  { %v13800_v48 = vpop.trf.xlu0 }
 0xa04   :  { %v13814_v5 = vpack.c.bf16 %v13800_v48, %v13799_v26 }
 0xa06   :  { %15888 = vmatpush3.bf16.msra.mxu1 %v13814_v5 }
 0xa07   :  { %v13801_v15 = vpop.trf.xlu0  ;;  %15889 = vmatprep.subr.bf16.mxu1 %v18795_v60 }
 0xa0b   :  { %v13802_v7 = vpop.trf.xlu0 }
 0xa0c   :  { %v13815_v35 = vpack.c.bf16 %v13802_v7, %v13801_v15 }
 0xa0e   :  { %15890 = vmatpush3.bf16.msra.mxu1 %v13815_v35 }
 0xa0f   :  { %v13803_v42 = vpop.trf.xlu0  ;;  %15891 = vmatprep.subr.bf16.mxu1 %v18795_v60 }
 0xa13   :  { %v13804_v63 = vpop.trf.xlu0 }
 0xa14   :  { %v13816_v1 = vpack.c.bf16 %v13804_v63, %v13803_v42 }
 0xa16   :  { %15892 = vmatpush3.bf16.msra.mxu1 %v13816_v1 }
 0xa17   :  { %v13805_v12 = vpop.trf.xlu0  ;;  %15893 = vmatprep.subr.bf16.mxu1 %v18795_v60 }
 0xa1b   :  { %v13806_v31 = vpop.trf.xlu0 }
 0xa1c   :  { %v13817_v14 = vpack.c.bf16 %v13806_v31, %v13805_v12 }
 0xa1e   :  { %15894 = vmatpush3.bf16.msra.mxu1 %v13817_v14 }
 0xa1f   :  { %v13807_v23 = vpop.trf.xlu0  ;;  %15895 = vmatprep.subr.bf16.mxu1 %v18795_v60 }
 0xa23   :  { %v13808_v57 = vpop.trf.xlu0 }
 0xa24   :  { %v13818_v58 = vpack.c.bf16 %v13808_v57, %v13807_v23 }
 0xa26   :  { %15896 = vmatpush3.bf16.msra.mxu1 %v13818_v58 }
 0xa27   :  { %v13809_v44 = vpop.trf.xlu0  ;;  %15897 = vmatprep.subr.bf16.mxu1 %v18795_v60 }
 0xa2b   :  { %v13810_v45 = vpop.trf.xlu0 }
 0xa2c   :  { %v13819_v30 = vpack.c.bf16 %v13810_v45, %v13809_v44 }
 0xa2e   :  { %15898 = vmatpush3.bf16.msra.mxu1 %v13819_v30 }
 0xa2f   :  { %v13811_v25 = vpop.trf.xlu0  ;;  %15899 = vmatprep.subr.bf16.mxu1 %v18795_v60 }
 0xa33   :  { %v13812_v59 = vpop.trf.xlu0 }
 0xa34   :  { %v13820_v55 = vpack.c.bf16 %v13812_v59, %v13811_v25 }
 0xa36   :  { %15900 = vmatpush3.bf16.msra.mxu1 %v13820_v55 }
 0xa39   :  { %15902 = vmatmul.mubr.bf16.vlgmr.msra.gmra.mrb[112].mxu1 %v13821_v40 }
 0xb0c   :  { %v13858_v8 = vpop.f32.mrb[112].mxu1 }
 0xb0d   :  { %v13859_v11 = vadd.f32 %v13858_v8, %v13823_v34  ;;  %v15903_v17 = vpop.f32.mrb[113].mxu1 }
 0xb0e   :  { %v13861_v36 = vpop.f32.mrb[114].mxu1 }
 0xb0f   :  { %13864 = vst [vmem:[%s22333_s11] sm:$0xff] %v13859_v11  ;;  %v15904_v43 = vpop.f32.mrb[115].mxu1 }
 0xb10   :  { %13869 = vsyncpa [#allocation4], 1 }
 0xb11   :  { %13870 = vsyncpa [#allocation6], 1 }
 0xb12   :  { %13871 = vsyncpa [#allocation9], 1 }
 0xb13   :  { %13872 = vsyncpa [#allocation12], 1 }
 0xb14   :  { %13873 = vsyncpa [#allocation15], 1 }

</bundles_post_ra>
